<compile_context>
chip_gen: v5e
topology: v5e:2x2
jax: 0.10.0
libtpu: 0.0.40
codegen_flags: <defaults>
</compile_context>

<pallas_src>
import functools

import jax
import jax.numpy as jnp
import numpy as np
from jax.experimental import pallas as pl
from jax.experimental.pallas import tpu as pltpu

EPS = 1e-5


def _residual_block_kernel(x_ref, w_ref, p_ref, o_ref, col_ref, *, H, W, C, Cp):
    HW = H * W
    three_cp = 3 * Cp

    # ---- in-kernel edge masks (no HBM mask input) ---------------------------
    # j = column index of flattened row r; masks kill the wrap-around rows of
    # the +/-1 column shifts (SAME padding semantics).
    r_idx = jax.lax.broadcasted_iota(jnp.int32, (HW, 1), 0)
    j_idx = r_idx % W
    mask_m1 = (j_idx != 0).astype(jnp.float32)        # valid source for dx = -1
    mask_p1 = (j_idx != (W - 1)).astype(jnp.float32)  # valid source for dx = +1

    # Channel mask: real channels vs lane padding (Cp >= C).
    cmask = (jax.lax.broadcasted_iota(jnp.int32, (1, Cp), 1) < C).astype(jnp.float32)

    x = x_ref[0]                      # (HW, Cp) f32, also the residual
    h = x

    # ---- zero halo bands of the im2col slab (written once, reused by both
    #      layers; rows [0, W) = row above image, rows [W+HW, 2W+HW) = below).
    zero_band = jnp.zeros((W, three_cp), jnp.bfloat16)
    col_ref[0:W, :] = zero_band
    col_ref[W + HW:2 * W + HW, :] = zero_band

    for layer in range(2):            # 2 stages -> small static unroll
        prm = p_ref[layer]            # (4, Cp) f32: [gamma, alpha, beta, bias]
        gamma = prm[0:1]
        alpha = prm[1:2]
        beta = prm[2:3]
        bias = prm[3:4]

        # ---- InstanceNorm2dPlus, fused single-pass stats (f32, EUP rsqrt) ---
        s1 = jnp.mean(h, axis=0, keepdims=True)            # (1, Cp)  E[h]
        s2 = jnp.mean(h * h, axis=0, keepdims=True)         # (1, Cp)  E[h^2]
        var_x = jnp.maximum(s2 - s1 * s1, 0.0)               # per-channel spatial var
        m = jnp.sum(s1 * cmask, axis=1, keepdims=True) * (1.0 / C)          # (1, 1)
        dev = (s1 - m) * cmask
        v = jnp.sum(dev * dev, axis=1, keepdims=True) * (1.0 / (C - 1))     # unbiased
        means_n = (s1 - m) * jax.lax.rsqrt(v + EPS)                          # (1, Cp)
        hn = (h - s1) * jax.lax.rsqrt(var_x + EPS)                           # (HW, Cp)
        hn = gamma * (hn + means_n * alpha) + beta

        # ---- activation: ELU -------------------------------------------------
        a = jnp.where(hn > 0.0, hn, jnp.exp(jnp.minimum(hn, 0.0)) - 1.0)

        # ---- im2col: 3 column-shift slabs (roll on XLU, bf16 stores) ---------
        # slot kx = dx+1 holds a[i, j+dx, :]; rolls stay f32 (32-bit rotate).
        a_m1 = (pltpu.roll(a, shift=1, axis=0) * mask_m1).astype(jnp.bfloat16)
        a_00 = a.astype(jnp.bfloat16)
        a_p1 = (pltpu.roll(a, shift=HW - 1, axis=0) * mask_p1).astype(jnp.bfloat16)
        col_ref[W:W + HW, 0:Cp] = a_m1
        col_ref[W:W + HW, Cp:2 * Cp] = a_00
        col_ref[W:W + HW, 2 * Cp:3 * Cp] = a_p1

        # ---- 3x3 conv: 3 accumulating MXU dots over row-offset views ---------
        # S[ky*W + i*W + j] = a[i + ky - 1, j + dx] (zero halo handles i+-1 OOB).
        acc = jnp.dot(col_ref[0:HW, :], w_ref[layer, 0],
                      preferred_element_type=jnp.float32)
        acc = acc + jnp.dot(col_ref[W:W + HW, :], w_ref[layer, 1],
                            preferred_element_type=jnp.float32)
        acc = acc + jnp.dot(col_ref[2 * W:2 * W + HW, :], w_ref[layer, 2],
                            preferred_element_type=jnp.float32)
        h = acc + bias                                                      # (HW, Cp)

    o_ref[0] = (h + x).astype(o_ref.dtype)


def residual_block_forward(x_nchw, conv_w, conv_b, norm_gamma, norm_alpha,
                           norm_beta):
    """x_nchw: (N, C, H, W) f32; conv_w: (2, C, C, 3, 3) OIHW; conv_b: (2, C);
    norm_*: (2, C) InstanceNorm2dPlus gamma / alpha / beta per stage."""
    N, C, H, W = x_nchw.shape
    assert C >= 2, "InstanceNorm2dPlus cross-channel variance needs C >= 2"
    assert W % 8 == 0, "W must be a multiple of 8 for the flattened (HW, C) layout"
    Cp = ((C + 127) // 128) * 128        # pad channel (lane) dim
    HW = H * W

    # Host-side layout: NHWC, channel-pad, flatten spatial -> (N, HW, Cp).
    x = jnp.transpose(x_nchw, (0, 2, 3, 1))
    x = jnp.pad(x, ((0, 0), (0, 0), (0, 0), (0, Cp - C))).reshape(N, HW, Cp)

    # (layer, O, I, ky, kx) -> (layer, ky, kx, I, O) -> (layer, ky, 3*Cp, Cp).
    wp = jnp.pad(conv_w, ((0, 0), (0, Cp - C), (0, Cp - C), (0, 0), (0, 0)))
    wm = jnp.transpose(wp, (0, 3, 4, 2, 1)).reshape(2, 3, 3 * Cp, Cp)
    wm = wm.astype(jnp.bfloat16)

    # Fused per-layer conditioning params: [gamma, alpha, beta, conv_bias].
    prm = jnp.stack([norm_gamma, norm_alpha, norm_beta, conv_b], axis=1)   # (2,4,C)
    prm = jnp.pad(prm, ((0, 0), (0, 0), (0, Cp - C))).astype(jnp.float32)

    # VMEM budget from actual buffer sizes (double-buffered ins/outs + scratch).
    per_step = (HW * Cp * 4) * 2 + 2 * 3 * 3 * Cp * Cp * 2 + 2 * 4 * Cp * 4
    col_bytes = (HW + 2 * W) * 3 * Cp * 2
    need = 2 * per_step + col_bytes + (4 << 20)
    try:
        cap = pltpu.get_tpu_info().vmem_capacity_bytes
    except Exception:
        cap = 64 * 1024 * 1024           # conservative (v7x) fallback
    vmem_limit = int(max(32 << 20, min(need, (cap * 3) // 4)))

    kernel = functools.partial(_residual_block_kernel, H=H, W=W, C=C, Cp=Cp)

    out = pl.pallas_call(
        kernel,
        out_shape=jax.ShapeDtypeStruct((N, HW, Cp), jnp.float32),
        grid_spec=pltpu.PrefetchScalarGridSpec(
            num_scalar_prefetch=0,
            grid=(N,),
            in_specs=[
                pl.BlockSpec((1, HW, Cp), lambda n: (n, 0, 0)),
                # Constant-index inputs (tiny here); pipeline_mode=pl.Buffered(1)
                # would single-buffer them once Cp grows.
                pl.BlockSpec((2, 3, 3 * Cp, Cp), lambda n: (0, 0, 0, 0)),
                pl.BlockSpec((2, 4, Cp), lambda n: (0, 0, 0)),
            ],
            out_specs=pl.BlockSpec((1, HW, Cp), lambda n: (n, 0, 0)),
            scratch_shapes=[pltpu.VMEM((HW + 2 * W, 3 * Cp), jnp.bfloat16)],
        ),
        compiler_params=pltpu.CompilerParams(
            dimension_semantics=("parallel",),
            vmem_limit_bytes=vmem_limit,
        ),
    )(x, wm, prm)

    out = out[..., :C].reshape(N, H, W, C)
    return jnp.transpose(out, (0, 3, 1, 2))                                # NCHW


def residual_block_reference(x_nchw, conv_w, conv_b, norm_gamma, norm_alpha,
                             norm_beta):
    """Pure-JAX reference (same math, lax conv) for correctness checking."""
    N, C, H, W = x_nchw.shape
    x = jnp.transpose(x_nchw, (0, 2, 3, 1))
    h = x
    for layer in range(2):
        gamma = norm_gamma[layer]
        alpha = norm_alpha[layer]
        beta = norm_beta[layer]
        means = jnp.mean(h, axis=(1, 2), keepdims=True)
        m = jnp.mean(means, axis=-1, keepdims=True)
        v = jnp.sum((means - m) ** 2, axis=-1, keepdims=True) / (C - 1)
        means_n = (means - m) / jnp.sqrt(v + EPS)
        var_x = jnp.mean((h - means) ** 2, axis=(1, 2), keepdims=True)
        hn = (h - means) / jnp.sqrt(var_x + EPS)
        hn = gamma * (hn + means_n * alpha) + beta
        hn = jax.nn.elu(hn)
        wk = jnp.transpose(conv_w[layer], (2, 3, 1, 0))                    # HWIO
        h = jax.lax.conv_general_dilated(
            hn, wk, window_strides=(1, 1), padding="SAME",
            dimension_numbers=("NHWC", "HWIO", "NHWC")) + conv_b[layer]
    out = h + x
    return jnp.transpose(out, (0, 3, 1, 2))


if __name__ == "__main__":
    N, C, H, W = 2, 4, 16, 16

    key = jax.random.PRNGKey(0)
    k1, k2, k3, k4, k5 = jax.random.split(key, 5)

    x = jax.random.normal(k1, (N, C, H, W), jnp.float32)

    # PyTorch Conv2d default init: U(-1/sqrt(fan_in), 1/sqrt(fan_in)), fan_in = C*9
    bound = 1.0 / np.sqrt(C * 9)
    conv_w = jax.random.uniform(k2, (2, C, C, 3, 3), jnp.float32, -bound, bound)
    conv_b = jax.random.uniform(k3, (2, C), jnp.float32, -bound, bound)

    # NCSNv2 InstanceNorm2dPlus init: gamma, alpha ~ N(1, 0.02); beta = 0
    norm_gamma = 1.0 + 0.02 * jax.random.normal(k4, (2, C), jnp.float32)
    norm_alpha = 1.0 + 0.02 * jax.random.normal(k5, (2, C), jnp.float32)
    norm_beta = jnp.zeros((2, C), jnp.float32)

    out = residual_block_forward(x, conv_w, conv_b, norm_gamma, norm_alpha,
                                 norm_beta)
    out = jax.block_until_ready(out)

    ref = residual_block_reference(x, conv_w, conv_b, norm_gamma, norm_alpha,
                                   norm_beta)
    np.testing.assert_allclose(np.asarray(out), np.asarray(ref),
                               rtol=2e-2, atol=2e-2)
    print("KERNEL_OK")
</pallas_src>

<mosaic_0001>
module attributes {stable_mosaic.version = 11 : i64} {
  func.func @_residual_block_kernel(%arg0: i32, %arg1: memref<1x256x128xf32, #tpu.memory_space<vmem>>, %arg2: memref<2x3x384x128xbf16, #tpu.memory_space<vmem>>, %arg3: memref<2x4x128xf32, #tpu.memory_space<vmem>>, %arg4: memref<1x256x128xf32, #tpu.memory_space<vmem>>, %arg5: memref<288x384xbf16, #tpu.memory_space<vmem>>) attributes {dimension_semantics = [#tpu.dimension_semantics<parallel>], iteration_bounds = array<i64: 2>, scalar_prefetch = 0 : i64, scratch_operands = 1 : i64, tpu.core_type = #tpu.core_type<tc>, window_params = [{transform_indices = @transform_0, window_bounds = array<i64: 1, 256, 128>}, {pipeline_mode = #tpu.pipeline_mode<synchronous>, transform_indices = @transform_1, window_bounds = array<i64: 2, 3, 384, 128>}, {pipeline_mode = #tpu.pipeline_mode<synchronous>, transform_indices = @transform_2, window_bounds = array<i64: 2, 4, 128>}, {transform_indices = @transform_3, window_bounds = array<i64: 1, 256, 128>}]} {
    %0 = tpu.iota {dimensions = array<i32: 0>} : vector<256x1xi32>
    %c16_i32 = arith.constant 16 : i32
    %c0_i32 = arith.constant 0 : i32
    %1 = arith.cmpi eq, %c16_i32, %c0_i32 : i32
    %c1_i32 = arith.constant 1 : i32
    %2 = arith.select %1, %c1_i32, %c16_i32 : i32
    %3 = vector.broadcast %2 : i32 to vector<256x1xi32>
    %4 = arith.remsi %0, %3 : vector<256x1xi32>
    %c0_i32_0 = arith.constant 0 : i32
    %5 = vector.broadcast %c0_i32_0 : i32 to vector<256x1xi32>
    %6 = arith.cmpi ne, %4, %5 : vector<256x1xi32>
    %c0_i32_1 = arith.constant 0 : i32
    %7 = vector.broadcast %c0_i32_1 : i32 to vector<256x1xi32>
    %8 = arith.cmpi slt, %4, %7 : vector<256x1xi32>
    %c0_i32_2 = arith.constant 0 : i32
    %9 = arith.cmpi slt, %2, %c0_i32_2 : i32
    %10 = vector.broadcast %9 : i1 to vector<256x1xi1>
    %11 = vector.broadcast %10 : vector<256x1xi1> to vector<256x1xi1>
    %12 = arith.xori %8, %11 : vector<256x1xi1>
    %13 = arith.andi %12, %6 : vector<256x1xi1>
    %14 = vector.broadcast %2 : i32 to vector<256x1xi32>
    %15 = arith.addi %4, %14 : vector<256x1xi32>
    %16 = arith.select %13, %15, %4 : vector<256x1xi1>, vector<256x1xi32>
    %c0_i32_3 = arith.constant 0 : i32
    %17 = vector.broadcast %c0_i32_3 : i32 to vector<256x1xi32>
    %18 = arith.cmpi ne, %16, %17 : vector<256x1xi32>
    %19 = arith.extui %18 : vector<256x1xi1> to vector<256x1xi32>
    %20 = arith.sitofp %19 : vector<256x1xi32> to vector<256x1xf32>
    %c15_i32 = arith.constant 15 : i32
    %21 = vector.broadcast %c15_i32 : i32 to vector<256x1xi32>
    %22 = arith.cmpi ne, %16, %21 : vector<256x1xi32>
    %23 = arith.extui %22 : vector<256x1xi1> to vector<256x1xi32>
    %24 = arith.sitofp %23 : vector<256x1xi32> to vector<256x1xf32>
    %25 = tpu.iota {dimensions = array<i32: 1>} : vector<1x128xi32>
    %c4_i32 = arith.constant 4 : i32
    %26 = vector.broadcast %c4_i32 : i32 to vector<1x128xi32>
    %27 = arith.cmpi slt, %25, %26 : vector<1x128xi32>
    %28 = arith.extui %27 : vector<1x128xi1> to vector<1x128xi32>
    %29 = arith.sitofp %28 : vector<1x128xi32> to vector<1x128xf32>
    %c0 = arith.constant 0 : index
    %c0_4 = arith.constant 0 : index
    %c0_5 = arith.constant 0 : index
    %30 = vector.load %arg1[%c0, %c0_4, %c0_5] : memref<1x256x128xf32, #tpu.memory_space<vmem>>, vector<1x256x128xf32>
    %31 = vector.shape_cast %30 : vector<1x256x128xf32> to vector<256x128xf32>
    %cst = arith.constant 0.000000e+00 : bf16
    %32 = vector.broadcast %cst : bf16 to vector<16x384xbf16>
    %c0_6 = arith.constant 0 : index
    %c0_7 = arith.constant 0 : index
    %33 = vector.load %arg5[%c0_6, %c0_7] : memref<288x384xbf16, #tpu.memory_space<vmem>>, vector<16x384xbf16>
    tpu.vector_store %arg5[%c0_6, %c0_7], %32 {strides = array<i32>} : memref<288x384xbf16, #tpu.memory_space<vmem>>, vector<16x384xbf16>,
    %c272 = arith.constant 272 : index
    %c0_8 = arith.constant 0 : index
    %34 = vector.load %arg5[%c272, %c0_8] : memref<288x384xbf16, #tpu.memory_space<vmem>>, vector<16x384xbf16>
    tpu.vector_store %arg5[%c272, %c0_8], %32 {strides = array<i32>} : memref<288x384xbf16, #tpu.memory_space<vmem>>, vector<16x384xbf16>,
    %c0_9 = arith.constant 0 : index
    %c0_10 = arith.constant 0 : index
    %c0_11 = arith.constant 0 : index
    %35 = vector.load %arg3[%c0_9, %c0_10, %c0_11] : memref<2x4x128xf32, #tpu.memory_space<vmem>>, vector<1x4x128xf32>
    %36 = vector.shape_cast %35 : vector<1x4x128xf32> to vector<4x128xf32>
    %37 = vector.extract_strided_slice %36 {offsets = [0, 0], sizes = [1, 128], strides = [1, 1]} : vector<4x128xf32> to vector<1x128xf32>
    %38 = vector.extract_strided_slice %36 {offsets = [1, 0], sizes = [1, 128], strides = [1, 1]} : vector<4x128xf32> to vector<1x128xf32>
    %39 = vector.extract_strided_slice %36 {offsets = [2, 0], sizes = [1, 128], strides = [1, 1]} : vector<4x128xf32> to vector<1x128xf32>
    %40 = vector.extract_strided_slice %36 {offsets = [3, 0], sizes = [1, 128], strides = [1, 1]} : vector<4x128xf32> to vector<1x128xf32>
    %cst_12 = arith.constant dense<0.000000e+00> : vector<128xf32>
    %41 = vector.multi_reduction <add>, %31, %cst_12 [0] : vector<256x128xf32> to vector<128xf32>
    %42 = vector.shape_cast %41 : vector<128xf32> to vector<1x128xf32>
    %cst_13 = arith.constant 2.560000e+02 : f32
    %43 = vector.broadcast %cst_13 : f32 to vector<1x128xf32>
    %44 = arith.divf %42, %43 : vector<1x128xf32>
    %45 = arith.mulf %31, %31 : vector<256x128xf32>
    %cst_14 = arith.constant dense<0.000000e+00> : vector<128xf32>
    %46 = vector.multi_reduction <add>, %45, %cst_14 [0] : vector<256x128xf32> to vector<128xf32>
    %47 = vector.shape_cast %46 : vector<128xf32> to vector<1x128xf32>
    %cst_15 = arith.constant 2.560000e+02 : f32
    %48 = vector.broadcast %cst_15 : f32 to vector<1x128xf32>
    %49 = arith.divf %47, %48 : vector<1x128xf32>
    %50 = arith.mulf %44, %44 : vector<1x128xf32>
    %51 = arith.subf %49, %50 : vector<1x128xf32>
    %cst_16 = arith.constant 0.000000e+00 : f32
    %52 = vector.broadcast %cst_16 : f32 to vector<1x128xf32>
    %53 = arith.maximumf %51, %52 : vector<1x128xf32>
    %54 = arith.mulf %44, %29 : vector<1x128xf32>
    %cst_17 = arith.constant dense<0.000000e+00> : vector<1xf32>
    %55 = vector.multi_reduction <add>, %54, %cst_17 [1] : vector<1x128xf32> to vector<1xf32>
    %56 = vector.shape_cast %55 : vector<1xf32> to vector<1x1xf32>
    %cst_18 = arith.constant 2.500000e-01 : f32
    %57 = vector.broadcast %cst_18 : f32 to vector<1x1xf32>
    %58 = arith.mulf %56, %57 : vector<1x1xf32>
    %59 = vector.broadcast %58 : vector<1x1xf32> to vector<1x128xf32>
    %60 = arith.subf %44, %59 : vector<1x128xf32>
    %61 = arith.mulf %60, %29 : vector<1x128xf32>
    %62 = arith.mulf %61, %61 : vector<1x128xf32>
    %cst_19 = arith.constant dense<0.000000e+00> : vector<1xf32>
    %63 = vector.multi_reduction <add>, %62, %cst_19 [1] : vector<1x128xf32> to vector<1xf32>
    %64 = vector.shape_cast %63 : vector<1xf32> to vector<1x1xf32>
    %cst_20 = arith.constant 0.333333343 : f32
    %65 = vector.broadcast %cst_20 : f32 to vector<1x1xf32>
    %66 = arith.mulf %64, %65 : vector<1x1xf32>
    %67 = vector.broadcast %58 : vector<1x1xf32> to vector<1x128xf32>
    %68 = arith.subf %44, %67 : vector<1x128xf32>
    %cst_21 = arith.constant 9.99999974E-6 : f32
    %69 = vector.broadcast %cst_21 : f32 to vector<1x1xf32>
    %70 = arith.addf %66, %69 : vector<1x1xf32>
    %71 = math.rsqrt %70 : vector<1x1xf32>
    %72 = vector.broadcast %71 : vector<1x1xf32> to vector<1x128xf32>
    %73 = arith.mulf %68, %72 : vector<1x128xf32>
    %74 = vector.broadcast %44 : vector<1x128xf32> to vector<256x128xf32>
    %75 = arith.subf %31, %74 : vector<256x128xf32>
    %cst_22 = arith.constant 9.99999974E-6 : f32
    %76 = vector.broadcast %cst_22 : f32 to vector<1x128xf32>
    %77 = arith.addf %53, %76 : vector<1x128xf32>
    %78 = math.rsqrt %77 : vector<1x128xf32>
    %79 = vector.broadcast %78 : vector<1x128xf32> to vector<256x128xf32>
    %80 = arith.mulf %75, %79 : vector<256x128xf32>
    %81 = arith.mulf %73, %38 : vector<1x128xf32>
    %82 = vector.broadcast %81 : vector<1x128xf32> to vector<256x128xf32>
    %83 = arith.addf %80, %82 : vector<256x128xf32>
    %84 = vector.broadcast %37 : vector<1x128xf32> to vector<256x128xf32>
    %85 = arith.mulf %84, %83 : vector<256x128xf32>
    %86 = vector.broadcast %39 : vector<1x128xf32> to vector<256x128xf32>
    %87 = arith.addf %85, %86 : vector<256x128xf32>
    %cst_23 = arith.constant 0.000000e+00 : f32
    %88 = vector.broadcast %cst_23 : f32 to vector<256x128xf32>
    %89 = arith.cmpf ogt, %87, %88 : vector<256x128xf32>
    %cst_24 = arith.constant 0.000000e+00 : f32
    %90 = vector.broadcast %cst_24 : f32 to vector<256x128xf32>
    %91 = arith.minimumf %87, %90 : vector<256x128xf32>
    %92 = math.exp %91 : vector<256x128xf32>
    %cst_25 = arith.constant 1.000000e+00 : f32
    %93 = vector.broadcast %cst_25 : f32 to vector<256x128xf32>
    %94 = arith.subf %92, %93 : vector<256x128xf32>
    %95 = arith.select %89, %87, %94 : vector<256x128xi1>, vector<256x128xf32>
    %c1_i32_26 = arith.constant 1 : i32
    %96 = tpu.dynamic_rotate %95 by %c1_i32_26 dim 0 : vector<256x128xf32>, i32 -> vector<256x128xf32>
    %97 = vector.broadcast %20 : vector<256x1xf32> to vector<256x128xf32>
    %98 = arith.mulf %96, %97 : vector<256x128xf32>
    %99 = arith.truncf %98 : vector<256x128xf32> to vector<256x128xbf16>
    %100 = arith.truncf %95 : vector<256x128xf32> to vector<256x128xbf16>
    %c255_i32 = arith.constant 255 : i32
    %101 = tpu.dynamic_rotate %95 by %c255_i32 dim 0 : vector<256x128xf32>, i32 -> vector<256x128xf32>
    %102 = vector.broadcast %24 : vector<256x1xf32> to vector<256x128xf32>
    %103 = arith.mulf %101, %102 : vector<256x128xf32>
    %104 = arith.truncf %103 : vector<256x128xf32> to vector<256x128xbf16>
    %c16 = arith.constant 16 : index
    %c0_27 = arith.constant 0 : index
    %105 = vector.load %arg5[%c16, %c0_27] : memref<288x384xbf16, #tpu.memory_space<vmem>>, vector<256x128xbf16>
    tpu.vector_store %arg5[%c16, %c0_27], %99 {strides = array<i32>} : memref<288x384xbf16, #tpu.memory_space<vmem>>, vector<256x128xbf16>,
    %c16_28 = arith.constant 16 : index
    %c128 = arith.constant 128 : index
    %106 = vector.load %arg5[%c16_28, %c128] : memref<288x384xbf16, #tpu.memory_space<vmem>>, vector<256x128xbf16>
    tpu.vector_store %arg5[%c16_28, %c128], %100 {strides = array<i32>} : memref<288x384xbf16, #tpu.memory_space<vmem>>, vector<256x128xbf16>,
    %c16_29 = arith.constant 16 : index
    %c256 = arith.constant 256 : index
    %107 = vector.load %arg5[%c16_29, %c256] : memref<288x384xbf16, #tpu.memory_space<vmem>>, vector<256x128xbf16>
    tpu.vector_store %arg5[%c16_29, %c256], %104 {strides = array<i32>} : memref<288x384xbf16, #tpu.memory_space<vmem>>, vector<256x128xbf16>,
    %c0_30 = arith.constant 0 : index
    %c0_31 = arith.constant 0 : index
    %108 = vector.load %arg5[%c0_30, %c0_31] : memref<288x384xbf16, #tpu.memory_space<vmem>>, vector<256x384xbf16>
    %c0_32 = arith.constant 0 : index
    %c0_33 = arith.constant 0 : index
    %c0_34 = arith.constant 0 : index
    %c0_35 = arith.constant 0 : index
    %109 = vector.load %arg2[%c0_32, %c0_33, %c0_34, %c0_35] : memref<2x3x384x128xbf16, #tpu.memory_space<vmem>>, vector<1x1x384x128xbf16>
    %110 = vector.shape_cast %109 : vector<1x1x384x128xbf16> to vector<384x128xbf16>
    %cst_36 = arith.constant dense<0.000000e+00> : vector<256x128xf32>
    %111 = tpu.matmul %108, %110, %cst_36 {dimension_numbers = #tpu.dot_dimension_numbers<[1], [0], [0], [1], [0, 0, 1, 1], [], []>} : vector<256x384xbf16>, vector<384x128xbf16>, vector<256x128xf32> -> vector<256x128xf32>
    %c16_37 = arith.constant 16 : index
    %c0_38 = arith.constant 0 : index
    %112 = vector.load %arg5[%c16_37, %c0_38] : memref<288x384xbf16, #tpu.memory_space<vmem>>, vector<256x384xbf16>
    %c0_39 = arith.constant 0 : index
    %c1 = arith.constant 1 : index
    %c0_40 = arith.constant 0 : index
    %c0_41 = arith.constant 0 : index
    %113 = vector.load %arg2[%c0_39, %c1, %c0_40, %c0_41] : memref<2x3x384x128xbf16, #tpu.memory_space<vmem>>, vector<1x1x384x128xbf16>
    %114 = vector.shape_cast %113 : vector<1x1x384x128xbf16> to vector<384x128xbf16>
    %cst_42 = arith.constant dense<0.000000e+00> : vector<256x128xf32>
    %115 = tpu.matmul %112, %114, %cst_42 {dimension_numbers = #tpu.dot_dimension_numbers<[1], [0], [0], [1], [0, 0, 1, 1], [], []>} : vector<256x384xbf16>, vector<384x128xbf16>, vector<256x128xf32> -> vector<256x128xf32>
    %116 = arith.addf %111, %115 : vector<256x128xf32>
    %c32 = arith.constant 32 : index
    %c0_43 = arith.constant 0 : index
    %117 = vector.load %arg5[%c32, %c0_43] : memref<288x384xbf16, #tpu.memory_space<vmem>>, vector<256x384xbf16>
    %c0_44 = arith.constant 0 : index
    %c2 = arith.constant 2 : index
    %c0_45 = arith.constant 0 : index
    %c0_46 = arith.constant 0 : index
    %118 = vector.load %arg2[%c0_44, %c2, %c0_45, %c0_46] : memref<2x3x384x128xbf16, #tpu.memory_space<vmem>>, vector<1x1x384x128xbf16>
    %119 = vector.shape_cast %118 : vector<1x1x384x128xbf16> to vector<384x128xbf16>
    %cst_47 = arith.constant dense<0.000000e+00> : vector<256x128xf32>
    %120 = tpu.matmul %117, %119, %cst_47 {dimension_numbers = #tpu.dot_dimension_numbers<[1], [0], [0], [1], [0, 0, 1, 1], [], []>} : vector<256x384xbf16>, vector<384x128xbf16>, vector<256x128xf32> -> vector<256x128xf32>
    %121 = arith.addf %116, %120 : vector<256x128xf32>
    %122 = vector.broadcast %40 : vector<1x128xf32> to vector<256x128xf32>
    %123 = arith.addf %121, %122 : vector<256x128xf32>
    %c1_48 = arith.constant 1 : index
    %c0_49 = arith.constant 0 : index
    %c0_50 = arith.constant 0 : index
    %124 = vector.load %arg3[%c1_48, %c0_49, %c0_50] : memref<2x4x128xf32, #tpu.memory_space<vmem>>, vector<1x4x128xf32>
    %125 = vector.shape_cast %124 : vector<1x4x128xf32> to vector<4x128xf32>
    %126 = vector.extract_strided_slice %125 {offsets = [0, 0], sizes = [1, 128], strides = [1, 1]} : vector<4x128xf32> to vector<1x128xf32>
    %127 = vector.extract_strided_slice %125 {offsets = [1, 0], sizes = [1, 128], strides = [1, 1]} : vector<4x128xf32> to vector<1x128xf32>
    %128 = vector.extract_strided_slice %125 {offsets = [2, 0], sizes = [1, 128], strides = [1, 1]} : vector<4x128xf32> to vector<1x128xf32>
    %129 = vector.extract_strided_slice %125 {offsets = [3, 0], sizes = [1, 128], strides = [1, 1]} : vector<4x128xf32> to vector<1x128xf32>
    %cst_51 = arith.constant dense<0.000000e+00> : vector<128xf32>
    %130 = vector.multi_reduction <add>, %123, %cst_51 [0] : vector<256x128xf32> to vector<128xf32>
    %131 = vector.shape_cast %130 : vector<128xf32> to vector<1x128xf32>
    %cst_52 = arith.constant 2.560000e+02 : f32
    %132 = vector.broadcast %cst_52 : f32 to vector<1x128xf32>
    %133 = arith.divf %131, %132 : vector<1x128xf32>
    %134 = arith.mulf %123, %123 : vector<256x128xf32>
    %cst_53 = arith.constant dense<0.000000e+00> : vector<128xf32>
    %135 = vector.multi_reduction <add>, %134, %cst_53 [0] : vector<256x128xf32> to vector<128xf32>
    %136 = vector.shape_cast %135 : vector<128xf32> to vector<1x128xf32>
    %cst_54 = arith.constant 2.560000e+02 : f32
    %137 = vector.broadcast %cst_54 : f32 to vector<1x128xf32>
    %138 = arith.divf %136, %137 : vector<1x128xf32>
    %139 = arith.mulf %133, %133 : vector<1x128xf32>
    %140 = arith.subf %138, %139 : vector<1x128xf32>
    %cst_55 = arith.constant 0.000000e+00 : f32
    %141 = vector.broadcast %cst_55 : f32 to vector<1x128xf32>
    %142 = arith.maximumf %140, %141 : vector<1x128xf32>
    %143 = arith.mulf %133, %29 : vector<1x128xf32>
    %cst_56 = arith.constant dense<0.000000e+00> : vector<1xf32>
    %144 = vector.multi_reduction <add>, %143, %cst_56 [1] : vector<1x128xf32> to vector<1xf32>
    %145 = vector.shape_cast %144 : vector<1xf32> to vector<1x1xf32>
    %cst_57 = arith.constant 2.500000e-01 : f32
    %146 = vector.broadcast %cst_57 : f32 to vector<1x1xf32>
    %147 = arith.mulf %145, %146 : vector<1x1xf32>
    %148 = vector.broadcast %147 : vector<1x1xf32> to vector<1x128xf32>
    %149 = arith.subf %133, %148 : vector<1x128xf32>
    %150 = arith.mulf %149, %29 : vector<1x128xf32>
    %151 = arith.mulf %150, %150 : vector<1x128xf32>
    %cst_58 = arith.constant dense<0.000000e+00> : vector<1xf32>
    %152 = vector.multi_reduction <add>, %151, %cst_58 [1] : vector<1x128xf32> to vector<1xf32>
    %153 = vector.shape_cast %152 : vector<1xf32> to vector<1x1xf32>
    %cst_59 = arith.constant 0.333333343 : f32
    %154 = vector.broadcast %cst_59 : f32 to vector<1x1xf32>
    %155 = arith.mulf %153, %154 : vector<1x1xf32>
    %156 = vector.broadcast %147 : vector<1x1xf32> to vector<1x128xf32>
    %157 = arith.subf %133, %156 : vector<1x128xf32>
    %cst_60 = arith.constant 9.99999974E-6 : f32
    %158 = vector.broadcast %cst_60 : f32 to vector<1x1xf32>
    %159 = arith.addf %155, %158 : vector<1x1xf32>
    %160 = math.rsqrt %159 : vector<1x1xf32>
    %161 = vector.broadcast %160 : vector<1x1xf32> to vector<1x128xf32>
    %162 = arith.mulf %157, %161 : vector<1x128xf32>
    %163 = vector.broadcast %133 : vector<1x128xf32> to vector<256x128xf32>
    %164 = arith.subf %123, %163 : vector<256x128xf32>
    %cst_61 = arith.constant 9.99999974E-6 : f32
    %165 = vector.broadcast %cst_61 : f32 to vector<1x128xf32>
    %166 = arith.addf %142, %165 : vector<1x128xf32>
    %167 = math.rsqrt %166 : vector<1x128xf32>
    %168 = vector.broadcast %167 : vector<1x128xf32> to vector<256x128xf32>
    %169 = arith.mulf %164, %168 : vector<256x128xf32>
    %170 = arith.mulf %162, %127 : vector<1x128xf32>
    %171 = vector.broadcast %170 : vector<1x128xf32> to vector<256x128xf32>
    %172 = arith.addf %169, %171 : vector<256x128xf32>
    %173 = vector.broadcast %126 : vector<1x128xf32> to vector<256x128xf32>
    %174 = arith.mulf %173, %172 : vector<256x128xf32>
    %175 = vector.broadcast %128 : vector<1x128xf32> to vector<256x128xf32>
    %176 = arith.addf %174, %175 : vector<256x128xf32>
    %cst_62 = arith.constant 0.000000e+00 : f32
    %177 = vector.broadcast %cst_62 : f32 to vector<256x128xf32>
    %178 = arith.cmpf ogt, %176, %177 : vector<256x128xf32>
    %cst_63 = arith.constant 0.000000e+00 : f32
    %179 = vector.broadcast %cst_63 : f32 to vector<256x128xf32>
    %180 = arith.minimumf %176, %179 : vector<256x128xf32>
    %181 = math.exp %180 : vector<256x128xf32>
    %cst_64 = arith.constant 1.000000e+00 : f32
    %182 = vector.broadcast %cst_64 : f32 to vector<256x128xf32>
    %183 = arith.subf %181, %182 : vector<256x128xf32>
    %184 = arith.select %178, %176, %183 : vector<256x128xi1>, vector<256x128xf32>
    %c1_i32_65 = arith.constant 1 : i32
    %185 = tpu.dynamic_rotate %184 by %c1_i32_65 dim 0 : vector<256x128xf32>, i32 -> vector<256x128xf32>
    %186 = vector.broadcast %20 : vector<256x1xf32> to vector<256x128xf32>
    %187 = arith.mulf %185, %186 : vector<256x128xf32>
    %188 = arith.truncf %187 : vector<256x128xf32> to vector<256x128xbf16>
    %189 = arith.truncf %184 : vector<256x128xf32> to vector<256x128xbf16>
    %c255_i32_66 = arith.constant 255 : i32
    %190 = tpu.dynamic_rotate %184 by %c255_i32_66 dim 0 : vector<256x128xf32>, i32 -> vector<256x128xf32>
    %191 = vector.broadcast %24 : vector<256x1xf32> to vector<256x128xf32>
    %192 = arith.mulf %190, %191 : vector<256x128xf32>
    %193 = arith.truncf %192 : vector<256x128xf32> to vector<256x128xbf16>
    %c16_67 = arith.constant 16 : index
    %c0_68 = arith.constant 0 : index
    %194 = vector.load %arg5[%c16_67, %c0_68] : memref<288x384xbf16, #tpu.memory_space<vmem>>, vector<256x128xbf16>
    tpu.vector_store %arg5[%c16_67, %c0_68], %188 {strides = array<i32>} : memref<288x384xbf16, #tpu.memory_space<vmem>>, vector<256x128xbf16>,
    %c16_69 = arith.constant 16 : index
    %c128_70 = arith.constant 128 : index
    %195 = vector.load %arg5[%c16_69, %c128_70] : memref<288x384xbf16, #tpu.memory_space<vmem>>, vector<256x128xbf16>
    tpu.vector_store %arg5[%c16_69, %c128_70], %189 {strides = array<i32>} : memref<288x384xbf16, #tpu.memory_space<vmem>>, vector<256x128xbf16>,
    %c16_71 = arith.constant 16 : index
    %c256_72 = arith.constant 256 : index
    %196 = vector.load %arg5[%c16_71, %c256_72] : memref<288x384xbf16, #tpu.memory_space<vmem>>, vector<256x128xbf16>
    tpu.vector_store %arg5[%c16_71, %c256_72], %193 {strides = array<i32>} : memref<288x384xbf16, #tpu.memory_space<vmem>>, vector<256x128xbf16>,
    %c0_73 = arith.constant 0 : index
    %c0_74 = arith.constant 0 : index
    %197 = vector.load %arg5[%c0_73, %c0_74] : memref<288x384xbf16, #tpu.memory_space<vmem>>, vector<256x384xbf16>
    %c1_75 = arith.constant 1 : index
    %c0_76 = arith.constant 0 : index
    %c0_77 = arith.constant 0 : index
    %c0_78 = arith.constant 0 : index
    %198 = vector.load %arg2[%c1_75, %c0_76, %c0_77, %c0_78] : memref<2x3x384x128xbf16, #tpu.memory_space<vmem>>, vector<1x1x384x128xbf16>
    %199 = vector.shape_cast %198 : vector<1x1x384x128xbf16> to vector<384x128xbf16>
    %cst_79 = arith.constant dense<0.000000e+00> : vector<256x128xf32>
    %200 = tpu.matmul %197, %199, %cst_79 {dimension_numbers = #tpu.dot_dimension_numbers<[1], [0], [0], [1], [0, 0, 1, 1], [], []>} : vector<256x384xbf16>, vector<384x128xbf16>, vector<256x128xf32> -> vector<256x128xf32>
    %c16_80 = arith.constant 16 : index
    %c0_81 = arith.constant 0 : index
    %201 = vector.load %arg5[%c16_80, %c0_81] : memref<288x384xbf16, #tpu.memory_space<vmem>>, vector<256x384xbf16>
    %c1_82 = arith.constant 1 : index
    %c1_83 = arith.constant 1 : index
    %c0_84 = arith.constant 0 : index
    %c0_85 = arith.constant 0 : index
    %202 = vector.load %arg2[%c1_82, %c1_83, %c0_84, %c0_85] : memref<2x3x384x128xbf16, #tpu.memory_space<vmem>>, vector<1x1x384x128xbf16>
    %203 = vector.shape_cast %202 : vector<1x1x384x128xbf16> to vector<384x128xbf16>
    %cst_86 = arith.constant dense<0.000000e+00> : vector<256x128xf32>
    %204 = tpu.matmul %201, %203, %cst_86 {dimension_numbers = #tpu.dot_dimension_numbers<[1], [0], [0], [1], [0, 0, 1, 1], [], []>} : vector<256x384xbf16>, vector<384x128xbf16>, vector<256x128xf32> -> vector<256x128xf32>
    %205 = arith.addf %200, %204 : vector<256x128xf32>
    %c32_87 = arith.constant 32 : index
    %c0_88 = arith.constant 0 : index
    %206 = vector.load %arg5[%c32_87, %c0_88] : memref<288x384xbf16, #tpu.memory_space<vmem>>, vector<256x384xbf16>
    %c1_89 = arith.constant 1 : index
    %c2_90 = arith.constant 2 : index
    %c0_91 = arith.constant 0 : index
    %c0_92 = arith.constant 0 : index
    %207 = vector.load %arg2[%c1_89, %c2_90, %c0_91, %c0_92] : memref<2x3x384x128xbf16, #tpu.memory_space<vmem>>, vector<1x1x384x128xbf16>
    %208 = vector.shape_cast %207 : vector<1x1x384x128xbf16> to vector<384x128xbf16>
    %cst_93 = arith.constant dense<0.000000e+00> : vector<256x128xf32>
    %209 = tpu.matmul %206, %208, %cst_93 {dimension_numbers = #tpu.dot_dimension_numbers<[1], [0], [0], [1], [0, 0, 1, 1], [], []>} : vector<256x384xbf16>, vector<384x128xbf16>, vector<256x128xf32> -> vector<256x128xf32>
    %210 = arith.addf %205, %209 : vector<256x128xf32>
    %211 = vector.broadcast %129 : vector<1x128xf32> to vector<256x128xf32>
    %212 = arith.addf %210, %211 : vector<256x128xf32>
    %213 = arith.addf %212, %31 : vector<256x128xf32>
    %c0_94 = arith.constant 0 : index
    %c0_95 = arith.constant 0 : index
    %c0_96 = arith.constant 0 : index
    %214 = vector.load %arg4[%c0_94, %c0_95, %c0_96] : memref<1x256x128xf32, #tpu.memory_space<vmem>>, vector<1x256x128xf32>
    %215 = vector.shape_cast %214 : vector<1x256x128xf32> to vector<256x128xf32>
    %216 = vector.shape_cast %213 : vector<256x128xf32> to vector<1x256x128xf32>
    tpu.vector_store %arg4[%c0_94, %c0_95, %c0_96], %216 {strides = array<i32>} : memref<1x256x128xf32, #tpu.memory_space<vmem>>, vector<1x256x128xf32>,
    return
  }
  func.func @transform_0(%arg0: i32) -> (i32, i32, i32) {
    %c0_i32 = arith.constant 0 : i32
    %c0_i32_0 = arith.constant 0 : i32
    %c0_i32_1 = arith.constant 0 : i32
    return %arg0, %c0_i32, %c0_i32_0 : i32, i32, i32
  }
  func.func @transform_1(%arg0: i32) -> (i32, i32, i32, i32) {
    %c0_i32 = arith.constant 0 : i32
    %c0_i32_0 = arith.constant 0 : i32
    %c0_i32_1 = arith.constant 0 : i32
    %c0_i32_2 = arith.constant 0 : i32
    %c0_i32_3 = arith.constant 0 : i32
    return %c0_i32, %c0_i32_0, %c0_i32_1, %c0_i32_2 : i32, i32, i32, i32
  }
  func.func @transform_2(%arg0: i32) -> (i32, i32, i32) {
    %c0_i32 = arith.constant 0 : i32
    %c0_i32_0 = arith.constant 0 : i32
    %c0_i32_1 = arith.constant 0 : i32
    %c0_i32_2 = arith.constant 0 : i32
    return %c0_i32, %c0_i32_0, %c0_i32_1 : i32, i32, i32
  }
  func.func @transform_3(%arg0: i32) -> (i32, i32, i32) {
    %c0_i32 = arith.constant 0 : i32
    %c0_i32_0 = arith.constant 0 : i32
    %c0_i32_1 = arith.constant 0 : i32
    return %arg0, %c0_i32, %c0_i32_0 : i32, i32, i32
  }
}

</mosaic_0001>

<bundles_post_ra>
// kernel: tpu_custom_call.1
= control target key start
LH: loop header
LB: loop body
LE: loop exit
PB: predicated region body
PF: predicated region fallthrough
CT: control target
= control target key end

     0   :  { %8 = vsyncpa [#allocation4], 0  ;;  %s13228_s0 = inlined_call_operand.hbm [shape: f32[2,256,128], index: 0, kind: input, shape index: {}]   ;;  %s13229_s1 = inlined_call_operand.hbm [shape: bf16[2,3,384,128], index: 1, kind: input, shape index: {}]   ;;  %s13230_s2 = inlined_call_operand.hbm [shape: f32[2,4,128], index: 2, kind: input, shape index: {}]   ;;  %s13231_s3 = inlined_call_operand.hbm [shape: f32[2,256,128], index: 3, kind: output, shape index: {}]  }
   0x1   :  { %10 = vsyncpa [#allocation4 + $0x1], 0 }
   0x2   :  { %11 = vsyncpa [#allocation7], 0 }
   0x3   :  { %12 = vsyncpa [#allocation5], 0 }
   0x4   :  { %14 = vsyncpa [#allocation5 + $0x1], 0  ;;  %s9338_s12 = smov 0   ;;  %s9340_s13 = smov 0  }
   0x5   :  { %s9342_s14 = smov 0   ;;  %s9344_s15 = smov 0  }
   0x6 LB: > { %s9359_s16 = sadd.s32 4294967295, %s9305_s15   ;;  %s7040_s17 = sadd.s32 4294967294, %s9305_s15   ;;  %s9305_s15 = sphi %s9344_s15, %s13626_s15   ;;  %s9301_s14 = sphi %s9342_s14, %s13625_s14   ;;  %s9297_s13 = sphi %s9340_s13, %s13624_s13   ;;  %s9293_s12 = sphi %s9338_s12, %s13623_s12  }
   0x7   : > { %p40_p0 = scmp.ne.s32.totalorder %s9297_s13, %s9293_s12  ;;  %p41_p1 = scmp.eq.s32.totalorder %s9359_s16, 0 }
   0x8   : > { %p106_p2 = scmp.eq.s32.totalorder %s9359_s16, 1  ;;  %p112_p3 = scmp.eq.s32.totalorder %s7040_s17, 1 }
   0x9   : > { %p9368_p4 = por %p41_p1, %p40_p0  ;;  %p7041_p5 = scmp.ge.s32.totalorder %s9305_s15, 1 }
   0xa   : > { %p9373_p6 = por %p112_p3, %p40_p0  ;;  %p119_p7 = scmp.lt.s32.totalorder %s9305_s15, 3 }
   0xb   : > { %s130_s22 = sshll.u32 %s13229_s1, 4  ;;  %s9307_s24 = smov [#allocation6]   ;;  %s131_s22 = int_to_ptr.hbm [resolvable:$true] %s130_s22 }
   0xc   : > { %p9381_p8 = pnand %p7041_p5, %p119_p7  ;;  %s132_s25 = sshll.u32 %s9307_s24, 4  ;;  %s133_s25 = int_to_ptr.vmem [resolvable:$true] %s132_s25 }
   0xd   : > { %s144_s28 = sshll.u32 %s13230_s2, 4  ;;  %s9308_s29 = smov 64   ;;  %s145_s28 = int_to_ptr.hbm [resolvable:$true] %s144_s28 }
   0xe   : > { %p8895_p9 = pneg %p9381_p8  ;;  %s9309_s30 = smov 4  }
   0xf   : > { %s9310_s4 = smov [#allocation8]   ;;  %s9394_s6 = sadd.s32 1, %s9305_s15  }
  0x10   : > { %p8896_p10 = pnand %p8895_p9, %p41_p1  ;;  %s146_s5 = sshll.u32 %s9310_s4, 4  ;;  %s147_s5 = int_to_ptr.vmem [resolvable:$true] %s146_s5 }
  0x11   : > { %s27_s7 = sadd.s32 1, %s9301_s14  ;;  %s24_s8 = ssub.s32 %s9305_s15, %s9394_s6 }
  0x12   : > { %8898 = dma.hbm_to_vmem [thread:$0]  (!%p8896_p10), %s131_s22, 18432, %s133_s25, [#allocation7], %s9308_s29, %s9308_s29, %s9309_s30  }
  0x13   : > { %8901 = dma.hbm_to_vmem [thread:$0]  (!%p8896_p10), %s145_s28, 128, %s147_s5, [#allocation7], %s9308_s29, %s9308_s29, %s9309_s30  }
  0x14   : > { %p34_p12 = scmp.ne.s32.totalorder %s9301_s14, %s9297_s13  ;;  %p25_p13 = scmp.eq.s32.totalorder %s24_s8, 0 }
  0x15   : > { %p35_p0 = scmp.eq.s32.totalorder %s9305_s15, 0  ;;  %p8912_p5 = scmp.lt.s32.totalorder %s9305_s15, 2 }
  0x16   : > { %p9404_p3 = por %p106_p2, %p34_p12  ;;  %s160_s11 = sand.u32 1, %s9301_s14  }
  0x17   : > { %s9410_s10 = scalar_select %p25_p13, %s9301_s14, %s27_s7  }
  0x18   : > { %p36_p7 = por %p35_p0, %p34_p12  ;;  %s7045_s17 = sshll.u32 %s160_s11, 8 }
  0x19   : > { %s8523_s20 = sshll.u32 %s9305_s15, 8  ;;  %s164_s25 = scalar_lea.vmem [#allocation3], %s7045_s17 }
  0x1a   : > { %s169_s24 = scalar_lea.hbm %s13228_s0, %s8523_s20  ;;  %s172_s26 = sshll.u32 %s164_s25, 4  ;;  %s173_s26 = int_to_ptr.vmem [resolvable:$true] %s172_s26 }
  0x1b   : > { %s170_s27 = sshll.u32 %s169_s24, 4  ;;  %p9417_p2 = pnand %p8912_p5, %p36_p7  ;;  %s171_s27 = int_to_ptr.hbm [resolvable:$true] %s170_s27 }
  0x1c   : > { %s161_s29 = scalar_lea.sflag [#allocation4], %s160_s11  ;;  %s9205_s30 = sshra.s32 %s171_s27, 4  ;;  %s9206_s30 = int_to_ptr.hbm [resolvable:$true] %s9205_s30 }
  0x1d   : > { %s9207_s4 = scalar_lea.hbm %s9206_s30, 256  ;;  %p9209_p10 = pneg %p9417_p2 }
  0x1e   : > { %p9208_p9 = scmp.ne.s32.totalorder %s9206_s30, %s9207_s4  ;;  %s9212_s8 = scalar_lea.hbm %s13228_s0, 512 }
  0x1f   : > { %p9213_p0 = scmp.lt.s32.totalorder %s9206_s30, %s13228_s0  ;;  %p9214_p5 = scmp.lt.s32.totalorder %s9212_s8, %s9207_s4 }
  0x20   : > { %p9210_p12 = pnand %p9209_p10, %p9208_p9 }
  0x21   : > { %p9215_p7 = por %p9214_p5, %p9213_p0 }
  0x22   : > { %p9211_p13 = pneg %p9210_p12 }
  0x24   : > { %p9216_p11 = pnand %p9215_p7, %p9211_p13 }
  0x26   : > { %9219 = shalt.err (!%p9216_p11)
}
  0x27   : > { %s9311_s11 = smov 128   ;;  %s9312_s21 = smov 8  }
  0x28   : > { %8905 = dma.hbm_to_vmem [thread:$0]  (!%p9417_p2), %s171_s27, 4096, %s173_s26, %s161_s29, %s9311_s11, %s9311_s11, %s9312_s21  }
  0x29   : > { %184 = sbr.rel (%p9381_p8) target bundleno = 2572 (0xa0c), region = 32 }
  0x2e   : > { %s9434_s22 = sand.u32 1, %s9297_s13  }
  0x2f   : > { %s7049_s24 = sshll.u32 %s9434_s22, 8  ;;  %s187_s25 = scalar_lea.sflag [#allocation4], %s9434_s22 }
  0x30   : > { %s9440_s30 = scalar_lea.vmem [#allocation3], %s7049_s24 }
  0x31   : > { %9280 = dma.done.wait (%p9368_p4), %s187_s25, 4096  }
  0x32   : > { %9282 = vsyncadd (%p9368_p4), %s187_s25, 4294963200 }
  0x33   : > { %9284 = dma.done.wait (%p41_p1), [#allocation7], 18560  }
  0x34   : > { %9286 = vsyncadd (%p41_p1), [#allocation7], 4294948736  ;;  %v9451_v0 = vld [vmem:[%s9440_s30] sm:$0xff]  ;;  %v9454_v1 = vld [vmem:[%s9440_s30 + $0x8] sm:$0xff]  ;;  %v9313_v50 = vmov 256.0   ;;  %s12998_s18 = scalar_lea.vmem [#allocation9], %s7049_s24 }
  0x35   : > { %v9457_v2 = vld [vmem:[%s9440_s30 + $0x10] sm:$0xff]  ;;  %v880_v3 = vadd.f32 %v9454_v1, %v9451_v0  ;;  %v9462_v4 = vld [vmem:[%s9440_s30 + $0x18] sm:$0xff]  ;;  %v9466_v6 = vld [vmem:[%s9440_s30 + $0x20] sm:$0xff]  ;;  %8959 = vrcp.f32 %v9313_v50  ;;  %v926_v50 = vmul.f32 %v9454_v1, %v9454_v1  ;;  %s8866_s23 = sshll.u32 %s9359_s16, 8  ;;  %s6945_s29 = sshll.u32 %s12998_s18, 4  ;;  %s6946_s29 = int_to_ptr.vmem [resolvable:$true] %s6945_s29 }
  0x36   : > { %v9470_v8 = vld [vmem:[%s9440_s30 + $0x28] sm:$0xff]  ;;  %v9474_v10 = vld [vmem:[%s9440_s30 + $0x30] sm:$0xff]  ;;  %v9478_v12 = vld [vmem:[%s9440_s30 + $0x38] sm:$0xff]  ;;  %s6944_s28 = scalar_lea.hbm %s13231_s3, %s8866_s23  ;;  %s6933_s4 = scalar_lea.sflag [#allocation5], %s9434_s22 }
  0x37   : > { %v881_v5 = vadd.f32 %v880_v3, %v9457_v2  ;;  %v9482_v14 = vld [vmem:[%s9440_s30 + $0x40] sm:$0xff]  ;;  %v9486_v16 = vld [vmem:[%s9440_s30 + $0x48] sm:$0xff]  ;;  %v9490_v18 = vld [vmem:[%s9440_s30 + $0x50] sm:$0xff]  ;;  %s6947_s16 = sshll.u32 %s6944_s28, 4  ;;  %s9255_s20 = scalar_lea.hbm %s13231_s3, 512  ;;  %s6948_s16 = int_to_ptr.hbm [resolvable:$true] %s6947_s16 }
  0x38   : > { %v9494_v20 = vld [vmem:[%s9440_s30 + $0x58] sm:$0xff]  ;;  %v9498_v22 = vld [vmem:[%s9440_s30 + $0x60] sm:$0xff]  ;;  %v9502_v24 = vld [vmem:[%s9440_s30 + $0x68] sm:$0xff]  ;;  %s9249_s5 = sshra.s32 %s6948_s16, 4  ;;  %s9250_s5 = int_to_ptr.hbm [resolvable:$true] %s9249_s5 }
  0x39   : > { %v882_v7 = vadd.f32 %v881_v5, %v9462_v4  ;;  %v9506_v26 = vld [vmem:[%s9440_s30 + $0x70] sm:$0xff]  ;;  %v9510_v28 = vld [vmem:[%s9440_s30 + $0x78] sm:$0xff]  ;;  %v9514_v30 = vld [vmem:[%s9440_s30 + $0x80] sm:$0xff]  ;;  %s9251_s7 = scalar_lea.hbm %s9250_s5, 256  ;;  %p9256_p11 = scmp.lt.s32.totalorder %s9250_s5, %s13231_s3 }
  0x3a   : > { %v9518_v32 = vld [vmem:[%s9440_s30 + $0x88] sm:$0xff]  ;;  %v9522_v34 = vld [vmem:[%s9440_s30 + $0x90] sm:$0xff]  ;;  %v9526_v36 = vld [vmem:[%s9440_s30 + $0x98] sm:$0xff]  ;;  %p9252_p1 = scmp.ne.s32.totalorder %s9250_s5, %s9251_s7  ;;  %p9257_p2 = scmp.lt.s32.totalorder %s9255_s20, %s9251_s7 }
  0x3b   : > { %v883_v9 = vadd.f32 %v882_v7, %v9466_v6  ;;  %v9530_v38 = vld [vmem:[%s9440_s30 + $0xa0] sm:$0xff]  ;;  %v9534_v40 = vld [vmem:[%s9440_s30 + $0xa8] sm:$0xff]  ;;  %v9538_v42 = vld [vmem:[%s9440_s30 + $0xb0] sm:$0xff]  ;;  %v8960_v56 = vpop.eup %8959 }
  0x3c   : > { %v9542_v44 = vld [vmem:[%s9440_s30 + $0xb8] sm:$0xff]  ;;  %v9546_v46 = vld [vmem:[%s9440_s30 + $0xc0] sm:$0xff]  ;;  %v9550_v48 = vld [vmem:[%s9440_s30 + $0xc8] sm:$0xff]  ;;  %v918_v61 = vmul.f32 256.0, %v8960_v56  ;;  %vm922_vm0 = vweird.f32 %v8960_v56  ;;  %p9253_p4 = pnand %p9252_p1, %p9404_p3  ;;  %p9258_p9 = por %p9257_p2, %p9256_p11 }
  0x3d   : > { %v884_v11 = vadd.f32 %v883_v9, %v9470_v8  ;;  %v9554_v51 = vld [vmem:[%s9440_s30 + $0xd0] sm:$0xff]  ;;  %v9558_v53 = vld [vmem:[%s9440_s30 + $0xd8] sm:$0xff]  ;;  %v9562_v55 = vld [vmem:[%s9440_s30 + $0xe0] sm:$0xff]  ;;  %v225_v9 = vlaneseq }
  0x3e   : > { %v9566_v58 = vld [vmem:[%s9440_s30 + $0xe8] sm:$0xff]  ;;  %v9570_v60 = vld [vmem:[%s9440_s30 + $0xf0] sm:$0xff]  ;;  %v9574_v63 = vld [vmem:[%s9440_s30 + $0xf8] sm:$0xff]  ;;  %v919_v5 = vsub.f32 1.0, %v918_v61  ;;  %p9254_p8 = pneg %p9253_p4 }
  0x3f   : > { %v885_v13 = vadd.f32 %v884_v11, %v9474_v10 }
  0x40   : > { %p9259_p10 = pnand %p9258_p9, %p9254_p8 }
  0x41   : > { %v886_v15 = vadd.f32 %v885_v13, %v9478_v12  ;;  %v920_v13 = vmul.f32 %v8960_v56, %v919_v5  ;;  %v931_v5 = vmul.f32 %v9474_v10, %v9474_v10 }
  0x43   : > { %v887_v17 = vadd.f32 %v886_v15, %v9482_v14 }
  0x45   : > { %v888_v19 = vadd.f32 %v887_v17, %v9486_v16  ;;  %v835_v17 = vand.u32 127, %v225_v9 }
  0x47   : > { %v889_v21 = vadd.f32 %v888_v19, %v9490_v18  ;;  %vm836_vm1 = vcmp.lt.s32.totalorder %v835_v17, 4 }
  0x49   : > { %v890_v23 = vadd.f32 %v889_v21, %v9494_v20  ;;  %v921_v21 = vadd.f32 %v8960_v56, %v920_v13 }
  0x4b   : > { %v891_v25 = vadd.f32 %v890_v23, %v9498_v22 }
  0x4d   : > { %v892_v27 = vadd.f32 %v891_v25, %v9502_v24 }
  0x4f   : > { %v893_v29 = vadd.f32 %v892_v27, %v9506_v26  ;;  %v9579_v27 = vsel %vm922_vm0, %v8960_v56, %v921_v21  ;;  %v928_v56 = vmul.f32 %v9462_v4, %v9462_v4 }
  0x50   : > { %13336 = vst [vmem:[#allocation13_spill] sm:$0xff] %v9579_v27 }
  0x51   : > { %v894_v31 = vadd.f32 %v893_v29, %v9510_v28 }
  0x53   : > { %v895_v33 = vadd.f32 %v894_v31, %v9514_v30  ;;  %v13235_v31 = vmov 0.0  }
  0x55   : > { %v896_v35 = vadd.f32 %v895_v33, %v9518_v32  ;;  %v9582_v33 = vsel %vm836_vm1, 1.0, %v13235_v31 }
  0x56   : > { %13337 = vst [vmem:[#allocation14_spill] sm:$0xff] %v9582_v33 }
  0x57   : > { %v897_v37 = vadd.f32 %v896_v35, %v9522_v34 }
  0x59   : > { %v898_v39 = vadd.f32 %v897_v37, %v9526_v36 }
  0x5b   : > { %v899_v41 = vadd.f32 %v898_v39, %v9530_v38 }
  0x5d   : > { %v900_v43 = vadd.f32 %v899_v41, %v9534_v40 }
  0x5f   : > { %v901_v45 = vadd.f32 %v900_v43, %v9538_v42 }
  0x61   : > { %v902_v47 = vadd.f32 %v901_v45, %v9542_v44 }
  0x63   : > { %v903_v49 = vadd.f32 %v902_v47, %v9546_v46 }
  0x65   : > { %v904_v52 = vadd.f32 %v903_v49, %v9550_v48  ;;  %v925_v49 = vmul.f32 %v9451_v0, %v9451_v0 }
  0x67   : > { %v905_v54 = vadd.f32 %v904_v52, %v9554_v51  ;;  %v927_v52 = vmul.f32 %v9457_v2, %v9457_v2 }
  0x69   : > { %v906_v57 = vadd.f32 %v905_v54, %v9558_v53  ;;  %v957_v54 = vadd.f32 %v926_v50, %v925_v49 }
  0x6b   : > { %v907_v59 = vadd.f32 %v906_v57, %v9562_v55  ;;  %v958_v57 = vadd.f32 %v957_v54, %v927_v52 }
  0x6d   : > { %v908_v62 = vadd.f32 %v907_v59, %v9566_v58  ;;  %v929_v59 = vmul.f32 %v9466_v6, %v9466_v6  ;;  %v959_v61 = vadd.f32 %v958_v57, %v928_v56  ;;  %v945_v57 = vmul.f32 %v9530_v38, %v9530_v38 }
  0x6f   : > { %v909_v3 = vadd.f32 %v908_v62, %v9570_v60  ;;  %v930_v62 = vmul.f32 %v9470_v8, %v9470_v8 }
  0x71   : > { %v910_v7 = vadd.f32 %v909_v3, %v9574_v63  ;;  %v960_v3 = vadd.f32 %v959_v61, %v929_v59  ;;  %v946_v61 = vmul.f32 %v9534_v40, %v9534_v40 }
  0x73   : > { %v911_v11 = vrot.slane %v910_v7, 4 }
  0x75   : > { %v912_v15 = vadd.f32 %v911_v11, %v910_v7  ;;  %v961_v7 = vadd.f32 %v960_v3, %v930_v62  ;;  %v932_v11 = vmul.f32 %v9478_v12, %v9478_v12  ;;  %v947_v3 = vmul.f32 %v9538_v42, %v9538_v42 }
  0x77   : > { %v913_v19 = vrot.slane %v912_v15, 2  ;;  %v962_v13 = vadd.f32 %v961_v7, %v931_v5  ;;  %v948_v7 = vmul.f32 %v9542_v44, %v9542_v44 }
  0x79   : > { %v914_v23 = vadd.f32 %v913_v19, %v912_v15  ;;  %v933_v15 = vmul.f32 %v9482_v14, %v9482_v14  ;;  %v963_v17 = vadd.f32 %v962_v13, %v932_v11  ;;  %v934_v19 = vmul.f32 %v9486_v16, %v9486_v16 }
  0x7a   : > { %v938_v14 = vmul.f32 %v9502_v24, %v9502_v24  ;;  %v939_v16 = vmul.f32 %v9506_v26, %v9506_v26  ;;  %v943_v24 = vmul.f32 %v9522_v34, %v9522_v34  ;;  %v944_v26 = vmul.f32 %v9526_v36, %v9526_v36 }
  0x7b   : > { %v915_v25 = vrot.slane %v914_v23, 1  ;;  %v964_v21 = vadd.f32 %v963_v17, %v933_v15  ;;  %v949_v13 = vmul.f32 %v9546_v46, %v9546_v46  ;;  %v950_v17 = vmul.f32 %v9550_v48, %v9550_v48 }
  0x7c   : > { %v954_v46 = vmul.f32 %v9566_v58, %v9566_v58  ;;  %v955_v48 = vmul.f32 %v9570_v60, %v9570_v60 }
  0x7d   : > { %v916_v29 = vadd.f32 %v915_v25, %v914_v23  ;;  %v935_v23 = vmul.f32 %v9490_v18, %v9490_v18  ;;  %v965_v25 = vadd.f32 %v964_v21, %v934_v19  ;;  %v940_v18 = vmul.f32 %v9510_v28, %v9510_v28 }
  0x7e   : > { %v951_v21 = vmul.f32 %v9554_v51, %v9554_v51  ;;  %v956_v51 = vmul.f32 %v9574_v63, %v9574_v63 }
  0x7f   : > { %v9585_v35 = vmul.f32 %v9579_v27, %v916_v29  ;;  %v936_v29 = vmul.f32 %v9494_v20, %v9494_v20  ;;  %v941_v20 = vmul.f32 %v9514_v30, %v9514_v30 }
  0x81   : > { %v998_v37 = vmul.f32 %v9582_v33, %v9585_v35  ;;  %v995_v58 = vmul.f32 %v9585_v35, %v9585_v35 }
  0x83   : > { %999 = vadd.xlane.f32.xlu0 %v998_v37  ;;  %v966_v37 = vadd.f32 %v965_v25, %v935_v23  ;;  %v952_v25 = vmul.f32 %v9558_v53, %v9558_v53 }
  0xf6   : > { %v1000_v39 = vpop.xlane.xlu0 %999 }
  0xf7   : > { %v1001_v41 = vmul.f32 0.25, %v1000_v39  ;;  %v937_v39 = vmul.f32 %v9498_v22, %v9498_v22  ;;  %v942_v22 = vmul.f32 %v9518_v32, %v9518_v32 }
  0xf9   : > { %v9590_v43 = vsub.f32 %v9585_v35, %v1001_v41  ;;  %v967_v41 = vadd.f32 %v966_v37, %v936_v29  ;;  %v953_v37 = vmul.f32 %v9562_v55, %v9562_v55 }
  0xfb   : > { %v1003_v45 = vmul.f32 %v9582_v33, %v9590_v43 }
  0xfd   : > { %v1004_v47 = vmul.f32 %v1003_v45, %v1003_v45  ;;  %v968_v45 = vadd.f32 %v967_v41, %v937_v39 }
  0xff   : > { %1005 = vadd.xlane.f32.xlu0 %v1004_v47  ;;  %v969_v47 = vadd.f32 %v968_v45, %v938_v14 }
 0x101   : > { %v970_v49 = vadd.f32 %v969_v47, %v939_v16 }
 0x103   : > { %v971_v50 = vadd.f32 %v970_v49, %v940_v18 }
 0x105   : > { %v972_v52 = vadd.f32 %v971_v50, %v941_v20 }
 0x107   : > { %v973_v54 = vadd.f32 %v972_v52, %v942_v22 }
 0x109   : > { %v974_v56 = vadd.f32 %v973_v54, %v943_v24  ;;  %v8614_v24 = vld [vmem:[#allocation6 + $0x138] sm:$0xff] }
 0x10a   : > { %v8606_v54 = vld [vmem:[#allocation6 + $0xf8] sm:$0xff]  ;;  %2427 = vmatpush.bf16.msra.mxu1 %v8614_v24  ;;  %8875 = vmatpush.bf16.msra.mxu3 %v8614_v24 }
 0x10b   : > { %v975_v59 = vadd.f32 %v974_v56, %v944_v26  ;;  %v8613_v56 = vld [vmem:[#allocation6 + $0x130] sm:$0xff]  ;;  %2338 = vmatpush.bf16.msra.mxu0 %v8606_v54  ;;  %8867 = vmatpush.bf16.msra.mxu2 %v8606_v54 }
 0x10d   : > { %v976_v62 = vadd.f32 %v975_v59, %v945_v57  ;;  %v8605_v57 = vld [vmem:[#allocation6 + $0xf0] sm:$0xff] }
 0x10e   : > { %2428 = vmatpush.bf16.msra.mxu1 %v8613_v56  ;;  %8876 = vmatpush.bf16.msra.mxu3 %v8613_v56 }
 0x10f   : > { %v977_v5 = vadd.f32 %v976_v62, %v946_v61  ;;  %2339 = vmatpush.bf16.msra.mxu0 %v8605_v57  ;;  %8868 = vmatpush.bf16.msra.mxu2 %v8605_v57 }
 0x111   : > { %v978_v11 = vadd.f32 %v977_v5, %v947_v3  ;;  %v8612_v3 = vld [vmem:[#allocation6 + $0x128] sm:$0xff] }
 0x112   : > { %v8604_v5 = vld [vmem:[#allocation6 + $0xe8] sm:$0xff]  ;;  %2429 = vmatpush.bf16.msra.mxu1 %v8612_v3  ;;  %8877 = vmatpush.bf16.msra.mxu3 %v8612_v3 }
 0x113   : > { %v979_v15 = vadd.f32 %v978_v11, %v948_v7  ;;  %2340 = vmatpush.bf16.msra.mxu0 %v8604_v5  ;;  %8869 = vmatpush.bf16.msra.mxu2 %v8604_v5  ;;  %v8622_v5 = vld [vmem:[#allocation6 + $0x178] sm:$0xff] }
 0x115   : > { %v980_v19 = vadd.f32 %v979_v15, %v949_v13  ;;  %v8611_v13 = vld [vmem:[#allocation6 + $0x120] sm:$0xff] }
 0x116   : > { %v8603_v15 = vld [vmem:[#allocation6 + $0xe0] sm:$0xff]  ;;  %2430 = vmatpush.bf16.msra.mxu1 %v8611_v13  ;;  %8878 = vmatpush.bf16.msra.mxu3 %v8611_v13  ;;  %v1025_v13 = vsub.f32 %v9470_v8, %v9585_v35 }
 0x117   : > { %v981_v23 = vadd.f32 %v980_v19, %v950_v17  ;;  %v8610_v19 = vld [vmem:[#allocation6 + $0x118] sm:$0xff]  ;;  %2341 = vmatpush.bf16.msra.mxu0 %v8603_v15  ;;  %8870 = vmatpush.bf16.msra.mxu2 %v8603_v15 }
 0x119   : > { %v982_v29 = vadd.f32 %v981_v23, %v951_v21  ;;  %v8602_v21 = vld [vmem:[#allocation6 + $0xd8] sm:$0xff] }
 0x11a   : > { %2431 = vmatpush.bf16.msra.mxu1 %v8610_v19  ;;  %8879 = vmatpush.bf16.msra.mxu3 %v8610_v19 }
 0x11b   : > { %v983_v39 = vadd.f32 %v982_v29, %v952_v25  ;;  %2342 = vmatpush.bf16.msra.mxu0 %v8602_v21  ;;  %8871 = vmatpush.bf16.msra.mxu2 %v8602_v21 }
 0x11d   : > { %v984_v41 = vadd.f32 %v983_v39, %v953_v37  ;;  %v8609_v37 = vld [vmem:[#allocation6 + $0x110] sm:$0xff] }
 0x11e   : > { %2432 = vmatpush.bf16.msra.mxu1 %v8609_v37  ;;  %8880 = vmatpush.bf16.msra.mxu3 %v8609_v37 }
 0x11f   : > { %v985_v14 = vadd.f32 %v984_v41, %v954_v46  ;;  %v8601_v46 = vld [vmem:[#allocation6 + $0xd0] sm:$0xff] }
 0x120   : > { %2343 = vmatpush.bf16.msra.mxu0 %v8601_v46  ;;  %8872 = vmatpush.bf16.msra.mxu2 %v8601_v46 }
 0x121   : > { %v986_v45 = vadd.f32 %v985_v14, %v955_v48  ;;  %v8608_v14 = vld [vmem:[#allocation6 + $0x108] sm:$0xff] }
 0x122   : > { %2433 = vmatpush.bf16.msra.mxu1 %v8608_v14  ;;  %8881 = vmatpush.bf16.msra.mxu3 %v8608_v14 }
 0x123   : > { %v987_v16 = vadd.f32 %v986_v45, %v956_v51  ;;  %v8600_v45 = vld [vmem:[#allocation6 + $0xc8] sm:$0xff] }
 0x124   : > { %2344 = vmatpush.bf16.msra.mxu0 %v8600_v45  ;;  %8873 = vmatpush.bf16.msra.mxu2 %v8600_v45 }
 0x125   : > { %v988_v47 = vrot.slane %v987_v16, 4 }
 0x127   : > { %v989_v53 = vadd.f32 %v988_v47, %v987_v16  ;;  %v9662_v16 = vshrl.u32 %v225_v9, 7  ;;  %v1020_v47 = vsub.f32 %v9451_v0, %v9585_v35  ;;  %v1037_v9 = vsub.f32 %v9518_v32, %v9585_v35 }
 0x128   : > { %v1051_v0 = vsub.f32 %v9574_v63, %v9585_v35  ;;  %v1038_v32 = vsub.f32 %v9522_v34, %v9585_v35 }
 0x129   : > { %v990_v18 = vrot.slane %v989_v53, 2  ;;  %13338 = vst [vmem:[#allocation15_spill] sm:$0xff] %v9662_v16  ;;  %v242_v24 = vadd.s32 128, %v9662_v16  ;;  %vm1419_vm12 = vcmp.lt.s32.totalorder %v9662_v16, 1 }
 0x12b   : > { %v991_v49 = vadd.f32 %v990_v18, %v989_v53  ;;  %v1021_v53 = vsub.f32 %v9454_v1, %v9585_v35  ;;  %v1035_v1 = vsub.f32 %v9510_v28, %v9585_v35  ;;  %v262_v28 = vand.u32 15, %v9662_v16 }
 0x12d   : > { %v992_v20 = vrot.slane %v991_v49, 1  ;;  %vm9704_vm8 = vcmp.ne.s32.totalorder %v262_v28, 0 }
 0x12f   : > { %v993_v55 = vadd.f32 %v992_v20, %v991_v49  ;;  %v1036_v20 = vsub.f32 %v9514_v30, %v9585_v35  ;;  %v1022_v30 = vsub.f32 %v9457_v2, %v9585_v35 }
 0x131   : > { %v994_v50 = vmul.f32 %v993_v55, %v9579_v27  ;;  %v8607_v55 = vld [vmem:[#allocation6 + $0x100] sm:$0xff] }
 0x132   : > { %2434 = vmatpush.bf16.msra.mxu1 %v8607_v55  ;;  %8882 = vmatpush.bf16.msra.mxu3 %v8607_v55 }
 0x133   : > { %v996_v22 = vsub.f32 %v994_v50, %v995_v58  ;;  %v879_v50 = vld [vmem:[#allocation8] sm:$0xf] }
 0x134   : > { %v9689_v54 = vperm.slane %v879_v50, 0 }
 0x135   : > { %v997_v52 = vmax.f32 %v996_v22, 0.0  ;;  %v1023_v22 = vsub.f32 %v9462_v4, %v9585_v35 }
 0x137   : > { %v1052_v60 = vadd.f32 1e-05, %v997_v52 }
 0x139   : > { %8961 = vrsqrt.f32 %v1052_v60  ;;  %vm1059_vm2 = vweird.f32 %v1052_v60 }
 0x13f   : > { %v8962_v26 = vpop.eup %8961 }
 0x140   : > { %v1054_v61 = vmul.f32 %v8962_v26, %v1052_v60  ;;  %vm1060_vm3 = vweird.f32 %v8962_v26 }
 0x141   : > { %vm1061_vm4 = vmor %vm1059_vm2, %vm1060_vm3 }
 0x142   : > { %v1055_v11 = vmul.f32 %v8962_v26, %v1054_v61 }
 0x144   : > { %v1056_v17 = vmul.f32 0.5, %v1055_v11  ;;  %v1024_v11 = vsub.f32 %v9466_v6, %v9585_v35 }
 0x146   : > { %v1057_v29 = vsub.f32 1.5, %v1056_v17 }
 0x148   : > { %v1058_v48 = vmul.f32 %v8962_v26, %v1057_v29 }
 0x14a   : > { %v9668_v49 = vsel %vm1061_vm4, %v8962_v26, %v1058_v48 }
 0x14b   : > { %v1063_v63 = vmul.f32 %v9668_v49, %v1020_v47  ;;  %v1064_v60 = vmul.f32 %v9668_v49, %v1021_v53  ;;  %v1079_v2 = vmul.f32 %v9668_v49, %v1036_v20  ;;  %v1080_v4 = vmul.f32 %v9668_v49, %v1037_v9 }
 0x14c   : > { %v1078_v34 = vmul.f32 %v9668_v49, %v1035_v1  ;;  %v1065_v56 = vmul.f32 %v9668_v49, %v1022_v30  ;;  %v1066_v57 = vmul.f32 %v9668_v49, %v1023_v22  ;;  %v1081_v3 = vmul.f32 %v9668_v49, %v1038_v32 }
 0x172   : > { %v1006_v59 = vpop.xlane.xlu0 %1005 }
 0x173   : > { %v1007_v62 = vmul.f32 0.33333334, %v1006_v59  ;;  %v9697_v59 = vperm.slane %v879_v50, 2 }
 0x175   : > { %v1008_v7 = vadd.f32 1e-05, %v1007_v62  ;;  %v1039_v62 = vsub.f32 %v9526_v36, %v9585_v35 }
 0x177   : > { %8963 = vrsqrt.f32 %v1008_v7  ;;  %vm1015_vm6 = vweird.f32 %v1008_v7  ;;  %v1082_v9 = vmul.f32 %v9668_v49, %v1039_v62 }
 0x17d   : > { %v8964_v23 = vpop.eup %8963 }
 0x17e   : > { %v1010_v25 = vmul.f32 %v8964_v23, %v1008_v7  ;;  %vm1016_vm5 = vweird.f32 %v8964_v23  ;;  %v374_v7 = vand.u32 15, %v242_v24 }
 0x17f   : > { %vm1017_vm7 = vmor %vm1015_vm6, %vm1016_vm5 }
 0x180   : > { %v1011_v39 = vmul.f32 %v8964_v23, %v1010_v25  ;;  %vm658_vm9 = vcmp.ne.s32.totalorder %v374_v7, 0  ;;  %v8579_v7 = vld [vmem:[#allocation6 + $0x38] sm:$0xff] }
 0x181   : > { %2765 = vmatpush.bf16.msrb.mxu3 %v8579_v7 }
 0x182   : > { %v1012_v41 = vmul.f32 0.5, %v1011_v39 }
 0x184   : > { %v1013_v51 = vsub.f32 1.5, %v1012_v41 }
 0x186   : > { %v1014_v18 = vmul.f32 %v8964_v23, %v1013_v51 }
 0x188   : > { %v1018_v58 = vsel %vm1017_vm7, %v8964_v23, %v1014_v18  ;;  %v8599_v18 = vld [vmem:[#allocation6 + $0xc0] sm:$0xff] }
 0x189   : > { %v1019_v52 = vmul.f32 %v1018_v58, %v9590_v43  ;;  %v1094_v43 = vmul.f32 %v9668_v49, %v1051_v0  ;;  %v9748_v0 = vmul.f32 %v9668_v49, %v1024_v11  ;;  %2345 = vmatpush.bf16.msra.mxu0 %v8599_v18  ;;  %8874 = vmatpush.bf16.msra.mxu2 %v8599_v18  ;;  %v8587_v11 = vld [vmem:[#allocation6 + $0x78] sm:$0xff] }
 0x18a   : > { %v9753_v58 = vmul.f32 %v9668_v49, %v1025_v13 }
 0x18b   : > { %v1095_v26 = vmul.f32 %v1019_v52, %v879_v50  ;;  %v9760_v52 = vsel %vm9704_vm8, 1.0, %v13235_v31 }
 0x18c   : > { %13341 = vst [vmem:[#allocation16_spill] sm:$0xff] %v9760_v52 }
 0x18d   : > { %v9699_v61 = vperm.slane %v1095_v26, 1  ;;  %2516 = vmatpush.bf16.msrb.mxu2 %v8622_v5  ;;  %2854 = vmatpush.bf16.msrb.mxu0 %v8587_v11 }
 0x18f   : > { %v1097_v15 = vadd.f32 %v9699_v61, %v1063_v63  ;;  %v1098_v17 = vadd.f32 %v9699_v61, %v1064_v60  ;;  %v1113_v19 = vadd.f32 %v9699_v61, %v1079_v2  ;;  %v1114_v36 = vadd.f32 %v9699_v61, %v1080_v4 }
 0x190   : > { %v1128_v21 = vadd.f32 %v9699_v61, %v1094_v43  ;;  %v1112_v23 = vadd.f32 %v9699_v61, %v1078_v34  ;;  %v1099_v25 = vadd.f32 %v9699_v61, %v1065_v56  ;;  %v1100_v29 = vadd.f32 %v9699_v61, %v1066_v57 }
 0x191   : > { %v1130_v6 = vmul.f32 %v9689_v54, %v1097_v15  ;;  %v1131_v8 = vmul.f32 %v9689_v54, %v1098_v17  ;;  %v1146_v37 = vmul.f32 %v9689_v54, %v1113_v19  ;;  %v1147_v39 = vmul.f32 %v9689_v54, %v1114_v36 }
 0x192   : > { %v1161_v46 = vmul.f32 %v9689_v54, %v1128_v21  ;;  %v1145_v41 = vmul.f32 %v9689_v54, %v1112_v23  ;;  %v1132_v48 = vmul.f32 %v9689_v54, %v1099_v25  ;;  %v1133_v14 = vmul.f32 %v9689_v54, %v1100_v29 }
 0x193   : > { %v9729_v51 = vadd.f32 %v9697_v59, %v1130_v6  ;;  %v9732_v45 = vadd.f32 %v9697_v59, %v1131_v8  ;;  %v9735_v47 = vadd.f32 %v9697_v59, %v1146_v37  ;;  %v9738_v53 = vadd.f32 %v9697_v59, %v1147_v39 }
 0x194   : > { %v9741_v20 = vadd.f32 %v9697_v59, %v1161_v46  ;;  %v9744_v55 = vadd.f32 %v9697_v59, %v1145_v41  ;;  %v9763_v32 = vadd.f32 %v9697_v59, %v1132_v48  ;;  %v9767_v24 = vadd.f32 %v9697_v59, %v1133_v14 }
 0x195   : > { %v1227_v1 = vmin.f32 %v9729_v51, 0.0  ;;  %v1228_v50 = vmin.f32 %v9732_v45, 0.0  ;;  %v1243_v30 = vmin.f32 %v9735_v47, 0.0  ;;  %v1244_v22 = vmin.f32 %v9738_v53, 0.0 }
 0x196   : > { %v1258_v28 = vmin.f32 %v9741_v20, 0.0  ;;  %v9770_v4 = vsel %vm658_vm9, 1.0, %v13235_v31  ;;  %v1242_v43 = vmin.f32 %v9744_v55, 0.0  ;;  %v1040_v56 = vsub.f32 %v9530_v38, %v9585_v35 }
 0x197   : > { %v1259_v63 = vmul.f32 1.442695, %v1227_v1  ;;  %v1261_v60 = vmul.f32 1.442695, %v1228_v50  ;;  %v1291_v26 = vmul.f32 1.442695, %v1243_v30  ;;  %v1041_v57 = vsub.f32 %v9534_v40, %v9585_v35 }
 0x198   : > { %v1293_v2 = vmul.f32 1.442695, %v1244_v22  ;;  %13342 = vst [vmem:[#allocation17_spill] sm:$0xff] %v9770_v4  ;;  %v1321_v34 = vmul.f32 1.442695, %v1258_v28  ;;  %v1229_v13 = vmin.f32 %v9763_v32, 0.0  ;;  %v1115_v15 = vadd.f32 %v9699_v61, %v1081_v3 }
 0x199   : > { %8965 = vpow2.f32 %v1259_v63  ;;  %v1289_v62 = vmul.f32 1.442695, %v1242_v43  ;;  %v1230_v17 = vmin.f32 %v9767_v24, 0.0  ;;  %v1116_v19 = vadd.f32 %v9699_v61, %v1082_v9 }
 0x19a   : > { %8967 = vpow2.f32 %v1261_v60  ;;  %v228_v36 = vadd.s32 16, %v9662_v16  ;;  %vm1195_vm10 = vcmp.gt.f32.partialorder %v9729_v51, 0.0  ;;  %v1263_v21 = vmul.f32 1.442695, %v1229_v13 }
 0x19b   : > { %8969 = vpow2.f32 %v1291_v26  ;;  %v1148_v23 = vmul.f32 %v9689_v54, %v1115_v15  ;;  %vm1196_vm11 = vcmp.gt.f32.partialorder %v9732_v45, 0.0  ;;  %v1265_v3 = vmul.f32 1.442695, %v1230_v17 }
 0x19c   : > { %8971 = vpow2.f32 %v1293_v2  ;;  %v9787_v25 = vadd.s32 144, %v9662_v16  ;;  %vm1211_vm13 = vcmp.gt.f32.partialorder %v9735_v47, 0.0  ;;  %v1149_v29 = vmul.f32 %v9689_v54, %v1116_v19 }
 0x19d   : > { %8973 = vpow2.f32 %v1321_v34  ;;  %v9792_v6 = vadd.f32 %v9697_v59, %v1148_v23  ;;  %vm1212_vm14 = vcmp.gt.f32.partialorder %v9738_v53, 0.0  ;;  %vm1226_vm15 = vcmp.gt.f32.partialorder %v9741_v20, 0.0 }
 0x19e   : > { %8975 = vpow2.f32 %v1289_v62  ;;  %v276_v37 = vand.u32 15, %v228_v36  ;;  %vm1210_vm0 = vcmp.gt.f32.partialorder %v9744_v55, 0.0  ;;  %vm1197_vm1 = vcmp.gt.f32.partialorder %v9763_v32, 0.0 }
 0x19f   : > { %v8966_v8 = vpop.eup %8965  ;;  %8977 = vpow2.f32 %v1263_v21  ;;  %v1245_v41 = vmin.f32 %v9792_v6, 0.0  ;;  %v388_v18 = vand.u32 15, %v9787_v25  ;;  %v9802_v9 = vadd.f32 %v9699_v61, %v9748_v0 }
 0x1a0   : > { %v8968_v39 = vpop.eup %8967  ;;  %v7086_v46 = vadd.f32 -1.0, %v8966_v8  ;;  %8979 = vpow2.f32 %v1265_v3  ;;  %vm1198_vm2 = vcmp.gt.f32.partialorder %v9767_v24, 0.0  ;;  %v9811_v22 = vadd.f32 %v9697_v59, %v1149_v29 }
 0x1a1   : > { %v8970_v48 = vpop.eup %8969  ;;  %v7087_v14 = vadd.f32 -1.0, %v8968_v39  ;;  %v1295_v63 = vmul.f32 1.442695, %v1245_v41  ;;  %vm9820_vm3 = vcmp.ne.s32.totalorder %v276_v37, 0  ;;  %vm1213_vm4 = vcmp.gt.f32.partialorder %v9792_v6, 0.0 }
 0x1a2   : > { %v8972_v1 = vpop.eup %8971  ;;  %v9807_v50 = vsel %vm1195_vm10, %v9729_v51, %v7086_v46  ;;  %v7102_v30 = vadd.f32 -1.0, %v8970_v48  ;;  %v9826_v51 = vadd.f32 %v9699_v61, %v9753_v58  ;;  %v1246_v36 = vmin.f32 %v9811_v22, 0.0 }
 0x1a3   : > { %v8974_v60 = vpop.eup %8973  ;;  %v9816_v28 = vsel %vm1196_vm11, %v9732_v45, %v7087_v14  ;;  %v1516_v0 = vpack.c.bf16 %v9807_v50, %v9807_v50  ;;  %v1387_v43 = vrot.slane %v9807_v50, 7  ;;  %v7103_v62 = vadd.f32 -1.0, %v8972_v1  ;;  %v8621_v1 = vld [vmem:[#allocation6 + $0x170] sm:$0xff] }
 0x1a4   : > { %v8976_v2 = vpop.eup %8975  ;;  %v1388_v34 = vrot.slane %v9816_v28, 7  ;;  %v1517_v45 = vpack.c.bf16 %v9816_v28, %v9816_v28  ;;  %v9835_v7 = vsel %vm1211_vm13, %v9735_v47, %v7102_v30  ;;  %v7117_v11 = vadd.f32 -1.0, %v8974_v60  ;;  %v8578_v30 = vld [vmem:[#allocation6 + $0x30] sm:$0xff]  ;;  %2517 = vmatpush.bf16.msrb.mxu2 %v8621_v1 }
 0x1a5   : > { %v8978_v5 = vpop.eup %8977  ;;  %1709 = vst [vmem:[#allocation2 + $0x1c] sm:$0xf] %v1516_v0  ;;  %v7101_v13 = vadd.f32 -1.0, %v8976_v2  ;;  %8981 = vpow2.f32 %v1295_v63  ;;  %v9840_v15 = vsel %vm1212_vm14, %v9738_v53, %v7103_v62  ;;  %v1403_v17 = vrot.slane %v9835_v7, 7  ;;  %v8586_v63 = vld [vmem:[#allocation6 + $0x70] sm:$0xff]  ;;  %2766 = vmatpush.bf16.msrb.mxu3 %v8578_v30 }
 0x1a6   : > { %v8980_v58 = vpop.eup %8979  ;;  %1710 = vst [vmem:[#allocation2 + $0x28] sm:$0xf] %v1517_v45  ;;  %v1532_v19 = vpack.c.bf16 %v9835_v7, %v9835_v7  ;;  %v1404_v47 = vrot.slane %v9840_v15, 7  ;;  %v1533_v21 = vpack.c.bf16 %v9840_v15, %v9840_v15  ;;  %v9852_v23 = vsel %vm1226_vm15, %v9741_v20, %v7117_v11  ;;  %2855 = vmatpush.bf16.msrb.mxu0 %v8586_v63 }
 0x1a7   : > { %v13232_v53 = vrot.slane %v9852_v23, 7  ;;  %v1450_v3 = vsel %vm1419_vm12, %v1387_v43, %v1388_v34  ;;  %v9863_v29 = vsel %vm1210_vm0, %v9744_v55, %v7101_v13  ;;  %v7088_v8 = vadd.f32 -1.0, %v8978_v5 }
 0x1a8   : > { %1725 = vst [vmem:[#allocation2 + $0xdc] sm:$0xf] %v1532_v19  ;;  %v1485_v37 = vpack.c.bf16 %v1450_v3, %v1450_v3  ;;  %v13233_v20 = vrot.slane %v9863_v29, 7  ;;  %v1434_v39 = vsel %vm1419_vm12, %v1403_v17, %v1404_v47  ;;  %v7089_v46 = vadd.f32 -1.0, %v8980_v58 }
 0x1a9   : > { %1726 = vst [vmem:[#allocation2 + $0xe8] sm:$0xf] %v1533_v21  ;;  %v1451_v41 = vsel %vm1419_vm12, %v13232_v53, %v1387_v43  ;;  %v1501_v48 = vpack.c.bf16 %v1434_v39, %v1434_v39  ;;  %v9877_v55 = vsel %vm1197_vm1, %v9763_v32, %v7088_v8  ;;  %v1297_v14 = vmul.f32 1.442695, %v1246_v36  ;;  %v9100_v8 = vld [vmem:[%s9440_s30 + $0xc8] sm:$0xff] }
 0x1aa   : > { %v1452_v0 = vmul.f32 %v9760_v52, %v1451_v41  ;;  %1678 = vst [vmem:[#allocation2 + $0x24] sm:$0xf] %v1485_v37  ;;  %v1435_v2 = vsel %vm1419_vm12, %v13233_v20, %v1403_v17  ;;  %v9887_v43 = vsel %vm1198_vm2, %v9767_v24, %v7089_v46  ;;  %v1389_v32 = vrot.slane %v9877_v55, 7 }
 0x1ab   : > { %v8982_v60 = vpop.eup %8981  ;;  %v1468_v62 = vmul.f32 %v9770_v4, %v1435_v2  ;;  %1694 = vst [vmem:[#allocation2 + $0xe4] sm:$0xf] %v1501_v48  ;;  %v1390_v5 = vrot.slane %v9887_v43, 7  ;;  %v1518_v11 = vpack.c.bf16 %v9877_v55, %v9877_v55  ;;  %v9897_v13 = vsel %vm9820_vm3, 1.0, %v13235_v31  ;;  %v8618_v4 = vld [vmem:[#allocation6 + $0x158] sm:$0xff] }
 0x1ac   : > { %v8527_v45 = vld [vmem:[#allocation2 + $0x1c] sm:$0xf]  ;;  %13345 = vst [vmem:[#allocation18_spill] sm:$0xff] %v9897_v13  ;;  %v1484_v24 = vpack.c.bf16 %v1452_v0, %v1452_v0  ;;  %v1519_v17 = vpack.c.bf16 %v9887_v43, %v9887_v43  ;;  %vm1214_vm5 = vcmp.gt.f32.partialorder %v9811_v22, 0.0  ;;  %8983 = vpow2.f32 %v1297_v14 }
 0x1ad   : > { %v7122_v58 = vld [vmem:[#allocation2 + $0x24] sm:$0xf0]  ;;  %vm9904_vm6 = vcmp.ne.s32.totalorder %v388_v18, 0  ;;  %v1500_v36 = vpack.c.bf16 %v1468_v62, %v1468_v62  ;;  %1711 = vst [vmem:[#allocation2 + $0x34] sm:$0xf] %v1518_v11  ;;  %v7104_v21 = vadd.f32 -1.0, %v8982_v60  ;;  %v1448_v3 = vsel %vm1419_vm12, %v1389_v32, %v1390_v5 }
 0x1ae   : > { %v9908_v26 = vor.u32 %v8527_v45, %v7122_v58  ;;  %1677 = vst [vmem:[#allocation2 + $0x18] sm:$0xf] %v1484_v24  ;;  %v1449_v25 = vsel %vm1419_vm12, %v1388_v34, %v1389_v32  ;;  %v1487_v18 = vpack.c.bf16 %v1448_v3, %v1448_v3  ;;  %v1134_v39 = vmul.f32 %v9689_v54, %v9802_v9 }
 0x1af   : > { %v8551_v37 = vld [vmem:[#allocation2 + $0xdc] sm:$0xf]  ;;  %1693 = vst [vmem:[#allocation2 + $0xd8] sm:$0xf] %v1500_v36  ;;  %v9925_v41 = vsel %vm1213_vm4, %v9792_v6, %v7104_v21  ;;  %v1454_v48 = vmul.f32 %v9897_v13, %v1449_v25  ;;  %v9931_v14 = vsel %vm9904_vm6, 1.0, %v13235_v31  ;;  %v1135_v34 = vmul.f32 %v9689_v54, %v9826_v51  ;;  %v9103_v13 = vld [vmem:[%s9440_s30 + $0xd0] sm:$0xff] }
 0x1b0   : > { %2435 = vmatmul.bf16.vlgmr.msra.gmra.mxu1 %v9908_v26  ;;  %v7218_v46 = vld [vmem:[#allocation2 + $0xe4] sm:$0xf0]  ;;  %13348 = vst [vmem:[#allocation19_spill] sm:$0xff] %v9931_v14  ;;  %v1405_v1 = vrot.slane %v9925_v41, 7  ;;  %v1534_v30 = vpack.c.bf16 %v9925_v41, %v9925_v41  ;;  %v230_v6 = vadd.s32 32, %v9662_v16  ;;  %v9942_v60 = vadd.f32 %v9697_v59, %v1134_v39 }
 0x1b1   : > { %v9935_v9 = vor.u32 %v8551_v37, %v7218_v46  ;;  %1712 = vst [vmem:[#allocation2 + $0x40] sm:$0xf] %v1519_v17  ;;  %v1486_v63 = vpack.c.bf16 %v1454_v48, %v1454_v48  ;;  %v9945_v0 = vadd.f32 %v9697_v59, %v1135_v34  ;;  %v1083_v51 = vmul.f32 %v9668_v49, %v1040_v56  ;;  %v8528_v40 = vld [vmem:[#allocation2 + $0x20] sm:$0xf0] }
 0x1b2   : > { %1680 = vst [vmem:[#allocation2 + $0x3c] sm:$0xf] %v1487_v18  ;;  %v8984_v2 = vpop.eup %8983  ;;  %v1433_v62 = vsel %vm1419_vm12, %v1404_v47, %v1405_v1  ;;  %v1084_v38 = vmul.f32 %v9668_v49, %v1041_v57  ;;  %v1231_v17 = vmin.f32 %v9942_v60, 0.0  ;;  %v290_v25 = vand.u32 15, %v230_v6  ;;  %v8552_v46 = vld [vmem:[#allocation2 + $0xe0] sm:$0xf0] }
 0x1b3   : > { %13349 = vst [vmem:[#allocation20_spill] sm:$0xff] %v9935_v9  ;;  %2475 = vmatmul.bf16.vlgmr.msra.gmra.mxu3 %v9935_v9  ;;  %v7105_v58 = vadd.f32 -1.0, %v8984_v2  ;;  %v1470_v24 = vmul.f32 %v9931_v14, %v1433_v62  ;;  %v1232_v19 = vmin.f32 %v9945_v0, 0.0  ;;  %v1117_v36 = vadd.f32 %v9699_v61, %v1083_v51 }
 0x1b4   : > { %1727 = vst [vmem:[#allocation2 + $0xf4] sm:$0xf] %v1534_v30  ;;  %v1118_v47 = vadd.f32 %v9699_v61, %v1084_v38  ;;  %v246_v30 = vadd.s32 160, %v9662_v16  ;;  %v1267_v51 = vmul.f32 1.442695, %v1231_v17  ;;  %vm1199_vm7 = vcmp.gt.f32.partialorder %v9942_v60, 0.0 }
 0x1b5   : > { %1679 = vst [vmem:[#allocation2 + $0x30] sm:$0xf] %v1486_v63  ;;  %v7120_v21 = vld [vmem:[#allocation2 + $0x18] sm:$0xf]  ;;  %v9973_v3 = vsel %vm1214_vm5, %v9811_v22, %v7105_v58  ;;  %v1502_v37 = vpack.c.bf16 %v1470_v24, %v1470_v24  ;;  %v1150_v22 = vmul.f32 %v9689_v54, %v1117_v36  ;;  %v1269_v38 = vmul.f32 1.442695, %v1232_v19 }
 0x1b6   : > { %v9975_v18 = vor.u32 %v8528_v40, %v7120_v21  ;;  %v7216_v39 = vld [vmem:[#allocation2 + $0xd8] sm:$0xf]  ;;  %v1406_v48 = vrot.slane %v9973_v3, 7  ;;  %v1535_v34 = vpack.c.bf16 %v9973_v3, %v9973_v3  ;;  %v1151_v2 = vmul.f32 %v9689_v54, %v1118_v47  ;;  %v8530_v24 = vld [vmem:[#allocation2 + $0x34] sm:$0xf] }
 0x1b7   : > { %v9981_v63 = vor.u32 %v8552_v46, %v7216_v39  ;;  %1695 = vst [vmem:[#allocation2 + $0xf0] sm:$0xf] %v1502_v37  ;;  %v1026_v58 = vsub.f32 %v9474_v10, %v9585_v35  ;;  %8985 = vpow2.f32 %v1267_v51  ;;  %v9995_v36 = vadd.f32 %v9697_v59, %v1150_v22  ;;  %v8577_v19 = vld [vmem:[#allocation6 + $0x28] sm:$0xff] }
 0x1b8   : > { %2346 = vmatmul.bf16.vlgmr.msra.gmra.mxu0 %v9975_v18  ;;  %1728 = vst [vmem:[#allocation2 + $0x100] sm:$0xf] %v1535_v34  ;;  %v1432_v62 = vsel %vm1419_vm12, %v1405_v1, %v1406_v48  ;;  %v9998_v47 = vadd.f32 %v9697_v59, %v1151_v2  ;;  %v7134_v21 = vld [vmem:[#allocation2 + $0x3c] sm:$0xf0]  ;;  %vm1200_vm8 = vcmp.gt.f32.partialorder %v9945_v0, 0.0  ;;  %8987 = vpow2.f32 %v1269_v38  ;;  %v8620_v1 = vld [vmem:[#allocation6 + $0x168] sm:$0xff]  ;;  %2767 = vmatpush.bf16.msrb.mxu3 %v8577_v19 }
 0x1b9   : > { %13350 = vst [vmem:[#allocation21_spill] sm:$0xff] %v9981_v63  ;;  %2386 = vmatmul.bf16.vlgmr.msra.gmra.mxu2 %v9981_v63  ;;  %v1503_v17 = vpack.c.bf16 %v1432_v62, %v1432_v62  ;;  %v1027_v10 = vsub.f32 %v9478_v12, %v9585_v35  ;;  %v1247_v40 = vmin.f32 %v9995_v36, 0.0  ;;  %vm10005_vm9 = vcmp.ne.s32.totalorder %v290_v25, 0  ;;  %v8585_v46 = vld [vmem:[#allocation6 + $0x68] sm:$0xff] }
 0x1ba   : > { %v402_v39 = vand.u32 15, %v246_v30  ;;  %v1248_v51 = vmin.f32 %v9998_v47, 0.0  ;;  %2518 = vmatpush.bf16.msrb.mxu2 %v8620_v1  ;;  %v1069_v22 = vmul.f32 %v9668_v49, %v1026_v58  ;;  %v10013_v12 = vor.u32 %v8530_v24, %v7134_v21  ;;  %2856 = vmatpush.bf16.msrb.mxu0 %v8585_v46  ;;  %v8531_v46 = vld [vmem:[#allocation2 + $0x38] sm:$0xf0] }
 0x1bb   : > { %1696 = vst [vmem:[#allocation2 + $0xfc] sm:$0xf] %v1503_v17  ;;  %v1070_v2 = vmul.f32 %v9668_v49, %v1027_v10  ;;  %v8554_v62 = vld [vmem:[#allocation2 + $0xf4] sm:$0xf]  ;;  %v1299_v38 = vmul.f32 1.442695, %v1247_v40  ;;  %v1042_v25 = vsub.f32 %v9538_v42, %v9585_v35  ;;  %v1043_v30 = vsub.f32 %v9542_v44, %v9585_v35 }
 0x1bc   : > { %v7132_v17 = vld [vmem:[#allocation2 + $0x30] sm:$0xf]  ;;  %v1301_v34 = vmul.f32 1.442695, %v1248_v51  ;;  %v10022_v1 = vsel %vm10005_vm9, 1.0, %v13235_v31  ;;  %v1103_v58 = vadd.f32 %v9699_v61, %v1069_v22  ;;  %vm10027_vm10 = vcmp.ne.s32.totalorder %v402_v39, 0 }
 0x1bd   : > { %13353 = vst [vmem:[#allocation22_spill] sm:$0xff] %v10022_v1  ;;  %v1104_v24 = vadd.f32 %v9699_v61, %v1070_v2  ;;  %v8986_v21 = vpop.eup %8985  ;;  %8989 = vpow2.f32 %v1299_v38  ;;  %v1085_v44 = vmul.f32 %v9668_v49, %v1042_v25  ;;  %v1086_v10 = vmul.f32 %v9668_v49, %v1043_v30 }
 0x1be   : > { %v8988_v40 = vpop.eup %8987  ;;  %v7090_v51 = vadd.f32 -1.0, %v8986_v21  ;;  %8991 = vpow2.f32 %v1301_v34  ;;  %v1136_v22 = vmul.f32 %v9689_v54, %v1103_v58  ;;  %v10036_v2 = vor.u32 %v8531_v46, %v7132_v17 }
 0x1bf   : > { %v7230_v19 = vld [vmem:[#allocation2 + $0xfc] sm:$0xf0]  ;;  %v7091_v45 = vadd.f32 -1.0, %v8988_v40  ;;  %v1137_v39 = vmul.f32 %v9689_v54, %v1104_v24  ;;  %v232_v38 = vadd.s32 48, %v9662_v16  ;;  %vm1215_vm11 = vcmp.gt.f32.partialorder %v9995_v36, 0.0 }
 0x1c0   : > { %2440 = vmatmul.bf16.gmra.mxu1 %v10013_v12  ;;  %v10033_v37 = vor.u32 %v8554_v62, %v7230_v19  ;;  %v10044_v25 = vsel %vm1199_vm7, %v9942_v60, %v7090_v51  ;;  %vm1216_vm13 = vcmp.gt.f32.partialorder %v9998_v47, 0.0  ;;  %v10049_v34 = vadd.f32 %v9697_v59, %v1136_v22  ;;  %v7228_v62 = vld [vmem:[#allocation2 + $0xf0] sm:$0xf] }
 0x1c1   : > { %v10054_v30 = vsel %vm1200_vm8, %v9945_v0, %v7091_v45  ;;  %v1391_v17 = vrot.slane %v10044_v25, 7  ;;  %v1520_v58 = vpack.c.bf16 %v10044_v25, %v10044_v25  ;;  %v1119_v60 = vadd.f32 %v9699_v61, %v1085_v44 }
 0x1c2   : > { %13356 = vst [vmem:[#allocation23_spill] sm:$0xff] %v10033_v37  ;;  %v1392_v24 = vrot.slane %v10054_v30, 7  ;;  %v1521_v21 = vpack.c.bf16 %v10054_v30, %v10054_v30  ;;  %v1120_v19 = vadd.f32 %v9699_v61, %v1086_v10  ;;  %v10065_v40 = vadd.s32 176, %v9662_v16  ;;  %v8555_v0 = vld [vmem:[#allocation2 + $0xf8] sm:$0xf0] }
 0x1c3   : > { %2480 = vmatmul.bf16.gmra.mxu3 %v10033_v37  ;;  %v8990_v46 = vpop.eup %8989  ;;  %1713 = vst [vmem:[#allocation2 + $0x4c] sm:$0xf] %v1520_v58  ;;  %v1447_v45 = vsel %vm1419_vm12, %v1390_v5, %v1391_v17  ;;  %v10072_v44 = vadd.f32 %v9697_v59, %v1137_v39  ;;  %v1233_v51 = vmin.f32 %v10049_v34, 0.0  ;;  %v304_v22 = vand.u32 15, %v232_v38  ;;  %v9105_v37 = vld [vmem:[%s9440_s30 + $0x60] sm:$0xff] }
 0x1c4   : > { %v8992_v56 = vpop.eup %8991  ;;  %v10075_v6 = vor.u32 %v8555_v0, %v7228_v62  ;;  %1714 = vst [vmem:[#allocation2 + $0x58] sm:$0xf] %v1521_v21  ;;  %v7106_v10 = vadd.f32 -1.0, %v8990_v46  ;;  %v1446_v58 = vsel %vm1419_vm12, %v1391_v17, %v1392_v24  ;;  %v1456_v53 = vmul.f32 %v10022_v1, %v1447_v45  ;;  %v8583_v1 = vld [vmem:[#allocation6 + $0x58] sm:$0xff] }
 0x1c5   : > { %v7107_v20 = vadd.f32 -1.0, %v8992_v56  ;;  %v1489_v5 = vpack.c.bf16 %v1446_v58, %v1446_v58  ;;  %v1234_v39 = vmin.f32 %v10072_v44, 0.0  ;;  %v1152_v57 = vmul.f32 %v9689_v54, %v1119_v60 }
 0x1c6   : > { %13357 = vst [vmem:[#allocation24_spill] sm:$0xff] %v10075_v6  ;;  %v10088_v38 = vsel %vm1215_vm11, %v9995_v36, %v7106_v10  ;;  %v1488_v62 = vpack.c.bf16 %v1456_v53, %v1456_v53  ;;  %v1271_v21 = vmul.f32 1.442695, %v1233_v51  ;;  %v1153_v46 = vmul.f32 %v9689_v54, %v1120_v19 }
 0x1c7   : > { %v10095_v56 = vsel %vm1216_vm13, %v9998_v47, %v7107_v20  ;;  %v1407_v17 = vrot.slane %v10088_v38, 7  ;;  %v1536_v60 = vpack.c.bf16 %v10088_v38, %v10088_v38  ;;  %1682 = vst [vmem:[#allocation2 + $0x54] sm:$0xf] %v1489_v5  ;;  %v10103_v53 = vsel %vm10027_vm10, 1.0, %v13235_v31 }
 0x1c8   : > { %2351 = vmatmul.bf16.gmra.mxu0 %v10036_v2  ;;  %13358 = vst [vmem:[#allocation25_spill] sm:$0xff] %v10103_v53  ;;  %v13234_v36 = vrot.slane %v10095_v56, 7  ;;  %v1537_v19 = vpack.c.bf16 %v10095_v56, %v10095_v56  ;;  %8993 = vpow2.f32 %v1271_v21  ;;  %vm10108_vm14 = vcmp.ne.s32.totalorder %v304_v22, 0  ;;  %v8576_v21 = vld [vmem:[#allocation6 + $0x20] sm:$0xff] }
 0x1c9   : > { %2391 = vmatmul.bf16.gmra.mxu2 %v10075_v6  ;;  %1681 = vst [vmem:[#allocation2 + $0x48] sm:$0xf] %v1488_v62  ;;  %v1431_v47 = vsel %vm1419_vm12, %v1406_v48, %v1407_v17  ;;  %v1273_v42 = vmul.f32 1.442695, %v1234_v39  ;;  %v10117_v0 = vadd.f32 %v9697_v59, %v1152_v57  ;;  %v10120_v45 = vadd.f32 %v9697_v59, %v1153_v46  ;;  %v8619_v62 = vld [vmem:[#allocation6 + $0x160] sm:$0xff] }
 0x1ca   : > { %1729 = vst [vmem:[#allocation2 + $0x10c] sm:$0xf] %v1536_v60  ;;  %v8533_v10 = vld [vmem:[#allocation2 + $0x4c] sm:$0xf]  ;;  %v1430_v22 = vsel %vm1419_vm12, %v1407_v17, %v13234_v36  ;;  %v1472_v58 = vmul.f32 %v10103_v53, %v1431_v47  ;;  %v416_v48 = vand.u32 15, %v10065_v40  ;;  %vm1201_vm15 = vcmp.gt.f32.partialorder %v10049_v34, 0.0  ;;  %2519 = vmatpush.bf16.msrb.mxu2 %v8619_v62  ;;  %2768 = vmatpush.bf16.msrb.mxu3 %v8576_v21 }
 0x1cb   : > { %1730 = vst [vmem:[#allocation2 + $0x118] sm:$0xf] %v1537_v19  ;;  %v7146_v57 = vld [vmem:[#allocation2 + $0x54] sm:$0xf0]  ;;  %v1505_v39 = vpack.c.bf16 %v1430_v22, %v1430_v22  ;;  %8995 = vpow2.f32 %v1273_v42  ;;  %v1249_v17 = vmin.f32 %v10117_v0, 0.0  ;;  %v1250_v19 = vmin.f32 %v10120_v45, 0.0 }
 0x1cc   : > { %v10131_v46 = vor.u32 %v8533_v10, %v7146_v57  ;;  %v1504_v60 = vpack.c.bf16 %v1472_v58, %v1472_v58  ;;  %v8584_v47 = vld [vmem:[#allocation6 + $0x60] sm:$0xff]  ;;  %vm1202_vm0 = vcmp.gt.f32.partialorder %v10072_v44, 0.0  ;;  %v9098_v10 = vld [vmem:[%s9440_s30 + $0x48] sm:$0xff]  ;;  %v1045_v62 = vsub.f32 %v9100_v8, %v9585_v35 }
 0x1cd   : > { %1698 = vst [vmem:[#allocation2 + $0x114] sm:$0xf] %v1505_v39  ;;  %v9097_v42 = vld [vmem:[%s9440_s30 + $0x40] sm:$0xff]  ;;  %v1029_v58 = vsub.f32 %v9098_v10, %v9585_v35  ;;  %v1303_v51 = vmul.f32 1.442695, %v1249_v17  ;;  %2857 = vmatpush.bf16.msrb.mxu0 %v8584_v47  ;;  %vm10183_vm1 = vcmp.ne.s32.totalorder %v416_v48, 0 }
 0x1ce   : > { %v1028_v22 = vsub.f32 %v9097_v42, %v9585_v35  ;;  %v8994_v57 = vpop.eup %8993  ;;  %1697 = vst [vmem:[#allocation2 + $0x108] sm:$0xf] %v1504_v60  ;;  %v9099_v39 = vld [vmem:[%s9440_s30 + $0xc0] sm:$0xff]  ;;  %v1305_v32 = vmul.f32 1.442695, %v1250_v19  ;;  %v10152_v60 = vsel %vm10108_vm14, 1.0, %v13235_v31  ;;  %v1088_v47 = vmul.f32 %v9668_v49, %v1045_v62  ;;  %2520 = vmatpush.bf16.msrb.mxu2 %v8618_v4 }
 0x1cf   : > { %v1044_v40 = vsub.f32 %v9099_v39, %v9585_v35  ;;  %v7092_v21 = vadd.f32 -1.0, %v8994_v57  ;;  %v1072_v10 = vmul.f32 %v9668_v49, %v1029_v58  ;;  %8997 = vpow2.f32 %v1303_v51  ;;  %13361 = vst [vmem:[#allocation26_spill] sm:$0xff] %v10152_v60  ;;  %v8534_v20 = vld [vmem:[#allocation2 + $0x50] sm:$0xf0] }
 0x1d0   : > { %2445 = vmatmul.bf16.gmra.mxu1 %v10131_v46  ;;  %v1071_v42 = vmul.f32 %v9668_v49, %v1028_v22  ;;  %v7144_v36 = vld [vmem:[#allocation2 + $0x48] sm:$0xf]  ;;  %8999 = vpow2.f32 %v1305_v32  ;;  %vm1217_vm2 = vcmp.gt.f32.partialorder %v10117_v0, 0.0  ;;  %vm1218_vm3 = vcmp.gt.f32.partialorder %v10120_v45, 0.0 }
 0x1d1   : > { %v8557_v11 = vld [vmem:[#allocation2 + $0x10c] sm:$0xf]  ;;  %v1087_v17 = vmul.f32 %v9668_v49, %v1044_v40  ;;  %v8996_v39 = vpop.eup %8995  ;;  %v10159_v19 = vsel %vm1201_vm15, %v10049_v34, %v7092_v21  ;;  %v1106_v51 = vadd.f32 %v9699_v61, %v1072_v10  ;;  %v10168_v5 = vor.u32 %v8534_v20, %v7144_v36  ;;  %2858 = vmatpush.bf16.msrb.mxu0 %v8583_v1 }
 0x1d2   : > { %v7242_v8 = vld [vmem:[#allocation2 + $0x114] sm:$0xf0]  ;;  %v1105_v22 = vadd.f32 %v9699_v61, %v1071_v42  ;;  %v7093_v57 = vadd.f32 -1.0, %v8996_v39  ;;  %v1393_v40 = vrot.slane %v10159_v19, 7  ;;  %v1522_v62 = vpack.c.bf16 %v10159_v19, %v10159_v19 }
 0x1d3   : > { %v10163_v58 = vor.u32 %v8557_v11, %v7242_v8  ;;  %v1139_v34 = vmul.f32 %v9689_v54, %v1106_v51  ;;  %v1121_v32 = vadd.f32 %v9699_v61, %v1087_v17  ;;  %v1122_v42 = vadd.f32 %v9699_v61, %v1088_v47 }
 0x1d4   : > { %v1138_v31 = vmul.f32 %v9689_v54, %v1105_v22  ;;  %v10177_v11 = vsel %vm1202_vm0, %v10072_v44, %v7093_v57  ;;  %1715 = vst [vmem:[#allocation2 + $0x64] sm:$0xf] %v1522_v62  ;;  %v1445_v36 = vsel %vm1419_vm12, %v1392_v24, %v1393_v40  ;;  %v8558_v17 = vld [vmem:[#allocation2 + $0x110] sm:$0xf0]  ;;  %v1046_v4 = vsub.f32 %v9103_v13, %v9585_v35 }
 0x1d5   : > { %13362 = vst [vmem:[#allocation27_spill] sm:$0xff] %v10163_v58  ;;  %2485 = vmatmul.bf16.gmra.mxu3 %v10163_v58  ;;  %v7240_v10 = vld [vmem:[#allocation2 + $0x108] sm:$0xf]  ;;  %v13237_v39 = vrot.slane %v10177_v11, 7  ;;  %v1523_v44 = vpack.c.bf16 %v10177_v11, %v10177_v11  ;;  %v1458_v8 = vmul.f32 %v10152_v60, %v1445_v36  ;;  %v8998_v22 = vpop.eup %8997  ;;  %v10200_v47 = vadd.f32 %v9697_v59, %v1139_v34 }
 0x1d6   : > { %v10194_v24 = vor.u32 %v8558_v17, %v7240_v10  ;;  %v10197_v48 = vadd.f32 %v9697_v59, %v1138_v31  ;;  %v1154_v51 = vmul.f32 %v9689_v54, %v1121_v32  ;;  %v9000_v20 = vpop.eup %8999  ;;  %v7108_v57 = vadd.f32 -1.0, %v8998_v22  ;;  %v8575_v60 = vld [vmem:[#allocation6 + $0x18] sm:$0xff] }
 0x1d7   : > { %1716 = vst [vmem:[#allocation2 + $0x70] sm:$0xf] %v1523_v44  ;;  %v1444_v62 = vsel %vm1419_vm12, %v1393_v40, %v13237_v39  ;;  %v1490_v36 = vpack.c.bf16 %v1458_v8, %v1458_v8  ;;  %v7109_v31 = vadd.f32 -1.0, %v9000_v20  ;;  %v1155_v34 = vmul.f32 %v9689_v54, %v1122_v42  ;;  %2769 = vmatpush.bf16.msrb.mxu3 %v8575_v60 }
 0x1d8   : > { %2356 = vmatmul.bf16.gmra.mxu0 %v10168_v5  ;;  %13365 = vst [vmem:[#allocation28_spill] sm:$0xff] %v10194_v24  ;;  %v1491_v10 = vpack.c.bf16 %v1444_v62, %v1444_v62  ;;  %v234_v17 = vadd.s32 64, %v9662_v16  ;;  %v10214_v32 = vsel %vm1217_vm2, %v10117_v0, %v7108_v57  ;;  %v1235_v44 = vmin.f32 %v10197_v48, 0.0 }
 0x1d9   : > { %2396 = vmatmul.bf16.gmra.mxu2 %v10194_v24  ;;  %1683 = vst [vmem:[#allocation2 + $0x60] sm:$0xf] %v1490_v36  ;;  %v1236_v22 = vmin.f32 %v10200_v47, 0.0  ;;  %v10219_v40 = vadd.f32 %v9697_v59, %v1154_v51  ;;  %v10222_v8 = vsel %vm1218_vm3, %v10120_v45, %v7109_v31  ;;  %v1409_v42 = vrot.slane %v10214_v32, 7 }
 0x1da   : > { %v1538_v20 = vpack.c.bf16 %v10214_v32, %v10214_v32  ;;  %1684 = vst [vmem:[#allocation2 + $0x6c] sm:$0xf] %v1491_v10  ;;  %v13366_v62 = vmov 0.0   ;;  %v13243_v51 = vrot.slane %v10222_v8, 7  ;;  %v1539_v45 = vpack.c.bf16 %v10222_v8, %v10222_v8 }
 0x1db   : > { %v10230_v0 = vsel %vm10183_vm1, 1.0, %v13366_v62  ;;  %v8536_v36 = vld [vmem:[#allocation2 + $0x64] sm:$0xf]  ;;  %v1275_v31 = vmul.f32 1.442695, %v1235_v44  ;;  %v13368_v39 = vrot.slane %v10095_v56, 7  ;;  %v10241_v21 = vadd.f32 %v9697_v59, %v1155_v34 }
 0x1dc   : > { %13367 = vst [vmem:[#allocation29_spill] sm:$0xff] %v10230_v0  ;;  %v1277_v53 = vmul.f32 1.442695, %v1236_v22  ;;  %v318_v14 = vand.u32 15, %v234_v17  ;;  %v1428_v57 = vsel %vm1419_vm12, %v1409_v42, %v13243_v51  ;;  %vm1203_vm4 = vcmp.gt.f32.partialorder %v10197_v48, 0.0 }
 0x1dd   : > { %1731 = vst [vmem:[#allocation2 + $0x124] sm:$0xf] %v1538_v20  ;;  %v1429_v10 = vsel %vm1419_vm12, %v13368_v39, %v1409_v42  ;;  %9001 = vpow2.f32 %v1275_v31  ;;  %v1251_v20 = vmin.f32 %v10219_v40, 0.0  ;;  %v1507_v17 = vpack.c.bf16 %v1428_v57, %v1428_v57  ;;  %v9101_v39 = vld [vmem:[%s9440_s30 + $0x50] sm:$0xff] }
 0x1de   : > { %1732 = vst [vmem:[#allocation2 + $0x130] sm:$0xf] %v1539_v45  ;;  %v1474_v44 = vmul.f32 %v10230_v0, %v1429_v10  ;;  %v7158_v34 = vld [vmem:[#allocation2 + $0x6c] sm:$0xf0]  ;;  %9003 = vpow2.f32 %v1277_v53  ;;  %v1252_v22 = vmin.f32 %v10241_v21, 0.0  ;;  %v1030_v57 = vsub.f32 %v9101_v39, %v9585_v35  ;;  %v9102_v53 = vld [vmem:[%s9440_s30 + $0x58] sm:$0xff] }
 0x1df   : > { %v10251_v45 = vor.u32 %v8536_v36, %v7158_v34  ;;  %v1307_v31 = vmul.f32 1.442695, %v1251_v20  ;;  %1700 = vst [vmem:[#allocation2 + $0x12c] sm:$0xf] %v1507_v17  ;;  %v1031_v0 = vsub.f32 %v9102_v53, %v9585_v35  ;;  %vm1204_vm5 = vcmp.gt.f32.partialorder %v10200_v47, 0.0  ;;  %v9104_v39 = vld [vmem:[%s9440_s30 + $0xd8] sm:$0xff] }
 0x1e0   : > { %v1506_v42 = vpack.c.bf16 %v1474_v44, %v1474_v44  ;;  %v7156_v10 = vld [vmem:[#allocation2 + $0x60] sm:$0xf]  ;;  %v1309_v51 = vmul.f32 1.442695, %v1252_v22  ;;  %vm10262_vm6 = vcmp.ne.s32.totalorder %v318_v14, 0  ;;  %v250_v60 = vadd.s32 192, %v9662_v16 }
 0x1e1   : > { %13369 = vst [vmem:[#allocation30_spill] sm:$0xff] %v10251_v45  ;;  %2450 = vmatmul.bf16.gmra.mxu1 %v10251_v45  ;;  %9005 = vpow2.f32 %v1307_v31  ;;  %v8537_v36 = vld [vmem:[#allocation2 + $0x68] sm:$0xf0]  ;;  %v1073_v44 = vmul.f32 %v9668_v49, %v1030_v57  ;;  %v1074_v20 = vmul.f32 %v9668_v49, %v1031_v0  ;;  %v1047_v13 = vsub.f32 %v9104_v39, %v9585_v35  ;;  %v8581_v45 = vld [vmem:[#allocation6 + $0x48] sm:$0xff] }
 0x1e2   : > { %1699 = vst [vmem:[#allocation2 + $0x120] sm:$0xf] %v1506_v42  ;;  %9007 = vpow2.f32 %v1309_v51  ;;  %v10272_v42 = vor.u32 %v8537_v36, %v7156_v10  ;;  %vm1219_vm7 = vcmp.gt.f32.partialorder %v10219_v40, 0.0  ;;  %v430_v14 = vand.u32 15, %v250_v60 }
 0x1e3   : > { %v9002_v34 = vpop.eup %9001  ;;  %v1107_v51 = vadd.f32 %v9699_v61, %v1073_v44  ;;  %v1108_v57 = vadd.f32 %v9699_v61, %v1074_v20  ;;  %v1089_v0 = vmul.f32 %v9668_v49, %v1046_v4  ;;  %vm1220_vm8 = vcmp.gt.f32.partialorder %v10241_v21, 0.0 }
 0x1e4   : > { %v8560_v22 = vld [vmem:[#allocation2 + $0x124] sm:$0xf]  ;;  %13372 = vst [vmem:[#allocation31_spill] sm:$0xff] %v10272_v42  ;;  %v9004_v31 = vpop.eup %9003  ;;  %v7094_v52 = vadd.f32 -1.0, %v9002_v34  ;;  %v10284_v10 = vsel %vm10262_vm6, 1.0, %v13366_v62  ;;  %v1090_v44 = vmul.f32 %v9668_v49, %v1047_v13  ;;  %vm10304_vm9 = vcmp.ne.s32.totalorder %v430_v14, 0 }
 0x1e5   : > { %v7254_v53 = vld [vmem:[#allocation2 + $0x12c] sm:$0xf0]  ;;  %v7095_v39 = vadd.f32 -1.0, %v9004_v31  ;;  %13374 = vst [vmem:[#allocation33_spill] sm:$0xff] %v10284_v10  ;;  %v1140_v36 = vmul.f32 %v9689_v54, %v1107_v51  ;;  %v1141_v4 = vmul.f32 %v9689_v54, %v1108_v57  ;;  %v13378_v14 = vrot.slane %v10177_v11, 7 }
 0x1e6   : > { %v10278_v33 = vor.u32 %v8560_v22, %v7254_v53  ;;  %v10290_v60 = vsel %vm1203_vm4, %v10197_v48, %v7094_v52  ;;  %v8561_v13 = vld [vmem:[#allocation2 + $0x128] sm:$0xf0]  ;;  %v10360_v48 = vadd.s32 208, %v9662_v16 }
 0x1e7   : > { %v9006_v20 = vpop.eup %9005  ;;  %v10299_v1 = vsel %vm1204_vm5, %v10200_v47, %v7095_v39  ;;  %v1395_v34 = vrot.slane %v10290_v60, 7  ;;  %v1524_v52 = vpack.c.bf16 %v10290_v60, %v10290_v60  ;;  %v1123_v47 = vadd.f32 %v9699_v61, %v1089_v0 }
 0x1e8   : > { %13373 = vst [vmem:[#allocation32_spill] sm:$0xff] %v10278_v33  ;;  %2361 = vmatmul.bf16.gmra.mxu0 %v10272_v42  ;;  %2490 = vmatmul.bf16.gmra.mxu3 %v10278_v33  ;;  %v9008_v22 = vpop.eup %9007  ;;  %v1525_v51 = vpack.c.bf16 %v10299_v1, %v10299_v1  ;;  %v7110_v57 = vadd.f32 -1.0, %v9006_v20  ;;  %v10319_v33 = vadd.f32 %v9697_v59, %v1140_v36  ;;  %v13379_v0 = vrot.slane %v10299_v1, 7 }
 0x1e9   : > { %v7252_v31 = vld [vmem:[#allocation2 + $0x120] sm:$0xf]  ;;  %1717 = vst [vmem:[#allocation2 + $0x7c] sm:$0xf] %v1524_v52  ;;  %v7111_v17 = vadd.f32 -1.0, %v9008_v22  ;;  %v1443_v27 = vsel %vm1419_vm12, %v13378_v14, %v1395_v34  ;;  %v10332_v22 = vadd.f32 %v9697_v59, %v1141_v4  ;;  %v10357_v14 = vadd.s32 80, %v9662_v16 }
 0x1ea   : > { %v10312_v39 = vor.u32 %v8561_v13, %v7252_v31  ;;  %1718 = vst [vmem:[#allocation2 + $0x88] sm:$0xf] %v1525_v51  ;;  %v10324_v53 = vsel %vm1219_vm7, %v10219_v40, %v7110_v57  ;;  %v1442_v20 = vsel %vm1419_vm12, %v1395_v34, %v13379_v0  ;;  %v1460_v52 = vmul.f32 %v10284_v10, %v1443_v27 }
 0x1eb   : > { %v10338_v36 = vsel %vm1220_vm8, %v10241_v21, %v7111_v17  ;;  %v1411_v40 = vrot.slane %v10324_v53, 7  ;;  %v1540_v31 = vpack.c.bf16 %v10324_v53, %v10324_v53  ;;  %v10346_v34 = vsel %vm10304_vm9, 1.0, %v13366_v62 }
 0x1ec   : > { %13377 = vst [vmem:[#allocation34_spill] sm:$0xff] %v10312_v39  ;;  %2401 = vmatmul.bf16.gmra.mxu2 %v10312_v39  ;;  %v13257_v4 = vrot.slane %v10338_v36, 7  ;;  %v1541_v13 = vpack.c.bf16 %v10338_v36, %v10338_v36  ;;  %v1492_v51 = vpack.c.bf16 %v1460_v52, %v1460_v52  ;;  %v1493_v21 = vpack.c.bf16 %v1442_v20, %v1442_v20 }
 0x1ed   : > { %13380 = vst [vmem:[#allocation35_spill] sm:$0xff] %v10346_v34  ;;  %v13381_v17 = vrot.slane %v10222_v8, 7  ;;  %v1237_v52 = vmin.f32 %v10319_v33, 0.0  ;;  %v1124_v10 = vadd.f32 %v9699_v61, %v1090_v44  ;;  %vm1205_vm10 = vcmp.gt.f32.partialorder %v10319_v33, 0.0 }
 0x1ee   : > { %1733 = vst [vmem:[#allocation2 + $0x13c] sm:$0xf] %v1540_v31  ;;  %v1426_v0 = vsel %vm1419_vm12, %v1411_v40, %v13257_v4  ;;  %v1238_v31 = vmin.f32 %v10332_v22, 0.0  ;;  %vm1206_vm11 = vcmp.gt.f32.partialorder %v10332_v22, 0.0  ;;  %vm1580_vm9 = vcmp.lt.s32.totalorder %v9662_v16, 7 }
 0x1ef   : > { %v1427_v57 = vsel %vm1419_vm12, %v13381_v17, %v1411_v40  ;;  %1734 = vst [vmem:[#allocation2 + $0x148] sm:$0xf] %v1541_v13  ;;  %v1509_v27 = vpack.c.bf16 %v1426_v0, %v1426_v0  ;;  %v1156_v13 = vmul.f32 %v9689_v54, %v1123_v47  ;;  %v1279_v24 = vmul.f32 1.442695, %v1237_v52  ;;  %v8574_v52 = vld [vmem:[#allocation6 + $0x10] sm:$0xff] }
 0x1f0   : > { %v1476_v20 = vmul.f32 %v10346_v34, %v1427_v57  ;;  %1685 = vst [vmem:[#allocation2 + $0x78] sm:$0xf] %v1492_v51  ;;  %v8539_v39 = vld [vmem:[#allocation2 + $0x7c] sm:$0xf]  ;;  %v1032_v40 = vsub.f32 %v9105_v37, %v9585_v35  ;;  %v1281_v17 = vmul.f32 1.442695, %v1238_v31  ;;  %v1157_v51 = vmul.f32 %v9689_v54, %v1124_v10  ;;  %2770 = vmatpush.bf16.msrb.mxu3 %v8574_v52 }
 0x1f1   : > { %1686 = vst [vmem:[#allocation2 + $0x84] sm:$0xf] %v1493_v21  ;;  %v9106_v57 = vld [vmem:[%s9440_s30 + $0x68] sm:$0xff]  ;;  %v7170_v34 = vld [vmem:[#allocation2 + $0x84] sm:$0xf0]  ;;  %v10378_v44 = vadd.f32 %v9697_v59, %v1156_v13  ;;  %9009 = vpow2.f32 %v1279_v24  ;;  %v8582_v10 = vld [vmem:[#allocation6 + $0x50] sm:$0xff] }
 0x1f2   : > { %v1508_v58 = vpack.c.bf16 %v1476_v20, %v1476_v20  ;;  %v1033_v4 = vsub.f32 %v9106_v57, %v9585_v35  ;;  %1702 = vst [vmem:[#allocation2 + $0x144] sm:$0xf] %v1509_v27  ;;  %v10381_v21 = vor.u32 %v8539_v39, %v7170_v34  ;;  %9011 = vpow2.f32 %v1281_v17  ;;  %v8617_v20 = vld [vmem:[#allocation6 + $0x150] sm:$0xff]  ;;  %v9107_v31 = vld [vmem:[%s9440_s30 + $0xe0] sm:$0xff]  ;;  %2859 = vmatpush.bf16.msrb.mxu0 %v8582_v10 }
 0x1f3   : > { %v10385_v37 = vadd.f32 %v9697_v59, %v1157_v51  ;;  %v1253_v27 = vmin.f32 %v10378_v44, 0.0  ;;  %v1048_v13 = vsub.f32 %v9107_v31, %v9585_v35  ;;  %v1075_v24 = vmul.f32 %v9668_v49, %v1032_v40  ;;  %2521 = vmatpush.bf16.msrb.mxu2 %v8617_v20  ;;  %v9108_v31 = vld [vmem:[%s9440_s30 + $0xe8] sm:$0xff] }
 0x1f4   : > { %13382 = vst [vmem:[#allocation36_spill] sm:$0xff] %v10381_v21  ;;  %2455 = vmatmul.bf16.gmra.mxu1 %v10381_v21  ;;  %v1076_v34 = vmul.f32 %v9668_v49, %v1033_v4  ;;  %v444_v0 = vand.u32 15, %v10360_v48  ;;  %v1049_v47 = vsub.f32 %v9108_v31, %v9585_v35  ;;  %vm1221_vm15 = vcmp.gt.f32.partialorder %v10378_v44, 0.0 }
 0x1f5   : > { %1701 = vst [vmem:[#allocation2 + $0x138] sm:$0xf] %v1508_v58  ;;  %v8563_v39 = vld [vmem:[#allocation2 + $0x13c] sm:$0xf]  ;;  %v332_v58 = vand.u32 15, %v10357_v14  ;;  %v1254_v57 = vmin.f32 %v10385_v37, 0.0  ;;  %v1109_v14 = vadd.f32 %v9699_v61, %v1075_v24  ;;  %v1091_v48 = vmul.f32 %v9668_v49, %v1048_v13 }
 0x1f6   : > { %v7266_v17 = vld [vmem:[#allocation2 + $0x144] sm:$0xf0]  ;;  %v1311_v51 = vmul.f32 1.442695, %v1253_v27  ;;  %v1110_v4 = vadd.f32 %v9699_v61, %v1076_v34  ;;  %v1092_v20 = vmul.f32 %v9668_v49, %v1049_v47  ;;  %vm10415_vm14 = vcmp.ne.s32.totalorder %v444_v0, 0  ;;  %2860 = vmatpush.bf16.msrb.mxu0 %v8581_v45 }
 0x1f7   : > { %v10399_v6 = vor.u32 %v8563_v39, %v7266_v17  ;;  %v7168_v9 = vld [vmem:[#allocation2 + $0x78] sm:$0xf]  ;;  %v1313_v27 = vmul.f32 1.442695, %v1254_v57  ;;  %v9010_v52 = vpop.eup %9009  ;;  %vm10409_vm13 = vcmp.ne.s32.totalorder %v332_v58, 0  ;;  %v1142_v10 = vmul.f32 %v9689_v54, %v1109_v14 }
 0x1f8   : > { %v8540_v40 = vld [vmem:[#allocation2 + $0x80] sm:$0xf0]  ;;  %9013 = vpow2.f32 %v1311_v51  ;;  %v1143_v24 = vmul.f32 %v9689_v54, %v1110_v4  ;;  %v9012_v34 = vpop.eup %9011  ;;  %v7096_v31 = vadd.f32 -1.0, %v9010_v52  ;;  %v1126_v4 = vadd.f32 %v9699_v61, %v1092_v20 }
 0x1f9   : > { %13383 = vst [vmem:[#allocation37_spill] sm:$0xff] %v10399_v6  ;;  %2495 = vmatmul.bf16.gmra.mxu3 %v10399_v6  ;;  %v10407_v39 = vor.u32 %v8540_v40, %v7168_v9  ;;  %v8564_v57 = vld [vmem:[#allocation2 + $0x140] sm:$0xf0]  ;;  %9015 = vpow2.f32 %v1313_v27  ;;  %v1125_v9 = vadd.f32 %v9699_v61, %v1091_v48  ;;  %v7097_v58 = vadd.f32 -1.0, %v9012_v34 }
 0x1fa   : > { %v10424_v14 = vadd.f32 %v9697_v59, %v1142_v10  ;;  %v10430_v40 = vsel %vm1205_vm10, %v10319_v33, %v7096_v31  ;;  %v10436_v0 = vsel %vm10409_vm13, 1.0, %v13366_v62  ;;  %v10439_v27 = vadd.f32 %v9697_v59, %v1143_v24 }
 0x1fb   : > { %13384 = vst [vmem:[#allocation38_spill] sm:$0xff] %v10407_v39  ;;  %2366 = vmatmul.bf16.gmra.mxu0 %v10407_v39  ;;  %v10445_v48 = vsel %vm1206_vm11, %v10332_v22, %v7097_v58  ;;  %v1397_v33 = vrot.slane %v10430_v40, 7  ;;  %v1526_v20 = vpack.c.bf16 %v10430_v40, %v10430_v40  ;;  %vm1222_vm0 = vcmp.gt.f32.partialorder %v10385_v37, 0.0 }
 0x1fc   : > { %v7264_v51 = vld [vmem:[#allocation2 + $0x138] sm:$0xf]  ;;  %13390 = vst [vmem:[#allocation40_spill] sm:$0xff] %v10436_v0  ;;  %v1527_v10 = vpack.c.bf16 %v10445_v48, %v10445_v48  ;;  %v10457_v24 = vsel %vm10415_vm14, 1.0, %v13366_v62  ;;  %v1158_v22 = vmul.f32 %v9689_v54, %v1125_v9  ;;  %v1239_v31 = vmin.f32 %v10424_v14, 0.0 }
 0x1fd   : > { %v10421_v13 = vor.u32 %v8564_v57, %v7264_v51  ;;  %13391 = vst [vmem:[#allocation41_spill] sm:$0xff] %v10457_v24  ;;  %v13392_v51 = vrot.slane %v10299_v1, 7  ;;  %v1159_v58 = vmul.f32 %v9689_v54, %v1126_v4  ;;  %v13393_v6 = vrot.slane %v10445_v48, 7 }
 0x1fe   : > { %v9014_v52 = vpop.eup %9013  ;;  %1719 = vst [vmem:[#allocation2 + $0x94] sm:$0xf] %v1526_v20  ;;  %v1240_v20 = vmin.f32 %v10439_v27, 0.0  ;;  %v1283_v63 = vmul.f32 1.442695, %v1239_v31  ;;  %vm1207_vm1 = vcmp.gt.f32.partialorder %v10424_v14, 0.0 }
 0x1ff   : > { %13389 = vst [vmem:[#allocation39_spill] sm:$0xff] %v10421_v13  ;;  %2406 = vmatmul.bf16.gmra.mxu2 %v10421_v13  ;;  %v7112_v34 = vadd.f32 -1.0, %v9014_v52  ;;  %v1441_v57 = vsel %vm1419_vm12, %v13392_v51, %v1397_v33  ;;  %v9016_v17 = vpop.eup %9015  ;;  %v1440_v47 = vsel %vm1419_vm12, %v1397_v33, %v13393_v6  ;;  %v238_v52 = vadd.s32 96, %v9662_v16 }
 0x200   : > { %1720 = vst [vmem:[#allocation2 + $0xa0] sm:$0xf] %v1527_v10  ;;  %v1462_v9 = vmul.f32 %v10436_v0, %v1441_v57  ;;  %v7113_v13 = vadd.f32 -1.0, %v9016_v17  ;;  %v1495_v4 = vpack.c.bf16 %v1440_v47, %v1440_v47  ;;  %v8595_v10 = vld [vmem:[#allocation6 + $0xb8] sm:$0xff]  ;;  %v10482_v57 = vadd.f32 %v9697_v59, %v1158_v22  ;;  %v9109_v0 = vld [vmem:[%s9440_s30 + $0x70] sm:$0xff] }
 0x201   : > { %v10476_v51 = vsel %vm1221_vm15, %v10378_v44, %v7112_v34  ;;  %9017 = vpow2.f32 %v1283_v63  ;;  %v1285_v44 = vmul.f32 1.442695, %v1240_v20  ;;  %v10490_v34 = vadd.f32 %v9697_v59, %v1159_v58  ;;  %2943 = vmatpush.bf16.msrb.mxu1 %v8595_v10  ;;  %v8616_v20 = vld [vmem:[#allocation6 + $0x148] sm:$0xff] }
 0x202   : > { %v1413_v21 = vrot.slane %v10476_v51, 7  ;;  %v1542_v6 = vpack.c.bf16 %v10476_v51, %v10476_v51  ;;  %v1494_v33 = vpack.c.bf16 %v1462_v9, %v1462_v9  ;;  %v10487_v17 = vsel %vm1222_vm0, %v10385_v37, %v7113_v13  ;;  %1688 = vst [vmem:[#allocation2 + $0x9c] sm:$0xf] %v1495_v4  ;;  %v8573_v4 = vld [vmem:[#allocation6 + $0x8] sm:$0xff]  ;;  %2522 = vmatpush.bf16.msrb.mxu2 %v8616_v20 }
 0x203   : > { %v13267_v47 = vrot.slane %v10487_v17, 7  ;;  %v1543_v22 = vpack.c.bf16 %v10487_v17, %v10487_v17  ;;  %v13394_v9 = vrot.slane %v10338_v36, 7  ;;  %9019 = vpow2.f32 %v1285_v44  ;;  %2771 = vmatpush.bf16.msrb.mxu3 %v8573_v4  ;;  %v9110_v4 = vld [vmem:[%s9440_s30 + $0xf0] sm:$0xff] }
 0x204   : > { %1735 = vst [vmem:[#allocation2 + $0x154] sm:$0xf] %v1542_v6  ;;  %v346_v58 = vand.u32 15, %v238_v52  ;;  %v1255_v31 = vmin.f32 %v10482_v57, 0.0  ;;  %v254_v39 = vadd.s32 224, %v9662_v16  ;;  %vm1208_vm2 = vcmp.gt.f32.partialorder %v10439_v27, 0.0 }
 0x205   : > { %v1425_v37 = vsel %vm1419_vm12, %v13394_v9, %v1413_v21  ;;  %1687 = vst [vmem:[#allocation2 + $0x90] sm:$0xf] %v1494_v33  ;;  %v8542_v10 = vld [vmem:[#allocation2 + $0x94] sm:$0xf]  ;;  %v1424_v6 = vsel %vm1419_vm12, %v1413_v21, %v13267_v47  ;;  %v1256_v9 = vmin.f32 %v10490_v34, 0.0  ;;  %v1034_v33 = vsub.f32 %v9109_v0, %v9585_v35  ;;  %v8593_v0 = vld [vmem:[#allocation6 + $0xa8] sm:$0xff] }
 0x206   : > { %v1478_v13 = vmul.f32 %v10457_v24, %v1425_v37  ;;  %1736 = vst [vmem:[#allocation2 + $0x160] sm:$0xf] %v1543_v22  ;;  %v1511_v63 = vpack.c.bf16 %v1424_v6, %v1424_v6  ;;  %v8594_v22 = vld [vmem:[#allocation6 + $0xb0] sm:$0xff]  ;;  %v1315_v21 = vmul.f32 1.442695, %v1255_v31  ;;  %v1531_v20 = vpack.c.bf16 %v9863_v29, %v9863_v29 }
 0x207   : > { %v7182_v44 = vld [vmem:[#allocation2 + $0x9c] sm:$0xf0]  ;;  %v1317_v47 = vmul.f32 1.442695, %v1256_v9  ;;  %v9018_v42 = vpop.eup %9017  ;;  %2944 = vmatpush.bf16.msrb.mxu1 %v8594_v22  ;;  %vm1223_vm3 = vcmp.gt.f32.partialorder %v10482_v57, 0.0  ;;  %vm10523_vm4 = vcmp.ne.s32.totalorder %v346_v58, 0  ;;  %v1547_v9 = vpack.c.bf16 %v9852_v23, %v9852_v23 }
 0x208   : > { %v1510_v52 = vpack.c.bf16 %v1478_v13, %v1478_v13  ;;  %v10512_v24 = vor.u32 %v8542_v10, %v7182_v44  ;;  %v1077_v13 = vmul.f32 %v9668_v49, %v1034_v33  ;;  %v1050_v10 = vsub.f32 %v9110_v4, %v9585_v35  ;;  %1704 = vst [vmem:[#allocation2 + $0x15c] sm:$0xf] %v1511_v63 }
 0x209   : > { %v7098_v31 = vadd.f32 -1.0, %v9018_v42  ;;  %9021 = vpow2.f32 %v1315_v21  ;;  %v9020_v33 = vpop.eup %9019  ;;  %vm1224_vm5 = vcmp.gt.f32.partialorder %v10490_v34, 0.0  ;;  %1724 = vst [vmem:[#allocation2 + $0xd0] sm:$0xf] %v1531_v20  ;;  %v458_v22 = vand.u32 15, %v254_v39 }
 0x20a   : > { %1703 = vst [vmem:[#allocation2 + $0x150] sm:$0xf] %v1510_v52  ;;  %2460 = vmatmul.bf16.gmra.mxu1 %v10512_v24  ;;  %v8543_v52 = vld [vmem:[#allocation2 + $0x98] sm:$0xf0]  ;;  %9023 = vpow2.f32 %v1317_v47  ;;  %v1111_v35 = vadd.f32 %v9699_v61, %v1077_v13  ;;  %v1093_v42 = vmul.f32 %v9668_v49, %v1050_v10  ;;  %v7099_v58 = vadd.f32 -1.0, %v9020_v33  ;;  %v8592_v13 = vld [vmem:[#allocation6 + $0xa0] sm:$0xff] }
 0x20b   : > { %v8566_v44 = vld [vmem:[#allocation2 + $0x154] sm:$0xf]  ;;  %v10535_v45 = vsel %vm1207_vm1, %v10424_v14, %v7098_v31  ;;  %1740 = vst [vmem:[#allocation2 + $0x190] sm:$0xf] %v1547_v9  ;;  %v10545_v49 = vsel %vm10523_vm4, 1.0, %v13366_v62  ;;  %2945 = vmatpush.bf16.msrb.mxu1 %v8593_v0  ;;  %v13399_v0 = vrot.slane %v10445_v48, 7 }
 0x20c   : > { %v7180_v63 = vld [vmem:[#allocation2 + $0x90] sm:$0xf]  ;;  %v1399_v37 = vrot.slane %v10535_v45, 7  ;;  %v1528_v47 = vpack.c.bf16 %v10535_v45, %v10535_v45  ;;  %13397 = vst [vmem:[#allocation42_spill] sm:$0xff] %v10545_v49  ;;  %v10552_v39 = vsel %vm1208_vm2, %v10439_v27, %v7099_v58  ;;  %v1144_v14 = vmul.f32 %v9689_v54, %v1111_v35 }
 0x20d   : > { %v7278_v21 = vld [vmem:[#allocation2 + $0x15c] sm:$0xf0]  ;;  %v10537_v4 = vor.u32 %v8543_v52, %v7180_v63  ;;  %v1127_v10 = vadd.f32 %v9699_v61, %v1093_v42  ;;  %v13273_v31 = vrot.slane %v10552_v39, 7  ;;  %v1529_v6 = vpack.c.bf16 %v10552_v39, %v10552_v39 }
 0x20e   : > { %v10547_v20 = vor.u32 %v8566_v44, %v7278_v21  ;;  %1721 = vst [vmem:[#allocation2 + $0xac] sm:$0xf] %v1528_v47  ;;  %v1439_v9 = vsel %vm1419_vm12, %v13399_v0, %v1399_v37  ;;  %v240_v27 = vadd.s32 112, %v9662_v16  ;;  %vm670_vm6 = vcmp.ne.s32.totalorder %v458_v22, 0  ;;  %v8591_v47 = vld [vmem:[#allocation6 + $0x98] sm:$0xff] }
 0x20f   : > { %2371 = vmatmul.bf16.gmra.mxu0 %v10537_v4  ;;  %v9022_v33 = vpop.eup %9021  ;;  %v1464_v61 = vmul.f32 %v10545_v49, %v1439_v9  ;;  %v10568_v52 = vadd.f32 %v9697_v59, %v1144_v14  ;;  %v1160_v35 = vmul.f32 %v9689_v54, %v1127_v10  ;;  %v8567_v63 = vld [vmem:[#allocation2 + $0x158] sm:$0xf0]  ;;  %1722 = vst [vmem:[#allocation2 + $0xb8] sm:$0xf] %v1529_v6  ;;  %v10583_v14 = vsel %vm670_vm6, 1.0, %v13366_v62 }
 0x210   : > { %13398 = vst [vmem:[#allocation43_spill] sm:$0xff] %v10547_v20  ;;  %2500 = vmatmul.bf16.gmra.mxu3 %v10547_v20  ;;  %v9024_v42 = vpop.eup %9023  ;;  %v7114_v58 = vadd.f32 -1.0, %v9022_v33  ;;  %v1438_v21 = vsel %vm1419_vm12, %v1399_v37, %v13273_v31  ;;  %2946 = vmatpush.bf16.msrb.mxu1 %v8592_v13  ;;  %v360_v33 = vand.u32 15, %v240_v27  ;;  %v231_v20 = vadd.s32 40, %v9662_v16 }
 0x211   : > { %v7276_v44 = vld [vmem:[#allocation2 + $0x150] sm:$0xf]  ;;  %v7115_v9 = vadd.f32 -1.0, %v9024_v42  ;;  %v1496_v22 = vpack.c.bf16 %v1464_v61, %v1464_v61  ;;  %v1497_v49 = vpack.c.bf16 %v1438_v21, %v1438_v21  ;;  %13401 = vst [vmem:[#allocation45_spill] sm:$0xff] %v10583_v14  ;;  %v1241_v10 = vmin.f32 %v10568_v52, 0.0 }
 0x212   : > { %v10575_v0 = vor.u32 %v8567_v63, %v7276_v44  ;;  %v10580_v54 = vsel %vm1223_vm3, %v10482_v57, %v7114_v58  ;;  %v10587_v6 = vadd.f32 %v9697_v59, %v1160_v35  ;;  %v13402_v63 = vrot.slane %v10487_v17, 7 }
 0x213   : > { %v10593_v37 = vsel %vm1224_vm5, %v10490_v34, %v7115_v9  ;;  %v1415_v13 = vrot.slane %v10580_v54, 7  ;;  %v1544_v57 = vpack.c.bf16 %v10580_v54, %v10580_v54  ;;  %1689 = vst [vmem:[#allocation2 + $0xa8] sm:$0xf] %v1496_v22  ;;  %v1287_v35 = vmul.f32 1.442695, %v1241_v10  ;;  %v8572_v9 = vld [vmem:[#allocation6] sm:$0xff] }
 0x214   : > { %13400 = vst [vmem:[#allocation44_spill] sm:$0xff] %v10575_v0  ;;  %2411 = vmatmul.bf16.gmra.mxu2 %v10575_v0  ;;  %v13272_v61 = vrot.slane %v10593_v37, 7  ;;  %v1545_v59 = vpack.c.bf16 %v10593_v37, %v10593_v37  ;;  %2947 = vmatpush.bf16.msrb.mxu1 %v8591_v47  ;;  %v1257_v27 = vmin.f32 %v10587_v6, 0.0  ;;  %vm1209_vm7 = vcmp.gt.f32.partialorder %v10568_v52, 0.0  ;;  %v8615_v47 = vld [vmem:[#allocation6 + $0x140] sm:$0xff]  ;;  %v8590_v22 = vld [vmem:[#allocation6 + $0x90] sm:$0xff] }
 0x215   : > { %1690 = vst [vmem:[#allocation2 + $0xb4] sm:$0xf] %v1497_v49  ;;  %v8545_v42 = vld [vmem:[#allocation2 + $0xac] sm:$0xf]  ;;  %v1423_v58 = vsel %vm1419_vm12, %v13402_v63, %v1415_v13  ;;  %9025 = vpow2.f32 %v1287_v35  ;;  %vm10614_vm8 = vcmp.ne.s32.totalorder %v360_v33, 0  ;;  %2523 = vmatpush.bf16.msrb.mxu2 %v8615_v47  ;;  %2772 = vmatpush.bf16.msrb.mxu3 %v8572_v9  ;;  %v227_v35 = vadd.s32 8, %v9662_v16 }
 0x216   : > { %1737 = vst [vmem:[#allocation2 + $0x16c] sm:$0xf] %v1544_v57  ;;  %v1422_v21 = vsel %vm1419_vm12, %v1415_v13, %v13272_v61  ;;  %v1480_v49 = vmul.f32 %v10583_v14, %v1423_v58  ;;  %v7194_v10 = vld [vmem:[#allocation2 + $0xb4] sm:$0xf0]  ;;  %v1319_v34 = vmul.f32 1.442695, %v1257_v27 }
 0x217   : > { %1738 = vst [vmem:[#allocation2 + $0x178] sm:$0xf] %v1545_v59  ;;  %v1513_v57 = vpack.c.bf16 %v1422_v21, %v1422_v21  ;;  %v256_v59 = vadd.s32 240, %v9662_v16  ;;  %v10619_v44 = vor.u32 %v8545_v42, %v7194_v10  ;;  %v8580_v58 = vld [vmem:[#allocation6 + $0x40] sm:$0xff]  ;;  %v8589_v21 = vld [vmem:[#allocation6 + $0x88] sm:$0xff]  ;;  %v229_v33 = vadd.s32 24, %v9662_v16 }
 0x218   : > { %v1512_v13 = vpack.c.bf16 %v1480_v49, %v1480_v49  ;;  %9027 = vpow2.f32 %v1319_v34  ;;  %2948 = vmatpush.bf16.msrb.mxu1 %v8590_v22  ;;  %vm1225_vm10 = vcmp.gt.f32.partialorder %v10587_v6, 0.0  ;;  %2861 = vmatpush.bf16.msrb.mxu0 %v8580_v58  ;;  %v269_v42 = vand.u32 15, %v227_v35  ;;  %v8588_v63 = vld [vmem:[#allocation6 + $0x80] sm:$0xff] }
 0x219   : > { %13405 = vst [vmem:[#allocation46_spill] sm:$0xff] %v10619_v44  ;;  %v472_v61 = vand.u32 15, %v256_v59  ;;  %v13406_v49 = vrot.slane %v9877_v55, 1  ;;  %v13407_v47 = vrot.slane %v9816_v28, 1  ;;  %v13409_v22 = vrot.slane %v9807_v50, 1 }
 0x21a   : > { %1706 = vst [vmem:[#allocation2 + $0x174] sm:$0xf] %v1513_v57  ;;  %2465 = vmatmul.bf16.gmra.mxu1 %v10619_v44  ;;  %v7192_v27 = vld [vmem:[#allocation2 + $0xa8] sm:$0xf]  ;;  %v10641_v59 = vsel %vm10614_vm8, 1.0, %v13366_v62  ;;  %v9315_v58 = vmov 0  }
 0x21b   : > { %1705 = vst [vmem:[#allocation2 + $0x168] sm:$0xf] %v1512_v13  ;;  %v1610_v34 = vsel %vm1580_vm9, %v13407_v47, %v13406_v49  ;;  %v13408_v9 = vmov %v13407_v47  ;;  %vm10643_vm11 = vcmp.ne.s32.totalorder %v472_v61, 0  ;;  %v283_v35 = vand.u32 15, %v229_v33 }
 0x21c   : > { %v1611_v10 = vsel %vm1580_vm9, %v13409_v22, %v13408_v9  ;;  %v8546_v57 = vld [vmem:[#allocation2 + $0xb0] sm:$0xf0]  ;;  %13410 = vst [vmem:[#allocation47_spill] sm:$0xff] %v10641_v59  ;;  %v13413_v28 = vrot.slane %v10044_v25, 1  ;;  %v13414_v49 = vrot.slane %v9887_v43, 1  ;;  %v9026_v9 = vpop.eup %9025  ;;  %vm739_vm13 = vcmp.ne.s32.totalorder %v269_v42, 15  ;;  %2949 = vmatpush.bf16.msrb.mxu1 %v8589_v21 }
 0x21d   : > { %871 = vst [vmem:[#allocation2] sm:$0xff] %v9315_v58  ;;  %v8569_v22 = vld [vmem:[#allocation2 + $0x16c] sm:$0xf]  ;;  %v10653_v31 = vor.u32 %v8546_v57, %v7192_v27  ;;  %v13416_v14 = vrot.slane %v9877_v55, 1  ;;  %v7100_v44 = vadd.f32 -1.0, %v9026_v9  ;;  %v10665_v27 = vsel %vm739_vm13, 1.0, %v13366_v62 }
 0x21e   : > { %v1608_v47 = vsel %vm1580_vm9, %v13414_v49, %v13413_v28  ;;  %873 = vst [vmem:[#allocation2 + $0xc] sm:$0xff] %v9315_v58  ;;  %v13415_v61 = vmov %v13414_v49  ;;  %v7290_v0 = vld [vmem:[#allocation2 + $0x174] sm:$0xf0]  ;;  %v13418_v57 = vrot.slane %v10159_v19, 1  ;;  %v13419_v42 = vrot.slane %v10054_v30, 1  ;;  %v9028_v28 = vpop.eup %9027 }
 0x21f   : > { %v10661_v33 = vsel %vm1580_vm9, %v13416_v14, %v13415_v61  ;;  %872 = vst [vmem:[#allocation2 + $0x8] sm:$0xf] %v9315_v58  ;;  %v10675_v43 = vor.u32 %v8569_v22, %v7290_v0  ;;  %2376 = vmatmul.bf16.gmra.mxu0 %v10653_v31  ;;  %v10681_v14 = vsel %vm10643_vm11, 1.0, %v13366_v62  ;;  %v1645_v21 = vpack.c.bf16 %v1611_v10, %v1611_v10 }
 0x220   : > { %13417 = vst [vmem:[#allocation48_spill] sm:$0xff] %v10665_v27  ;;  %v10673_v55 = vsel %vm1580_vm9, %v13419_v42, %v13418_v57  ;;  %vm741_vm14 = vcmp.ne.s32.totalorder %v283_v35, 15  ;;  %v10686_v49 = vsel %vm1209_vm7, %v10568_v52, %v7100_v44  ;;  %v1614_v0 = vmul.f32 %v10665_v27, %v1610_v34  ;;  %2950 = vmatpush.bf16.msrb.mxu1 %v8588_v63  ;;  %v8686_v27 = vld [vmem:[#allocation6 + $0x1f8] sm:$0xff] }
 0x221   : > { %13420 = vst [vmem:[#allocation49_spill] sm:$0xff] %v10681_v14  ;;  %v10690_v9 = vsel %vm741_vm14, 1.0, %v13366_v62  ;;  %v13422_v22 = vmov %v13419_v42  ;;  %v13423_v13 = vrot.slane %v10044_v25, 1  ;;  %2505 = vmatmul.bf16.gmra.mxu3 %v10675_v43  ;;  %v1401_v35 = vrot.slane %v10686_v49, 7  ;;  %v8570_v57 = vld [vmem:[#allocation2 + $0x170] sm:$0xf0] }
 0x222   : > { %874 = vst [vmem:[#allocation2 + $0x14] sm:$0xf] %v9315_v58  ;;  %v1530_v52 = vpack.c.bf16 %v10686_v49, %v10686_v49  ;;  %v7116_v44 = vadd.f32 -1.0, %v9028_v28  ;;  %v297_v34 = vand.u32 15, %v231_v20  ;;  %v7288_v61 = vld [vmem:[#allocation2 + $0x168] sm:$0xf]  ;;  %v10705_v25 = vmul.f32 %v10690_v9, %v1608_v47  ;;  %3634 = vmatpush.bf16.msra.mxu3 %v8686_v27 }
 0x223   : > { %875 = vst [vmem:[#allocation2 + $0x198] sm:$0xff] %v9315_v58  ;;  %v10698_v10 = vsel %vm1580_vm9, %v13423_v13, %v13422_v22  ;;  %v1647_v30 = vpack.c.bf16 %v10661_v33, %v10661_v33  ;;  %v10709_v42 = vor.u32 %v8570_v57, %v7288_v61  ;;  %v13424_v20 = vrot.slane %v9863_v29, 7 }
 0x224   : > { %13421 = vst [vmem:[#allocation50_spill] sm:$0xff] %v10690_v9  ;;  %v10714_v22 = vsel %vm1225_vm10, %v10587_v6, %v7116_v44  ;;  %v13425_v28 = vrot.slane %v10552_v39, 7  ;;  %v233_v6 = vadd.s32 56, %v9662_v16  ;;  %v1646_v57 = vpack.c.bf16 %v1614_v0, %v1614_v0 }
 0x225   : > { %877 = vst [vmem:[#allocation2 + $0x1a4] sm:$0xff] %v9315_v58  ;;  %v1436_v63 = vsel %vm1419_vm12, %v1401_v35, %v13424_v20  ;;  %v1417_v33 = vrot.slane %v10714_v22, 7  ;;  %v1546_v13 = vpack.c.bf16 %v10714_v22, %v10714_v22  ;;  %2416 = vmatmul.bf16.gmra.mxu2 %v10709_v42  ;;  %vm10731_vm15 = vcmp.ne.s32.totalorder %v297_v34, 15 }
 0x226   : > { %876 = vst [vmem:[#allocation2 + $0x1a0] sm:$0xf] %v9315_v58  ;;  %v1437_v47 = vsel %vm1419_vm12, %v13425_v28, %v1401_v35  ;;  %v1499_v61 = vpack.c.bf16 %v1436_v63, %v1436_v63  ;;  %v7206_v35 = vld [vmem:[#allocation2 + $0xcc] sm:$0xf0]  ;;  %v13428_v9 = vrot.slane %v9852_v23, 7  ;;  %v13430_v0 = vrot.slane %v10290_v60, 1 }
 0x227   : > { %1723 = vst [vmem:[#allocation2 + $0xc4] sm:$0xf] %v1530_v52  ;;  %v1466_v52 = vmul.f32 %v10641_v59, %v1437_v47  ;;  %v13429_v47 = vrot.slane %v10593_v37, 7  ;;  %v8694_v59 = vld [vmem:[#allocation6 + $0x238] sm:$0xff]  ;;  %v13438_v27 = vrot.slane %v10290_v60, 1  ;;  %v13440_v60 = vrot.slane %v10535_v45, 1 }
 0x228   : > { %878 = vst [vmem:[#allocation2 + $0x1ac] sm:$0xf] %v9315_v58  ;;  %v1420_v58 = vsel %vm1419_vm12, %v1417_v33, %v13428_v9  ;;  %v1648_v9 = vpack.c.bf16 %v10705_v25, %v10705_v25  ;;  %3723 = vmatpush.bf16.msra.mxu0 %v8694_v59 }
 0x229   : > { %1741 = vst [vmem:[#allocation2 + $0x20] sm:$0xf] %v1645_v21  ;;  %v1498_v28 = vpack.c.bf16 %v1466_v52, %v1466_v52  ;;  %v1421_v44 = vsel %vm1419_vm12, %v13429_v47, %v1417_v33  ;;  %v13431_v21 = vrot.slane %v10177_v11, 1  ;;  %v8678_v52 = vld [vmem:[#allocation6 + $0x1b8] sm:$0xff]  ;;  %v1649_v33 = vpack.c.bf16 %v10698_v10, %v10698_v10 }
 0x22a   : > { %1739 = vst [vmem:[#allocation2 + $0x184] sm:$0xf] %v1546_v13  ;;  %v1482_v63 = vmul.f32 %v10681_v14, %v1421_v44  ;;  %v1515_v13 = vpack.c.bf16 %v1420_v58, %v1420_v58  ;;  %v10757_v47 = vsel %vm10731_vm15, 1.0, %v13366_v62  ;;  %v13434_v44 = vrot.slane %v10159_v19, 1  ;;  %3545 = vmatpush.bf16.msra.mxu2 %v8678_v52 }
 0x22b   : > { %v1604_v34 = vsel %vm1580_vm9, %v13431_v21, %v13430_v0  ;;  %1692 = vst [vmem:[#allocation2 + $0xcc] sm:$0xf] %v1499_v61  ;;  %v311_v0 = vand.u32 15, %v233_v6  ;;  %v13433_v61 = vmov %v13431_v21  ;;  %v235_v21 = vadd.s32 72, %v9662_v16 }
 0x22c   : > { %1691 = vst [vmem:[#allocation2 + $0xc0] sm:$0xf] %v1498_v28  ;;  %v1605_v58 = vsel %vm1580_vm9, %v13434_v44, %v13433_v61  ;;  %v1514_v25 = vpack.c.bf16 %v1482_v63, %v1482_v63  ;;  %v1618_v10 = vmul.f32 %v10757_v47, %v10673_v55  ;;  %v13435_v19 = vrot.slane %v10430_v40, 1 }
 0x22d   : > { %13432 = vst [vmem:[#allocation51_spill] sm:$0xff] %v10757_v47  ;;  %v1651_v20 = vpack.c.bf16 %v1605_v58, %v1605_v58  ;;  %vm745_vm0 = vcmp.ne.s32.totalorder %v311_v0, 15  ;;  %v325_v11 = vand.u32 15, %v235_v21  ;;  %v13436_v6 = vrot.slane %v10299_v1, 1  ;;  %v2436_v59 = vpop.f32.mrf.mxu1 }
 0x22e   : > { %1708 = vst [vmem:[#allocation2 + $0x18c] sm:$0xf] %v1515_v13  ;;  %v8548_v28 = vld [vmem:[#allocation2 + $0xc4] sm:$0xf]  ;;  %v1650_v52 = vpack.c.bf16 %v1618_v10, %v1618_v10  ;;  %v10783_v0 = vsel %vm745_vm0, 1.0, %v13366_v62  ;;  %v237_v1 = vadd.s32 88, %v9662_v16 }
 0x22f   : > { %1742 = vst [vmem:[#allocation2 + $0x2c] sm:$0xf] %v1646_v57  ;;  %v1602_v61 = vsel %vm1580_vm9, %v13436_v6, %v13435_v19  ;;  %v13437_v63 = vmov %v13436_v6  ;;  %v10780_v13 = vor.u32 %v8548_v28, %v7206_v35  ;;  %v7302_v57 = vld [vmem:[#allocation2 + $0x18c] sm:$0xf0]  ;;  %v1620_v58 = vmul.f32 %v10783_v0, %v1604_v34 }
 0x230   : > { %v1603_v55 = vsel %vm1580_vm9, %v13438_v27, %v13437_v63  ;;  %1707 = vst [vmem:[#allocation2 + $0x180] sm:$0xf] %v1514_v25  ;;  %vm747_vm1 = vcmp.ne.s32.totalorder %v325_v11, 15  ;;  %v13441_v21 = vrot.slane %v10445_v48, 1  ;;  %v13444_v34 = vmov %v13435_v19 }
 0x231   : > { %13439 = vst [vmem:[#allocation52_spill] sm:$0xff] %v10783_v0  ;;  %v1653_v44 = vpack.c.bf16 %v1603_v55, %v1603_v55  ;;  %2470 = vmatmul.bf16.gmra.mxu1 %v10780_v13  ;;  %v8596_v25 = vld [vmem:[#allocation2 + $0x184] sm:$0xf]  ;;  %v10795_v10 = vsel %vm747_vm1, 1.0, %v13366_v62  ;;  %v239_v11 = vadd.s32 104, %v9662_v16  ;;  %v13445_v19 = vrot.slane %v10686_v49, 1 }
 0x232   : > { %1743 = vst [vmem:[#allocation2 + $0x38] sm:$0xf] %v1647_v30  ;;  %v1600_v35 = vsel %vm1580_vm9, %v13441_v21, %v13440_v60  ;;  %v13443_v30 = vmov %v13441_v21  ;;  %v13446_v6 = vrot.slane %v10552_v39, 1  ;;  %v8549_v27 = vld [vmem:[#allocation2 + $0xc8] sm:$0xf0]  ;;  %v1652_v55 = vpack.c.bf16 %v1620_v58, %v1620_v58 }
 0x233   : > { %1744 = vst [vmem:[#allocation2 + $0x44] sm:$0xf] %v1648_v9  ;;  %v1601_v28 = vsel %vm1580_vm9, %v13444_v34, %v13443_v30  ;;  %v7305_v9 = vor.u32 %v8596_v25, %v7302_v57  ;;  %v1622_v48 = vmul.f32 %v10795_v10, %v1602_v61  ;;  %v339_v60 = vand.u32 15, %v237_v1  ;;  %v7204_v40 = vld [vmem:[#allocation2 + $0xc0] sm:$0xf] }
 0x234   : > { %13442 = vst [vmem:[#allocation53_spill] sm:$0xff] %v10795_v10  ;;  %v1598_v63 = vsel %vm1580_vm9, %v13446_v6, %v13445_v19  ;;  %v1655_v21 = vpack.c.bf16 %v1601_v28, %v1601_v28  ;;  %v353_v30 = vand.u32 15, %v239_v11  ;;  %v13447_v34 = vmov %v13446_v6 }
 0x235   : > { %1745 = vst [vmem:[#allocation2 + $0x50] sm:$0xf] %v1649_v33  ;;  %v13448_v0 = vrot.slane %v10535_v45, 1  ;;  %v241_v19 = vadd.s32 120, %v9662_v16  ;;  %v10818_v57 = vor.u32 %v8549_v27, %v7204_v40  ;;  %v1654_v33 = vpack.c.bf16 %v1622_v48, %v1622_v48  ;;  %2510 = vmatmul.bf16.gmra.mxu3 %v7305_v9  ;;  %v8597_v58 = vld [vmem:[#allocation2 + $0x188] sm:$0xf0]  ;;  %v10840_v27 = vpop.f32.mrf.mxu1 }
 0x236   : > { %1746 = vst [vmem:[#allocation2 + $0x5c] sm:$0xf] %v1650_v52  ;;  %vm749_vm2 = vcmp.ne.s32.totalorder %v339_v60, 15  ;;  %vm751_vm3 = vcmp.ne.s32.totalorder %v353_v30, 15  ;;  %v13450_v45 = vrot.slane %v9925_v41, 1  ;;  %v13451_v39 = vrot.slane %v9840_v15, 1  ;;  %v2347_v60 = vpop.f32.mrf.mxu0  ;;  %v2476_v40 = vpop.f32.mrf.mxu3 }
 0x237   : > { %v1599_v47 = vsel %vm1580_vm9, %v13448_v0, %v13447_v34  ;;  %1747 = vst [vmem:[#allocation2 + $0x68] sm:$0xf] %v1651_v20  ;;  %v10821_v52 = vsel %vm749_vm2, 1.0, %v13366_v62  ;;  %v13453_v20 = vrot.slane %v9835_v7, 1  ;;  %2381 = vmatmul.bf16.gmra.mxu0 %v10818_v57  ;;  %v7300_v25 = vld [vmem:[#allocation2 + $0x180] sm:$0xf] }
 0x238   : > { %v1657_v61 = vpack.c.bf16 %v1599_v47, %v1599_v47  ;;  %1748 = vst [vmem:[#allocation2 + $0x74] sm:$0xf] %v1652_v55  ;;  %v1594_v0 = vsel %vm1580_vm9, %v13451_v39, %v13450_v45  ;;  %v13452_v1 = vmov %v13451_v39  ;;  %v1624_v28 = vmul.f32 %v10821_v52, %v1600_v35 }
 0x239   : > { %13449 = vst [vmem:[#allocation54_spill] sm:$0xff] %v10821_v52  ;;  %v1595_v47 = vsel %vm1580_vm9, %v13453_v20, %v13452_v1  ;;  %v10838_v11 = vsel %vm751_vm3, 1.0, %v13366_v62  ;;  %v367_v6 = vand.u32 15, %v241_v19  ;;  %v7301_v9 = vor.u32 %v8597_v58, %v7300_v25  ;;  %v7416_v19 = vld [vmem:[#allocation2 + $0x8] sm:$0xf] }
 0x23a   : > { %1749 = vst [vmem:[#allocation2 + $0x80] sm:$0xf] %v1653_v44  ;;  %v1626_v15 = vmul.f32 %v10838_v11, %v1598_v63  ;;  %v1563_v55 = vrot.slane %v9863_v29, 1  ;;  %v243_v48 = vadd.s32 136, %v9662_v16  ;;  %v1656_v30 = vpack.c.bf16 %v1624_v28, %v1624_v28  ;;  %v8526_v63 = vld [vmem:[#allocation2 + $0x10] sm:$0xf0] }
 0x23b   : > { %13454 = vst [vmem:[#allocation55_spill] sm:$0xff] %v10838_v11  ;;  %vm753_vm4 = vcmp.ne.s32.totalorder %v367_v6, 15  ;;  %v1661_v44 = vpack.c.bf16 %v1595_v47, %v1595_v47  ;;  %v245_v35 = vadd.s32 152, %v9662_v16  ;;  %2421 = vmatmul.bf16.gmra.mxu2 %v7301_v9  ;;  %v10847_v58 = vadd.f32 %v2436_v59, %v2347_v60 }
 0x23c   : > { %1750 = vst [vmem:[#allocation2 + $0x8c] sm:$0xf] %v1654_v33  ;;  %v1658_v33 = vpack.c.bf16 %v1626_v15, %v1626_v15  ;;  %v10850_v29 = vsel %vm753_vm4, 1.0, %v13366_v62  ;;  %v13456_v45 = vmov %v13453_v20  ;;  %v13457_v39 = vrot.slane %v10686_v49, 1 }
 0x23d   : > { %1751 = vst [vmem:[#allocation2 + $0x98] sm:$0xf] %v1655_v21  ;;  %v1596_v21 = vsel %vm1580_vm9, %v1563_v55, %v13456_v45  ;;  %v381_v20 = vand.u32 15, %v243_v48  ;;  %v395_v59 = vand.u32 15, %v245_v35  ;;  %v13458_v28 = vrot.slane %v10088_v38, 1 }
 0x23e   : > { %1753 = vst [vmem:[#allocation2 + $0xb0] sm:$0xf] %v1657_v61  ;;  %v1597_v1 = vsel %vm1580_vm9, %v13457_v39, %v1563_v55  ;;  %v1628_v61 = vmul.f32 %v10850_v29, %v1596_v21  ;;  %v13459_v7 = vrot.slane %v9973_v3, 1  ;;  %v13461_v9 = vrot.slane %v9925_v41, 1  ;;  %v8525_v41 = vld [vmem:[#allocation2 + $0x8] sm:$0xf0] }
 0x23f   : > { %13455 = vst [vmem:[#allocation56_spill] sm:$0xff] %v10850_v29  ;;  %v1659_v25 = vpack.c.bf16 %v1597_v1, %v1597_v1  ;;  %vm755_vm5 = vcmp.ne.s32.totalorder %v381_v20, 15  ;;  %vm757_vm6 = vcmp.ne.s32.totalorder %v395_v59, 15  ;;  %v13462_v55 = vrot.slane %v10214_v32, 1  ;;  %v8524_v45 = vld [vmem:[#allocation2 + $0x4] sm:$0xf] }
 0x240   : > { %1752 = vst [vmem:[#allocation2 + $0xa4] sm:$0xf] %v1656_v30  ;;  %v1592_v6 = vsel %vm1580_vm9, %v13459_v7, %v13458_v28  ;;  %v13460_v49 = vmov %v13459_v7  ;;  %v13463_v48 = vrot.slane %v10095_v56, 1  ;;  %v7408_v30 = vld [vmem:[#allocation2] sm:$0xf]  ;;  %v7417_v35 = vor.u32 %v8526_v63, %v7416_v19  ;;  %v2387_v63 = vpop.f32.mrf.mxu2  ;;  %v13492_v29 = vld [vmem:[#allocation21_spill] sm:$0xff] }
 0x241   : > { %1754 = vst [vmem:[#allocation2 + $0xbc] sm:$0xf] %v1658_v33  ;;  %v1593_v15 = vsel %vm1580_vm9, %v13461_v9, %v13460_v49  ;;  %v1660_v33 = vpack.c.bf16 %v1628_v61, %v1628_v61  ;;  %v10884_v3 = vsel %vm757_vm6, 1.0, %v13366_v62  ;;  %v247_v20 = vadd.s32 168, %v9662_v16  ;;  %v7410_v19 = vld [vmem:[#allocation2 + $0xc] sm:$0xf0]  ;;  %v2441_v61 = vpop.f32.mrf.mxu1 }
 0x242   : > { %1757 = vst [vmem:[#allocation2 + $0xe0] sm:$0xf] %v1661_v44  ;;  %v1590_v60 = vsel %vm1580_vm9, %v13463_v48, %v13462_v55  ;;  %v10881_v44 = vsel %vm755_vm5, 1.0, %v13366_v62  ;;  %v1632_v39 = vmul.f32 %v10884_v3, %v1592_v6  ;;  %v1663_v1 = vpack.c.bf16 %v1593_v15, %v1593_v15  ;;  %v10905_v55 = vpop.f32.mrf.mxu0  ;;  %2951 = vmatmul.bf16.vlgmr.msrb.gmra.mxu1 %v7417_v35 }
 0x243   : > { %1755 = vst [vmem:[#allocation2 + $0xc8] sm:$0xf] %v1659_v25  ;;  %v1630_v21 = vmul.f32 %v10881_v44, %v1594_v0  ;;  %v13466_v25 = vmov %v13463_v48  ;;  %v249_v0 = vadd.s32 184, %v9662_v16  ;;  %v13467_v6 = vrot.slane %v10324_v53, 1  ;;  %v10907_v48 = vpop.f32.mrf.mxu3 }
 0x244   : > { %13464 = vst [vmem:[#allocation57_spill] sm:$0xff] %v10881_v44  ;;  %v1591_v7 = vsel %vm1580_vm9, %v13458_v28, %v13466_v25  ;;  %v13468_v49 = vrot.slane %v10222_v8, 1  ;;  %v10903_v15 = vadd.f32 %v2476_v40, %v2387_v63  ;;  %v1664_v38 = vpack.c.bf16 %v1632_v39, %v1632_v39  ;;  %v8529_v8 = vld [vmem:[#allocation2 + $0x28] sm:$0xf0] }
 0x245   : > { %13465 = vst [vmem:[#allocation58_spill] sm:$0xff] %v10884_v3  ;;  %v1662_v56 = vpack.c.bf16 %v1630_v21, %v1630_v21  ;;  %v7409_v25 = vor.u32 %v8525_v41, %v7408_v30  ;;  %v1665_v28 = vpack.c.bf16 %v1591_v7, %v1591_v7  ;;  %v423_v59 = vand.u32 15, %v249_v0  ;;  %v7128_v0 = vld [vmem:[#allocation2 + $0x20] sm:$0xf] }
 0x246   : > { %1756 = vst [vmem:[#allocation2 + $0xd4] sm:$0xf] %v1660_v33  ;;  %v1588_v9 = vsel %vm1580_vm9, %v13468_v49, %v13467_v6  ;;  %v409_v33 = vand.u32 15, %v247_v20  ;;  %v13469_v47 = vmov %v13468_v49  ;;  %v13470_v34 = vrot.slane %v10214_v32, 1 }
 0x247   : > { %1759 = vst [vmem:[#allocation2 + $0xf8] sm:$0xf] %v1663_v1  ;;  %v7413_v63 = vor.u32 %v8524_v45, %v7410_v19  ;;  %v251_v21 = vadd.s32 200, %v9662_v16  ;;  %v1577_v39 = vrot.slane %v10593_v37, 1  ;;  %v1578_v30 = vrot.slane %v10714_v22, 1  ;;  %2773 = vmatmul.bf16.vlgmr.msrb.gmra.mxu3 %v7409_v25 }
 0x248   : > { %v1589_v40 = vsel %vm1580_vm9, %v13470_v34, %v13469_v47  ;;  %1758 = vst [vmem:[#allocation2 + $0xec] sm:$0xf] %v1662_v56  ;;  %vm759_vm7 = vcmp.ne.s32.totalorder %v409_v33, 15  ;;  %vm761_vm8 = vcmp.ne.s32.totalorder %v423_v59, 15  ;;  %v13473_v41 = vrot.slane %v10338_v36, 1  ;;  %v10946_v33 = vpop.f32.mrf.mxu2 }
 0x249   : > { %v1667_v6 = vpack.c.bf16 %v1589_v40, %v1589_v40  ;;  %1760 = vst [vmem:[#allocation2 + $0x104] sm:$0xf] %v1664_v38  ;;  %v10919_v35 = vsel %vm759_vm7, 1.0, %v13366_v62  ;;  %v10923_v34 = vsel %vm761_vm8, 1.0, %v13366_v62  ;;  %v437_v47 = vand.u32 15, %v251_v21  ;;  %2862 = vmatmul.bf16.vlgmr.msrb.gmra.mxu0 %v7413_v63  ;;  %v10948_v25 = vpop.f32.mrf.mxu1 }
 0x24a   : > { %13471 = vst [vmem:[#allocation59_spill] sm:$0xff] %v10919_v35  ;;  %v1634_v32 = vmul.f32 %v10919_v35, %v1590_v60  ;;  %v13474_v45 = vrot.slane %v10324_v53, 1  ;;  %v1636_v1 = vmul.f32 %v10923_v34, %v1588_v9  ;;  %v13475_v20 = vrot.slane %v10476_v51, 1 }
 0x24b   : > { %1761 = vst [vmem:[#allocation2 + $0x110] sm:$0xf] %v1665_v28  ;;  %v13476_v60 = vmov %v13473_v41  ;;  %v253_v7 = vadd.s32 216, %v9662_v16  ;;  %vm763_vm10 = vcmp.ne.s32.totalorder %v437_v47, 15  ;;  %v13477_v49 = vrot.slane %v10487_v17, 1  ;;  %v2481_v21 = vpop.f32.mrf.mxu3 }
 0x24c   : > { %13472 = vst [vmem:[#allocation60_spill] sm:$0xff] %v10923_v34  ;;  %v1587_v37 = vsel %vm1580_vm9, %v13474_v45, %v13473_v41  ;;  %v1586_v59 = vsel %vm1580_vm9, %v13476_v60, %v13475_v20  ;;  %v1666_v53 = vpack.c.bf16 %v1634_v32, %v1634_v32  ;;  %v13478_v56 = vmov %v13475_v20  ;;  %v8685_v20 = vld [vmem:[#allocation6 + $0x1f0] sm:$0xff] }
 0x24d   : > { %1763 = vst [vmem:[#allocation2 + $0x128] sm:$0xf] %v1667_v6  ;;  %v1669_v19 = vpack.c.bf16 %v1587_v37, %v1587_v37  ;;  %v1585_v9 = vsel %vm1580_vm9, %v13478_v56, %v13477_v49  ;;  %v255_v38 = vadd.s32 232, %v9662_v16  ;;  %v7129_v36 = vor.u32 %v8529_v8, %v7128_v0  ;;  %v2352_v6 = vpop.f32.mrf.mxu0  ;;  %v8693_v60 = vld [vmem:[#allocation6 + $0x230] sm:$0xff]  ;;  %3635 = vmatpush.bf16.msra.mxu3 %v8685_v20 }
 0x24e   : > { %v1668_v28 = vpack.c.bf16 %v1636_v1, %v1636_v1  ;;  %v10951_v40 = vsel %vm763_vm10, 1.0, %v13366_v62  ;;  %v451_v63 = vand.u32 15, %v253_v7  ;;  %1762 = vst [vmem:[#allocation2 + $0x11c] sm:$0xf] %v1666_v53  ;;  %v13480_v32 = vrot.slane %v10580_v54, 1  ;;  %v8677_v1 = vld [vmem:[#allocation6 + $0x1b0] sm:$0xff]  ;;  %3724 = vmatpush.bf16.msra.mxu0 %v8693_v60 }
 0x24f   : > { %13479 = vst [vmem:[#allocation61_spill] sm:$0xff] %v10951_v40  ;;  %v1638_v51 = vmul.f32 %v10951_v40, %v1586_v59  ;;  %v13481_v47 = vmov %v13477_v49  ;;  %v1671_v41 = vpack.c.bf16 %v1585_v9, %v1585_v9  ;;  %v465_v45 = vand.u32 15, %v255_v38  ;;  %2524 = vmatmul.bf16.vlgmr.msrb.gmra.mxu2 %v7129_v36 }
 0x250   : > { %1765 = vst [vmem:[#allocation2 + $0x140] sm:$0xf] %v1669_v19  ;;  %v1584_v8 = vsel %vm1580_vm9, %v13481_v47, %v13480_v32  ;;  %v10960_v37 = vadd.f32 %v2441_v61, %v2352_v6  ;;  %vm765_vm11 = vcmp.ne.s32.totalorder %v451_v63, 15  ;;  %v1582_v59 = vsel %vm1580_vm9, %v1577_v39, %v1578_v30  ;;  %3546 = vmatpush.bf16.msra.mxu2 %v8677_v1 }
 0x251   : > { %1764 = vst [vmem:[#allocation2 + $0x134] sm:$0xf] %v1668_v28  ;;  %v13482_v17 = vmov %v13480_v32  ;;  %v1670_v7 = vpack.c.bf16 %v1638_v51, %v1638_v51  ;;  %v10971_v0 = vsel %vm765_vm11, 1.0, %v13366_v62  ;;  %vm767_vm13 = vcmp.ne.s32.totalorder %v465_v45, 15  ;;  %v2392_v28 = vpop.f32.mrf.mxu2 }
 0x252   : > { %v1583_v19 = vsel %vm1580_vm9, %v13482_v17, %v1577_v39  ;;  %13483 = vst [vmem:[#allocation62_spill] sm:$0xff] %v10971_v0  ;;  %v1640_v53 = vmul.f32 %v10971_v0, %v1584_v8  ;;  %v10975_v49 = vsel %vm767_vm13, 1.0, %v13366_v62  ;;  %v257_v54 = vadd.s32 248, %v9662_v16  ;;  %2956 = vmatmul.bf16.gmra.mxu1 %v7129_v36  ;;  %v7530_v16 = vld [vmem:[#allocation2 + $0x54] sm:$0xf0] }
 0x253   : > { %v1673_v61 = vpack.c.bf16 %v1583_v19, %v1583_v19  ;;  %1767 = vst [vmem:[#allocation2 + $0x158] sm:$0xf] %v1671_v41  ;;  %v1642_v39 = vmul.f32 %v10975_v49, %v1582_v59  ;;  %v1579_v9 = vrot.slane %v9852_v23, 1  ;;  %v13485_v51 = vrot.slane %v9807_v50, 1  ;;  %v2446_v41 = vpop.f32.mrf.mxu1  ;;  %v10995_v22 = vpop.f32.mrf.mxu3  ;;  %v8532_v50 = vld [vmem:[#allocation2 + $0x40] sm:$0xf0] }
 0x254   : > { %1766 = vst [vmem:[#allocation2 + $0x14c] sm:$0xf] %v1670_v7  ;;  %v1672_v56 = vpack.c.bf16 %v1640_v53, %v1640_v53  ;;  %v479_v38 = vand.u32 15, %v257_v54  ;;  %v10988_v47 = vadd.f32 %v2481_v21, %v2392_v28  ;;  %v7140_v21 = vld [vmem:[#allocation2 + $0x38] sm:$0xf] }
 0x255   : > { %13484 = vst [vmem:[#allocation63_spill] sm:$0xff] %v10975_v49  ;;  %v1674_v63 = vpack.c.bf16 %v1642_v39, %v1642_v39  ;;  %v1581_v6 = vsel %vm1580_vm9, %v1578_v30, %v1579_v9  ;;  %v1612_v32 = vsel %vm1580_vm9, %v1579_v9, %v13485_v51  ;;  %v10990_v8 = vpop.f32.mrf.mxu0  ;;  %v7141_v20 = vor.u32 %v8532_v50, %v7140_v21  ;;  %v8535_v53 = vld [vmem:[#allocation2 + $0x58] sm:$0xf0]  ;;  %v7152_v54 = vld [vmem:[#allocation2 + $0x50] sm:$0xf] }
 0x256   : > { %1769 = vst [vmem:[#allocation2 + $0x170] sm:$0xf] %v1673_v61  ;;  %vm769_vm14 = vcmp.ne.s32.totalorder %v479_v38, 15  ;;  %v1675_v23 = vpack.c.bf16 %v1581_v6, %v1581_v6  ;;  %v8684_v6 = vld [vmem:[#allocation6 + $0x1e8] sm:$0xff]  ;;  %v7164_v50 = vld [vmem:[#allocation2 + $0x68] sm:$0xf] }
 0x257   : > { %1768 = vst [vmem:[#allocation2 + $0x164] sm:$0xf] %v1672_v56  ;;  %v10993_v45 = vsel %vm769_vm14, 1.0, %v13366_v62  ;;  %2778 = vmatmul.bf16.gmra.mxu3 %v9975_v18  ;;  %v7153_v56 = vor.u32 %v8535_v53, %v7152_v54  ;;  %v8692_v51 = vld [vmem:[#allocation6 + $0x228] sm:$0xff]  ;;  %v8541_v54 = vld [vmem:[#allocation2 + $0x88] sm:$0xf0] }
 0x258   : > { %1770 = vst [vmem:[#allocation2 + $0x17c] sm:$0xf] %v1674_v63  ;;  %v1644_v30 = vmul.f32 %v10993_v45, %v1612_v32  ;;  %v8676_v63 = vld [vmem:[#allocation6 + $0x1a8] sm:$0xff]  ;;  %3636 = vmatpush.bf16.msra.mxu3 %v8684_v6  ;;  %3725 = vmatpush.bf16.msra.mxu0 %v8692_v51  ;;  %v8675_v51 = vld [vmem:[#allocation6 + $0x1a0] sm:$0xff] }
 0x259   : > { %13486 = vst [vmem:[#allocation64_spill] sm:$0xff] %v10993_v45  ;;  %2867 = vmatmul.bf16.gmra.mxu0 %v9908_v26  ;;  %v11000_v36 = vpop.f32.mrf.mxu2  ;;  %3547 = vmatpush.bf16.msra.mxu2 %v8676_v63  ;;  %v8547_v49 = vld [vmem:[#allocation2 + $0xb8] sm:$0xf0] }
 0x25a   : > { %1771 = vst [vmem:[#allocation2 + $0x188] sm:$0xf] %v1675_v23  ;;  %v1676_v1 = vpack.c.bf16 %v1644_v30, %v1644_v30 }
 0x25b   : > { %v11004_v59 = vpop.f32.mrf.mxu1  ;;  %v2486_v17 = vpop.f32.mrf.mxu3 }
 0x25c   : > { %1772 = vst [vmem:[#allocation2 + $0x194] sm:$0xf] %v1676_v1 }
 0x25d   : > { %v2357_v60 = vpop.f32.mrf.mxu0  ;;  %3548 = vmatpush.bf16.msra.mxu2 %v8675_v51 }
 0x25e   : > { %v11002_v62 = vadd.f32 %v2446_v41, %v2357_v60  ;;  %v8538_v41 = vld [vmem:[#allocation2 + $0x70] sm:$0xf0] }
 0x25f   : > { %2529 = vmatmul.bf16.gmra.mxu2 %v7141_v20  ;;  %v7165_v1 = vor.u32 %v8538_v41, %v7164_v50 }
 0x261   : > { %v2397_v19 = vpop.f32.mrf.mxu2 }
 0x262   : > { %2961 = vmatmul.bf16.gmra.mxu1 %v7141_v20  ;;  %v11008_v61 = vadd.f32 %v2486_v17, %v2397_v19 }
 0x263   : > { %v2451_v18 = vpop.f32.mrf.mxu1  ;;  %v2488_v26 = vpop.f32.mrf.mxu3  ;;  %v8598_v10 = vld [vmem:[#allocation2 + $0x190] sm:$0xf0] }
 0x265   : > { %v11006_v7 = vpop.f32.mrf.mxu0 }
 0x267   : > { %2783 = vmatmul.bf16.gmra.mxu3 %v10036_v2 }
 0x269   : > { %2872 = vmatmul.bf16.gmra.mxu0 %v10013_v12  ;;  %v2399_v39 = vpop.f32.mrf.mxu2 }
 0x26a   : > { %v11012_v38 = vadd.f32 %v2488_v26, %v2399_v39 }
 0x26b   : > { %v11016_v32 = vpop.f32.mrf.mxu1  ;;  %v2491_v2 = vpop.f32.mrf.mxu3 }
 0x26d   : > { %v2362_v9 = vpop.f32.mrf.mxu0 }
 0x26e   : > { %v11014_v28 = vadd.f32 %v2451_v18, %v2362_v9  ;;  %v13488_v9 = vld [vmem:[#allocation30_spill] sm:$0xff] }
 0x26f   : > { %2534 = vmatmul.bf16.gmra.mxu2 %v7153_v56 }
 0x271   : > { %v2402_v12 = vpop.f32.mrf.mxu2 }
 0x272   : > { %2966 = vmatmul.bf16.gmra.mxu1 %v7153_v56  ;;  %v11020_v30 = vadd.f32 %v2491_v2, %v2402_v12  ;;  %v8683_v2 = vld [vmem:[#allocation6 + $0x1e0] sm:$0xff] }
 0x273   : > { %v2456_v21 = vpop.f32.mrf.mxu1  ;;  %v2493_v20 = vpop.f32.mrf.mxu3  ;;  %3637 = vmatpush.bf16.msra.mxu3 %v8683_v2 }
 0x275   : > { %v11018_v23 = vpop.f32.mrf.mxu0 }
 0x277   : > { %2788 = vmatmul.bf16.gmra.mxu3 %v10168_v5  ;;  %v13487_v5 = vld [vmem:[#allocation31_spill] sm:$0xff] }
 0x279   : > { %2877 = vmatmul.bf16.gmra.mxu0 %v10131_v46  ;;  %v2404_v60 = vpop.f32.mrf.mxu2  ;;  %v7176_v46 = vld [vmem:[#allocation2 + $0x80] sm:$0xf] }
 0x27a   : > { %v11024_v17 = vadd.f32 %v2493_v20, %v2404_v60  ;;  %v7177_v6 = vor.u32 %v8541_v54, %v7176_v46  ;;  %v8691_v20 = vld [vmem:[#allocation6 + $0x220] sm:$0xff]  ;;  %v7188_v54 = vld [vmem:[#allocation2 + $0x98] sm:$0xf] }
 0x27b   : > { %v11028_v53 = vpop.f32.mrf.mxu1  ;;  %3726 = vmatpush.bf16.msra.mxu0 %v8691_v20 }
 0x27c   : > { %v2496_v26 = vpop.f32.mrf.mxu3 }
 0x27d   : > { %v2367_v19 = vpop.f32.mrf.mxu0 }
 0x27e   : > { %v11026_v18 = vadd.f32 %v2456_v21, %v2367_v19 }
 0x27f   : > { %2539 = vmatmul.bf16.gmra.mxu2 %v7165_v1 }
 0x282   : > { %2971 = vmatmul.bf16.gmra.mxu1 %v7165_v1  ;;  %v2407_v56 = vpop.f32.mrf.mxu2 }
 0x283   : > { %v11031_v39 = vadd.f32 %v2496_v26, %v2407_v56  ;;  %v8544_v26 = vld [vmem:[#allocation2 + $0xa0] sm:$0xf0] }
 0x284   : > { %v2498_v41 = vpop.f32.mrf.mxu3  ;;  %v13489_v56 = vld [vmem:[#allocation38_spill] sm:$0xff] }
 0x285   : > { %v11034_v63 = vpop.f32.mrf.mxu0 }
 0x287   : > { %2793 = vmatmul.bf16.gmra.mxu3 %v13487_v5  ;;  %v2461_v12 = vpop.f32.mrf.mxu1  ;;  %v13490_v5 = vld [vmem:[#allocation36_spill] sm:$0xff] }
 0x289   : > { %2882 = vmatmul.bf16.gmra.mxu0 %v13488_v9  ;;  %v7189_v9 = vor.u32 %v8544_v26, %v7188_v54  ;;  %v7200_v26 = vld [vmem:[#allocation2 + $0xb0] sm:$0xf] }
 0x28a   : > { %v2409_v50 = vpop.f32.mrf.mxu2  ;;  %v7201_v54 = vor.u32 %v8547_v49, %v7200_v26  ;;  %v8550_v26 = vld [vmem:[#allocation2 + $0xd0] sm:$0xf0] }
 0x28b   : > { %v11036_v1 = vadd.f32 %v2498_v41, %v2409_v50 }
 0x28d   : > { %v2372_v21 = vpop.f32.mrf.mxu0 }
 0x28e   : > { %v11038_v60 = vadd.f32 %v2461_v12, %v2372_v21 }
 0x28f   : > { %2544 = vmatmul.bf16.gmra.mxu2 %v7177_v6  ;;  %v2463_v19 = vpop.f32.mrf.mxu1 }
 0x292   : > { %2976 = vmatmul.bf16.gmra.mxu1 %v7177_v6 }
 0x293   : > { %v2501_v46 = vpop.f32.mrf.mxu3 }
 0x295   : > { %v2374_v51 = vpop.f32.mrf.mxu0 }
 0x296   : > { %v11042_v2 = vadd.f32 %v2463_v19, %v2374_v51 }
 0x297   : > { %2798 = vmatmul.bf16.gmra.mxu3 %v13489_v56  ;;  %v2412_v41 = vpop.f32.mrf.mxu2  ;;  %v2466_v6 = vpop.f32.mrf.mxu1 }
 0x298   : > { %v11044_v50 = vadd.f32 %v2501_v46, %v2412_v41  ;;  %v8674_v41 = vld [vmem:[#allocation6 + $0x198] sm:$0xff] }
 0x299   : > { %2887 = vmatmul.bf16.gmra.mxu0 %v13490_v5  ;;  %3549 = vmatpush.bf16.msra.mxu2 %v8674_v41 }
 0x29b   : > { %v2503_v12 = vpop.f32.mrf.mxu3 }
 0x29d   : > { %v2377_v21 = vpop.f32.mrf.mxu0 }
 0x29e   : > { %v11046_v20 = vadd.f32 %v2466_v6, %v2377_v21 }
 0x29f   : > { %2549 = vmatmul.bf16.gmra.mxu2 %v7189_v9  ;;  %v2414_v45 = vpop.f32.mrf.mxu2  ;;  %v2468_v19 = vpop.f32.mrf.mxu1 }
 0x2a0   : > { %v11048_v56 = vadd.f32 %v2503_v12, %v2414_v45 }
 0x2a2   : > { %2981 = vmatmul.bf16.gmra.mxu1 %v7189_v9  ;;  %v8682_v9 = vld [vmem:[#allocation6 + $0x1d8] sm:$0xff] }
 0x2a3   : > { %3638 = vmatpush.bf16.msra.mxu3 %v8682_v9 }
 0x2a4   : > { %v2506_v5 = vpop.f32.mrf.mxu3 }
 0x2a5   : > { %v2379_v46 = vpop.f32.mrf.mxu0 }
 0x2a6   : > { %v11052_v51 = vadd.f32 %v2468_v19, %v2379_v46  ;;  %v7212_v19 = vld [vmem:[#allocation2 + $0xc8] sm:$0xf]  ;;  %v13491_v46 = vld [vmem:[#allocation46_spill] sm:$0xff] }
 0x2a7   : > { %2803 = vmatmul.bf16.gmra.mxu3 %v10537_v4  ;;  %v8690_v4 = vld [vmem:[#allocation6 + $0x218] sm:$0xff]  ;;  %v7213_v41 = vor.u32 %v8550_v26, %v7212_v19 }
 0x2a8   : > { %v2417_v6 = vpop.f32.mrf.mxu2  ;;  %3727 = vmatpush.bf16.msra.mxu0 %v8690_v4 }
 0x2a9   : > { %2892 = vmatmul.bf16.gmra.mxu0 %v10512_v24  ;;  %v11054_v45 = vadd.f32 %v2506_v5, %v2417_v6 }
 0x2ac   : > { %v2508_v12 = vpop.f32.mrf.mxu3 }
 0x2ae   : > { %v2471_v21 = vpop.f32.mrf.mxu1 }
 0x2af   : > { %2554 = vmatmul.bf16.gmra.mxu2 %v7201_v54 }
 0x2b0   : > { %v2419_v24 = vpop.f32.mrf.mxu2 }
 0x2b1   : > { %v11058_v40 = vadd.f32 %v2508_v12, %v2419_v24  ;;  %v8553_v24 = vld [vmem:[#allocation2 + $0xe8] sm:$0xf0] }
 0x2b2   : > { %2986 = vmatmul.bf16.gmra.mxu1 %v7201_v54 }
 0x2b4   : > { %v2382_v0 = vpop.f32.mrf.mxu0 }
 0x2b5   : > { %v11056_v49 = vadd.f32 %v2471_v21, %v2382_v0 }
 0x2b6   : > { %v2473_v9 = vpop.f32.mrf.mxu1 }
 0x2b7   : > { %2808 = vmatmul.bf16.gmra.mxu3 %v10653_v31  ;;  %v7224_v31 = vld [vmem:[#allocation2 + $0xe0] sm:$0xf] }
 0x2b8   : > { %v2511_v5 = vpop.f32.mrf.mxu3  ;;  %v7225_v26 = vor.u32 %v8553_v24, %v7224_v31  ;;  %v8556_v31 = vld [vmem:[#allocation2 + $0x100] sm:$0xf0] }
 0x2b9   : > { %2897 = vmatmul.bf16.gmra.mxu0 %v13491_v46  ;;  %v8673_v46 = vld [vmem:[#allocation6 + $0x190] sm:$0xff] }
 0x2ba   : > { %3550 = vmatpush.bf16.msra.mxu2 %v8673_v46  ;;  %v7236_v46 = vld [vmem:[#allocation2 + $0xf8] sm:$0xf] }
 0x2bc   : > { %v2384_v6 = vpop.f32.mrf.mxu0 }
 0x2bd   : > { %v11062_v34 = vadd.f32 %v2473_v9, %v2384_v6  ;;  %v8681_v9 = vld [vmem:[#allocation6 + $0x1d0] sm:$0xff] }
 0x2be   : > { %v2422_v54 = vpop.f32.mrf.mxu2  ;;  %3639 = vmatpush.bf16.msra.mxu3 %v8681_v9  ;;  %v13493_v9 = vld [vmem:[#allocation20_spill] sm:$0xff] }
 0x2bf   : > { %2559 = vmatmul.bf16.gmra.mxu2 %v7213_v41  ;;  %v11064_v4 = vadd.f32 %v2511_v5, %v2422_v54 }
 0x2c0   : > { %v2513_v0 = vpop.f32.mrf.mxu3 }
 0x2c2   : > { %2991 = vmatmul.bf16.gmra.mxu1 %v7213_v41 }
 0x2c6   : > { %v2863_v21 = vpop.f32.mrf.mxu0  ;;  %v2424_v12 = vpop.f32.mrf.mxu2 }
 0x2c7   : > { %v11066_v35 = vadd.f32 %v2513_v0, %v2424_v12  ;;  %2813 = vmatmul.bf16.gmra.mxu3 %v10818_v57  ;;  %v8689_v57 = vld [vmem:[#allocation6 + $0x210] sm:$0xff] }
 0x2c8   : > { %3728 = vmatpush.bf16.msra.mxu0 %v8689_v57 }
 0x2c9   : > { %2902 = vmatmul.bf16.gmra.mxu0 %v10780_v13  ;;  %v2439_v13 = vadd.f32 %v10840_v27, %v10905_v55 }
 0x2ca   : > { %v2774_v19 = vpop.f32.mrf.mxu3 }
 0x2ce   : > { %v2865_v6 = vpop.f32.mrf.mxu0 }
 0x2cf   : > { %2564 = vmatmul.bf16.gmra.mxu2 %v7225_v26 }
 0x2d2   : > { %v2525_v5 = vpop.f32.mrf.mxu2  ;;  %v2776_v3 = vpop.f32.mrf.mxu3  ;;  %2996 = vmatmul.bf16.gmra.mxu1 %v7225_v26 }
 0x2d3   : > { %v2526_v41 = vadd.f32 %v2525_v5, %v10847_v58 }
 0x2d5   : > { %v2775_v54 = vadd.f32 %v2774_v19, %v2526_v41  ;;  %v7237_v19 = vor.u32 %v8556_v31, %v7236_v46  ;;  %v13494_v31 = vld [vmem:[#allocation24_spill] sm:$0xff]  ;;  %v13495_v46 = vld [vmem:[#allocation23_spill] sm:$0xff] }
 0x2d6   : > { %v2868_v12 = vpop.f32.mrf.mxu0 }
 0x2d7   : > { %v11071_v0 = vadd.f32 %v2863_v21, %v2775_v54  ;;  %2818 = vmatmul.bf16.gmra.mxu3 %v13492_v29  ;;  %v2444_v29 = vadd.f32 %v10948_v25, %v10990_v8 }
 0x2d9   : > { %2907 = vmatmul.bf16.gmra.mxu0 %v13493_v9 }
 0x2da   : > { %v2527_v24 = vpop.f32.mrf.mxu2  ;;  %v2779_v5 = vpop.f32.mrf.mxu3 }
 0x2db   : > { %v2528_v44 = vadd.f32 %v2527_v24, %v2439_v13 }
 0x2dd   : > { %v2777_v58 = vadd.f32 %v2776_v3, %v2528_v44  ;;  %v8559_v44 = vld [vmem:[#allocation2 + $0x118] sm:$0xf0] }
 0x2de   : > { %v2870_v26 = vpop.f32.mrf.mxu0 }
 0x2df   : > { %v11077_v21 = vadd.f32 %v2865_v6, %v2777_v58  ;;  %2569 = vmatmul.bf16.gmra.mxu2 %v7237_v19  ;;  %v7248_v6 = vld [vmem:[#allocation2 + $0x110] sm:$0xf] }
 0x2e0   : > { %v7249_v58 = vor.u32 %v8559_v44, %v7248_v6 }
 0x2e2   : > { %v2530_v41 = vpop.f32.mrf.mxu2  ;;  %v2781_v54 = vpop.f32.mrf.mxu3  ;;  %3001 = vmatmul.bf16.gmra.mxu1 %v7237_v19  ;;  %v8680_v19 = vld [vmem:[#allocation6 + $0x1c8] sm:$0xff] }
 0x2e3   : > { %v2531_v27 = vadd.f32 %v2530_v41, %v10960_v37  ;;  %v11088_v41 = vpop.f32.mrf.mxu1  ;;  %3640 = vmatpush.bf16.msra.mxu3 %v8680_v19 }
 0x2e5   : > { %v2780_v55 = vadd.f32 %v2779_v5, %v2531_v27 }
 0x2e6   : > { %v2873_v13 = vpop.f32.mrf.mxu0 }
 0x2e7   : > { %v11080_v57 = vadd.f32 %v2868_v12, %v2780_v55  ;;  %2823 = vmatmul.bf16.gmra.mxu3 %v13494_v31  ;;  %v8672_v12 = vld [vmem:[#allocation6 + $0x188] sm:$0xff]  ;;  %v8562_v31 = vld [vmem:[#allocation2 + $0x130] sm:$0xf0] }
 0x2e8   : > { %3551 = vmatpush.bf16.msra.mxu2 %v8672_v12  ;;  %v7260_v12 = vld [vmem:[#allocation2 + $0x128] sm:$0xf] }
 0x2e9   : > { %2912 = vmatmul.bf16.gmra.mxu0 %v13495_v46 }
 0x2ea   : > { %v2532_v24 = vpop.f32.mrf.mxu2  ;;  %v2784_v37 = vpop.f32.mrf.mxu3 }
 0x2eb   : > { %v2533_v3 = vadd.f32 %v2532_v24, %v2444_v29  ;;  %v11095_v6 = vpop.f32.mrf.mxu1 }
 0x2ed   : > { %v2782_v9 = vadd.f32 %v2781_v54, %v2533_v3  ;;  %v8688_v54 = vld [vmem:[#allocation6 + $0x208] sm:$0xff] }
 0x2ee   : > { %v2875_v25 = vpop.f32.mrf.mxu0  ;;  %3729 = vmatpush.bf16.msra.mxu0 %v8688_v54 }
 0x2ef   : > { %v11086_v5 = vadd.f32 %v2870_v26, %v2782_v9  ;;  %2574 = vmatmul.bf16.gmra.mxu2 %v7249_v58  ;;  %v2449_v26 = vadd.f32 %v11004_v59, %v11006_v7  ;;  %v13496_v9 = vld [vmem:[#allocation28_spill] sm:$0xff] }
 0x2f2   : > { %v2535_v8 = vpop.f32.mrf.mxu2  ;;  %v2786_v29 = vpop.f32.mrf.mxu3  ;;  %3006 = vmatmul.bf16.gmra.mxu1 %v7249_v58 }
 0x2f3   : > { %v2536_v27 = vadd.f32 %v2535_v8, %v11002_v62  ;;  %v13497_v62 = vld [vmem:[#allocation27_spill] sm:$0xff] }
 0x2f5   : > { %v2785_v55 = vadd.f32 %v2784_v37, %v2536_v27  ;;  %v11102_v27 = vpop.f32.mrf.mxu1 }
 0x2f6   : > { %v2878_v44 = vpop.f32.mrf.mxu0 }
 0x2f7   : > { %v11091_v24 = vadd.f32 %v2873_v13, %v2785_v55  ;;  %2828 = vmatmul.bf16.gmra.mxu3 %v13496_v9  ;;  %v7261_v13 = vor.u32 %v8562_v31, %v7260_v12  ;;  %v13498_v9 = vld [vmem:[#allocation34_spill] sm:$0xff] }
 0x2f8   : > { %v7272_v12 = vld [vmem:[#allocation2 + $0x140] sm:$0xf] }
 0x2f9   : > { %2917 = vmatmul.bf16.gmra.mxu0 %v13497_v62  ;;  %v13499_v62 = vld [vmem:[#allocation32_spill] sm:$0xff] }
 0x2fa   : > { %v2537_v3 = vpop.f32.mrf.mxu2  ;;  %v2789_v19 = vpop.f32.mrf.mxu3 }
 0x2fb   : > { %v2538_v46 = vadd.f32 %v2537_v3, %v2449_v26  ;;  %v2454_v3 = vadd.f32 %v11016_v32, %v11018_v23 }
 0x2fd   : > { %v2787_v37 = vadd.f32 %v2786_v29, %v2538_v46  ;;  %v8565_v46 = vld [vmem:[#allocation2 + $0x148] sm:$0xf0] }
 0x2fe   : > { %v2880_v8 = vpop.f32.mrf.mxu0 }
 0x2ff   : > { %v11099_v58 = vadd.f32 %v2875_v25, %v2787_v37  ;;  %2579 = vmatmul.bf16.gmra.mxu2 %v7261_v13  ;;  %v7273_v37 = vor.u32 %v8565_v46, %v7272_v12  ;;  %v2459_v46 = vadd.f32 %v11028_v53, %v11034_v63 }
 0x302   : > { %v2540_v59 = vpop.f32.mrf.mxu2  ;;  %v2791_v54 = vpop.f32.mrf.mxu3  ;;  %3011 = vmatmul.bf16.gmra.mxu1 %v7261_v13  ;;  %v8671_v13 = vld [vmem:[#allocation6 + $0x180] sm:$0xff] }
 0x303   : > { %v2541_v7 = vadd.f32 %v2540_v59, %v11014_v28  ;;  %3552 = vmatpush.bf16.msra.mxu2 %v8671_v13  ;;  %v13500_v13 = vld [vmem:[#allocation39_spill] sm:$0xff] }
 0x305   : > { %v2790_v55 = vadd.f32 %v2789_v19, %v2541_v7  ;;  %v11110_v19 = vpop.f32.mrf.mxu1  ;;  %v8679_v7 = vld [vmem:[#allocation6 + $0x1c0] sm:$0xff] }
 0x306   : > { %v2883_v29 = vpop.f32.mrf.mxu0  ;;  %3641 = vmatpush.bf16.msra.mxu3 %v8679_v7  ;;  %v7284_v7 = vld [vmem:[#allocation2 + $0x158] sm:$0xf] }
 0x307   : > { %v11104_v26 = vadd.f32 %v2878_v44, %v2790_v55  ;;  %2833 = vmatmul.bf16.gmra.mxu3 %v13498_v9 }
 0x309   : > { %2922 = vmatmul.bf16.gmra.mxu0 %v13499_v62  ;;  %v8568_v62 = vld [vmem:[#allocation2 + $0x160] sm:$0xf0] }
 0x30a   : > { %v2542_v31 = vpop.f32.mrf.mxu2  ;;  %v2794_v59 = vpop.f32.mrf.mxu3 }
 0x30b   : > { %v2543_v25 = vadd.f32 %v2542_v31, %v2454_v3 }
 0x30d   : > { %v2792_v28 = vadd.f32 %v2791_v54, %v2543_v25  ;;  %v8687_v54 = vld [vmem:[#allocation6 + $0x200] sm:$0xff] }
 0x30e   : > { %v2885_v32 = vpop.f32.mrf.mxu0  ;;  %3730 = vmatpush.bf16.msra.mxu0 %v8687_v54 }
 0x30f   : > { %v11112_v44 = vadd.f32 %v2880_v8, %v2792_v28  ;;  %2584 = vmatmul.bf16.gmra.mxu2 %v7273_v37  ;;  %v11119_v8 = vpop.f32.mrf.mxu1 }
 0x312   : > { %v2545_v23 = vpop.f32.mrf.mxu2  ;;  %v2796_v31 = vpop.f32.mrf.mxu3  ;;  %3016 = vmatmul.bf16.gmra.mxu1 %v7273_v37 }
 0x313   : > { %v2546_v55 = vadd.f32 %v2545_v23, %v11026_v18  ;;  %v13501_v18 = vld [vmem:[#allocation37_spill] sm:$0xff] }
 0x315   : > { %v2795_v3 = vadd.f32 %v2794_v59, %v2546_v55 }
 0x316   : > { %v2888_v25 = vpop.f32.mrf.mxu0 }
 0x317   : > { %v11115_v9 = vadd.f32 %v2883_v29, %v2795_v3  ;;  %2838 = vmatmul.bf16.gmra.mxu3 %v13500_v13  ;;  %v7285_v29 = vor.u32 %v8568_v62, %v7284_v7  ;;  %v11125_v63 = vpop.f32.mrf.mxu1  ;;  %v13502_v62 = vld [vmem:[#allocation44_spill] sm:$0xff] }
 0x319   : > { %2927 = vmatmul.bf16.gmra.mxu0 %v13501_v18  ;;  %v8571_v18 = vld [vmem:[#allocation2 + $0x178] sm:$0xf0] }
 0x31a   : > { %v2547_v12 = vpop.f32.mrf.mxu2  ;;  %v2799_v23 = vpop.f32.mrf.mxu3 }
 0x31b   : > { %v2548_v28 = vadd.f32 %v2547_v12, %v2459_v46 }
 0x31d   : > { %v2797_v59 = vadd.f32 %v2796_v31, %v2548_v28  ;;  %v13503_v28 = vld [vmem:[#allocation43_spill] sm:$0xff] }
 0x31e   : > { %v2890_v55 = vpop.f32.mrf.mxu0 }
 0x31f   : > { %v11123_v37 = vadd.f32 %v2885_v32, %v2797_v59  ;;  %2589 = vmatmul.bf16.gmra.mxu2 %v7285_v29  ;;  %v7296_v32 = vld [vmem:[#allocation2 + $0x170] sm:$0xf]  ;;  %v11133_v7 = vpop.f32.mrf.mxu1 }
 0x320   : > { %v7297_v52 = vor.u32 %v8571_v18, %v7296_v32 }
 0x322   : > { %v2550_v53 = vpop.f32.mrf.mxu2  ;;  %v2801_v11 = vpop.f32.mrf.mxu3  ;;  %3021 = vmatmul.bf16.gmra.mxu1 %v7285_v29 }
 0x323   : > { %v2551_v3 = vadd.f32 %v2550_v53, %v11038_v60 }
 0x325   : > { %v2800_v54 = vadd.f32 %v2799_v23, %v2551_v3 }
 0x326   : > { %v2893_v12 = vpop.f32.mrf.mxu0 }
 0x327   : > { %v11128_v46 = vadd.f32 %v2888_v25, %v2800_v54  ;;  %2843 = vmatmul.bf16.gmra.mxu3 %v13502_v62 }
 0x329   : > { %2932 = vmatmul.bf16.gmra.mxu0 %v13503_v28 }
 0x32a   : > { %v2552_v13 = vpop.f32.mrf.mxu2  ;;  %v2804_v60 = vpop.f32.mrf.mxu3 }
 0x32b   : > { %v2553_v31 = vadd.f32 %v2552_v13, %v11042_v2  ;;  %v11138_v2 = vpop.f32.mrf.mxu1 }
 0x32d   : > { %v2802_v59 = vadd.f32 %v2801_v11, %v2553_v31 }
 0x32e   : > { %v2895_v25 = vpop.f32.mrf.mxu0 }
 0x32f   : > { %v11135_v23 = vadd.f32 %v2890_v55, %v2802_v59  ;;  %2594 = vmatmul.bf16.gmra.mxu2 %v7297_v52  ;;  %v7308_v55 = vld [vmem:[#allocation2 + $0x188] sm:$0xf] }
 0x330   : > { %v7309_v31 = vor.u32 %v8598_v10, %v7308_v55  ;;  %v7516_v10 = vld [vmem:[#allocation2 + $0x30] sm:$0xf]  ;;  %v8624_v55 = vld [vmem:[#allocation2 + $0x38] sm:$0xf0] }
 0x332   : > { %v2555_v29 = vpop.f32.mrf.mxu2  ;;  %v2806_v54 = vpop.f32.mrf.mxu3  ;;  %3026 = vmatmul.bf16.gmra.mxu1 %v7297_v52 }
 0x333   : > { %v2556_v53 = vadd.f32 %v2555_v29, %v11046_v20 }
 0x335   : > { %v2805_v3 = vadd.f32 %v2804_v60, %v2556_v53  ;;  %v8623_v53 = vld [vmem:[#allocation2 + $0x34] sm:$0xf] }
 0x336   : > { %v2898_v62 = vpop.f32.mrf.mxu0 }
 0x337   : > { %v11140_v13 = vadd.f32 %v2893_v12, %v2805_v3  ;;  %2848 = vmatmul.bf16.gmra.mxu3 %v10709_v42  ;;  %v7518_v3 = vld [vmem:[#allocation2 + $0x3c] sm:$0xf0]  ;;  %v8625_v42 = vld [vmem:[#allocation2 + $0x40] sm:$0xf0] }
 0x339   : > { %2937 = vmatmul.bf16.gmra.mxu0 %v10675_v43  ;;  %v7524_v43 = vld [vmem:[#allocation2 + $0x38] sm:$0xf] }
 0x33a   : > { %v2557_v28 = vpop.f32.mrf.mxu2  ;;  %v2809_v20 = vpop.f32.mrf.mxu3 }
 0x33b   : > { %v2558_v11 = vadd.f32 %v2557_v28, %v11052_v51  ;;  %v7521_v28 = vor.u32 %v8623_v53, %v7518_v3  ;;  %v8626_v3 = vld [vmem:[#allocation2 + $0x4c] sm:$0xf] }
 0x33d   : > { %v2807_v18 = vadd.f32 %v2806_v54, %v2558_v11  ;;  %v7525_v11 = vor.u32 %v8625_v42, %v7524_v43 }
 0x33e   : > { %v2900_v59 = vpop.f32.mrf.mxu0 }
 0x33f   : > { %v11145_v32 = vadd.f32 %v2895_v25, %v2807_v18  ;;  %2599 = vmatmul.bf16.gmra.mxu2 %v7309_v31 }
 0x342   : > { %v2560_v12 = vpop.f32.mrf.mxu2  ;;  %v2811_v29 = vpop.f32.mrf.mxu3 }
 0x343   : > { %v2561_v52 = vadd.f32 %v2560_v12, %v11056_v49  ;;  %v7517_v49 = vor.u32 %v8624_v55, %v7516_v10  ;;  %v7528_v10 = vld [vmem:[#allocation2 + $0x48] sm:$0xf]  ;;  %v8627_v55 = vld [vmem:[#allocation2 + $0x50] sm:$0xf0] }
 0x345   : > { %v2810_v60 = vadd.f32 %v2809_v20, %v2561_v52 }
 0x346   : > { %v2903_v14 = vpop.f32.mrf.mxu0 }
 0x347   : > { %v11148_v51 = vadd.f32 %v2898_v62, %v2810_v60  ;;  %3642 = vmatmul.bf16.vlgmr.msra.gmra.mxu3 %v7521_v28  ;;  %v2479_v28 = vadd.f32 %v10907_v48, %v10946_v33 }
 0x349   : > { %3731 = vmatmul.bf16.vlgmr.msra.gmra.mxu0 %v7525_v11 }
 0x34a   : > { %v2562_v54 = vpop.f32.mrf.mxu2  ;;  %v2814_v31 = vpop.f32.mrf.mxu3 }
 0x34b   : > { %v2563_v25 = vadd.f32 %v2562_v54, %v11062_v34  ;;  %v8628_v34 = vld [vmem:[#allocation2 + $0x58] sm:$0xf0]  ;;  %v7536_v54 = vld [vmem:[#allocation2 + $0x50] sm:$0xf] }
 0x34c   : > { %v7537_v11 = vor.u32 %v8628_v34, %v7536_v54  ;;  %v8631_v34 = vld [vmem:[#allocation2 + $0x70] sm:$0xf0]  ;;  %v7548_v54 = vld [vmem:[#allocation2 + $0x68] sm:$0xf] }
 0x34d   : > { %v2812_v18 = vadd.f32 %v2811_v29, %v2563_v25  ;;  %v7533_v29 = vor.u32 %v8626_v3, %v7530_v16 }
 0x34e   : > { %v2905_v62 = vpop.f32.mrf.mxu0 }
 0x34f   : > { %v11151_v20 = vadd.f32 %v2900_v59, %v2812_v18  ;;  %3553 = vmatmul.bf16.vlgmr.msra.gmra.mxu2 %v7517_v49  ;;  %v7529_v18 = vor.u32 %v8627_v55, %v7528_v10  ;;  %v7549_v10 = vor.u32 %v8631_v34, %v7548_v54  ;;  %v7552_v54 = vld [vmem:[#allocation2 + $0x78] sm:$0xf] }
 0x352   : > { %v2565_v12 = vpop.f32.mrf.mxu2  ;;  %v2816_v53 = vpop.f32.mrf.mxu3 }
 0x353   : > { %v2566_v52 = vadd.f32 %v2565_v12, %v10903_v15 }
 0x355   : > { %v2815_v60 = vadd.f32 %v2814_v31, %v2566_v52  ;;  %v8629_v52 = vld [vmem:[#allocation2 + $0x64] sm:$0xf] }
 0x356   : > { %v2908_v43 = vpop.f32.mrf.mxu0 }
 0x357   : > { %v11154_v42 = vadd.f32 %v2903_v14, %v2815_v60  ;;  %3647 = vmatmul.bf16.gmra.mxu3 %v7533_v29  ;;  %v7542_v60 = vld [vmem:[#allocation2 + $0x6c] sm:$0xf0] }
 0x359   : > { %3736 = vmatmul.bf16.gmra.mxu0 %v7537_v11 }
 0x35a   : > { %v2567_v59 = vpop.f32.mrf.mxu2  ;;  %v2819_v49 = vpop.f32.mrf.mxu3 }
 0x35b   : > { %v2568_v25 = vadd.f32 %v2567_v59, %v2479_v28  ;;  %v2484_v28 = vadd.f32 %v10995_v22, %v11000_v36  ;;  %v7540_v59 = vld [vmem:[#allocation2 + $0x60] sm:$0xf] }
 0x35d   : > { %v2817_v15 = vadd.f32 %v2816_v53, %v2568_v25  ;;  %v7545_v53 = vor.u32 %v8629_v52, %v7542_v60  ;;  %v8630_v25 = vld [vmem:[#allocation2 + $0x68] sm:$0xf0] }
 0x35e   : > { %v2910_v14 = vpop.f32.mrf.mxu0  ;;  %v7541_v55 = vor.u32 %v8630_v25, %v7540_v59  ;;  %v8634_v60 = vld [vmem:[#allocation2 + $0x88] sm:$0xf0]  ;;  %v8633_v59 = vld [vmem:[#allocation2 + $0x80] sm:$0xf0] }
 0x35f   : > { %v11158_v31 = vadd.f32 %v2905_v62, %v2817_v15  ;;  %3558 = vmatmul.bf16.gmra.mxu2 %v7529_v18 }
 0x362   : > { %v2570_v12 = vpop.f32.mrf.mxu2  ;;  %v2821_v33 = vpop.f32.mrf.mxu3 }
 0x363   : > { %v2571_v48 = vadd.f32 %v2570_v12, %v10988_v47 }
 0x365   : > { %v2820_v16 = vadd.f32 %v2819_v49, %v2571_v48  ;;  %v8632_v48 = vld [vmem:[#allocation2 + $0x7c] sm:$0xf] }
 0x366   : > { %v2913_v29 = vpop.f32.mrf.mxu0 }
 0x367   : > { %v11161_v3 = vadd.f32 %v2908_v43, %v2820_v16  ;;  %3652 = vmatmul.bf16.gmra.mxu3 %v7545_v53  ;;  %v7554_v16 = vld [vmem:[#allocation2 + $0x84] sm:$0xf0]  ;;  %v7560_v53 = vld [vmem:[#allocation2 + $0x80] sm:$0xf] }
 0x368   : > { %v7557_v34 = vor.u32 %v8632_v48, %v7554_v16 }
 0x369   : > { %3741 = vmatmul.bf16.gmra.mxu0 %v7549_v10 }
 0x36a   : > { %v2572_v62 = vpop.f32.mrf.mxu2  ;;  %v2824_v15 = vpop.f32.mrf.mxu3 }
 0x36b   : > { %v2573_v11 = vadd.f32 %v2572_v62, %v2484_v28  ;;  %v7561_v62 = vor.u32 %v8634_v60, %v7560_v53  ;;  %v7564_v53 = vld [vmem:[#allocation2 + $0x90] sm:$0xf] }
 0x36d   : > { %v2822_v47 = vadd.f32 %v2821_v33, %v2573_v11 }
 0x36e   : > { %v2915_v43 = vpop.f32.mrf.mxu0 }
 0x36f   : > { %v11165_v18 = vadd.f32 %v2910_v14, %v2822_v47  ;;  %3563 = vmatmul.bf16.gmra.mxu2 %v7541_v55 }
 0x372   : > { %v2575_v49 = vpop.f32.mrf.mxu2  ;;  %v2826_v12 = vpop.f32.mrf.mxu3 }
 0x373   : > { %v2576_v22 = vadd.f32 %v2575_v49, %v11008_v61  ;;  %v7553_v61 = vor.u32 %v8633_v59, %v7552_v54  ;;  %v8636_v54 = vld [vmem:[#allocation2 + $0x98] sm:$0xf0] }
 0x375   : > { %v2825_v36 = vadd.f32 %v2824_v15, %v2576_v22  ;;  %v8635_v22 = vld [vmem:[#allocation2 + $0x94] sm:$0xf] }
 0x376   : > { %v2918_v28 = vpop.f32.mrf.mxu0 }
 0x377   : > { %v11168_v52 = vadd.f32 %v2913_v29, %v2825_v36  ;;  %3657 = vmatmul.bf16.gmra.mxu3 %v7557_v34  ;;  %v7566_v36 = vld [vmem:[#allocation2 + $0x9c] sm:$0xf0]  ;;  %v7572_v34 = vld [vmem:[#allocation2 + $0x98] sm:$0xf] }
 0x378   : > { %v7569_v16 = vor.u32 %v8635_v22, %v7566_v36  ;;  %v7578_v22 = vld [vmem:[#allocation2 + $0xb4] sm:$0xf0] }
 0x379   : > { %3746 = vmatmul.bf16.gmra.mxu0 %v7561_v62  ;;  %v11177_v62 = vpop.f32.mrf.mxu1 }
 0x37a   : > { %v2577_v33 = vpop.f32.mrf.mxu2  ;;  %v2829_v11 = vpop.f32.mrf.mxu3 }
 0x37b   : > { %v2578_v14 = vadd.f32 %v2577_v33, %v11012_v38  ;;  %v8637_v38 = vld [vmem:[#allocation2 + $0xa0] sm:$0xf0] }
 0x37c   : > { %v7573_v33 = vor.u32 %v8637_v38, %v7572_v34  ;;  %v8640_v38 = vld [vmem:[#allocation2 + $0xb8] sm:$0xf0]  ;;  %v7584_v34 = vld [vmem:[#allocation2 + $0xb0] sm:$0xf] }
 0x37d   : > { %v2827_v10 = vadd.f32 %v2826_v12, %v2578_v14  ;;  %v7565_v14 = vor.u32 %v8636_v54, %v7564_v53  ;;  %v7585_v53 = vor.u32 %v8640_v38, %v7584_v34  ;;  %v7590_v38 = vld [vmem:[#allocation2 + $0xcc] sm:$0xf0] }
 0x37e   : > { %v2920_v29 = vpop.f32.mrf.mxu0 }
 0x37f   : > { %v11171_v25 = vadd.f32 %v2915_v43, %v2827_v10  ;;  %3568 = vmatmul.bf16.gmra.mxu2 %v7553_v61 }
 0x382   : > { %v2580_v47 = vpop.f32.mrf.mxu2  ;;  %v2831_v49 = vpop.f32.mrf.mxu3 }
 0x383   : > { %v2581_v55 = vadd.f32 %v2580_v47, %v11020_v30 }
 0x385   : > { %v2830_v15 = vadd.f32 %v2829_v11, %v2581_v55 }
 0x386   : > { %v2923_v60 = vpop.f32.mrf.mxu0 }
 0x387   : > { %v11174_v48 = vadd.f32 %v2918_v28, %v2830_v15  ;;  %3662 = vmatmul.bf16.gmra.mxu3 %v7569_v16  ;;  %v8638_v15 = vld [vmem:[#allocation2 + $0xac] sm:$0xf] }
 0x388   : > { %v7581_v16 = vor.u32 %v8638_v15, %v7578_v22  ;;  %v8641_v22 = vld [vmem:[#allocation2 + $0xc4] sm:$0xf] }
 0x389   : > { %3751 = vmatmul.bf16.gmra.mxu0 %v7573_v33  ;;  %v7593_v34 = vor.u32 %v8641_v22, %v7590_v38 }
 0x38a   : > { %v2582_v12 = vpop.f32.mrf.mxu2  ;;  %v2834_v59 = vpop.f32.mrf.mxu3 }
 0x38b   : > { %v2583_v43 = vadd.f32 %v2582_v12, %v11024_v17  ;;  %v11182_v17 = vpop.f32.mrf.mxu1 }
 0x38d   : > { %v2832_v30 = vadd.f32 %v2831_v49, %v2583_v43  ;;  %v8639_v43 = vld [vmem:[#allocation2 + $0xb0] sm:$0xf0] }
 0x38e   : > { %v2925_v28 = vpop.f32.mrf.mxu0 }
 0x38f   : > { %v11179_v10 = vadd.f32 %v2920_v29, %v2832_v30  ;;  %3573 = vmatmul.bf16.gmra.mxu2 %v7565_v14  ;;  %v7576_v29 = vld [vmem:[#allocation2 + $0xa8] sm:$0xf] }
 0x390   : > { %v7577_v54 = vor.u32 %v8639_v43, %v7576_v29 }
 0x391   : > { %13504 = vst [vmem:[#allocation31_spill] sm:$0xff] %v11179_v10 }
 0x392   : > { %v2585_v61 = vpop.f32.mrf.mxu2  ;;  %v2836_v55 = vpop.f32.mrf.mxu3 }
 0x393   : > { %v2586_v11 = vadd.f32 %v2585_v61, %v11031_v39 }
 0x395   : > { %v2835_v47 = vadd.f32 %v2834_v59, %v2586_v11 }
 0x396   : > { %v2928_v49 = vpop.f32.mrf.mxu0 }
 0x397   : > { %v11184_v36 = vadd.f32 %v2923_v60, %v2835_v47  ;;  %3667 = vmatmul.bf16.gmra.mxu3 %v7581_v16  ;;  %v11189_v60 = vpop.f32.mrf.mxu1  ;;  %v8643_v16 = vld [vmem:[#allocation2 + $0xd0] sm:$0xf0] }
 0x399   : > { %13505 = vst [vmem:[#allocation30_spill] sm:$0xff] %v11184_v36  ;;  %3756 = vmatmul.bf16.gmra.mxu0 %v7585_v53 }
 0x39a   : > { %v2587_v12 = vpop.f32.mrf.mxu2  ;;  %v2839_v30 = vpop.f32.mrf.mxu3 }
 0x39b   : > { %v2588_v33 = vadd.f32 %v2587_v12, %v11036_v1  ;;  %v7596_v12 = vld [vmem:[#allocation2 + $0xc8] sm:$0xf] }
 0x39c   : > { %v7597_v53 = vor.u32 %v8643_v16, %v7596_v12  ;;  %v8644_v12 = vld [vmem:[#allocation2 + $0xdc] sm:$0xf] }
 0x39d   : > { %v2837_v39 = vadd.f32 %v2836_v55, %v2588_v33 }
 0x39e   : > { %v2930_v59 = vpop.f32.mrf.mxu0 }
 0x39f   : > { %v11187_v14 = vadd.f32 %v2925_v28, %v2837_v39  ;;  %3578 = vmatmul.bf16.gmra.mxu2 %v7577_v54  ;;  %v7588_v28 = vld [vmem:[#allocation2 + $0xc0] sm:$0xf]  ;;  %v11194_v33 = vpop.f32.mrf.mxu1  ;;  %v8642_v39 = vld [vmem:[#allocation2 + $0xc8] sm:$0xf0] }
 0x3a0   : > { %v7589_v54 = vor.u32 %v8642_v39, %v7588_v28  ;;  %v7608_v28 = vld [vmem:[#allocation2 + $0xe0] sm:$0xf] }
 0x3a1   : > { %13506 = vst [vmem:[#allocation38_spill] sm:$0xff] %v11187_v14 }
 0x3a2   : > { %v2590_v61 = vpop.f32.mrf.mxu2  ;;  %v2841_v15 = vpop.f32.mrf.mxu3 }
 0x3a3   : > { %v2591_v11 = vadd.f32 %v2590_v61, %v11044_v50 }
 0x3a5   : > { %v2840_v47 = vadd.f32 %v2839_v30, %v2591_v11 }
 0x3a6   : > { %v2933_v55 = vpop.f32.mrf.mxu0 }
 0x3a7   : > { %v11192_v1 = vadd.f32 %v2928_v49, %v2840_v47  ;;  %3672 = vmatmul.bf16.gmra.mxu3 %v7593_v34  ;;  %v11200_v22 = vpop.f32.mrf.mxu1  ;;  %v8646_v34 = vld [vmem:[#allocation2 + $0xe8] sm:$0xf0] }
 0x3a9   : > { %13507 = vst [vmem:[#allocation36_spill] sm:$0xff] %v11192_v1  ;;  %3761 = vmatmul.bf16.gmra.mxu0 %v7597_v53  ;;  %v7602_v1 = vld [vmem:[#allocation2 + $0xe4] sm:$0xf0] }
 0x3aa   : > { %v2592_v29 = vpop.f32.mrf.mxu2  ;;  %v2844_v30 = vpop.f32.mrf.mxu3 }
 0x3ab   : > { %v2593_v43 = vadd.f32 %v2592_v29, %v11048_v56  ;;  %v7605_v29 = vor.u32 %v8644_v12, %v7602_v1 }
 0x3ad   : > { %v2842_v50 = vadd.f32 %v2841_v15, %v2593_v43  ;;  %v7609_v43 = vor.u32 %v8646_v34, %v7608_v28  ;;  %v8647_v34 = vld [vmem:[#allocation2 + $0xf4] sm:$0xf]  ;;  %v7614_v28 = vld [vmem:[#allocation2 + $0xfc] sm:$0xf0] }
 0x3ae   : > { %v2935_v49 = vpop.f32.mrf.mxu0 }
 0x3af   : > { %v11197_v61 = vadd.f32 %v2930_v59, %v2842_v50  ;;  %3583 = vmatmul.bf16.gmra.mxu2 %v7589_v54  ;;  %v7600_v59 = vld [vmem:[#allocation2 + $0xd8] sm:$0xf]  ;;  %v8645_v50 = vld [vmem:[#allocation2 + $0xe0] sm:$0xf0] }
 0x3b0   : > { %v7601_v54 = vor.u32 %v8645_v50, %v7600_v59 }
 0x3b1   : > { %13508 = vst [vmem:[#allocation46_spill] sm:$0xff] %v11197_v61 }
 0x3b2   : > { %v2595_v11 = vpop.f32.mrf.mxu2  ;;  %v2846_v16 = vpop.f32.mrf.mxu3 }
 0x3b3   : > { %v2596_v47 = vadd.f32 %v2595_v11, %v11054_v45  ;;  %v11205_v11 = vpop.f32.mrf.mxu1 }
 0x3b5   : > { %v2845_v38 = vadd.f32 %v2844_v30, %v2596_v47 }
 0x3b6   : > { %v2938_v15 = vpop.f32.mrf.mxu0 }
 0x3b7   : > { %v11202_v56 = vadd.f32 %v2933_v55, %v2845_v38  ;;  %3677 = vmatmul.bf16.gmra.mxu3 %v7605_v29  ;;  %v8649_v29 = vld [vmem:[#allocation2 + $0x100] sm:$0xf0] }
 0x3b9   : > { %13509 = vst [vmem:[#allocation21_spill] sm:$0xff] %v11202_v56  ;;  %3766 = vmatmul.bf16.gmra.mxu0 %v7609_v43  ;;  %v7620_v43 = vld [vmem:[#allocation2 + $0xf8] sm:$0xf] }
 0x3ba   : > { %v2597_v53 = vpop.f32.mrf.mxu2  ;;  %v2849_v30 = vpop.f32.mrf.mxu3  ;;  %v7621_v50 = vor.u32 %v8649_v29, %v7620_v43 }
 0x3bb   : > { %v2598_v39 = vadd.f32 %v2597_v53, %v11058_v40  ;;  %v11212_v53 = vpop.f32.mrf.mxu1 }
 0x3bd   : > { %v2847_v45 = vadd.f32 %v2846_v16, %v2598_v39  ;;  %v7617_v16 = vor.u32 %v8647_v34, %v7614_v28  ;;  %v2953_v28 = vadd.f32 %v11088_v41, %v11071_v0  ;;  %v2955_v0 = vadd.f32 %v11095_v6, %v11077_v21  ;;  %v8655_v21 = vld [vmem:[#allocation2 + $0x130] sm:$0xf0] }
 0x3be   : > { %v2940_v55 = vpop.f32.mrf.mxu0 }
 0x3bf   : > { %v11207_v47 = vadd.f32 %v2935_v49, %v2847_v45  ;;  %3588 = vmatmul.bf16.gmra.mxu2 %v7601_v54  ;;  %v7612_v49 = vld [vmem:[#allocation2 + $0xf0] sm:$0xf]  ;;  %v8648_v54 = vld [vmem:[#allocation2 + $0xf8] sm:$0xf0] }
 0x3c1   : > { %13510 = vst [vmem:[#allocation20_spill] sm:$0xff] %v11207_v47 }
 0x3c2   : > { %v2600_v1 = vpop.f32.mrf.mxu2  ;;  %v2851_v56 = vpop.f32.mrf.mxu3 }
 0x3c3   : > { %v2601_v38 = vadd.f32 %v2600_v1, %v11064_v4 }
 0x3c5   : > { %v2850_v12 = vadd.f32 %v2849_v30, %v2601_v38  ;;  %v7613_v30 = vor.u32 %v8648_v54, %v7612_v49  ;;  %v7624_v54 = vld [vmem:[#allocation2 + $0x108] sm:$0xf] }
 0x3c6   : > { %v3732_v59 = vpop.f32.mrf.mxu0 }
 0x3c7   : > { %v11210_v40 = vadd.f32 %v2938_v15, %v2850_v12  ;;  %3682 = vmatmul.bf16.gmra.mxu3 %v7617_v16  ;;  %v7626_v16 = vld [vmem:[#allocation2 + $0x114] sm:$0xf0] }
 0x3c9   : > { %13511 = vst [vmem:[#allocation24_spill] sm:$0xff] %v11210_v40  ;;  %3771 = vmatmul.bf16.gmra.mxu0 %v7621_v50  ;;  %v11217_v40 = vpop.f32.mrf.mxu1 }
 0x3ca   : > { %v2602_v39 = vpop.f32.mrf.mxu2  ;;  %v3643_v1 = vpop.f32.mrf.mxu3 }
 0x3cb   : > { %v2603_v45 = vadd.f32 %v2602_v39, %v11066_v35  ;;  %v8650_v35 = vld [vmem:[#allocation2 + $0x10c] sm:$0xf] }
 0x3cc   : > { %v7629_v49 = vor.u32 %v8650_v35, %v7626_v16 }
 0x3cd   : > { %v2852_v4 = vadd.f32 %v2851_v56, %v2603_v45  ;;  %v8652_v56 = vld [vmem:[#allocation2 + $0x118] sm:$0xf0] }
 0x3ce   : > { %v3734_v15 = vpop.f32.mrf.mxu0 }
 0x3cf   : > { %v11215_v38 = vadd.f32 %v2940_v55, %v2852_v4  ;;  %3593 = vmatmul.bf16.gmra.mxu2 %v7613_v30  ;;  %v7632_v55 = vld [vmem:[#allocation2 + $0x110] sm:$0xf] }
 0x3d0   : > { %v7633_v4 = vor.u32 %v8652_v56, %v7632_v55  ;;  %v7638_v55 = vld [vmem:[#allocation2 + $0x12c] sm:$0xf0] }
 0x3d1   : > { %13512 = vst [vmem:[#allocation23_spill] sm:$0xff] %v11215_v38  ;;  %v8651_v38 = vld [vmem:[#allocation2 + $0x110] sm:$0xf0] }
 0x3d2   : > { %v3554_v12 = vpop.f32.mrf.mxu2  ;;  %v3645_v43 = vpop.f32.mrf.mxu3 }
 0x3d3   : > { %v3644_v34 = vadd.f32 %v3643_v1, %v3554_v12  ;;  %v11223_v1 = vpop.f32.mrf.mxu1 }
 0x3d5   : > { %v3733_v29 = vadd.f32 %v3732_v59, %v3644_v34  ;;  %v7625_v59 = vor.u32 %v8651_v38, %v7624_v54 }
 0x3d6   : > { %v3737_v50 = vpop.f32.mrf.mxu0 }
 0x3d7   : > { %v11221_v39 = vadd.f32 %v3733_v29, %v2953_v28  ;;  %3687 = vmatmul.bf16.gmra.mxu3 %v7629_v49  ;;  %v8653_v49 = vld [vmem:[#allocation2 + $0x124] sm:$0xf] }
 0x3d8   : > { %v7641_v6 = vor.u32 %v8653_v49, %v7638_v55 }
 0x3d9   : > { %3776 = vmatmul.bf16.gmra.mxu0 %v7633_v4 }
 0x3da   : > { %v3556_v45 = vpop.f32.mrf.mxu2  ;;  %v3648_v12 = vpop.f32.mrf.mxu3 }
 0x3db   : > { %v3646_v30 = vadd.f32 %v3645_v43, %v3556_v45  ;;  %v2958_v43 = vadd.f32 %v11102_v27, %v11080_v57  ;;  %v11231_v45 = vpop.f32.mrf.mxu1  ;;  %v2960_v57 = vadd.f32 %v11110_v19, %v11086_v5  ;;  %v8658_v5 = vld [vmem:[#allocation2 + $0x148] sm:$0xf0] }
 0x3dd   : > { %v3735_v41 = vadd.f32 %v3734_v15, %v3646_v30  ;;  %v7644_v15 = vld [vmem:[#allocation2 + $0x128] sm:$0xf]  ;;  %v7636_v30 = vld [vmem:[#allocation2 + $0x120] sm:$0xf] }
 0x3de   : > { %v3739_v28 = vpop.f32.mrf.mxu0 }
 0x3df   : > { %v11227_v34 = vadd.f32 %v3735_v41, %v2955_v0  ;;  %3598 = vmatmul.bf16.gmra.mxu2 %v7625_v59  ;;  %v7645_v0 = vor.u32 %v8655_v21, %v7644_v15  ;;  %v8654_v59 = vld [vmem:[#allocation2 + $0x128] sm:$0xf0]  ;;  %v7650_v15 = vld [vmem:[#allocation2 + $0x144] sm:$0xf0] }
 0x3e2   : > { %v3559_v29 = vpop.f32.mrf.mxu2  ;;  %v3650_v56 = vpop.f32.mrf.mxu3 }
 0x3e3   : > { %v3649_v35 = vadd.f32 %v3648_v12, %v3559_v29 }
 0x3e5   : > { %v3738_v16 = vadd.f32 %v3737_v50, %v3649_v35  ;;  %v7637_v50 = vor.u32 %v8654_v59, %v7636_v30  ;;  %v11239_v35 = vpop.f32.mrf.mxu1  ;;  %v7656_v30 = vld [vmem:[#allocation2 + $0x140] sm:$0xf] }
 0x3e6   : > { %v3742_v38 = vpop.f32.mrf.mxu0  ;;  %v7657_v59 = vor.u32 %v8658_v5, %v7656_v30  ;;  %v7662_v30 = vld [vmem:[#allocation2 + $0x15c] sm:$0xf0] }
 0x3e7   : > { %v11233_v4 = vadd.f32 %v3738_v16, %v2958_v43  ;;  %3692 = vmatmul.bf16.gmra.mxu3 %v7641_v6  ;;  %v8656_v6 = vld [vmem:[#allocation2 + $0x13c] sm:$0xf] }
 0x3e8   : > { %v7653_v19 = vor.u32 %v8656_v6, %v7650_v15  ;;  %v2968_v15 = vadd.f32 %v11133_v7, %v11104_v26  ;;  %v2970_v26 = vadd.f32 %v11138_v2, %v11112_v44  ;;  %v8664_v44 = vld [vmem:[#allocation2 + $0x178] sm:$0xf0] }
 0x3e9   : > { %3781 = vmatmul.bf16.gmra.mxu0 %v7645_v0 }
 0x3ea   : > { %v3561_v54 = vpop.f32.mrf.mxu2  ;;  %v3653_v12 = vpop.f32.mrf.mxu3 }
 0x3eb   : > { %v3651_v41 = vadd.f32 %v3650_v56, %v3561_v54  ;;  %v2963_v56 = vadd.f32 %v11119_v8, %v11091_v24  ;;  %v2965_v24 = vadd.f32 %v11125_v63, %v11099_v58  ;;  %v8661_v63 = vld [vmem:[#allocation2 + $0x160] sm:$0xf0] }
 0x3ed   : > { %v3740_v27 = vadd.f32 %v3739_v28, %v3651_v41  ;;  %v7648_v41 = vld [vmem:[#allocation2 + $0x138] sm:$0xf] }
 0x3ee   : > { %v3744_v43 = vpop.f32.mrf.mxu0 }
 0x3ef   : > { %v11237_v29 = vadd.f32 %v3740_v27, %v2960_v57  ;;  %3603 = vmatmul.bf16.gmra.mxu2 %v7637_v50  ;;  %v11245_v57 = vpop.f32.mrf.mxu1  ;;  %v8657_v50 = vld [vmem:[#allocation2 + $0x140] sm:$0xf0] }
 0x3f2   : > { %v3564_v16 = vpop.f32.mrf.mxu2  ;;  %v3655_v21 = vpop.f32.mrf.mxu3 }
 0x3f3   : > { %v3654_v49 = vadd.f32 %v3653_v12, %v3564_v16 }
 0x3f5   : > { %v3743_v55 = vadd.f32 %v3742_v38, %v3654_v49  ;;  %v7649_v38 = vor.u32 %v8657_v50, %v7648_v41  ;;  %v7660_v50 = vld [vmem:[#allocation2 + $0x150] sm:$0xf] }
 0x3f6   : > { %v3747_v28 = vpop.f32.mrf.mxu0 }
 0x3f7   : > { %v11243_v54 = vadd.f32 %v3743_v55, %v2963_v56  ;;  %3697 = vmatmul.bf16.gmra.mxu3 %v7653_v19  ;;  %v3002_v6 = vpop.f32.mrf.mxu1  ;;  %v8659_v19 = vld [vmem:[#allocation2 + $0x154] sm:$0xf] }
 0x3f9   : > { %3786 = vmatmul.bf16.gmra.mxu0 %v7657_v59  ;;  %v7668_v59 = vld [vmem:[#allocation2 + $0x158] sm:$0xf] }
 0x3fa   : > { %v3566_v0 = vpop.f32.mrf.mxu2  ;;  %v3658_v12 = vpop.f32.mrf.mxu3 }
 0x3fb   : > { %v3656_v27 = vadd.f32 %v3655_v21, %v3566_v0  ;;  %v11254_v0 = vadd.f32 %v3002_v6, %v11168_v52 }
 0x3fd   : > { %v3745_v8 = vadd.f32 %v3744_v43, %v3656_v27  ;;  %v7665_v43 = vor.u32 %v8659_v19, %v7662_v30  ;;  %v8662_v19 = vld [vmem:[#allocation2 + $0x16c] sm:$0xf]  ;;  %v7674_v30 = vld [vmem:[#allocation2 + $0x174] sm:$0xf0] }
 0x3fe   : > { %v3749_v49 = vpop.f32.mrf.mxu0  ;;  %v7677_v2 = vor.u32 %v8662_v19, %v7674_v30  ;;  %v7692_v30 = vld [vmem:[#allocation2 + $0x188] sm:$0xf] }
 0x3ff   : > { %v11249_v16 = vadd.f32 %v3745_v8, %v2965_v24  ;;  %3608 = vmatmul.bf16.gmra.mxu2 %v7649_v38  ;;  %v7669_v24 = vor.u32 %v8661_v63, %v7668_v59  ;;  %v8660_v38 = vld [vmem:[#allocation2 + $0x158] sm:$0xf0] }
 0x402   : > { %v3569_v56 = vpop.f32.mrf.mxu2  ;;  %v3660_v5 = vpop.f32.mrf.mxu3 }
 0x403   : > { %v3659_v55 = vadd.f32 %v3658_v12, %v3569_v56 }
 0x405   : > { %v3748_v21 = vadd.f32 %v3747_v28, %v3659_v55  ;;  %v7661_v28 = vor.u32 %v8660_v38, %v7660_v50 }
 0x406   : > { %v3752_v41 = vpop.f32.mrf.mxu0 }
 0x407   : > { %v11256_v58 = vadd.f32 %v3748_v21, %v2968_v15  ;;  %3702 = vmatmul.bf16.gmra.mxu3 %v7665_v43  ;;  %v2973_v15 = vadd.f32 %v11177_v62, %v11115_v9  ;;  %v7680_v43 = vld [vmem:[#allocation2 + $0x170] sm:$0xf] }
 0x408   : > { %v7681_v50 = vor.u32 %v8664_v44, %v7680_v43 }
 0x409   : > { %3791 = vmatmul.bf16.gmra.mxu0 %v7669_v24  ;;  %v8663_v24 = vld [vmem:[#allocation2 + $0x170] sm:$0xf0] }
 0x40a   : > { %v3571_v27 = vpop.f32.mrf.mxu2  ;;  %v3663_v52 = vpop.f32.mrf.mxu3 }
 0x40b   : > { %v3661_v8 = vadd.f32 %v3660_v5, %v3571_v27  ;;  %v7672_v27 = vld [vmem:[#allocation2 + $0x168] sm:$0xf] }
 0x40d   : > { %v3750_v7 = vadd.f32 %v3749_v49, %v3661_v8  ;;  %v7673_v8 = vor.u32 %v8663_v24, %v7672_v27  ;;  %v8666_v27 = vld [vmem:[#allocation2 + $0x188] sm:$0xf0] }
 0x40e   : > { %v11262_v56 = vpop.f32.mrf.mxu0 }
 0x40f   : > { %v11260_v12 = vadd.f32 %v3750_v7, %v2970_v26  ;;  %3613 = vmatmul.bf16.gmra.mxu2 %v7661_v28  ;;  %v2978_v26 = vadd.f32 %v11189_v60, %v11128_v46 }
 0x412   : > { %v3574_v55 = vpop.f32.mrf.mxu2  ;;  %v11266_v5 = vpop.f32.mrf.mxu3 }
 0x413   : > { %v3664_v6 = vadd.f32 %v3663_v52, %v3574_v55  ;;  %v8665_v52 = vld [vmem:[#allocation2 + $0x184] sm:$0xf]  ;;  %v7686_v55 = vld [vmem:[#allocation2 + $0x18c] sm:$0xf0] }
 0x415   : > { %v3753_v21 = vadd.f32 %v3752_v41, %v3664_v6 }
 0x416   : > { %v3757_v49 = vpop.f32.mrf.mxu0 }
 0x417   : > { %v11268_v63 = vadd.f32 %v3753_v21, %v2973_v15  ;;  %3707 = vmatmul.bf16.gmra.mxu3 %v7677_v2  ;;  %v8667_v15 = vld [vmem:[#allocation2 + $0x190] sm:$0xf0]  ;;  %v7689_v21 = vor.u32 %v8665_v52, %v7686_v55  ;;  %v7684_v2 = vld [vmem:[#allocation2 + $0x180] sm:$0xf] }
 0x418   : > { %v7693_v43 = vor.u32 %v8667_v15, %v7692_v30  ;;  %v8669_v30 = vld [vmem:[#allocation2 + $0x1a0] sm:$0xf0] }
 0x419   : > { %3796 = vmatmul.bf16.gmra.mxu0 %v7681_v50  ;;  %v7685_v50 = vor.u32 %v8666_v27, %v7684_v2 }
 0x41a   : > { %v11270_v59 = vpop.f32.mrf.mxu2  ;;  %v3668_v9 = vpop.f32.mrf.mxu3 }
 0x41e   : > { %v11272_v62 = vpop.f32.mrf.mxu0 }
 0x41f   : > { %3618 = vmatmul.bf16.gmra.mxu2 %v7673_v8  ;;  %v8668_v8 = vld [vmem:[#allocation2 + $0x19c] sm:$0xf] }
 0x422   : > { %v3579_v41 = vpop.f32.mrf.mxu2  ;;  %v11276_v28 = vpop.f32.mrf.mxu3 }
 0x423   : > { %v3669_v38 = vadd.f32 %v3668_v9, %v3579_v41  ;;  %v7698_v9 = vld [vmem:[#allocation2 + $0x1a4] sm:$0xf0]  ;;  %v2983_v41 = vadd.f32 %v11200_v22, %v11140_v13 }
 0x424   : > { %v7701_v15 = vor.u32 %v8668_v8, %v7698_v9 }
 0x425   : > { %v3758_v7 = vadd.f32 %v3757_v49, %v3669_v38 }
 0x426   : > { %v3762_v19 = vpop.f32.mrf.mxu0 }
 0x427   : > { %v11278_v6 = vadd.f32 %v3758_v7, %v2978_v26  ;;  %3712 = vmatmul.bf16.gmra.mxu3 %v7689_v21  ;;  %v7704_v26 = vld [vmem:[#allocation2 + $0x1a0] sm:$0xf]  ;;  %v8670_v7 = vld [vmem:[#allocation2 + $0x1a8] sm:$0xf0]  ;;  %v7696_v21 = vld [vmem:[#allocation2 + $0x198] sm:$0xf] }
 0x428   : > { %v7705_v2 = vor.u32 %v8670_v7, %v7704_v26 }
 0x429   : > { %3801 = vmatmul.bf16.gmra.mxu0 %v7693_v43 }
 0x42a   : > { %v11280_v44 = vpop.f32.mrf.mxu2  ;;  %v3673_v46 = vpop.f32.mrf.mxu3 }
 0x42b   : > { %v3671_v10 = vadd.f32 %v11276_v28, %v11280_v44 }
 0x42e   : > { %v11282_v60 = vpop.f32.mrf.mxu0 }
 0x42f   : > { %3623 = vmatmul.bf16.gmra.mxu2 %v7685_v50  ;;  %v7697_v50 = vor.u32 %v8669_v30, %v7696_v21  ;;  %v2993_v30 = vadd.f32 %v11223_v1, %v11154_v42  ;;  %v11318_v42 = vpop.f32.mrf.mxu1 }
 0x432   : > { %v3584_v49 = vpop.f32.mrf.mxu2  ;;  %v11286_v52 = vpop.f32.mrf.mxu3 }
 0x433   : > { %v3674_v24 = vadd.f32 %v3673_v46, %v3584_v49  ;;  %v2988_v49 = vadd.f32 %v11212_v53, %v11148_v51 }
 0x435   : > { %v3763_v38 = vadd.f32 %v3762_v19, %v3674_v24 }
 0x436   : > { %v3767_v43 = vpop.f32.mrf.mxu0 }
 0x437   : > { %v11288_v55 = vadd.f32 %v3763_v38, %v2983_v41  ;;  %3717 = vmatmul.bf16.gmra.mxu3 %v7701_v15 }
 0x439   : > { %3806 = vmatmul.bf16.gmra.mxu0 %v7705_v2 }
 0x43a   : > { %v11290_v27 = vpop.f32.mrf.mxu2  ;;  %v3678_v46 = vpop.f32.mrf.mxu3 }
 0x43e   : > { %v11292_v13 = vpop.f32.mrf.mxu0 }
 0x43f   : > { %3628 = vmatmul.bf16.gmra.mxu2 %v7697_v50 }
 0x442   : > { %v3589_v22 = vpop.f32.mrf.mxu2  ;;  %v11296_v8 = vpop.f32.mrf.mxu3 }
 0x443   : > { %v3679_v19 = vadd.f32 %v3678_v46, %v3589_v22 }
 0x445   : > { %v3768_v24 = vadd.f32 %v3767_v43, %v3679_v19 }
 0x446   : > { %v3772_v41 = vpop.f32.mrf.mxu0 }
 0x447   : > { %v11298_v9 = vadd.f32 %v3768_v24, %v2988_v49  ;;  %v2998_v24 = vadd.f32 %v11239_v35, %v11161_v3 }
 0x44a   : > { %v11300_v38 = vpop.f32.mrf.mxu2  ;;  %v3683_v26 = vpop.f32.mrf.mxu3 }
 0x44e   : > { %v11302_v7 = vpop.f32.mrf.mxu0 }
 0x452   : > { %v3594_v15 = vpop.f32.mrf.mxu2  ;;  %v11306_v50 = vpop.f32.mrf.mxu3 }
 0x453   : > { %v3684_v21 = vadd.f32 %v3683_v26, %v3594_v15 }
 0x455   : > { %v3773_v2 = vadd.f32 %v3772_v41, %v3684_v21 }
 0x456   : > { %v3777_v53 = vpop.f32.mrf.mxu0 }
 0x457   : > { %v11308_v51 = vadd.f32 %v3773_v2, %v2993_v30  ;;  %v11324_v2 = vpop.f32.mrf.mxu1 }
 0x45a   : > { %v11310_v43 = vpop.f32.mrf.mxu2  ;;  %v3688_v46 = vpop.f32.mrf.mxu3 }
 0x45e   : > { %v11312_v22 = vpop.f32.mrf.mxu0 }
 0x462   : > { %v3599_v19 = vpop.f32.mrf.mxu2  ;;  %v11316_v15 = vpop.f32.mrf.mxu3 }
 0x463   : > { %v3689_v49 = vadd.f32 %v3688_v46, %v3599_v19  ;;  %v9111_v19 = vld [vmem:[#allocation8] sm:$0xf] }
 0x464   : > { %v11328_v14 = vperm.slane %v9111_v19, 3 }
 0x465   : > { %v3778_v26 = vadd.f32 %v3777_v53, %v3689_v49 }
 0x466   : > { %v3782_v41 = vpop.f32.mrf.mxu0  ;;  %v11332_v35 = vadd.f32 %v11328_v14, %v11227_v34  ;;  %v11353_v34 = vadd.f32 %v11328_v14, %v11237_v29  ;;  %v11367_v19 = vadd.f32 %v11328_v14, %v11243_v54 }
 0x467   : > { %v11320_v1 = vadd.f32 %v3778_v26, %v2998_v24  ;;  %v11341_v24 = vadd.f32 %v11328_v14, %v11221_v39  ;;  %v3666_v39 = vadd.f32 %v11266_v5, %v11270_v59  ;;  %v11375_v5 = vadd.f32 %v11328_v14, %v11249_v16 }
 0x468   : > { %13513 = vst [vmem:[#allocation28_spill] sm:$0xff] %v11332_v35  ;;  %v3920_v36 = vmul.f32 %v11353_v34, %v11353_v34  ;;  %v2975_v16 = vadd.f32 %v11182_v17, %v11123_v37  ;;  %v3676_v37 = vadd.f32 %v11286_v52, %v11290_v27 }
 0x469   : > { %v3879_v29 = vadd.f32 %v11332_v35, %v11341_v24  ;;  %v3922_v28 = vmul.f32 %v11375_v5, %v11375_v5 }
 0x46a   : > { %v11322_v21 = vpop.f32.mrf.mxu2  ;;  %v3693_v30 = vpop.f32.mrf.mxu3 }
 0x46e   : > { %v11326_v47 = vpop.f32.mrf.mxu0 }
 0x472   : > { %v3604_v61 = vpop.f32.mrf.mxu2  ;;  %v11334_v53 = vpop.f32.mrf.mxu3 }
 0x473   : > { %v3694_v46 = vadd.f32 %v3693_v30, %v3604_v61  ;;  %v11345_v61 = vadd.f32 %v11328_v14, %v11233_v4  ;;  %v3917_v4 = vmul.f32 %v11341_v24, %v11341_v24 }
 0x475   : > { %v3783_v3 = vadd.f32 %v3782_v41, %v3694_v46  ;;  %v3918_v41 = vmul.f32 %v11332_v35, %v11332_v35  ;;  %v3919_v46 = vmul.f32 %v11345_v61, %v11345_v61  ;;  %v3880_v54 = vadd.f32 %v3879_v29, %v11345_v61 }
 0x476   : > { %v11347_v26 = vpop.f32.mrf.mxu0 }
 0x477   : > { %v11337_v49 = vadd.f32 %v3783_v3, %v11254_v0  ;;  %v11357_v0 = vpop.f32.mrf.mxu1  ;;  %v3949_v3 = vadd.f32 %v3918_v41, %v3917_v4  ;;  %v3921_v41 = vmul.f32 %v11367_v19, %v11367_v19  ;;  %v11387_v4 = vadd.f32 %v11328_v14, %v11256_v58 }
 0x478   : > { %13515 = vst [vmem:[#allocation34_spill] sm:$0xff] %v11357_v0  ;;  %v3755_v0 = vadd.f32 %v11262_v56, %v3666_v39  ;;  %v3881_v56 = vadd.f32 %v3880_v54, %v11353_v34  ;;  %v3760_v58 = vadd.f32 %v11272_v62, %v3671_v10 }
 0x479   : > { %13514 = vst [vmem:[#allocation27_spill] sm:$0xff] %v11337_v49  ;;  %v3950_v49 = vadd.f32 %v3949_v3, %v3919_v46  ;;  %v11400_v46 = vadd.f32 %v11328_v14, %v11260_v12  ;;  %v2980_v12 = vadd.f32 %v11194_v33, %v11135_v23 }
 0x47a   : > { %v11355_v30 = vpop.f32.mrf.mxu2  ;;  %v11377_v59 = vpop.f32.mrf.mxu3  ;;  %v3821_v29 = vadd.f32 %v3755_v0, %v2975_v16  ;;  %v3882_v17 = vadd.f32 %v3881_v56, %v11367_v19  ;;  %v3765_v16 = vadd.f32 %v11282_v60, %v3676_v37  ;;  %v3681_v56 = vadd.f32 %v11296_v8, %v11300_v38 }
 0x47b   : > { %v3951_v39 = vadd.f32 %v3950_v49, %v3920_v36  ;;  %v3923_v36 = vmul.f32 %v11387_v4, %v11387_v4  ;;  %v11412_v49 = vadd.f32 %v11328_v14, %v11268_v63  ;;  %v3924_v52 = vmul.f32 %v11400_v46, %v11400_v46 }
 0x47c   : > { %v3883_v10 = vadd.f32 %v3882_v17, %v11375_v5  ;;  %v11422_v27 = vadd.f32 %v11328_v14, %v3821_v29 }
 0x47d   : > { %v3952_v3 = vadd.f32 %v3951_v39, %v3921_v41  ;;  %v3823_v41 = vadd.f32 %v3760_v58, %v2980_v12  ;;  %v3925_v33 = vmul.f32 %v11412_v49, %v11412_v49  ;;  %v11432_v39 = vadd.f32 %v11328_v14, %v11278_v6 }
 0x47e   : > { %v11391_v35 = vpop.f32.mrf.mxu0  ;;  %v3884_v63 = vadd.f32 %v3883_v10, %v11387_v4  ;;  %v3926_v8 = vmul.f32 %v11422_v27, %v11422_v27  ;;  %v3686_v6 = vadd.f32 %v11306_v50, %v11310_v43  ;;  %v11452_v12 = vadd.f32 %v11328_v14, %v11288_v55 }
 0x47f   : > { %v11406_v54 = vpop.f32.mrf.mxu1  ;;  %v3953_v62 = vadd.f32 %v3952_v3, %v3922_v28  ;;  %v2985_v28 = vadd.f32 %v11205_v11, %v11145_v32  ;;  %v11442_v38 = vadd.f32 %v11328_v14, %v3823_v41  ;;  %v3770_v3 = vadd.f32 %v11292_v13, %v3681_v56 }
 0x480   : > { %v3885_v60 = vadd.f32 %v3884_v63, %v11400_v46  ;;  %v2990_v10 = vadd.f32 %v11217_v40, %v11151_v20  ;;  %v3775_v63 = vadd.f32 %v11302_v7, %v3686_v6  ;;  %v3691_v55 = vadd.f32 %v11316_v15, %v11322_v21 }
 0x481   : > { %v3954_v23 = vadd.f32 %v3953_v62, %v3923_v36  ;;  %v3825_v17 = vadd.f32 %v3765_v16, %v2985_v28  ;;  %v3927_v36 = vmul.f32 %v11432_v39, %v11432_v39  ;;  %v3928_v50 = vmul.f32 %v11442_v38, %v11442_v38 }
 0x482   : > { %v11396_v44 = vpop.f32.mrf.mxu2  ;;  %v11417_v0 = vpop.f32.mrf.mxu3  ;;  %v3886_v32 = vadd.f32 %v3885_v60, %v11412_v49  ;;  %v3827_v16 = vadd.f32 %v3770_v3, %v2990_v10  ;;  %v3929_v56 = vmul.f32 %v11452_v12, %v11452_v12  ;;  %v2995_v28 = vadd.f32 %v11231_v45, %v11158_v31 }
 0x483   : > { %v3955_v37 = vadd.f32 %v3954_v23, %v3924_v52  ;;  %v11462_v43 = vadd.f32 %v11328_v14, %v3825_v17  ;;  %v3780_v17 = vadd.f32 %v11312_v22, %v3691_v55  ;;  %v11490_v45 = vadd.f32 %v11328_v14, %v11308_v51 }
 0x484   : > { %v3887_v13 = vadd.f32 %v3886_v32, %v11422_v27  ;;  %v11480_v21 = vadd.f32 %v11328_v14, %v3827_v16  ;;  %v3000_v32 = vadd.f32 %v11245_v57, %v11165_v18  ;;  %v3005_v18 = vadd.f32 %v11318_v42, %v11171_v25 }
 0x485   : > { %v3956_v11 = vadd.f32 %v3955_v37, %v3925_v33  ;;  %v11472_v33 = vadd.f32 %v11328_v14, %v11298_v9  ;;  %v3930_v15 = vmul.f32 %v11462_v43, %v11462_v43  ;;  %v3696_v9 = vadd.f32 %v11334_v53, %v11355_v30 }
 0x486   : > { %v11436_v29 = vpop.f32.mrf.mxu0  ;;  %v3888_v20 = vadd.f32 %v3887_v13, %v11432_v39  ;;  %v3932_v30 = vmul.f32 %v11480_v21, %v11480_v21  ;;  %v3831_v13 = vadd.f32 %v3780_v17, %v3000_v32  ;;  %v11511_v16 = vadd.f32 %v11328_v14, %v11320_v1  ;;  %v13518_v17 = vld [vmem:[#allocation34_spill] sm:$0xff] }
 0x487   : > { %v11456_v52 = vpop.f32.mrf.mxu1  ;;  %v3957_v41 = vadd.f32 %v3956_v11, %v3926_v8  ;;  %v3829_v8 = vadd.f32 %v3775_v63, %v2995_v28  ;;  %v3931_v31 = vmul.f32 %v11472_v33, %v11472_v33  ;;  %v3699_v11 = vadd.f32 %v11377_v59, %v11396_v44 }
 0x488   : > { %v3889_v7 = vadd.f32 %v3888_v20, %v11442_v38  ;;  %v3785_v51 = vadd.f32 %v11326_v47, %v3696_v9  ;;  %v3933_v44 = vmul.f32 %v11490_v45, %v11490_v45 }
 0x489   : > { %v3958_v40 = vadd.f32 %v3957_v41, %v3927_v36  ;;  %v11500_v10 = vadd.f32 %v11328_v14, %v3829_v8  ;;  %v3788_v63 = vadd.f32 %v11347_v26, %v3699_v11  ;;  %v13517_v8 = vld [vmem:[#allocation31_spill] sm:$0xff] }
 0x48a   : > { %v3611_v58 = vpop.f32.mrf.mxu2  ;;  %v3703_v62 = vpop.f32.mrf.mxu3  ;;  %v3890_v3 = vadd.f32 %v3889_v7, %v11452_v12  ;;  %v3010_v9 = vadd.f32 %v13518_v17, %v13517_v8 }
 0x48b   : > { %v3959_v37 = vadd.f32 %v3958_v40, %v3928_v50  ;;  %v3701_v57 = vadd.f32 %v11417_v0, %v3611_v58  ;;  %v3008_v40 = vadd.f32 %v11324_v2, %v11174_v48  ;;  %v3934_v0 = vmul.f32 %v11500_v10, %v11500_v10 }
 0x48c   : > { %v3891_v36 = vadd.f32 %v3890_v3, %v11462_v43  ;;  %v11520_v58 = vadd.f32 %v11328_v14, %v3831_v13 }
 0x48d   : > { %v3960_v6 = vadd.f32 %v3959_v37, %v3929_v56  ;;  %v3833_v56 = vadd.f32 %v3785_v51, %v3005_v18  ;;  %v3790_v26 = vadd.f32 %v11391_v35, %v3701_v57  ;;  %v3935_v37 = vmul.f32 %v11511_v16, %v11511_v16 }
 0x48e   : > { %v3794_v23 = vpop.f32.mrf.mxu0  ;;  %v3892_v50 = vadd.f32 %v3891_v36, %v11472_v33  ;;  %v3834_v2 = vadd.f32 %v3788_v63, %v3008_v40  ;;  %v3936_v35 = vmul.f32 %v11520_v58, %v11520_v58 }
 0x48f   : > { %v3961_v53 = vadd.f32 %v3960_v6, %v3930_v15  ;;  %v3017_v41 = vpop.f32.mrf.mxu1  ;;  %v13516_v15 = vld [vmem:[#allocation27_spill] sm:$0xff]  ;;  %v3835_v11 = vadd.f32 %v3790_v26, %v3010_v9 }
 0x490   : > { %v3893_v20 = vadd.f32 %v3892_v50, %v11480_v21  ;;  %v11528_v48 = vadd.f32 %v11328_v14, %v13516_v15 }
 0x491   : > { %v3962_v59 = vadd.f32 %v3961_v53, %v3931_v31  ;;  %v11537_v31 = vadd.f32 %v11328_v14, %v3833_v56 }
 0x492   : > { %v3614_v60 = vpop.f32.mrf.mxu2  ;;  %v3705_v22 = vpop.f32.mrf.mxu3  ;;  %v3894_v1 = vadd.f32 %v3893_v20, %v11490_v45  ;;  %v3937_v13 = vmul.f32 %v11528_v48, %v11528_v48 }
 0x493   : > { %v3704_v25 = vadd.f32 %v3703_v62, %v3614_v60  ;;  %v3963_v42 = vadd.f32 %v3962_v59, %v3932_v30  ;;  %v13520_v59 = vld [vmem:[#allocation38_spill] sm:$0xff] }
 0x494   : > { %v3895_v60 = vadd.f32 %v3894_v1, %v11500_v10 }
 0x495   : > { %v3964_v7 = vadd.f32 %v3963_v42, %v3933_v44  ;;  %v3793_v3 = vadd.f32 %v11436_v29, %v3704_v25  ;;  %v11545_v29 = vadd.f32 %v11328_v14, %v3834_v2  ;;  %v3015_v44 = vadd.f32 %v11456_v52, %v13520_v59 }
 0x496   : > { %v3797_v47 = vpop.f32.mrf.mxu0  ;;  %v3896_v32 = vadd.f32 %v3895_v60, %v11511_v16  ;;  %v11555_v42 = vadd.f32 %v11328_v14, %v3835_v11 }
 0x497   : > { %v3965_v6 = vadd.f32 %v3964_v7, %v3934_v0  ;;  %v3019_v50 = vpop.f32.mrf.mxu1  ;;  %v3939_v26 = vmul.f32 %v11545_v29, %v11545_v29 }
 0x498   : > { %v3897_v18 = vadd.f32 %v3896_v32, %v11520_v58  ;;  %v3940_v2 = vmul.f32 %v11555_v42, %v11555_v42 }
 0x499   : > { %v3966_v30 = vadd.f32 %v3965_v6, %v3935_v37  ;;  %v13522_v6 = vld [vmem:[#allocation46_spill] sm:$0xff] }
 0x49a   : > { %v3616_v55 = vpop.f32.mrf.mxu2  ;;  %v3708_v62 = vpop.f32.mrf.mxu3  ;;  %v3898_v25 = vadd.f32 %v3897_v18, %v11528_v48 }
 0x49b   : > { %v3706_v28 = vadd.f32 %v3705_v22, %v3616_v55  ;;  %v13519_v22 = vld [vmem:[#allocation30_spill] sm:$0xff]  ;;  %v3967_v55 = vadd.f32 %v3966_v30, %v3936_v35  ;;  %v3020_v35 = vadd.f32 %v3019_v50, %v13522_v6 }
 0x49c   : > { %v3013_v36 = vadd.f32 %v11406_v54, %v13519_v22  ;;  %v3938_v54 = vmul.f32 %v11537_v31, %v11537_v31 }
 0x49d   : > { %v3795_v53 = vadd.f32 %v3794_v23, %v3706_v28  ;;  %v13521_v23 = vld [vmem:[#allocation36_spill] sm:$0xff]  ;;  %v3968_v1 = vadd.f32 %v3967_v55, %v3937_v13  ;;  %v3899_v28 = vadd.f32 %v3898_v25, %v11537_v31 }
 0x49e   : > { %v3836_v57 = vadd.f32 %v3793_v3, %v3013_v36  ;;  %v3018_v20 = vadd.f32 %v3017_v41, %v13521_v23  ;;  %v3799_v40 = vpop.f32.mrf.mxu0 }
 0x49f   : > { %v3837_v0 = vadd.f32 %v3795_v53, %v3015_v44  ;;  %v3969_v41 = vadd.f32 %v3968_v1, %v3938_v54  ;;  %v3900_v15 = vadd.f32 %v3899_v28, %v11545_v29  ;;  %v3022_v32 = vpop.f32.mrf.mxu1 }
 0x4a0   : > { %v11561_v7 = vadd.f32 %v11328_v14, %v3836_v57 }
 0x4a1   : > { %v3901_v8 = vadd.f32 %v3900_v15, %v11555_v42 }
 0x4a2   : > { %v3619_v51 = vpop.f32.mrf.mxu2  ;;  %v3710_v52 = vpop.f32.mrf.mxu3  ;;  %v3941_v17 = vmul.f32 %v11561_v7, %v11561_v7 }
 0x4a3   : > { %v3709_v63 = vadd.f32 %v3708_v62, %v3619_v51  ;;  %v11567_v62 = vadd.f32 %v11328_v14, %v3837_v0  ;;  %v3902_v22 = vadd.f32 %v3901_v8, %v11561_v7  ;;  %v13523_v0 = vld [vmem:[#allocation21_spill] sm:$0xff] }
 0x4a5   : > { %v3798_v56 = vadd.f32 %v3797_v47, %v3709_v63  ;;  %v3970_v47 = vadd.f32 %v3969_v41, %v3939_v26  ;;  %v3942_v36 = vmul.f32 %v11567_v62, %v11567_v62  ;;  %v3903_v18 = vadd.f32 %v3902_v22, %v11567_v62 }
 0x4a6   : > { %v3802_v30 = vpop.f32.mrf.mxu0 }
 0x4a7   : > { %v3838_v37 = vadd.f32 %v3798_v56, %v3018_v20  ;;  %v3971_v11 = vadd.f32 %v3970_v47, %v3940_v2  ;;  %v3023_v56 = vadd.f32 %v3022_v32, %v13523_v0 }
 0x4a9   : > { %v11573_v9 = vadd.f32 %v11328_v14, %v3838_v37  ;;  %v3972_v51 = vadd.f32 %v3971_v11, %v3941_v17  ;;  %v13524_v17 = vld [vmem:[#allocation20_spill] sm:$0xff] }
 0x4aa   : > { %v3621_v60 = vpop.f32.mrf.mxu2  ;;  %v3713_v13 = vpop.f32.mrf.mxu3 }
 0x4ab   : > { %v3711_v3 = vadd.f32 %v3710_v52, %v3621_v60  ;;  %v3943_v57 = vmul.f32 %v11573_v9, %v11573_v9  ;;  %v3973_v44 = vadd.f32 %v3972_v51, %v3942_v36  ;;  %v3904_v50 = vadd.f32 %v3903_v18, %v11573_v9  ;;  %v3024_v52 = vpop.f32.mrf.mxu1 }
 0x4ad   : > { %v3800_v53 = vadd.f32 %v3799_v40, %v3711_v3  ;;  %v3974_v54 = vadd.f32 %v3973_v44, %v3943_v57  ;;  %v3025_v3 = vadd.f32 %v3024_v52, %v13524_v17  ;;  %v13525_v57 = vld [vmem:[#allocation24_spill] sm:$0xff] }
 0x4ae   : > { %v3804_v37 = vpop.f32.mrf.mxu0 }
 0x4af   : > { %v3839_v59 = vadd.f32 %v3800_v53, %v3020_v35 }
 0x4b1   : > { %v11584_v63 = vadd.f32 %v11328_v14, %v3839_v59 }
 0x4b2   : > { %v3624_v55 = vpop.f32.mrf.mxu2  ;;  %v3715_v26 = vpop.f32.mrf.mxu3 }
 0x4b3   : > { %v3905_v23 = vadd.f32 %v3904_v50, %v11584_v63  ;;  %v3944_v20 = vmul.f32 %v11584_v63, %v11584_v63  ;;  %v3714_v40 = vadd.f32 %v3713_v13, %v3624_v55  ;;  %v3027_v11 = vpop.f32.mrf.mxu1 }
 0x4b4   : > { %v3028_v59 = vadd.f32 %v3027_v11, %v13525_v57 }
 0x4b5   : > { %v3975_v25 = vadd.f32 %v3974_v54, %v3944_v20  ;;  %v3803_v1 = vadd.f32 %v3802_v30, %v3714_v40 }
 0x4b6   : > { %v3807_v36 = vpop.f32.mrf.mxu0 }
 0x4b7   : > { %v3840_v28 = vadd.f32 %v3803_v1, %v3023_v56 }
 0x4b9   : > { %v11591_v41 = vadd.f32 %v11328_v14, %v3840_v28 }
 0x4ba   : > { %v3626_v15 = vpop.f32.mrf.mxu2  ;;  %v3718_v32 = vpop.f32.mrf.mxu3 }
 0x4bb   : > { %v3906_v2 = vadd.f32 %v3905_v23, %v11591_v41  ;;  %v3945_v47 = vmul.f32 %v11591_v41, %v11591_v41  ;;  %v3716_v60 = vadd.f32 %v3715_v26, %v3626_v15  ;;  %v3029_v0 = vpop.f32.mrf.mxu1  ;;  %v13526_v26 = vld [vmem:[#allocation23_spill] sm:$0xff] }
 0x4bc   : > { %v3030_v52 = vadd.f32 %v3029_v0, %v13526_v26 }
 0x4bd   : > { %v3976_v8 = vadd.f32 %v3975_v25, %v3945_v47  ;;  %v3805_v6 = vadd.f32 %v3804_v37, %v3716_v60 }
 0x4be   : > { %v3809_v56 = vpop.f32.mrf.mxu0 }
 0x4bf   : > { %v3841_v35 = vadd.f32 %v3805_v6, %v3025_v3 }
 0x4c1   : > { %v11598_v22 = vadd.f32 %v11328_v14, %v3841_v35 }
 0x4c2   : > { %v3629_v53 = vpop.f32.mrf.mxu2  ;;  %v3720_v54 = vpop.f32.mrf.mxu3 }
 0x4c3   : > { %v3907_v30 = vadd.f32 %v3906_v2, %v11598_v22  ;;  %v3946_v13 = vmul.f32 %v11598_v22, %v11598_v22  ;;  %v3719_v51 = vadd.f32 %v3718_v32, %v3629_v53 }
 0x4c5   : > { %v3977_v18 = vadd.f32 %v3976_v8, %v3946_v13  ;;  %v3808_v44 = vadd.f32 %v3807_v36, %v3719_v51  ;;  %v13527_v51 = vld [vmem:[#allocation13_spill] sm:$0xff] }
 0x4c7   : > { %v3842_v50 = vadd.f32 %v3808_v44, %v3028_v59  ;;  %v8777_v44 = vld [vmem:[#allocation6 + $0x338] sm:$0xff] }
 0x4c8   : > { %5329 = vmatpush.bf16.msra.mxu1 %v8777_v44 }
 0x4c9   : > { %v11605_v55 = vadd.f32 %v11328_v14, %v3842_v50 }
 0x4ca   : > { %v3631_v23 = vpop.f32.mrf.mxu2 }
 0x4cb   : > { %v3908_v20 = vadd.f32 %v3907_v30, %v11605_v55  ;;  %v3947_v40 = vmul.f32 %v11605_v55, %v11605_v55  ;;  %v3721_v25 = vadd.f32 %v3720_v54, %v3631_v23  ;;  %v8776_v54 = vld [vmem:[#allocation6 + $0x330] sm:$0xff] }
 0x4cc   : > { %5330 = vmatpush.bf16.msra.mxu1 %v8776_v54 }
 0x4cd   : > { %v3978_v1 = vadd.f32 %v3977_v18, %v3947_v40  ;;  %v3810_v28 = vadd.f32 %v3809_v56, %v3721_v25  ;;  %v8775_v40 = vld [vmem:[#allocation6 + $0x328] sm:$0xff]  ;;  %v13528_v25 = vld [vmem:[#allocation14_spill] sm:$0xff] }
 0x4cf   : > { %v3843_v37 = vadd.f32 %v3810_v28, %v3030_v52 }
 0x4d0   : > { %5331 = vmatpush.bf16.msra.mxu1 %v8775_v40 }
 0x4d1   : > { %v3876_v15 = vadd.f32 %v11328_v14, %v3843_v37 }
 0x4d3   : > { %v3909_v2 = vadd.f32 %v3908_v20, %v3876_v15  ;;  %v3948_v47 = vmul.f32 %v3876_v15, %v3876_v15 }
 0x4d5   : > { %v3910_v60 = vrot.slane %v3909_v2, 4  ;;  %v3979_v8 = vadd.f32 %v3978_v1, %v3948_v47 }
 0x4d7   : > { %v3911_v17 = vadd.f32 %v3910_v60, %v3909_v2  ;;  %v3980_v3 = vrot.slane %v3979_v8, 4 }
 0x4d9   : > { %v3912_v6 = vrot.slane %v3911_v17, 2  ;;  %v3981_v35 = vadd.f32 %v3980_v3, %v3979_v8 }
 0x4db   : > { %v3913_v32 = vadd.f32 %v3912_v6, %v3911_v17  ;;  %v3982_v11 = vrot.slane %v3981_v35, 2 }
 0x4dd   : > { %v3914_v36 = vrot.slane %v3913_v32, 1  ;;  %v3983_v53 = vadd.f32 %v3982_v11, %v3981_v35  ;;  %v8774_v11 = vld [vmem:[#allocation6 + $0x320] sm:$0xff] }
 0x4de   : > { %5332 = vmatpush.bf16.msra.mxu1 %v8774_v11 }
 0x4df   : > { %v3915_v30 = vadd.f32 %v3914_v36, %v3913_v32  ;;  %v3984_v13 = vrot.slane %v3983_v53, 1 }
 0x4e1   : > { %v11613_v18 = vmul.f32 %v3915_v30, %v13527_v51  ;;  %v3985_v57 = vadd.f32 %v3984_v13, %v3983_v53 }
 0x4e3   : > { %v3986_v14 = vmul.f32 %v3985_v57, %v13527_v51  ;;  %v3987_v59 = vmul.f32 %v11613_v18, %v11613_v18  ;;  %v3990_v0 = vmul.f32 %v13528_v25, %v11613_v18  ;;  %v4043_v2 = vsub.f32 %v3876_v15, %v11613_v18 }
 0x4e4   : > { %v4038_v8 = vsub.f32 %v11573_v9, %v11613_v18  ;;  %v4039_v17 = vsub.f32 %v11584_v63, %v11613_v18  ;;  %v4040_v3 = vsub.f32 %v11591_v41, %v11613_v18  ;;  %v4041_v6 = vsub.f32 %v11598_v22, %v11613_v18  ;;  %v8773_v22 = vld [vmem:[#allocation6 + $0x318] sm:$0xff] }
 0x4e5   : > { %v3988_v50 = vsub.f32 %v3986_v14, %v3987_v59  ;;  %3991 = vadd.xlane.f32.xlu1 %v3990_v0  ;;  %v4042_v15 = vsub.f32 %v11605_v55, %v11613_v18  ;;  %5333 = vmatpush.bf16.msra.mxu1 %v8773_v22  ;;  %v8772_v55 = vld [vmem:[#allocation6 + $0x310] sm:$0xff] }
 0x4e7   : > { %v3989_v23 = vmax.f32 %v3988_v50, 0.0 }
 0x4e9   : > { %v4044_v20 = vadd.f32 1e-05, %v3989_v23  ;;  %5334 = vmatpush.bf16.msra.mxu1 %v8772_v55 }
 0x4eb   : > { %9029 = vrsqrt.f32 %v4044_v20  ;;  %vm4051_vm0 = vweird.f32 %v4044_v20 }
 0x4f1   : > { %v9030_v56 = vpop.eup %9029 }
 0x4f2   : > { %v4046_v1 = vmul.f32 %v9030_v56, %v4044_v20  ;;  %vm4052_vm15 = vweird.f32 %v9030_v56 }
 0x4f3   : > { %vm4053_vm1 = vmor %vm4051_vm0, %vm4052_vm15 }
 0x4f4   : > { %v4047_v26 = vmul.f32 %v9030_v56, %v4046_v1 }
 0x4f6   : > { %v4048_v52 = vmul.f32 0.5, %v4047_v26  ;;  %v4014_v26 = vsub.f32 %v11345_v61, %v11613_v18  ;;  %v4021_v61 = vsub.f32 %v11422_v27, %v11613_v18  ;;  %v4027_v27 = vsub.f32 %v11480_v21, %v11613_v18 }
 0x4f7   : > { %v4034_v21 = vsub.f32 %v11545_v29, %v11613_v18 }
 0x4f8   : > { %v4049_v28 = vsub.f32 1.5, %v4048_v52  ;;  %v4015_v52 = vsub.f32 %v11353_v34, %v11613_v18  ;;  %v4022_v34 = vsub.f32 %v11432_v39, %v11613_v18  ;;  %v4028_v39 = vsub.f32 %v11490_v45, %v11613_v18 }
 0x4f9   : > { %v4035_v45 = vsub.f32 %v11555_v42, %v11613_v18 }
 0x4fa   : > { %v4050_v37 = vmul.f32 %v9030_v56, %v4049_v28  ;;  %v4016_v28 = vsub.f32 %v11367_v19, %v11613_v18  ;;  %v4023_v19 = vsub.f32 %v11442_v38, %v11613_v18  ;;  %v4030_v38 = vsub.f32 %v11511_v16, %v11613_v18 }
 0x4fb   : > { %v4037_v16 = vsub.f32 %v11567_v62, %v11613_v18 }
 0x4fc   : > { %v11621_v47 = vsel %vm4053_vm1, %v9030_v56, %v4050_v37  ;;  %v4012_v56 = vsub.f32 %v11341_v24, %v11613_v18  ;;  %v4017_v37 = vsub.f32 %v11375_v5, %v11613_v18  ;;  %v4019_v24 = vsub.f32 %v11400_v46, %v11613_v18 }
 0x4fd   : > { %v11624_v60 = vmul.f32 %v11621_v47, %v4043_v2  ;;  %v11637_v35 = vmul.f32 %v11621_v47, %v4038_v8  ;;  %v11640_v32 = vmul.f32 %v11621_v47, %v4039_v17  ;;  %v11643_v9 = vmul.f32 %v11621_v47, %v4040_v3 }
 0x4fe   : > { %v11646_v63 = vmul.f32 %v11621_v47, %v4041_v6  ;;  %v11649_v41 = vmul.f32 %v11621_v47, %v4042_v15  ;;  %v4018_v2 = vsub.f32 %v11387_v4, %v11613_v18  ;;  %v4020_v8 = vsub.f32 %v11412_v49, %v11613_v18  ;;  %v3878_v49 = vld [vmem:[#allocation8 + $0x4] sm:$0xf] }
 0x4ff   : > { %v4024_v5 = vsub.f32 %v11452_v12, %v11613_v18  ;;  %v4025_v4 = vsub.f32 %v11462_v43, %v11613_v18  ;;  %v4026_v46 = vsub.f32 %v11472_v33, %v11613_v18  ;;  %v4029_v3 = vsub.f32 %v11500_v10, %v11613_v18 }
 0x500   : > { %v4031_v12 = vsub.f32 %v11520_v58, %v11613_v18  ;;  %v4032_v43 = vsub.f32 %v11528_v48, %v11613_v18  ;;  %v4033_v33 = vsub.f32 %v11537_v31, %v11613_v18  ;;  %v4036_v10 = vsub.f32 %v11561_v7, %v11613_v18 }
 0x501   : > { %v4055_v58 = vmul.f32 %v11621_v47, %v4012_v56  ;;  %v4057_v15 = vmul.f32 %v11621_v47, %v4014_v26  ;;  %v4058_v31 = vmul.f32 %v11621_v47, %v4015_v52  ;;  %v4059_v29 = vmul.f32 %v11621_v47, %v4016_v28 }
 0x502   : > { %v4060_v11 = vmul.f32 %v11621_v47, %v4017_v37  ;;  %v4061_v42 = vmul.f32 %v11621_v47, %v4018_v2  ;;  %v4062_v7 = vmul.f32 %v11621_v47, %v4019_v24  ;;  %v4063_v22 = vmul.f32 %v11621_v47, %v4020_v8 }
 0x503   : > { %v4064_v62 = vmul.f32 %v11621_v47, %v4021_v61  ;;  %v4066_v55 = vmul.f32 %v11621_v47, %v4023_v19  ;;  %v11731_v56 = vperm.slane %v3878_v49, 0 }
 0x558   : > { %v3992_v36 = vpop.xlane.xlu1 %3991 }
 0x559   : > { %v3993_v53 = vmul.f32 0.25, %v3992_v36  ;;  %v4067_v36 = vmul.f32 %v11621_v47, %v4024_v5 }
 0x55b   : > { %v3994_v30 = vsub.f32 %v11613_v18, %v3993_v53  ;;  %v4068_v53 = vmul.f32 %v11621_v47, %v4025_v4 }
 0x55d   : > { %v3995_v13 = vmul.f32 %v13528_v25, %v3994_v30  ;;  %v13529_v25 = vld [vmem:[#allocation28_spill] sm:$0xff] }
 0x55e   : > { %v4013_v1 = vsub.f32 %v13529_v25, %v11613_v18  ;;  %v4065_v18 = vmul.f32 %v11621_v47, %v4022_v34  ;;  %v11733_v25 = vperm.slane %v3878_v49, 2 }
 0x55f   : > { %v3996_v51 = vmul.f32 %v3995_v13, %v3995_v13 }
 0x560   : > { %v4056_v48 = vmul.f32 %v11621_v47, %v4013_v1 }
 0x561   : > { %3997 = vadd.xlane.f32.xlu1 %v3996_v51  ;;  %v4070_v51 = vmul.f32 %v11621_v47, %v4027_v27 }
 0x5d4   : > { %v3998_v57 = vpop.xlane.xlu1 %3997 }
 0x5d5   : > { %v3999_v14 = vmul.f32 0.33333334, %v3998_v57  ;;  %v4071_v57 = vmul.f32 %v11621_v47, %v4028_v39 }
 0x5d7   : > { %v4000_v59 = vadd.f32 1e-05, %v3999_v14  ;;  %v4072_v14 = vmul.f32 %v11621_v47, %v4029_v3 }
 0x5d9   : > { %9031 = vrsqrt.f32 %v4000_v59  ;;  %vm4007_vm3 = vweird.f32 %v4000_v59 }
 0x5df   : > { %v9032_v44 = vpop.eup %9031 }
 0x5e0   : > { %v4002_v50 = vmul.f32 %v9032_v44, %v4000_v59  ;;  %vm4008_vm2 = vweird.f32 %v9032_v44  ;;  %v4073_v59 = vmul.f32 %v11621_v47, %v4030_v38 }
 0x5e1   : > { %vm4009_vm4 = vmor %vm4007_vm3, %vm4008_vm2 }
 0x5e2   : > { %v4003_v54 = vmul.f32 %v9032_v44, %v4002_v50  ;;  %v4075_v50 = vmul.f32 %v11621_v47, %v4032_v43 }
 0x5e4   : > { %v4004_v23 = vmul.f32 0.5, %v4003_v54  ;;  %v4076_v54 = vmul.f32 %v11621_v47, %v4033_v33 }
 0x5e6   : > { %v4005_v20 = vsub.f32 1.5, %v4004_v23  ;;  %v4077_v23 = vmul.f32 %v11621_v47, %v4034_v21 }
 0x5e8   : > { %v4006_v40 = vmul.f32 %v9032_v44, %v4005_v20  ;;  %v4078_v20 = vmul.f32 %v11621_v47, %v4035_v45 }
 0x5ea   : > { %v4010_v0 = vsel %vm4009_vm4, %v9032_v44, %v4006_v40  ;;  %v4074_v44 = vmul.f32 %v11621_v47, %v4031_v12  ;;  %v4079_v40 = vmul.f32 %v11621_v47, %v4036_v10 }
 0x5eb   : > { %v4011_v17 = vmul.f32 %v4010_v0, %v3994_v30  ;;  %v4069_v30 = vmul.f32 %v11621_v47, %v4026_v46  ;;  %v4080_v0 = vmul.f32 %v11621_v47, %v4037_v16 }
 0x5ed   : > { %v4087_v6 = vmul.f32 %v4011_v17, %v3878_v49 }
 0x5ef   : > { %v4088_v13 = vperm.slane %v4087_v6, 1 }
 0x5f1   : > { %v4089_v1 = vadd.f32 %v4088_v13, %v4055_v58  ;;  %v4090_v26 = vadd.f32 %v4088_v13, %v4056_v48  ;;  %v4091_v52 = vadd.f32 %v4088_v13, %v4057_v15  ;;  %v4092_v28 = vadd.f32 %v4088_v13, %v4058_v31 }
 0x5f2   : > { %v4093_v37 = vadd.f32 %v4088_v13, %v4059_v29  ;;  %v4094_v2 = vadd.f32 %v4088_v13, %v4060_v11  ;;  %v4095_v24 = vadd.f32 %v4088_v13, %v4061_v42  ;;  %v4096_v8 = vadd.f32 %v4088_v13, %v4062_v7 }
 0x5f3   : > { %v4097_v61 = vadd.f32 %v4088_v13, %v4063_v22  ;;  %v4098_v34 = vadd.f32 %v4088_v13, %v4064_v62  ;;  %v4099_v17 = vadd.f32 %v4088_v13, %v4065_v18  ;;  %v4100_v19 = vadd.f32 %v4088_v13, %v4066_v55 }
 0x5f4   : > { %v4101_v5 = vadd.f32 %v4088_v13, %v4067_v36  ;;  %v4102_v4 = vadd.f32 %v4088_v13, %v4068_v53  ;;  %v4103_v46 = vadd.f32 %v4088_v13, %v4069_v30  ;;  %v4104_v47 = vadd.f32 %v4088_v13, %v4070_v51 }
 0x5f5   : > { %v4105_v27 = vadd.f32 %v4088_v13, %v4071_v57  ;;  %v4106_v39 = vadd.f32 %v4088_v13, %v4072_v14  ;;  %v4107_v49 = vadd.f32 %v4088_v13, %v4073_v59  ;;  %v4108_v3 = vadd.f32 %v4088_v13, %v4074_v44 }
 0x5f6   : > { %v4109_v38 = vadd.f32 %v4088_v13, %v4075_v50  ;;  %v4110_v12 = vadd.f32 %v4088_v13, %v4076_v54  ;;  %v4111_v43 = vadd.f32 %v4088_v13, %v4077_v23  ;;  %v4112_v33 = vadd.f32 %v4088_v13, %v4078_v20 }
 0x5f7   : > { %v4113_v21 = vadd.f32 %v4088_v13, %v4079_v40  ;;  %v4114_v45 = vadd.f32 %v4088_v13, %v4080_v0  ;;  %v4115_v10 = vadd.f32 %v4088_v13, %v11637_v35  ;;  %v4116_v16 = vadd.f32 %v4088_v13, %v11640_v32 }
 0x5f8   : > { %v4117_v6 = vadd.f32 %v4088_v13, %v11643_v9  ;;  %v4118_v58 = vadd.f32 %v4088_v13, %v11646_v63  ;;  %v4119_v48 = vadd.f32 %v4088_v13, %v11649_v41  ;;  %v4120_v15 = vadd.f32 %v4088_v13, %v11624_v60 }
 0x5f9   : > { %v4122_v31 = vmul.f32 %v11731_v56, %v4089_v1  ;;  %v4123_v29 = vmul.f32 %v11731_v56, %v4090_v26  ;;  %v4124_v11 = vmul.f32 %v11731_v56, %v4091_v52  ;;  %v4125_v42 = vmul.f32 %v11731_v56, %v4092_v28 }
 0x5fa   : > { %v4126_v35 = vmul.f32 %v11731_v56, %v4093_v37  ;;  %v4127_v32 = vmul.f32 %v11731_v56, %v4094_v2  ;;  %v4128_v9 = vmul.f32 %v11731_v56, %v4095_v24  ;;  %v4129_v63 = vmul.f32 %v11731_v56, %v4096_v8 }
 0x5fb   : > { %v4130_v41 = vmul.f32 %v11731_v56, %v4097_v61  ;;  %v4131_v60 = vmul.f32 %v11731_v56, %v4098_v34  ;;  %v4132_v7 = vmul.f32 %v11731_v56, %v4099_v17  ;;  %v4133_v22 = vmul.f32 %v11731_v56, %v4100_v19 }
 0x5fc   : > { %v4134_v62 = vmul.f32 %v11731_v56, %v4101_v5  ;;  %v4135_v18 = vmul.f32 %v11731_v56, %v4102_v4  ;;  %v4136_v55 = vmul.f32 %v11731_v56, %v4103_v46  ;;  %v4137_v36 = vmul.f32 %v11731_v56, %v4104_v47 }
 0x5fd   : > { %v4138_v53 = vmul.f32 %v11731_v56, %v4105_v27  ;;  %v4139_v30 = vmul.f32 %v11731_v56, %v4106_v39  ;;  %v4140_v13 = vmul.f32 %v11731_v56, %v4107_v49  ;;  %v4141_v51 = vmul.f32 %v11731_v56, %v4108_v3 }
 0x5fe   : > { %v4142_v57 = vmul.f32 %v11731_v56, %v4109_v38  ;;  %v4143_v14 = vmul.f32 %v11731_v56, %v4110_v12  ;;  %v4144_v59 = vmul.f32 %v11731_v56, %v4111_v43  ;;  %v4145_v44 = vmul.f32 %v11731_v56, %v4112_v33 }
 0x5ff   : > { %v4146_v50 = vmul.f32 %v11731_v56, %v4113_v21  ;;  %v4147_v54 = vmul.f32 %v11731_v56, %v4114_v45  ;;  %v4148_v23 = vmul.f32 %v11731_v56, %v4115_v10  ;;  %v4149_v20 = vmul.f32 %v11731_v56, %v4116_v16 }
 0x600   : > { %v4150_v40 = vmul.f32 %v11731_v56, %v4117_v6  ;;  %v4151_v0 = vmul.f32 %v11731_v56, %v4118_v58  ;;  %v4152_v1 = vmul.f32 %v11731_v56, %v4119_v48  ;;  %v4153_v26 = vmul.f32 %v11731_v56, %v4120_v15 }
 0x601   : > { %v11774_v52 = vadd.f32 %v11733_v25, %v4122_v31  ;;  %v11777_v28 = vadd.f32 %v11733_v25, %v4123_v29  ;;  %v11780_v37 = vadd.f32 %v11733_v25, %v4124_v11  ;;  %v11783_v2 = vadd.f32 %v11733_v25, %v4125_v42 }
 0x602   : > { %v11786_v24 = vadd.f32 %v11733_v25, %v4126_v35  ;;  %v11789_v8 = vadd.f32 %v11733_v25, %v4127_v32  ;;  %v11792_v56 = vadd.f32 %v11733_v25, %v4128_v9  ;;  %v11795_v61 = vadd.f32 %v11733_v25, %v4129_v63 }
 0x603   : > { %v11798_v34 = vadd.f32 %v11733_v25, %v4130_v41  ;;  %v11801_v17 = vadd.f32 %v11733_v25, %v4131_v60  ;;  %v11804_v19 = vadd.f32 %v11733_v25, %v4132_v7  ;;  %v11807_v5 = vadd.f32 %v11733_v25, %v4133_v22 }
 0x604   : > { %v11810_v4 = vadd.f32 %v11733_v25, %v4134_v62  ;;  %v11813_v46 = vadd.f32 %v11733_v25, %v4135_v18  ;;  %v11816_v47 = vadd.f32 %v11733_v25, %v4136_v55  ;;  %v11819_v27 = vadd.f32 %v11733_v25, %v4137_v36 }
 0x605   : > { %v11822_v39 = vadd.f32 %v11733_v25, %v4138_v53  ;;  %v11825_v49 = vadd.f32 %v11733_v25, %v4139_v30  ;;  %v4219_v3 = vmin.f32 %v11774_v52, 0.0  ;;  %v11829_v38 = vadd.f32 %v11733_v25, %v4140_v13 }
 0x606   : > { %v11832_v12 = vadd.f32 %v11733_v25, %v4141_v51  ;;  %v11835_v43 = vadd.f32 %v11733_v25, %v4142_v57  ;;  %v4220_v33 = vmin.f32 %v11777_v28, 0.0  ;;  %v11839_v21 = vadd.f32 %v11733_v25, %v4143_v14 }
 0x607   : > { %v11842_v45 = vadd.f32 %v11733_v25, %v4144_v59  ;;  %v11845_v10 = vadd.f32 %v11733_v25, %v4145_v44  ;;  %v4221_v16 = vmin.f32 %v11780_v37, 0.0  ;;  %v11849_v6 = vadd.f32 %v11733_v25, %v4146_v50 }
 0x608   : > { %13530 = vst [vmem:[#allocation32_spill] sm:$0xff] %v11832_v12  ;;  %v11852_v58 = vadd.f32 %v11733_v25, %v4147_v54  ;;  %v11855_v48 = vadd.f32 %v11733_v25, %v4148_v23  ;;  %v4222_v15 = vmin.f32 %v11783_v2, 0.0  ;;  %v11859_v31 = vadd.f32 %v11733_v25, %v4149_v20 }
 0x609   : > { %13531 = vst [vmem:[#allocation39_spill] sm:$0xff] %v11835_v43  ;;  %v11862_v29 = vadd.f32 %v11733_v25, %v4150_v40  ;;  %v4223_v11 = vmin.f32 %v11786_v24, 0.0  ;;  %v4251_v42 = vmul.f32 1.442695, %v4219_v3  ;;  %v11866_v35 = vadd.f32 %v11733_v25, %v4151_v0 }
 0x60a   : > { %13532 = vst [vmem:[#allocation37_spill] sm:$0xff] %v11839_v21  ;;  %v11869_v32 = vadd.f32 %v11733_v25, %v4152_v1  ;;  %v4224_v9 = vmin.f32 %v11789_v8, 0.0  ;;  %v4253_v63 = vmul.f32 1.442695, %v4220_v33  ;;  %v11873_v41 = vadd.f32 %v11733_v25, %v4153_v26 }
 0x60b   : > { %13533 = vst [vmem:[#allocation44_spill] sm:$0xff] %v11842_v45  ;;  %v4225_v60 = vmin.f32 %v11792_v56, 0.0  ;;  %v4226_v7 = vmin.f32 %v11795_v61, 0.0  ;;  %v4255_v22 = vmul.f32 1.442695, %v4221_v16  ;;  %v4227_v62 = vmin.f32 %v11798_v34, 0.0 }
 0x60c   : > { %13534 = vst [vmem:[#allocation43_spill] sm:$0xff] %v11845_v10  ;;  %v4228_v18 = vmin.f32 %v11801_v17, 0.0  ;;  %v4229_v55 = vmin.f32 %v11804_v19, 0.0  ;;  %v4257_v36 = vmul.f32 1.442695, %v4222_v15  ;;  %v4230_v53 = vmin.f32 %v11807_v5, 0.0 }
 0x60d   : > { %13535 = vst [vmem:[#allocation27_spill] sm:$0xff] %v11849_v6  ;;  %v4231_v30 = vmin.f32 %v11810_v4, 0.0  ;;  %9033 = vpow2.f32 %v4251_v42  ;;  %v4259_v13 = vmul.f32 1.442695, %v4223_v11  ;;  %v4232_v25 = vmin.f32 %v11813_v46, 0.0 }
 0x60e   : > { %v4233_v51 = vmin.f32 %v11816_v47, 0.0  ;;  %9035 = vpow2.f32 %v4253_v63  ;;  %v4261_v57 = vmul.f32 1.442695, %v4224_v9  ;;  %v4234_v14 = vmin.f32 %v11819_v27, 0.0 }
 0x60f   : > { %v4235_v59 = vmin.f32 %v11822_v39, 0.0  ;;  %9037 = vpow2.f32 %v4255_v22  ;;  %v4263_v44 = vmul.f32 1.442695, %v4225_v60  ;;  %v4236_v50 = vmin.f32 %v11825_v49, 0.0 }
 0x610   : > { %v4237_v54 = vmin.f32 %v11829_v38, 0.0  ;;  %9039 = vpow2.f32 %v4257_v36  ;;  %v4265_v23 = vmul.f32 1.442695, %v4226_v7  ;;  %v4238_v20 = vmin.f32 %v11832_v12, 0.0 }
 0x611   : > { %v4239_v40 = vmin.f32 %v11835_v43, 0.0  ;;  %9041 = vpow2.f32 %v4259_v13  ;;  %v4267_v0 = vmul.f32 1.442695, %v4227_v62  ;;  %v4240_v1 = vmin.f32 %v11839_v21, 0.0 }
 0x612   : > { %v4241_v26 = vmin.f32 %v11842_v45, 0.0  ;;  %9043 = vpow2.f32 %v4261_v57  ;;  %v4269_v3 = vmul.f32 1.442695, %v4228_v18  ;;  %v4242_v16 = vmin.f32 %v11845_v10, 0.0 }
 0x613   : > { %v9034_v33 = vpop.eup %9033  ;;  %v4243_v15 = vmin.f32 %v11849_v6, 0.0  ;;  %9045 = vpow2.f32 %v4263_v44  ;;  %v4271_v11 = vmul.f32 1.442695, %v4229_v55  ;;  %v4244_v9 = vmin.f32 %v11852_v58, 0.0 }
 0x614   : > { %v9036_v42 = vpop.eup %9035  ;;  %v4245_v63 = vmin.f32 %v11855_v48, 0.0  ;;  %9047 = vpow2.f32 %v4265_v23  ;;  %v4273_v60 = vmul.f32 1.442695, %v4230_v53  ;;  %v4246_v22 = vmin.f32 %v11859_v31, 0.0 }
 0x615   : > { %v9038_v7 = vpop.eup %9037  ;;  %v4247_v62 = vmin.f32 %v11862_v29, 0.0  ;;  %9049 = vpow2.f32 %v4267_v0  ;;  %v4275_v18 = vmul.f32 1.442695, %v4231_v30  ;;  %vm4187_vm5 = vcmp.gt.f32.partialorder %v11774_v52, 0.0 }
 0x616   : > { %v9040_v36 = vpop.eup %9039  ;;  %vm4188_vm6 = vcmp.gt.f32.partialorder %v11777_v28, 0.0  ;;  %v4248_v55 = vmin.f32 %v11866_v35, 0.0  ;;  %v4249_v13 = vmin.f32 %v11869_v32, 0.0  ;;  %9051 = vpow2.f32 %v4269_v3 }
 0x617   : > { %v4277_v57 = vmul.f32 1.442695, %v4232_v25  ;;  %v9042_v44 = vpop.eup %9041  ;;  %vm4189_vm7 = vcmp.gt.f32.partialorder %v11780_v37, 0.0  ;;  %v4250_v53 = vmin.f32 %v11873_v41, 0.0  ;;  %9053 = vpow2.f32 %v4271_v11 }
 0x618   : > { %v4279_v23 = vmul.f32 1.442695, %v4233_v51  ;;  %v4281_v0 = vmul.f32 1.442695, %v4234_v14  ;;  %v9044_v30 = vpop.eup %9043  ;;  %vm4190_vm8 = vcmp.gt.f32.partialorder %v11783_v2, 0.0  ;;  %vm4191_vm10 = vcmp.gt.f32.partialorder %v11786_v24, 0.0 }
 0x619   : > { %9055 = vpow2.f32 %v4273_v60  ;;  %v4283_v6 = vmul.f32 1.442695, %v4235_v59  ;;  %v11906_v10 = vmul.f32 1.442695, %v4236_v50  ;;  %v11908_v45 = vmul.f32 1.442695, %v4237_v54  ;;  %v9046_v25 = vpop.eup %9045 }
 0x61a   : > { %vm4192_vm11 = vcmp.gt.f32.partialorder %v11789_v8, 0.0  ;;  %9057 = vpow2.f32 %v4275_v18  ;;  %v11911_v3 = vmul.f32 1.442695, %v4238_v20  ;;  %v11913_v11 = vmul.f32 1.442695, %v4239_v40  ;;  %v9048_v14 = vpop.eup %9047 }
 0x61b   : > { %v11915_v51 = vmul.f32 1.442695, %v4240_v1  ;;  %vm4193_vm13 = vcmp.gt.f32.partialorder %v11792_v56, 0.0  ;;  %9059 = vpow2.f32 %v4277_v57  ;;  %v11918_v60 = vmul.f32 1.442695, %v4241_v26  ;;  %v9050_v54 = vpop.eup %9049 }
 0x61c   : > { %v11920_v59 = vmul.f32 1.442695, %v4242_v16  ;;  %v4301_v50 = vmul.f32 1.442695, %v4244_v9  ;;  %vm4194_vm14 = vcmp.gt.f32.partialorder %v11795_v61, 0.0  ;;  %9061 = vpow2.f32 %v4279_v23  ;;  %v9052_v40 = vpop.eup %9051 }
 0x61d   : > { %v4303_v18 = vmul.f32 1.442695, %v4245_v63  ;;  %v7802_v20 = vadd.f32 -1.0, %v9034_v33  ;;  %v7803_v21 = vadd.f32 -1.0, %v9036_v42  ;;  %vm4195_vm15 = vcmp.gt.f32.partialorder %v11798_v34, 0.0  ;;  %v9054_v26 = vpop.eup %9053 }
 0x61e   : > { %13536 = vst [vmem:[#allocation31_spill] sm:$0xff] %v11920_v59  ;;  %9063 = vpow2.f32 %v4281_v0  ;;  %v11924_v1 = vmul.f32 1.442695, %v4243_v15  ;;  %v4305_v43 = vmul.f32 1.442695, %v4246_v22  ;;  %v7804_v57 = vadd.f32 -1.0, %v9038_v7 }
 0x61f   : > { %9065 = vpow2.f32 %v4283_v6  ;;  %v4307_v16 = vmul.f32 1.442695, %v4247_v62  ;;  %v7805_v12 = vadd.f32 -1.0, %v9040_v36  ;;  %v7806_v9 = vadd.f32 -1.0, %v9042_v44  ;;  %v9056_v59 = vpop.eup %9055 }
 0x620   : > { %vm4196_vm0 = vcmp.gt.f32.partialorder %v11801_v17, 0.0  ;;  %vm4212_vm1 = vcmp.gt.f32.partialorder %v11852_v58, 0.0  ;;  %9067 = vpow2.f32 %v4301_v50  ;;  %v4309_v33 = vmul.f32 1.442695, %v4248_v55  ;;  %v9058_v23 = vpop.eup %9057 }
 0x621   : > { %v4311_v42 = vmul.f32 1.442695, %v4249_v13  ;;  %v7807_v63 = vadd.f32 -1.0, %v9044_v30  ;;  %vm4213_vm2 = vcmp.gt.f32.partialorder %v11855_v48, 0.0  ;;  %9069 = vpow2.f32 %v4303_v18  ;;  %v11939_v22 = vpop.eup %9059 }
 0x622   : > { %v7808_v15 = vadd.f32 -1.0, %v9046_v25  ;;  %v11932_v6 = vsel %vm4187_vm5, %v11774_v52, %v7802_v20  ;;  %v11937_v7 = vsel %vm4188_vm6, %v11777_v28, %v7803_v21  ;;  %vm4214_vm3 = vcmp.gt.f32.partialorder %v11859_v31, 0.0  ;;  %v11947_v13 = vpop.eup %9061 }
 0x623   : > { %9071 = vpow2.f32 %v4305_v43  ;;  %v4313_v62 = vmul.f32 1.442695, %v4250_v53  ;;  %v7809_v36 = vadd.f32 -1.0, %v9048_v14  ;;  %v11945_v55 = vsel %vm4189_vm7, %v11780_v37, %v7804_v57 }
 0x624   : > { %vm4197_vm4 = vcmp.gt.f32.partialorder %v11804_v19, 0.0  ;;  %vm4215_vm5 = vcmp.gt.f32.partialorder %v11862_v29, 0.0  ;;  %9073 = vpow2.f32 %v4307_v16  ;;  %v7810_v52 = vadd.f32 -1.0, %v9050_v54  ;;  %v11961_v37 = vpop.eup %9063 }
 0x625   : > { %v11954_v28 = vsel %vm4190_vm8, %v11783_v2, %v7805_v12  ;;  %v11959_v43 = vsel %vm4191_vm10, %v11786_v24, %v7806_v9  ;;  %vm4216_vm6 = vcmp.gt.f32.partialorder %v11866_v35, 0.0  ;;  %9075 = vpow2.f32 %v4309_v33  ;;  %v11971_v12 = vpop.eup %9065 }
 0x626   : > { %v11967_v21 = vsel %vm4192_vm11, %v11789_v8, %v7807_v63  ;;  %v4379_v44 = vrot.slane %v11932_v6, 7  ;;  %v4380_v2 = vrot.slane %v11937_v7, 7  ;;  %vm4217_vm7 = vcmp.gt.f32.partialorder %v11869_v32, 0.0  ;;  %v9068_v30 = vpop.eup %9067 }
 0x627   : > { %9077 = vpow2.f32 %v4311_v42  ;;  %v7811_v24 = vadd.f32 -1.0, %v9052_v40  ;;  %v11977_v53 = vsel %vm4193_vm13, %v11792_v56, %v7808_v15  ;;  %v4381_v0 = vrot.slane %v11945_v55, 7  ;;  %v9070_v50 = vpop.eup %9069 }
 0x628   : > { %vm4218_vm8 = vcmp.gt.f32.partialorder %v11873_v41, 0.0  ;;  %9079 = vpow2.f32 %v4313_v62  ;;  %v11984_v8 = vsel %vm4194_vm14, %v11795_v61, %v7809_v36  ;;  %v4382_v25 = vrot.slane %v11954_v28, 7 }
 0x629   : > { %v4383_v14 = vrot.slane %v11959_v43, 7  ;;  %9081 = vpow2.f32 %v11906_v10  ;;  %v7812_v56 = vadd.f32 -1.0, %v9054_v26  ;;  %v7827_v54 = vadd.f32 -1.0, %v9068_v30  ;;  %v9072_v20 = vpop.eup %9071 }
 0x62a   : > { %v11992_v18 = vsel %vm4195_vm15, %v11798_v34, %v7810_v52  ;;  %vm4198_vm10 = vcmp.gt.f32.partialorder %v11807_v5, 0.0  ;;  %9083 = vpow2.f32 %v11908_v45  ;;  %v7813_v61 = vadd.f32 -1.0, %v9056_v59  ;;  %v9074_v16 = vpop.eup %9073 }
 0x62b   : > { %v7828_v40 = vadd.f32 -1.0, %v9070_v50  ;;  %v4384_v57 = vrot.slane %v11967_v21, 7  ;;  %vm4199_vm11 = vcmp.gt.f32.partialorder %v11810_v4, 0.0  ;;  %v7829_v10 = vadd.f32 -1.0, %v9072_v20  ;;  %v9076_v59 = vpop.eup %9075 }
 0x62c   : > { %v12001_v26 = vsel %vm4196_vm0, %v11801_v17, %v7811_v24  ;;  %v12006_v34 = vsel %vm4212_vm1, %v11852_v58, %v7827_v54  ;;  %v13312_v45 = vrot.slane %v11977_v53, 7  ;;  %vm4200_vm13 = vcmp.gt.f32.partialorder %v11813_v46, 0.0 }
 0x62d   : > { %9085 = vpow2.f32 %v11911_v3  ;;  %v7830_v9 = vadd.f32 -1.0, %v9074_v16  ;;  %v12014_v33 = vsel %vm4213_vm2, %v11855_v48, %v7828_v40  ;;  %v13311_v17 = vrot.slane %v12006_v34, 7  ;;  %v9078_v42 = vpop.eup %9077 }
 0x62e   : > { %vm4201_vm14 = vcmp.gt.f32.partialorder %v11816_v47, 0.0  ;;  %v7814_v58 = vadd.f32 -1.0, %v9058_v23  ;;  %v7831_v63 = vadd.f32 -1.0, %v9076_v59  ;;  %v12021_v15 = vsel %vm4214_vm3, %v11859_v31, %v7829_v10  ;;  %v9080_v62 = vpop.eup %9079 }
 0x62f   : > { %v4405_v3 = vrot.slane %v12014_v33, 7  ;;  %v7832_v36 = vadd.f32 -1.0, %v9078_v42  ;;  %v12027_v48 = vsel %vm4197_vm4, %v11804_v19, %v7812_v56  ;;  %v12032_v52 = vsel %vm4215_vm5, %v11862_v29, %v7830_v9  ;;  %v9082_v24 = vpop.eup %9081  ;;  %v13606_v19 = vld [vmem:[#allocation63_spill] sm:$0xff] }
 0x630   : > { %v4406_v23 = vrot.slane %v12021_v15, 7  ;;  %vm4202_vm15 = vcmp.gt.f32.partialorder %v11819_v27, 0.0  ;;  %v7833_v31 = vadd.f32 -1.0, %v9080_v62  ;;  %v12039_v30 = vsel %vm4216_vm6, %v11866_v35, %v7831_v63  ;;  %v9084_v29 = vpop.eup %9083 }
 0x631   : > { %v4407_v50 = vrot.slane %v12032_v52, 7  ;;  %v12046_v56 = vsel %vm1419_vm12, %v13311_v17, %v4405_v3  ;;  %vm4203_vm0 = vcmp.gt.f32.partialorder %v11822_v39, 0.0  ;;  %v12052_v54 = vsel %vm4217_vm7, %v11869_v32, %v7832_v36 }
 0x632   : > { %v4408_v35 = vrot.slane %v12039_v30, 7  ;;  %v12058_v40 = vsel %vm1419_vm12, %v4405_v3, %v4406_v23  ;;  %v7815_v16 = vadd.f32 -1.0, %v11939_v22  ;;  %v12064_v10 = vsel %vm4218_vm8, %v11873_v41, %v7833_v31  ;;  %v13541_v31 = vld [vmem:[#allocation39_spill] sm:$0xff] }
 0x633   : > { %v4409_v59 = vrot.slane %v12052_v54, 7  ;;  %v12069_v32 = vsel %vm1419_vm12, %v4406_v23, %v4407_v50  ;;  %v9086_v9 = vpop.eup %9085  ;;  %vm4204_vm1 = vcmp.gt.f32.partialorder %v11825_v49, 0.0  ;;  %9087 = vpow2.f32 %v11913_v11 }
 0x634   : > { %v7816_v42 = vadd.f32 -1.0, %v11947_v13  ;;  %v4410_v22 = vrot.slane %v12064_v10, 7  ;;  %v12077_v63 = vsel %vm1419_vm12, %v4407_v50, %v4408_v35  ;;  %9089 = vpow2.f32 %v11915_v51  ;;  %v13542_v50 = vld [vmem:[#allocation37_spill] sm:$0xff] }
 0x635   : > { %v12083_v41 = vsel %vm4198_vm10, %v11807_v5, %v7813_v61  ;;  %v12088_v11 = vsel %vm1419_vm12, %v4408_v35, %v4409_v59  ;;  %vm4205_vm2 = vcmp.gt.f32.partialorder %v11829_v38, 0.0  ;;  %9091 = vpow2.f32 %v11918_v60  ;;  %v13539_v61 = vld [vmem:[#allocation31_spill] sm:$0xff]  ;;  %v13545_v60 = vld [vmem:[#allocation44_spill] sm:$0xff] }
 0x636   : > { %v7817_v13 = vadd.f32 -1.0, %v11961_v37  ;;  %v12096_v51 = vsel %vm4199_vm11, %v11810_v4, %v7814_v58  ;;  %v12100_v5 = vsel %vm1419_vm12, %v4409_v59, %v4410_v22  ;;  %9093 = vpow2.f32 %v13539_v61  ;;  %v13540_v37 = vld [vmem:[#allocation32_spill] sm:$0xff]  ;;  %v13544_v61 = vld [vmem:[#allocation18_spill] sm:$0xff] }
 0x637   : > { %13538 = vst [vmem:[#allocation34_spill] sm:$0xff] %v12100_v5  ;;  %v7818_v62 = vadd.f32 -1.0, %v11971_v12  ;;  %v12107_v36 = vsel %vm4200_vm13, %v11813_v46, %v7815_v16  ;;  %vm4206_vm3 = vcmp.gt.f32.partialorder %v13540_v37, 0.0  ;;  %9095 = vpow2.f32 %v11924_v1  ;;  %v13543_v59 = vld [vmem:[#allocation16_spill] sm:$0xff] }
 0x638   : > { %v12115_v4 = vsel %vm4201_vm14, %v11816_v47, %v7816_v42  ;;  %v7819_v23 = vadd.f32 -1.0, %v9082_v24  ;;  %v4438_v46 = vsel %vm1419_vm12, %v4382_v25, %v4383_v14  ;;  %v4440_v47 = vsel %vm1419_vm12, %v4380_v2, %v4381_v0 }
 0x639   : > { %v4442_v1 = vsel %vm1419_vm12, %v4410_v22, %v4379_v44  ;;  %v9088_v24 = vpop.eup %9087  ;;  %vm4207_vm4 = vcmp.gt.f32.partialorder %v13541_v31, 0.0  ;;  %vm4208_vm5 = vcmp.gt.f32.partialorder %v13542_v50, 0.0  ;;  %v12140_v35 = vsel %vm4202_vm15, %v11819_v27, %v7817_v13 }
 0x63a   : > { %v4443_v42 = vmul.f32 %v13543_v59, %v4442_v1  ;;  %v4445_v17 = vmul.f32 %v13544_v61, %v4440_v47  ;;  %v9090_v12 = vpop.eup %9089  ;;  %vm4209_vm6 = vcmp.gt.f32.partialorder %v13545_v60, 0.0  ;;  %v7820_v22 = vadd.f32 -1.0, %v9084_v29  ;;  %v13546_v47 = vld [vmem:[#allocation43_spill] sm:$0xff]  ;;  %v13548_v61 = vld [vmem:[#allocation22_spill] sm:$0xff] }
 0x63b   : > { %v12149_v58 = vsel %vm4203_vm0, %v11822_v39, %v7818_v62  ;;  %v4436_v27 = vsel %vm1419_vm12, %v4384_v57, %v13312_v45  ;;  %v4441_v13 = vsel %vm1419_vm12, %v4379_v44, %v4380_v2  ;;  %v9092_v29 = vpop.eup %9091  ;;  %vm4210_vm7 = vcmp.gt.f32.partialorder %v13546_v47, 0.0  ;;  %v13547_v1 = vld [vmem:[#allocation27_spill] sm:$0xff] }
 0x63c   : > { %vm4211_vm8 = vcmp.gt.f32.partialorder %v13547_v1, 0.0  ;;  %v7821_v39 = vadd.f32 -1.0, %v9086_v9  ;;  %v4439_v59 = vsel %vm1419_vm12, %v4381_v0, %v4382_v25  ;;  %v4447_v16 = vmul.f32 %v13548_v61, %v4438_v46  ;;  %v9094_v45 = vpop.eup %9093  ;;  %v13549_v0 = vld [vmem:[#allocation26_spill] sm:$0xff] }
 0x63d   : > { %v7822_v20 = vadd.f32 -1.0, %v9088_v24  ;;  %v12176_v44 = vsel %vm4204_vm1, %v11825_v49, %v7819_v23  ;;  %v4437_v9 = vsel %vm1419_vm12, %v4383_v14, %v4384_v57  ;;  %v9096_v62 = vpop.eup %9095  ;;  %v4449_v25 = vmul.f32 %v13549_v0, %v4436_v27 }
 0x63e   : > { %v4475_v46 = vpack.c.bf16 %v4443_v42, %v4443_v42  ;;  %v4476_v61 = vpack.c.bf16 %v4441_v13, %v4441_v13  ;;  %v4477_v24 = vpack.c.bf16 %v4445_v17, %v4445_v17  ;;  %v7823_v3 = vadd.f32 -1.0, %v9090_v12 }
 0x63f   : > { %v12189_v49 = vsel %vm4205_vm2, %v11829_v38, %v7820_v22  ;;  %v13550_v23 = vrot.slane %v11992_v18, 7  ;;  %v13551_v2 = vrot.slane %v11984_v8, 7  ;;  %v4478_v14 = vpack.c.bf16 %v4439_v59, %v4439_v59 }
 0x640   : > { %v7824_v57 = vadd.f32 -1.0, %v9092_v29  ;;  %v4394_v27 = vrot.slane %v12140_v35, 7  ;;  %v13553_v17 = vrot.slane %v11977_v53, 7  ;;  %v4479_v38 = vpack.c.bf16 %v4447_v16, %v4447_v16  ;;  %4667 = vst [vmem:[#allocation2 + $0x18] sm:$0xf] %v4475_v46  ;;  %v13557_v16 = vld [vmem:[#allocation33_spill] sm:$0xff] }
 0x641   : > { %v4434_v5 = vsel %vm1419_vm12, %v13551_v2, %v13550_v23  ;;  %v13552_v42 = vmov %v13551_v2  ;;  %v7825_v22 = vadd.f32 -1.0, %v9094_v45  ;;  %v7826_v13 = vadd.f32 -1.0, %v9096_v62  ;;  %4668 = vst [vmem:[#allocation2 + $0x24] sm:$0xf] %v4476_v61 }
 0x642   : > { %v4435_v12 = vsel %vm1419_vm12, %v13553_v17, %v13552_v42  ;;  %v12207_v0 = vsel %vm4206_vm3, %v13540_v37, %v7821_v39  ;;  %v4480_v59 = vpack.c.bf16 %v4437_v9, %v4437_v9  ;;  %v4395_v29 = vrot.slane %v12149_v58, 7  ;;  %4669 = vst [vmem:[#allocation2 + $0x30] sm:$0xf] %v4477_v24  ;;  %v13567_v17 = vld [vmem:[#allocation40_spill] sm:$0xff] }
 0x643   : > { %13554 = vst [vmem:[#allocation30_spill] sm:$0xff] %v12207_v0  ;;  %v13555_v2 = vrot.slane %v12027_v48, 7  ;;  %v13556_v23 = vrot.slane %v12001_v26, 7  ;;  %v4451_v46 = vmul.f32 %v13557_v16, %v4434_v5  ;;  %v4481_v45 = vpack.c.bf16 %v4449_v25, %v4449_v25 }
 0x644   : > { %v12220_v37 = vsel %vm4207_vm4, %v13541_v31, %v7822_v20  ;;  %v12225_v39 = vsel %vm4208_vm5, %v13542_v50, %v7823_v3  ;;  %v4396_v62 = vrot.slane %v12176_v44, 7  ;;  %v4482_v9 = vpack.c.bf16 %v4435_v12, %v4435_v12  ;;  %4670 = vst [vmem:[#allocation2 + $0x3c] sm:$0xf] %v4478_v14 }
 0x645   : > { %v4432_v42 = vsel %vm1419_vm12, %v13556_v23, %v13555_v2  ;;  %13558 = vst [vmem:[#allocation38_spill] sm:$0xff] %v12220_v37  ;;  %v12231_v5 = vsel %vm4209_vm6, %v13545_v60, %v7824_v57  ;;  %v4397_v25 = vrot.slane %v12189_v49, 7  ;;  %v4398_v61 = vrot.slane %v12207_v0, 7 }
 0x646   : > { %13559 = vst [vmem:[#allocation36_spill] sm:$0xff] %v12225_v39  ;;  %v13561_v20 = vrot.slane %v12096_v51, 7  ;;  %v13562_v31 = vrot.slane %v12083_v41, 7  ;;  %v12244_v50 = vsel %vm4210_vm7, %v13546_v47, %v7825_v22  ;;  %v12249_v60 = vsel %vm4211_vm8, %v13547_v1, %v7826_v13 }
 0x647   : > { %13560 = vst [vmem:[#allocation46_spill] sm:$0xff] %v12231_v5  ;;  %v13565_v24 = vmov %v13556_v23  ;;  %v13566_v14 = vrot.slane %v11992_v18, 7  ;;  %v4453_v12 = vmul.f32 %v13567_v17, %v4432_v42  ;;  %v13569_v47 = vrot.slane %v12107_v36, 7 }
 0x648   : > { %v4430_v3 = vsel %vm1419_vm12, %v13562_v31, %v13561_v20  ;;  %4671 = vst [vmem:[#allocation2 + $0x48] sm:$0xf] %v4479_v38  ;;  %v13568_v38 = vrot.slane %v12115_v4, 7  ;;  %v4483_v2 = vpack.c.bf16 %v4451_v46, %v4451_v46  ;;  %v4507_v1 = vpack.c.bf16 %v11932_v6, %v11932_v6 }
 0x649   : > { %13563 = vst [vmem:[#allocation21_spill] sm:$0xff] %v12244_v50  ;;  %v4433_v57 = vsel %vm1419_vm12, %v13566_v14, %v13565_v24  ;;  %v4508_v13 = vpack.c.bf16 %v11937_v7, %v11937_v7  ;;  %v4399_v23 = vrot.slane %v12220_v37, 7  ;;  %v4400_v42 = vrot.slane %v12225_v39, 7 }
 0x64a   : > { %13564 = vst [vmem:[#allocation20_spill] sm:$0xff] %v12249_v60  ;;  %v4428_v22 = vsel %vm1419_vm12, %v13569_v47, %v13568_v38  ;;  %v13571_v16 = vrot.slane %v12027_v48, 7  ;;  %v4401_v24 = vrot.slane %v12231_v5, 7  ;;  %v4402_v14 = vrot.slane %v12244_v50, 7 }
 0x64b   : > { %4672 = vst [vmem:[#allocation2 + $0x54] sm:$0xf] %v4480_v59  ;;  %v13570_v59 = vmov %v13562_v31  ;;  %v13572_v31 = vld [vmem:[#allocation42_spill] sm:$0xff]  ;;  %v4484_v17 = vpack.c.bf16 %v4433_v57, %v4433_v57  ;;  %v4403_v38 = vrot.slane %v12249_v60, 7  ;;  %v13573_v39 = vrot.slane %v12096_v51, 7  ;;  %v13576_v60 = vld [vmem:[#allocation17_spill] sm:$0xff] }
 0x64c   : > { %4673 = vst [vmem:[#allocation2 + $0x60] sm:$0xf] %v4481_v45  ;;  %v4431_v20 = vsel %vm1419_vm12, %v13571_v16, %v13570_v59  ;;  %v4455_v46 = vmul.f32 %v13572_v31, %v4430_v3  ;;  %v4426_v45 = vsel %vm1419_vm12, %v4394_v27, %v4395_v29  ;;  %v13574_v3 = vld [vmem:[#allocation47_spill] sm:$0xff]  ;;  %v4485_v16 = vpack.c.bf16 %v4453_v12, %v4453_v12  ;;  %v8771_v31 = vld [vmem:[#allocation6 + $0x308] sm:$0xff] }
 0x64d   : > { %4674 = vst [vmem:[#allocation2 + $0x6c] sm:$0xf] %v4482_v9  ;;  %v4429_v59 = vsel %vm1419_vm12, %v13573_v39, %v13569_v47  ;;  %v4457_v9 = vmul.f32 %v13574_v3, %v4428_v22  ;;  %v4424_v50 = vsel %vm1419_vm12, %v4396_v62, %v4397_v25  ;;  %v4486_v5 = vpack.c.bf16 %v4431_v20, %v4431_v20  ;;  %v13577_v20 = vld [vmem:[#allocation19_spill] sm:$0xff] }
 0x64e   : > { %4699 = vst [vmem:[#allocation2 + $0x1c] sm:$0xf] %v4507_v1  ;;  %v13575_v57 = vrot.slane %v12115_v4, 7  ;;  %v4459_v37 = vmul.f32 %v13576_v60, %v4426_v45  ;;  %v4487_v0 = vpack.c.bf16 %v4455_v46, %v4455_v46  ;;  %5335 = vmatpush.bf16.msra.mxu1 %v8771_v31  ;;  %v4420_v39 = vsel %vm1419_vm12, %v4400_v42, %v4401_v24  ;;  %v13578_v45 = vld [vmem:[#allocation25_spill] sm:$0xff] }
 0x64f   : > { %4700 = vst [vmem:[#allocation2 + $0x28] sm:$0xf] %v4508_v13  ;;  %v4422_v12 = vsel %vm1419_vm12, %v4398_v61, %v4399_v23  ;;  %v4488_v22 = vpack.c.bf16 %v4429_v59, %v4429_v59  ;;  %v4425_v13 = vsel %vm1419_vm12, %v4395_v29, %v4396_v62  ;;  %v4489_v47 = vpack.c.bf16 %v4457_v9, %v4457_v9  ;;  %v13579_v31 = vld [vmem:[#allocation29_spill] sm:$0xff]  ;;  %v13580_v62 = vld [vmem:[#allocation35_spill] sm:$0xff] }
 0x650   : > { %4675 = vst [vmem:[#allocation2 + $0x78] sm:$0xf] %v4483_v2  ;;  %v4427_v1 = vsel %vm1419_vm12, %v13575_v57, %v4394_v27  ;;  %v4418_v2 = vsel %vm1419_vm12, %v4402_v14, %v4403_v38  ;;  %v4461_v27 = vmul.f32 %v13577_v20, %v4424_v50  ;;  %v4423_v46 = vsel %vm1419_vm12, %v4397_v25, %v4398_v61 }
 0x651   : > { %4676 = vst [vmem:[#allocation2 + $0x84] sm:$0xf] %v4484_v17  ;;  %v4490_v60 = vpack.c.bf16 %v4427_v1, %v4427_v1  ;;  %v4463_v3 = vmul.f32 %v13578_v45, %v4422_v12  ;;  %v4465_v59 = vmul.f32 %v13579_v31, %v4420_v39  ;;  %v4491_v17 = vpack.c.bf16 %v4459_v37, %v4459_v37  ;;  %v13582_v37 = vld [vmem:[#allocation41_spill] sm:$0xff] }
 0x652   : > { %4677 = vst [vmem:[#allocation2 + $0x90] sm:$0xf] %v4485_v16  ;;  %v4419_v57 = vsel %vm1419_vm12, %v4401_v24, %v4402_v14  ;;  %v4421_v29 = vsel %vm1419_vm12, %v4399_v23, %v4400_v42  ;;  %v4467_v50 = vmul.f32 %v13580_v62, %v4418_v2  ;;  %v4492_v9 = vpack.c.bf16 %v4425_v13, %v4425_v13  ;;  %v13583_v16 = vld [vmem:[#allocation45_spill] sm:$0xff] }
 0x653   : > { %4678 = vst [vmem:[#allocation2 + $0x9c] sm:$0xf] %v4486_v5  ;;  %v13581_v5 = vrot.slane %v12006_v34, 7  ;;  %v4493_v61 = vpack.c.bf16 %v4461_v27, %v4461_v27  ;;  %v4471_v24 = vmul.f32 %v13583_v16, %v12069_v32  ;;  %v13584_v14 = vld [vmem:[#allocation49_spill] sm:$0xff]  ;;  %v4494_v42 = vpack.c.bf16 %v4423_v46, %v4423_v46 }
 0x654   : > { %4679 = vst [vmem:[#allocation2 + $0xa8] sm:$0xf] %v4487_v0  ;;  %v4469_v0 = vmul.f32 %v13582_v37, %v12046_v56  ;;  %v4473_v23 = vmul.f32 %v13584_v14, %v12088_v11  ;;  %v4495_v1 = vpack.c.bf16 %v4463_v3, %v4463_v3  ;;  %v4496_v39 = vpack.c.bf16 %v4421_v29, %v4421_v29 }
 0x655   : > { %4680 = vst [vmem:[#allocation2 + $0xb4] sm:$0xf] %v4488_v22  ;;  %v4417_v25 = vsel %vm1419_vm12, %v4403_v38, %v13581_v5  ;;  %v4497_v12 = vpack.c.bf16 %v4465_v59, %v4465_v59  ;;  %v4498_v22 = vpack.c.bf16 %v4419_v57, %v4419_v57  ;;  %v4499_v2 = vpack.c.bf16 %v4467_v50, %v4467_v50 }
 0x656   : > { %4681 = vst [vmem:[#allocation2 + $0xc0] sm:$0xf] %v4489_v47  ;;  %v4564_v38 = vrot.slane %v12006_v34, 1  ;;  %v4565_v13 = vrot.slane %v12014_v33, 1  ;;  %v4566_v56 = vrot.slane %v12021_v15, 1  ;;  %v4567_v32 = vrot.slane %v12032_v52, 1 }
 0x657   : > { %4682 = vst [vmem:[#allocation2 + $0xcc] sm:$0xf] %v4490_v60  ;;  %v4568_v20 = vrot.slane %v12039_v30, 1  ;;  %v4569_v11 = vrot.slane %v12052_v54, 1  ;;  %v4570_v27 = vrot.slane %v12064_v10, 1  ;;  %v4500_v47 = vpack.c.bf16 %v4417_v25, %v4417_v25 }
 0x658   : > { %4683 = vst [vmem:[#allocation2 + $0xd8] sm:$0xf] %v4491_v17  ;;  %v4542_v60 = vrot.slane %v11954_v28, 1  ;;  %v12334_v46 = vsel %vm1580_vm9, %v4565_v13, %v4566_v56  ;;  %v12340_v45 = vsel %vm1580_vm9, %v4564_v38, %v4565_v13  ;;  %v12356_v17 = vsel %vm1580_vm9, %v4566_v56, %v4567_v32 }
 0x659   : > { %4684 = vst [vmem:[#allocation2 + $0xe4] sm:$0xf] %v4492_v9  ;;  %v12344_v3 = vsel %vm1580_vm9, %v4569_v11, %v4570_v27  ;;  %v12348_v31 = vsel %vm1580_vm9, %v4568_v20, %v4569_v11  ;;  %v12352_v59 = vsel %vm1580_vm9, %v4567_v32, %v4568_v20  ;;  %v4543_v57 = vrot.slane %v11959_v43, 1 }
 0x65a   : > { %4685 = vst [vmem:[#allocation2 + $0xf0] sm:$0xf] %v4493_v61  ;;  %v4544_v29 = vrot.slane %v11967_v21, 1  ;;  %v4545_v62 = vrot.slane %v11977_v53, 1  ;;  %v4546_v50 = vrot.slane %v11984_v8, 1  ;;  %v4501_v9 = vpack.c.bf16 %v4469_v0, %v4469_v0 }
 0x65b   : > { %4686 = vst [vmem:[#allocation2 + $0xfc] sm:$0xf] %v4494_v42  ;;  %v4539_v5 = vrot.slane %v11932_v6, 1  ;;  %v4540_v25 = vrot.slane %v11937_v7, 1  ;;  %v4541_v61 = vrot.slane %v11945_v55, 1  ;;  %v4502_v37 = vpack.c.bf16 %v12058_v40, %v12058_v40 }
 0x65c   : > { %4687 = vst [vmem:[#allocation2 + $0x108] sm:$0xf] %v4495_v1  ;;  %v4503_v16 = vpack.c.bf16 %v4471_v24, %v4471_v24  ;;  %v4504_v14 = vpack.c.bf16 %v12077_v63, %v12077_v63  ;;  %v12373_v0 = vsel %vm1580_vm9, %v4545_v62, %v4546_v50  ;;  %v12377_v6 = vsel %vm1580_vm9, %v4544_v29, %v4545_v62  ;;  %v8784_v62 = vld [vmem:[#allocation6 + $0x370] sm:$0xff] }
 0x65d   : > { %4688 = vst [vmem:[#allocation2 + $0x114] sm:$0xf] %v4496_v39  ;;  %v12381_v7 = vsel %vm1580_vm9, %v4543_v57, %v4544_v29  ;;  %v12385_v40 = vsel %vm1580_vm9, %v4542_v60, %v4543_v57  ;;  %v4505_v63 = vpack.c.bf16 %v4473_v23, %v4473_v23  ;;  %v12389_v24 = vsel %vm1580_vm9, %v4541_v61, %v4542_v60  ;;  %v13585_v39 = vld [vmem:[#allocation34_spill] sm:$0xff]  ;;  %v8785_v60 = vld [vmem:[#allocation6 + $0x378] sm:$0xff] }
 0x65e   : > { %4689 = vst [vmem:[#allocation2 + $0x120] sm:$0xf] %v4497_v12  ;;  %v4600_v42 = vsel %vm1580_vm9, %v4540_v25, %v4541_v61  ;;  %v12395_v1 = vsel %vm1580_vm9, %v4570_v27, %v4539_v5  ;;  %v4506_v12 = vpack.c.bf16 %v13585_v39, %v13585_v39  ;;  %v4509_v23 = vpack.c.bf16 %v11945_v55, %v11945_v55  ;;  %v8749_v29 = vld [vmem:[#allocation6 + $0x270] sm:$0xff] }
 0x65f   : > { %4690 = vst [vmem:[#allocation2 + $0x12c] sm:$0xf] %v4498_v22  ;;  %v13586_v22 = vld [vmem:[#allocation48_spill] sm:$0xff]  ;;  %v4601_v13 = vsel %vm1580_vm9, %v4539_v5, %v4540_v25  ;;  %v4510_v56 = vpack.c.bf16 %v11954_v28, %v11954_v28  ;;  %v4511_v11 = vpack.c.bf16 %v11959_v43, %v11959_v43  ;;  %v4512_v27 = vpack.c.bf16 %v11967_v21, %v11967_v21  ;;  %v8750_v28 = vld [vmem:[#allocation6 + $0x278] sm:$0xff] }
 0x660   : > { %4691 = vst [vmem:[#allocation2 + $0x138] sm:$0xf] %v4499_v2  ;;  %v4604_v2 = vmul.f32 %v13586_v22, %v4600_v42  ;;  %v4635_v32 = vpack.c.bf16 %v4601_v13, %v4601_v13  ;;  %v4513_v55 = vpack.c.bf16 %v11977_v53, %v11977_v53  ;;  %v4515_v57 = vpack.c.bf16 %v11992_v18, %v11992_v18  ;;  %v13587_v22 = vld [vmem:[#allocation30_spill] sm:$0xff]  ;;  %v8782_v13 = vld [vmem:[#allocation6 + $0x360] sm:$0xff] }
 0x661   : > { %4692 = vst [vmem:[#allocation2 + $0x144] sm:$0xf] %v4500_v47  ;;  %v4514_v47 = vpack.c.bf16 %v11984_v8, %v11984_v8  ;;  %v4516_v43 = vpack.c.bf16 %v12001_v26, %v12001_v26  ;;  %v4517_v21 = vpack.c.bf16 %v12027_v48, %v12027_v48  ;;  %v4518_v53 = vpack.c.bf16 %v12083_v41, %v12083_v41 }
 0x662   : > { %4693 = vst [vmem:[#allocation2 + $0x150] sm:$0xf] %v4501_v9  ;;  %v4636_v20 = vpack.c.bf16 %v4604_v2, %v4604_v2  ;;  %5756 = vmatpush.bf16.msrb.mxu0 %v8750_v28  ;;  %5418 = vmatpush.bf16.msrb.mxu2 %v8785_v60  ;;  %v8793_v9 = vld [vmem:[#allocation6 + $0x3b8] sm:$0xff]  ;;  %v4519_v5 = vpack.c.bf16 %v12096_v51, %v12096_v51  ;;  %v13591_v28 = vld [vmem:[#allocation21_spill] sm:$0xff] }
 0x663   : > { %4694 = vst [vmem:[#allocation2 + $0x15c] sm:$0xf] %v4502_v37  ;;  %v4520_v25 = vpack.c.bf16 %v12107_v36, %v12107_v36  ;;  %5507 = vmatpush.bf16.msrb.mxu3 %v8793_v9  ;;  %v4521_v61 = vpack.c.bf16 %v12115_v4, %v12115_v4  ;;  %v4522_v37 = vpack.c.bf16 %v12140_v35, %v12140_v35 }
 0x664   : > { %4695 = vst [vmem:[#allocation2 + $0x168] sm:$0xf] %v4503_v16  ;;  %v8748_v16 = vld [vmem:[#allocation6 + $0x268] sm:$0xff]  ;;  %v4523_v42 = vpack.c.bf16 %v12149_v58, %v12149_v58  ;;  %v4524_v39 = vpack.c.bf16 %v12176_v44, %v12176_v44  ;;  %v4526_v2 = vpack.c.bf16 %v13587_v22, %v13587_v22  ;;  %v4530_v60 = vpack.c.bf16 %v13591_v28, %v13591_v28 }
 0x665   : > { %4696 = vst [vmem:[#allocation2 + $0x174] sm:$0xf] %v4504_v14  ;;  %v8783_v14 = vld [vmem:[#allocation6 + $0x368] sm:$0xff]  ;;  %v4533_v9 = vpack.c.bf16 %v12014_v33, %v12014_v33  ;;  %v4537_v33 = vpack.c.bf16 %v12052_v54, %v12052_v54  ;;  %v4554_v54 = vrot.slane %v12140_v35, 1 }
 0x666   : > { %4697 = vst [vmem:[#allocation2 + $0x180] sm:$0xf] %v4505_v63  ;;  %5757 = vmatpush.bf16.msrb.mxu0 %v8749_v29  ;;  %5419 = vmatpush.bf16.msrb.mxu2 %v8784_v62  ;;  %v8792_v63 = vld [vmem:[#allocation6 + $0x3b0] sm:$0xff]  ;;  %v4532_v62 = vpack.c.bf16 %v12006_v34, %v12006_v34 }
 0x667   : > { %4698 = vst [vmem:[#allocation2 + $0x18c] sm:$0xf] %v4506_v12  ;;  %5508 = vmatpush.bf16.msrb.mxu3 %v8792_v63  ;;  %v4525_v12 = vpack.c.bf16 %v12189_v49, %v12189_v49  ;;  %v8789_v63 = vld [vmem:[#allocation6 + $0x398] sm:$0xff] }
 0x668   : > { %4701 = vst [vmem:[#allocation2 + $0x34] sm:$0xf] %v4509_v23  ;;  %v8747_v23 = vld [vmem:[#allocation6 + $0x260] sm:$0xff] }
 0x669   : > { %4731 = vst [vmem:[#allocation2 + $0x20] sm:$0xf] %v4635_v32  ;;  %v13588_v32 = vld [vmem:[#allocation38_spill] sm:$0xff] }
 0x66a   : > { %4732 = vst [vmem:[#allocation2 + $0x2c] sm:$0xf] %v4636_v20  ;;  %5758 = vmatpush.bf16.msrb.mxu0 %v8748_v16  ;;  %5420 = vmatpush.bf16.msrb.mxu2 %v8783_v14  ;;  %v4527_v20 = vpack.c.bf16 %v13588_v32, %v13588_v32  ;;  %v8745_v16 = vld [vmem:[#allocation6 + $0x250] sm:$0xff]  ;;  %v4559_v8 = vrot.slane %v13588_v32, 1 }
 0x66b   : > { %4702 = vst [vmem:[#allocation2 + $0x40] sm:$0xf] %v4510_v56  ;;  %v8791_v56 = vld [vmem:[#allocation6 + $0x3a8] sm:$0xff]  ;;  %v8780_v14 = vld [vmem:[#allocation6 + $0x350] sm:$0xff] }
 0x66c   : > { %4703 = vst [vmem:[#allocation2 + $0x4c] sm:$0xf] %v4511_v11  ;;  %v13589_v11 = vld [vmem:[#allocation36_spill] sm:$0xff]  ;;  %5509 = vmatpush.bf16.msrb.mxu3 %v8791_v56  ;;  %v13594_v56 = vld [vmem:[#allocation51_spill] sm:$0xff] }
 0x66d   : > { %4704 = vst [vmem:[#allocation2 + $0x58] sm:$0xf] %v4512_v27  ;;  %v4528_v27 = vpack.c.bf16 %v13589_v11, %v13589_v11 }
 0x66e   : > { %4705 = vst [vmem:[#allocation2 + $0x64] sm:$0xf] %v4513_v55  ;;  %v13590_v55 = vld [vmem:[#allocation46_spill] sm:$0xff]  ;;  %5759 = vmatpush.bf16.msrb.mxu0 %v8747_v23  ;;  %5421 = vmatpush.bf16.msrb.mxu2 %v8782_v13  ;;  %v4538_v23 = vpack.c.bf16 %v12064_v10, %v12064_v10  ;;  %v4557_v13 = vrot.slane %v12189_v49, 1  ;;  %v4637_v10 = vpack.c.bf16 %v12389_v24, %v12389_v24  ;;  %v8696_v24 = vld [vmem:[#allocation2 + $0x8] sm:$0xf0] }
 0x66f   : > { %4706 = vst [vmem:[#allocation2 + $0x70] sm:$0xf] %v4514_v47  ;;  %v4529_v47 = vpack.c.bf16 %v13590_v55, %v13590_v55  ;;  %v13602_v49 = vld [vmem:[#allocation59_spill] sm:$0xff]  ;;  %v8701_v34 = vld [vmem:[#allocation2 + $0x34] sm:$0xf] }
 0x670   : > { %4707 = vst [vmem:[#allocation2 + $0x7c] sm:$0xf] %v4515_v57  ;;  %v8746_v57 = vld [vmem:[#allocation6 + $0x258] sm:$0xff] }
 0x671   : > { %4708 = vst [vmem:[#allocation2 + $0x88] sm:$0xf] %v4516_v43  ;;  %v8781_v43 = vld [vmem:[#allocation6 + $0x358] sm:$0xff] }
 0x672   : > { %4709 = vst [vmem:[#allocation2 + $0x94] sm:$0xf] %v4517_v21  ;;  %v8790_v21 = vld [vmem:[#allocation6 + $0x3a0] sm:$0xff]  ;;  %5760 = vmatpush.bf16.msrb.mxu0 %v8746_v57  ;;  %5422 = vmatpush.bf16.msrb.mxu2 %v8781_v43  ;;  %v8779_v57 = vld [vmem:[#allocation6 + $0x348] sm:$0xff] }
 0x673   : > { %4710 = vst [vmem:[#allocation2 + $0xa0] sm:$0xf] %v4518_v53  ;;  %v13592_v53 = vld [vmem:[#allocation20_spill] sm:$0xff]  ;;  %5510 = vmatpush.bf16.msrb.mxu3 %v8790_v21 }
 0x674   : > { %4711 = vst [vmem:[#allocation2 + $0xac] sm:$0xf] %v4519_v5  ;;  %v4531_v29 = vpack.c.bf16 %v13592_v53, %v13592_v53  ;;  %v4547_v5 = vrot.slane %v11992_v18, 1  ;;  %v4548_v18 = vrot.slane %v12001_v26, 1  ;;  %v4555_v26 = vrot.slane %v12149_v58, 1  ;;  %v13595_v43 = vld [vmem:[#allocation52_spill] sm:$0xff] }
 0x675   : > { %4712 = vst [vmem:[#allocation2 + $0xb8] sm:$0xf] %v4520_v25  ;;  %v4534_v25 = vpack.c.bf16 %v12021_v15, %v12021_v15  ;;  %v4550_v15 = vrot.slane %v12083_v41, 1 }
 0x676   : > { %4713 = vst [vmem:[#allocation2 + $0xc4] sm:$0xf] %v4521_v61  ;;  %v4535_v61 = vpack.c.bf16 %v12032_v52, %v12032_v52  ;;  %v4551_v52 = vrot.slane %v12096_v51, 1  ;;  %v4594_v41 = vsel %vm1580_vm9, %v4546_v50, %v4547_v5  ;;  %5761 = vmatpush.bf16.msrb.mxu0 %v8745_v16  ;;  %5423 = vmatpush.bf16.msrb.mxu2 %v8780_v14  ;;  %v4560_v50 = vrot.slane %v13589_v11, 1  ;;  %v7848_v11 = vld [vmem:[#allocation2 + $0x30] sm:$0xf] }
 0x677   : > { %4714 = vst [vmem:[#allocation2 + $0xd0] sm:$0xf] %v4522_v37  ;;  %v4536_v37 = vpack.c.bf16 %v12039_v30, %v12039_v30  ;;  %v4552_v30 = vrot.slane %v12107_v36, 1  ;;  %5511 = vmatpush.bf16.msrb.mxu3 %v8789_v63  ;;  %v4610_v21 = vmul.f32 %v13595_v43, %v4594_v41  ;;  %v4639_v14 = vpack.c.bf16 %v12381_v7, %v12381_v7  ;;  %v8778_v41 = vld [vmem:[#allocation6 + $0x340] sm:$0xff] }
 0x678   : > { %4715 = vst [vmem:[#allocation2 + $0xdc] sm:$0xf] %v4523_v42  ;;  %v4549_v42 = vrot.slane %v12027_v48, 1  ;;  %v4556_v48 = vrot.slane %v12176_v44, 1  ;;  %v4590_v16 = vsel %vm1580_vm9, %v4550_v15, %v4551_v52  ;;  %v4593_v63 = vsel %vm1580_vm9, %v4547_v5, %v4548_v18  ;;  %v8786_v43 = vld [vmem:[#allocation6 + $0x380] sm:$0xff]  ;;  %v13601_v44 = vld [vmem:[#allocation58_spill] sm:$0xff] }
 0x679   : > { %4716 = vst [vmem:[#allocation2 + $0xe8] sm:$0xf] %v4524_v39  ;;  %v4553_v39 = vrot.slane %v12115_v4, 1  ;;  %v4641_v5 = vpack.c.bf16 %v12373_v0, %v12373_v0  ;;  %v4586_v0 = vsel %vm1580_vm9, %v4554_v54, %v4555_v26  ;;  %v4561_v36 = vrot.slane %v13590_v55, 1  ;;  %v13599_v55 = vld [vmem:[#allocation56_spill] sm:$0xff] }
 0x67a   : > { %4717 = vst [vmem:[#allocation2 + $0xf4] sm:$0xf] %v4525_v12  ;;  %v13593_v12 = vld [vmem:[#allocation50_spill] sm:$0xff]  ;;  %5424 = vmatpush.bf16.msrb.mxu2 %v8779_v57  ;;  %v13598_v57 = vld [vmem:[#allocation55_spill] sm:$0xff]  ;;  %v4584_v51 = vsel %vm1580_vm9, %v4556_v48, %v4557_v13 }
 0x67b   : > { %4718 = vst [vmem:[#allocation2 + $0x100] sm:$0xf] %v4526_v2  ;;  %v4606_v2 = vmul.f32 %v13593_v12, %v12385_v40  ;;  %v4558_v40 = vrot.slane %v13587_v22, 1  ;;  %v4588_v7 = vsel %vm1580_vm9, %v4552_v30, %v4553_v39  ;;  %v4581_v22 = vsel %vm1580_vm9, %v4559_v8, %v4560_v50 }
 0x67c   : > { %4719 = vst [vmem:[#allocation2 + $0x10c] sm:$0xf] %v4527_v20  ;;  %v4608_v20 = vmul.f32 %v13594_v56, %v12377_v6  ;;  %v7836_v56 = vld [vmem:[#allocation2 + $0x18] sm:$0xf] }
 0x67d   : > { %4720 = vst [vmem:[#allocation2 + $0x118] sm:$0xf] %v4528_v27  ;;  %v8744_v27 = vld [vmem:[#allocation6 + $0x248] sm:$0xff]  ;;  %v4638_v6 = vpack.c.bf16 %v4606_v2, %v4606_v2  ;;  %v4582_v35 = vsel %vm1580_vm9, %v4558_v40, %v4559_v8  ;;  %v4583_v58 = vsel %vm1580_vm9, %v4557_v13, %v4558_v40 }
 0x67e   : > { %4721 = vst [vmem:[#allocation2 + $0x124] sm:$0xf] %v4529_v47  ;;  %v8788_v47 = vld [vmem:[#allocation6 + $0x390] sm:$0xff]  ;;  %v4640_v2 = vpack.c.bf16 %v4608_v20, %v4608_v20  ;;  %5762 = vmatpush.bf16.msrb.mxu0 %v8744_v27  ;;  %5425 = vmatpush.bf16.msrb.mxu2 %v8778_v41  ;;  %v4653_v13 = vpack.c.bf16 %v4583_v58, %v4583_v58  ;;  %v13604_v8 = vld [vmem:[#allocation61_spill] sm:$0xff] }
 0x67f   : > { %4722 = vst [vmem:[#allocation2 + $0x130] sm:$0xf] %v4530_v60  ;;  %v4592_v60 = vsel %vm1580_vm9, %v4548_v18, %v4549_v42  ;;  %5512 = vmatpush.bf16.msrb.mxu3 %v8788_v47  ;;  %v8758_v47 = vld [vmem:[#allocation6 + $0x2b8] sm:$0xff]  ;;  %v13597_v20 = vld [vmem:[#allocation54_spill] sm:$0xff] }
 0x680   : > { %4723 = vst [vmem:[#allocation2 + $0x13c] sm:$0xf] %v4531_v29  ;;  %v8770_v29 = vld [vmem:[#allocation6 + $0x300] sm:$0xff]  ;;  %v7838_v18 = vld [vmem:[#allocation2 + $0x24] sm:$0xf0]  ;;  %v4614_v27 = vmul.f32 %v13597_v20, %v4590_v16 }
 0x681   : > { %4724 = vst [vmem:[#allocation2 + $0x148] sm:$0xf] %v4532_v62  ;;  %v8743_v62 = vld [vmem:[#allocation6 + $0x240] sm:$0xff]  ;;  %5336 = vmatpush.bf16.msra.mxu1 %v8770_v29  ;;  %v7844_v16 = vld [vmem:[#allocation2 + $0x20] sm:$0xf] }
 0x682   : > { %4725 = vst [vmem:[#allocation2 + $0x154] sm:$0xf] %v4533_v9  ;;  %v8124_v9 = vld [vmem:[#allocation2] sm:$0xf]  ;;  %5763 = vmatpush.bf16.msrb.mxu0 %v8743_v62  ;;  %v4587_v62 = vsel %vm1580_vm9, %v4553_v39, %v4554_v54  ;;  %v4585_v39 = vsel %vm1580_vm9, %v4555_v26, %v4556_v48  ;;  %v4622_v26 = vmul.f32 %v13601_v44, %v4582_v35 }
 0x683   : > { %4726 = vst [vmem:[#allocation2 + $0x160] sm:$0xf] %v4534_v25  ;;  %v8787_v25 = vld [vmem:[#allocation6 + $0x388] sm:$0xff]  ;;  %v4651_v41 = vpack.c.bf16 %v4585_v39, %v4585_v39  ;;  %v8708_v39 = vld [vmem:[#allocation2 + $0x68] sm:$0xf0] }
 0x684   : > { %4727 = vst [vmem:[#allocation2 + $0x16c] sm:$0xf] %v4535_v61  ;;  %v8698_v61 = vld [vmem:[#allocation2 + $0x1c] sm:$0xf]  ;;  %5513 = vmatpush.bf16.msrb.mxu3 %v8787_v25 }
 0x685   : > { %4728 = vst [vmem:[#allocation2 + $0x178] sm:$0xf] %v4536_v37  ;;  %v13596_v37 = vld [vmem:[#allocation53_spill] sm:$0xff]  ;;  %5845 = vmatpush.bf16.msrb.mxu1 %v8758_v47  ;;  %v12524_v25 = vor.u32 %v8698_v61, %v7838_v18  ;;  %v4563_v61 = vrot.slane %v13592_v53, 1  ;;  %v4655_v18 = vpack.c.bf16 %v4581_v22, %v4581_v22 }
 0x686   : > { %4729 = vst [vmem:[#allocation2 + $0x184] sm:$0xf] %v4537_v33  ;;  %v4612_v12 = vmul.f32 %v13596_v37, %v4592_v60  ;;  %v4591_v33 = vsel %vm1580_vm9, %v4549_v42, %v4550_v15  ;;  %v4642_v60 = vpack.c.bf16 %v4610_v21, %v4610_v21  ;;  %v8700_v37 = vld [vmem:[#allocation2 + $0x28] sm:$0xf0]  ;;  %v4589_v42 = vsel %vm1580_vm9, %v4551_v52, %v4552_v30  ;;  %v8710_v22 = vld [vmem:[#allocation2 + $0x7c] sm:$0xf] }
 0x687   : > { %4730 = vst [vmem:[#allocation2 + $0x190] sm:$0xf] %v4538_v23  ;;  %v8699_v23 = vld [vmem:[#allocation2 + $0x20] sm:$0xf0]  ;;  %v4643_v15 = vpack.c.bf16 %v4593_v63, %v4593_v63  ;;  %v4616_v21 = vmul.f32 %v13598_v57, %v4588_v7  ;;  %v4645_v52 = vpack.c.bf16 %v4591_v33, %v4591_v33  ;;  %v12534_v30 = vor.u32 %v8700_v37, %v7844_v16  ;;  %v13603_v7 = vld [vmem:[#allocation60_spill] sm:$0xff] }
 0x688   : > { %4733 = vst [vmem:[#allocation2 + $0x38] sm:$0xf] %v4637_v10  ;;  %v12509_v29 = vor.u32 %v8699_v23, %v7836_v56  ;;  %v8125_v10 = vor.u32 %v8696_v24, %v8124_v9  ;;  %v4618_v9 = vmul.f32 %v13599_v55, %v4586_v0  ;;  %5514 = vmatpush.bf16.msrb.mxu3 %v8786_v43  ;;  %v4562_v24 = vrot.slane %v13591_v28, 1  ;;  %v13600_v28 = vld [vmem:[#allocation57_spill] sm:$0xff] }
 0x689   : > { %4734 = vst [vmem:[#allocation2 + $0x44] sm:$0xf] %v4638_v6  ;;  %v4644_v6 = vpack.c.bf16 %v4612_v12, %v4612_v12  ;;  %v4647_v4 = vpack.c.bf16 %v4589_v42, %v4589_v42  ;;  %v4620_v54 = vmul.f32 %v13600_v28, %v4584_v51  ;;  %v4648_v53 = vpack.c.bf16 %v4616_v21, %v4616_v21 }
 0x68a   : > { %4735 = vst [vmem:[#allocation2 + $0x50] sm:$0xf] %v4639_v14  ;;  %5337 = vmatmul.bf16.vlgmr.msra.gmra.mxu1 %v12509_v29  ;;  %v4646_v14 = vpack.c.bf16 %v4614_v27, %v4614_v27  ;;  %5764 = vmatmul.bf16.vlgmr.msrb.gmra.mxu0 %v8125_v10  ;;  %v4580_v63 = vsel %vm1580_vm9, %v4560_v50, %v4561_v36  ;;  %v8702_v27 = vld [vmem:[#allocation2 + $0x38] sm:$0xf0] }
 0x68b   : > { %4736 = vst [vmem:[#allocation2 + $0x5c] sm:$0xf] %v4640_v2  ;;  %5426 = vmatmul.bf16.vlgmr.msrb.gmra.mxu2 %v12524_v25  ;;  %v4649_v12 = vpack.c.bf16 %v4587_v62, %v4587_v62  ;;  %5515 = vmatmul.bf16.vlgmr.msrb.gmra.mxu3 %v12534_v30  ;;  %v4650_v48 = vpack.c.bf16 %v4618_v9, %v4618_v9  ;;  %v8704_v9 = vld [vmem:[#allocation2 + $0x4c] sm:$0xf] }
 0x68c   : > { %4737 = vst [vmem:[#allocation2 + $0x68] sm:$0xf] %v4641_v5  ;;  %v4578_v2 = vsel %vm1580_vm9, %v4562_v24, %v4563_v61  ;;  %v4624_v56 = vmul.f32 %v13602_v49, %v4580_v63  ;;  %v4652_v47 = vpack.c.bf16 %v4620_v54, %v4620_v54  ;;  %v4579_v40 = vsel %vm1580_vm9, %v4561_v36, %v4562_v24  ;;  %v8707_v54 = vld [vmem:[#allocation2 + $0x64] sm:$0xf]  ;;  %v7886_v49 = vld [vmem:[#allocation2 + $0x84] sm:$0xf0] }
 0x68d   : > { %4738 = vst [vmem:[#allocation2 + $0x74] sm:$0xf] %v4642_v60  ;;  %v4626_v33 = vmul.f32 %v13603_v7, %v4578_v2  ;;  %v4654_v5 = vpack.c.bf16 %v4622_v26, %v4622_v26  ;;  %v4577_v32 = vsel %vm1580_vm9, %v4563_v61, %v4564_v38  ;;  %v4628_v50 = vmul.f32 %v13604_v8, %v12340_v45  ;;  %v13605_v60 = vld [vmem:[#allocation62_spill] sm:$0xff]  ;;  %v8756_v26 = vld [vmem:[#allocation6 + $0x2a8] sm:$0xff]  ;;  %v7896_v7 = vld [vmem:[#allocation2 + $0x90] sm:$0xf] }
 0x68e   : > { %4739 = vst [vmem:[#allocation2 + $0x80] sm:$0xf] %v4643_v15  ;;  %v4656_v23 = vpack.c.bf16 %v4624_v56, %v4624_v56  ;;  %v4657_v20 = vpack.c.bf16 %v4579_v40, %v4579_v40  ;;  %v4630_v43 = vmul.f32 %v13605_v60, %v12356_v17  ;;  %v7849_v0 = vor.u32 %v8702_v27, %v7848_v11  ;;  %v7850_v15 = vld [vmem:[#allocation2 + $0x3c] sm:$0xf0]  ;;  %v13607_v17 = vld [vmem:[#allocation64_spill] sm:$0xff] }
 0x68f   : > { %4740 = vst [vmem:[#allocation2 + $0x8c] sm:$0xf] %v4644_v6  ;;  %v4658_v37 = vpack.c.bf16 %v4626_v33, %v4626_v33  ;;  %v4659_v42 = vpack.c.bf16 %v4577_v32, %v4577_v32  ;;  %v4632_v38 = vmul.f32 %v13606_v19, %v12348_v31  ;;  %v4660_v10 = vpack.c.bf16 %v4628_v50, %v4628_v50  ;;  %v7856_v36 = vld [vmem:[#allocation2 + $0x38] sm:$0xf]  ;;  %v8711_v2 = vld [vmem:[#allocation2 + $0x80] sm:$0xf0] }
 0x690   : > { %4741 = vst [vmem:[#allocation2 + $0x98] sm:$0xf] %v4645_v52  ;;  %v8703_v45 = vld [vmem:[#allocation2 + $0x40] sm:$0xf0]  ;;  %v4661_v57 = vpack.c.bf16 %v12334_v46, %v12334_v46  ;;  %v4634_v21 = vmul.f32 %v13607_v17, %v12395_v1  ;;  %v4662_v6 = vpack.c.bf16 %v4630_v43, %v4630_v43  ;;  %v12597_v16 = vor.u32 %v8701_v34, %v7850_v15  ;;  %v8714_v33 = vld [vmem:[#allocation2 + $0x98] sm:$0xf0] }
 0x691   : > { %4742 = vst [vmem:[#allocation2 + $0xa4] sm:$0xf] %v4646_v14  ;;  %v4663_v51 = vpack.c.bf16 %v12352_v59, %v12352_v59  ;;  %v12602_v31 = vor.u32 %v8703_v45, %v7856_v36  ;;  %v8757_v52 = vld [vmem:[#allocation6 + $0x2b0] sm:$0xff]  ;;  %v4664_v62 = vpack.c.bf16 %v4632_v38, %v4632_v38  ;;  %v4665_v46 = vpack.c.bf16 %v12344_v3, %v12344_v3  ;;  %v7860_v59 = vld [vmem:[#allocation2 + $0x48] sm:$0xf] }
 0x692   : > { %4743 = vst [vmem:[#allocation2 + $0xb0] sm:$0xf] %v4647_v4  ;;  %5846 = vmatpush.bf16.msrb.mxu1 %v8757_v52  ;;  %v4666_v1 = vpack.c.bf16 %v4634_v21, %v4634_v21  ;;  %v7862_v14 = vld [vmem:[#allocation2 + $0x54] sm:$0xf0]  ;;  %v8706_v24 = vld [vmem:[#allocation2 + $0x58] sm:$0xf0] }
 0x693   : > { %4744 = vst [vmem:[#allocation2 + $0xbc] sm:$0xf] %v4648_v53  ;;  %v12608_v61 = vor.u32 %v8704_v9, %v7862_v14  ;;  %v7868_v3 = vld [vmem:[#allocation2 + $0x50] sm:$0xf]  ;;  %v7872_v4 = vld [vmem:[#allocation2 + $0x60] sm:$0xf] }
 0x694   : > { %4745 = vst [vmem:[#allocation2 + $0xc8] sm:$0xf] %v4649_v12  ;;  %v12610_v35 = vor.u32 %v8706_v24, %v7868_v3  ;;  %v7873_v28 = vor.u32 %v8708_v39, %v7872_v4  ;;  %v7874_v53 = vld [vmem:[#allocation2 + $0x6c] sm:$0xf0]  ;;  %v8709_v63 = vld [vmem:[#allocation2 + $0x70] sm:$0xf0] }
 0x695   : > { %4746 = vst [vmem:[#allocation2 + $0xd4] sm:$0xf] %v4650_v48  ;;  %v12614_v12 = vor.u32 %v8707_v54, %v7874_v53  ;;  %v7880_v58 = vld [vmem:[#allocation2 + $0x68] sm:$0xf]  ;;  %v7884_v48 = vld [vmem:[#allocation2 + $0x78] sm:$0xf] }
 0x696   : > { %4747 = vst [vmem:[#allocation2 + $0xe0] sm:$0xf] %v4651_v41  ;;  %v12616_v44 = vor.u32 %v8709_v63, %v7880_v58  ;;  %5847 = vmatpush.bf16.msrb.mxu1 %v8756_v26  ;;  %v7885_v41 = vor.u32 %v8711_v2, %v7884_v48  ;;  %v8712_v56 = vld [vmem:[#allocation2 + $0x88] sm:$0xf0]  ;;  %v7898_v11 = vld [vmem:[#allocation2 + $0x9c] sm:$0xf0] }
 0x697   : > { %4748 = vst [vmem:[#allocation2 + $0xec] sm:$0xf] %v4652_v47  ;;  %v12620_v47 = vor.u32 %v8710_v22, %v7886_v49  ;;  %v7904_v50 = vld [vmem:[#allocation2 + $0x98] sm:$0xf]  ;;  %v7908_v27 = vld [vmem:[#allocation2 + $0xa8] sm:$0xf] }
 0x698   : > { %4749 = vst [vmem:[#allocation2 + $0xf8] sm:$0xf] %v4653_v13  ;;  %v7892_v13 = vld [vmem:[#allocation2 + $0x80] sm:$0xf]  ;;  %v8715_v32 = vld [vmem:[#allocation2 + $0xa0] sm:$0xf0] }
 0x699   : > { %4750 = vst [vmem:[#allocation2 + $0x104] sm:$0xf] %v4654_v5  ;;  %v12622_v40 = vor.u32 %v8712_v56, %v7892_v13  ;;  %v7897_v5 = vor.u32 %v8714_v33, %v7896_v7  ;;  %v8717_v60 = vld [vmem:[#allocation2 + $0xb0] sm:$0xf0]  ;;  %v7916_v15 = vld [vmem:[#allocation2 + $0xb0] sm:$0xf] }
 0x69a   : > { %4751 = vst [vmem:[#allocation2 + $0x110] sm:$0xf] %v4655_v18  ;;  %5342 = vmatmul.bf16.gmra.mxu1 %v7849_v0  ;;  %5769 = vmatmul.bf16.gmra.mxu0 %v12509_v29  ;;  %v8705_v29 = vld [vmem:[#allocation2 + $0x50] sm:$0xf0]  ;;  %v7909_v43 = vor.u32 %v8717_v60, %v7908_v27  ;;  %v7920_v38 = vld [vmem:[#allocation2 + $0xc0] sm:$0xf] }
 0x69b   : > { %4752 = vst [vmem:[#allocation2 + $0x11c] sm:$0xf] %v4656_v23  ;;  %5431 = vmatmul.bf16.gmra.mxu2 %v12597_v16  ;;  %5520 = vmatmul.bf16.gmra.mxu3 %v12602_v31  ;;  %v7861_v55 = vor.u32 %v8705_v29, %v7860_v59  ;;  %v8713_v18 = vld [vmem:[#allocation2 + $0x94] sm:$0xf]  ;;  %v12628_v23 = vor.u32 %v8715_v32, %v7904_v50  ;;  %v7922_v17 = vld [vmem:[#allocation2 + $0xcc] sm:$0xf0] }
 0x69c   : > { %4753 = vst [vmem:[#allocation2 + $0x128] sm:$0xf] %v4657_v20  ;;  %v12626_v8 = vor.u32 %v8713_v18, %v7898_v11  ;;  %v8755_v20 = vld [vmem:[#allocation6 + $0x2a0] sm:$0xff]  ;;  %v7928_v36 = vld [vmem:[#allocation2 + $0xc8] sm:$0xf] }
 0x69d   : > { %4754 = vst [vmem:[#allocation2 + $0x134] sm:$0xf] %v4658_v37  ;;  %5848 = vmatpush.bf16.msrb.mxu1 %v8755_v20  ;;  %v8716_v37 = vld [vmem:[#allocation2 + $0xac] sm:$0xf]  ;;  %v8721_v21 = vld [vmem:[#allocation2 + $0xd0] sm:$0xf0] }
 0x69e   : > { %4755 = vst [vmem:[#allocation2 + $0x140] sm:$0xf] %v4659_v42  ;;  %v8718_v42 = vld [vmem:[#allocation2 + $0xb8] sm:$0xf0]  ;;  %v8754_v52 = vld [vmem:[#allocation6 + $0x298] sm:$0xff]  ;;  %v8753_v20 = vld [vmem:[#allocation6 + $0x290] sm:$0xff] }
 0x69f   : > { %4756 = vst [vmem:[#allocation2 + $0x14c] sm:$0xf] %v4660_v10  ;;  %v12634_v19 = vor.u32 %v8718_v42, %v7916_v15  ;;  %v8720_v10 = vld [vmem:[#allocation2 + $0xc8] sm:$0xf0]  ;;  %v8722_v29 = vld [vmem:[#allocation2 + $0xdc] sm:$0xf] }
 0x6a0   : > { %4757 = vst [vmem:[#allocation2 + $0x158] sm:$0xf] %v4661_v57  ;;  %v7921_v45 = vor.u32 %v8720_v10, %v7920_v38  ;;  %v8719_v57 = vld [vmem:[#allocation2 + $0xc4] sm:$0xf]  ;;  %v8724_v14 = vld [vmem:[#allocation2 + $0xe8] sm:$0xf0] }
 0x6a1   : > { %4758 = vst [vmem:[#allocation2 + $0x164] sm:$0xf] %v4662_v6  ;;  %v12638_v6 = vor.u32 %v8719_v57, %v7922_v17  ;;  %5849 = vmatpush.bf16.msrb.mxu1 %v8754_v52  ;;  %v7940_v3 = vld [vmem:[#allocation2 + $0xe0] sm:$0xf]  ;;  %v7944_v26 = vld [vmem:[#allocation2 + $0xf0] sm:$0xf] }
 0x6a2   : > { %4759 = vst [vmem:[#allocation2 + $0x170] sm:$0xf] %v4663_v51  ;;  %v12640_v51 = vor.u32 %v8721_v21, %v7928_v36  ;;  %v12646_v4 = vor.u32 %v8724_v14, %v7940_v3  ;;  %v8726_v2 = vld [vmem:[#allocation2 + $0xf8] sm:$0xf0]  ;;  %v8725_v49 = vld [vmem:[#allocation2 + $0xf4] sm:$0xf] }
 0x6a3   : > { %4760 = vst [vmem:[#allocation2 + $0x17c] sm:$0xf] %v4664_v62  ;;  %v7932_v62 = vld [vmem:[#allocation2 + $0xd8] sm:$0xf]  ;;  %v7946_v56 = vld [vmem:[#allocation2 + $0xfc] sm:$0xf0] }
 0x6a4   : > { %4761 = vst [vmem:[#allocation2 + $0x188] sm:$0xf] %v4665_v46  ;;  %v12650_v18 = vor.u32 %v8725_v49, %v7946_v56  ;;  %v7952_v32 = vld [vmem:[#allocation2 + $0xf8] sm:$0xf]  ;;  %v7956_v15 = vld [vmem:[#allocation2 + $0x108] sm:$0xf] }
 0x6a5   : > { %4762 = vst [vmem:[#allocation2 + $0x194] sm:$0xf] %v4666_v1  ;;  %v8723_v1 = vld [vmem:[#allocation2 + $0xe0] sm:$0xf0]  ;;  %5850 = vmatpush.bf16.msrb.mxu1 %v8753_v20  ;;  %v8729_v10 = vld [vmem:[#allocation2 + $0x110] sm:$0xf0] }
 0x6a6   : > { %v7933_v59 = vor.u32 %v8723_v1, %v7932_v62  ;;  %v8728_v17 = vld [vmem:[#allocation2 + $0x10c] sm:$0xf]  ;;  %v7958_v21 = vld [vmem:[#allocation2 + $0x114] sm:$0xf0]  ;;  %v8730_v1 = vld [vmem:[#allocation2 + $0x118] sm:$0xf0] }
 0x6a7   : > { %v8731_v49 = vld [vmem:[#allocation2 + $0x124] sm:$0xf]  ;;  %v7970_v56 = vld [vmem:[#allocation2 + $0x12c] sm:$0xf0] }
 0x6aa   : > { %5347 = vmatmul.bf16.gmra.mxu1 %v7861_v55  ;;  %5774 = vmatmul.bf16.gmra.mxu0 %v7849_v0  ;;  %v7910_v0 = vld [vmem:[#allocation2 + $0xb4] sm:$0xf0] }
 0x6ab   : > { %5436 = vmatmul.bf16.gmra.mxu2 %v12608_v61  ;;  %5525 = vmatmul.bf16.gmra.mxu3 %v12610_v35  ;;  %v12632_v34 = vor.u32 %v8716_v37, %v7910_v0 }
 0x6ba   : > { %5352 = vmatmul.bf16.gmra.mxu1 %v7873_v28  ;;  %5779 = vmatmul.bf16.gmra.mxu0 %v7861_v55  ;;  %v7934_v55 = vld [vmem:[#allocation2 + $0xe4] sm:$0xf0] }
 0x6bb   : > { %5441 = vmatmul.bf16.gmra.mxu2 %v12614_v12  ;;  %5530 = vmatmul.bf16.gmra.mxu3 %v12616_v44  ;;  %v12644_v24 = vor.u32 %v8722_v29, %v7934_v55  ;;  %v7964_v55 = vld [vmem:[#allocation2 + $0x110] sm:$0xf] }
 0x6bc   : > { %v12662_v14 = vor.u32 %v8730_v1, %v7964_v55  ;;  %v8734_v1 = vld [vmem:[#allocation2 + $0x13c] sm:$0xf]  ;;  %v7982_v55 = vld [vmem:[#allocation2 + $0x144] sm:$0xf0] }
 0x6ca   : > { %5357 = vmatmul.bf16.gmra.mxu1 %v7885_v41  ;;  %5784 = vmatmul.bf16.gmra.mxu0 %v7873_v28 }
 0x6cb   : > { %5446 = vmatmul.bf16.gmra.mxu2 %v12620_v47  ;;  %5535 = vmatmul.bf16.gmra.mxu3 %v12622_v40 }
 0x6da   : > { %5362 = vmatmul.bf16.gmra.mxu1 %v7897_v5  ;;  %5789 = vmatmul.bf16.gmra.mxu0 %v7885_v41  ;;  %v7945_v41 = vor.u32 %v8726_v2, %v7944_v26  ;;  %v7968_v26 = vld [vmem:[#allocation2 + $0x120] sm:$0xf]  ;;  %v8732_v2 = vld [vmem:[#allocation2 + $0x128] sm:$0xf0] }
 0x6db   : > { %5451 = vmatmul.bf16.gmra.mxu2 %v12626_v8  ;;  %5540 = vmatmul.bf16.gmra.mxu3 %v12628_v23 }
 0x6ea   : > { %5367 = vmatmul.bf16.gmra.mxu1 %v7909_v43  ;;  %5794 = vmatmul.bf16.gmra.mxu0 %v7897_v5  ;;  %v8727_v5 = vld [vmem:[#allocation2 + $0x100] sm:$0xf0] }
 0x6eb   : > { %5456 = vmatmul.bf16.gmra.mxu2 %v12632_v34  ;;  %5545 = vmatmul.bf16.gmra.mxu3 %v12634_v19  ;;  %v12652_v50 = vor.u32 %v8727_v5, %v7952_v32  ;;  %v8733_v32 = vld [vmem:[#allocation2 + $0x130] sm:$0xf0] }
 0x6fa   : > { %5372 = vmatmul.bf16.gmra.mxu1 %v7921_v45  ;;  %5799 = vmatmul.bf16.gmra.mxu0 %v7909_v43 }
 0x6fb   : > { %5461 = vmatmul.bf16.gmra.mxu2 %v12638_v6  ;;  %5550 = vmatmul.bf16.gmra.mxu3 %v12640_v51 }
 0x707   : > { %v5338_v46 = vpop.f32.mrf.mxu1  ;;  %v5765_v9 = vpop.f32.mrf.mxu0 }
 0x70a   : > { %5377 = vmatmul.bf16.gmra.mxu1 %v7933_v59  ;;  %5804 = vmatmul.bf16.gmra.mxu0 %v7921_v45  ;;  %v7957_v45 = vor.u32 %v8729_v10, %v7956_v15 }
 0x70b   : > { %5466 = vmatmul.bf16.gmra.mxu2 %v12644_v24  ;;  %5555 = vmatmul.bf16.gmra.mxu3 %v12646_v4 }
 0x70e   : > { %v5427_v28 = vpop.f32.mrf.mxu2  ;;  %v5516_v63 = vpop.f32.mrf.mxu3 }
 0x70f   : > { %v5340_v39 = vpop.f32.mrf.mxu1  ;;  %v5767_v54 = vpop.f32.mrf.mxu0  ;;  %v5428_v53 = vadd.f32 %v5427_v28, %v5338_v46 }
 0x711   : > { %v5517_v58 = vadd.f32 %v5516_v63, %v5428_v53 }
 0x713   : > { %v12656_v36 = vadd.f32 %v5765_v9, %v5517_v58 }
 0x716   : > { %v5429_v22 = vpop.f32.mrf.mxu2  ;;  %v5518_v33 = vpop.f32.mrf.mxu3 }
 0x717   : > { %v5343_v48 = vpop.f32.mrf.mxu1  ;;  %v5770_v13 = vpop.f32.mrf.mxu0  ;;  %v5430_v7 = vadd.f32 %v5429_v22, %v5340_v39  ;;  %v7969_v22 = vor.u32 %v8732_v2, %v7968_v26  ;;  %v12686_v26 = vor.u32 %v8734_v1, %v7982_v55  ;;  %v7988_v2 = vld [vmem:[#allocation2 + $0x140] sm:$0xf] }
 0x719   : > { %v5519_v11 = vadd.f32 %v5518_v33, %v5430_v7  ;;  %13608 = vst [vmem:[#allocation24_spill] sm:$0xff] %v12686_v26 }
 0x71a   : > { %5382 = vmatmul.bf16.gmra.mxu1 %v7945_v41  ;;  %5809 = vmatmul.bf16.gmra.mxu0 %v7933_v59  ;;  %v12660_v59 = vor.u32 %v8728_v17, %v7958_v21  ;;  %v7980_v17 = vld [vmem:[#allocation2 + $0x138] sm:$0xf] }
 0x71b   : > { %5471 = vmatmul.bf16.gmra.mxu2 %v12650_v18  ;;  %5560 = vmatmul.bf16.gmra.mxu3 %v12652_v50  ;;  %v12668_v63 = vadd.f32 %v5767_v54, %v5519_v11  ;;  %v7976_v11 = vld [vmem:[#allocation2 + $0x128] sm:$0xf] }
 0x71e   : > { %v5432_v60 = vpop.f32.mrf.mxu2  ;;  %v5521_v0 = vpop.f32.mrf.mxu3 }
 0x71f   : > { %v5345_v27 = vpop.f32.mrf.mxu1  ;;  %v5772_v43 = vpop.f32.mrf.mxu0  ;;  %v5433_v37 = vadd.f32 %v5432_v60, %v5343_v48  ;;  %v12676_v60 = vor.u32 %v8733_v32, %v7976_v11  ;;  %v8856_v11 = vld [vmem:[#allocation6 + $0x430] sm:$0xff] }
 0x721   : > { %v5522_v42 = vadd.f32 %v5521_v0, %v5433_v37  ;;  %v8752_v37 = vld [vmem:[#allocation6 + $0x288] sm:$0xff] }
 0x722   : > { %5851 = vmatpush.bf16.msrb.mxu1 %v8752_v37  ;;  %v8766_v37 = vld [vmem:[#allocation6 + $0x2f8] sm:$0xff] }
 0x723   : > { %v12672_v20 = vadd.f32 %v5770_v13, %v5522_v42  ;;  %5934 = vmatpush.bf16.msra.mxu2 %v8766_v37  ;;  %v8764_v37 = vld [vmem:[#allocation6 + $0x2e8] sm:$0xff] }
 0x726   : > { %v5434_v57 = vpop.f32.mrf.mxu2  ;;  %v5523_v46 = vpop.f32.mrf.mxu3 }
 0x727   : > { %v5348_v38 = vpop.f32.mrf.mxu1  ;;  %v12658_v52 = vpop.f32.mrf.mxu0  ;;  %v5435_v62 = vadd.f32 %v5434_v57, %v5345_v27  ;;  %v12674_v27 = vor.u32 %v8731_v49, %v7970_v56 }
 0x729   : > { %v5524_v29 = vadd.f32 %v5523_v46, %v5435_v62 }
 0x72a   : > { %5387 = vmatmul.bf16.gmra.mxu1 %v7957_v45  ;;  %5814 = vmatmul.bf16.gmra.mxu0 %v7945_v41 }
 0x72b   : > { %5476 = vmatmul.bf16.gmra.mxu2 %v12660_v59  ;;  %5565 = vmatmul.bf16.gmra.mxu3 %v12662_v14  ;;  %v12682_v57 = vadd.f32 %v5772_v43, %v5524_v29 }
 0x72e   : > { %v5437_v9 = vpop.f32.mrf.mxu2  ;;  %v5526_v53 = vpop.f32.mrf.mxu3 }
 0x72f   : > { %v5350_v3 = vpop.f32.mrf.mxu1  ;;  %v12666_v39 = vpop.f32.mrf.mxu0  ;;  %v5438_v28 = vadd.f32 %v5437_v9, %v5348_v38 }
 0x731   : > { %v5527_v58 = vadd.f32 %v5526_v53, %v5438_v28  ;;  %v8736_v53 = vld [vmem:[#allocation2 + $0x148] sm:$0xf0] }
 0x732   : > { %v12693_v29 = vor.u32 %v8736_v53, %v7988_v2 }
 0x733   : > { %v12691_v43 = vadd.f32 %v12658_v52, %v5527_v58  ;;  %v8855_v52 = vld [vmem:[#allocation6 + $0x428] sm:$0xff]  ;;  %v7992_v58 = vld [vmem:[#allocation2 + $0x150] sm:$0xf] }
 0x734   : > { %13609 = vst [vmem:[#allocation23_spill] sm:$0xff] %v12693_v29 }
 0x736   : > { %v5439_v41 = vpop.f32.mrf.mxu2  ;;  %v5528_v5 = vpop.f32.mrf.mxu3 }
 0x737   : > { %v5353_v48 = vpop.f32.mrf.mxu1  ;;  %v12670_v7 = vpop.f32.mrf.mxu0  ;;  %v5440_v33 = vadd.f32 %v5439_v41, %v5350_v3  ;;  %v8857_v41 = vld [vmem:[#allocation6 + $0x438] sm:$0xff] }
 0x738   : > { %6625 = vmatpush.bf16.msra.mxu0 %v8857_v41  ;;  %v8751_v41 = vld [vmem:[#allocation6 + $0x280] sm:$0xff] }
 0x739   : > { %v5529_v54 = vadd.f32 %v5528_v5, %v5440_v33  ;;  %5852 = vmatpush.bf16.msrb.mxu1 %v8751_v41 }
 0x73a   : > { %5392 = vmatmul.bf16.gmra.mxu1 %v7969_v22  ;;  %5819 = vmatmul.bf16.gmra.mxu0 %v7957_v45  ;;  %v8735_v45 = vld [vmem:[#allocation2 + $0x140] sm:$0xf0] }
 0x73b   : > { %5481 = vmatmul.bf16.gmra.mxu2 %v12674_v27  ;;  %5570 = vmatmul.bf16.gmra.mxu3 %v12676_v60  ;;  %v7981_v62 = vor.u32 %v8735_v45, %v7980_v17  ;;  %v8737_v45 = vld [vmem:[#allocation2 + $0x154] sm:$0xf] }
 0x73c   : > { %6626 = vmatpush.bf16.msra.mxu0 %v8856_v11 }
 0x73e   : > { %v5442_v15 = vpop.f32.mrf.mxu2  ;;  %v5531_v13 = vpop.f32.mrf.mxu3 }
 0x73f   : > { %v5355_v0 = vpop.f32.mrf.mxu1  ;;  %v12680_v38 = vpop.f32.mrf.mxu0  ;;  %v5443_v10 = vadd.f32 %v5442_v15, %v5353_v48 }
 0x740   : > { %6627 = vmatpush.bf16.msra.mxu0 %v8855_v52 }
 0x741   : > { %v5532_v42 = vadd.f32 %v5531_v13, %v5443_v10  ;;  %v8738_v10 = vld [vmem:[#allocation2 + $0x158] sm:$0xf0] }
 0x742   : > { %v12704_v13 = vor.u32 %v8738_v10, %v7992_v58 }
 0x746   : > { %v5444_v46 = vpop.f32.mrf.mxu2  ;;  %v5533_v28 = vpop.f32.mrf.mxu3 }
 0x747   : > { %v5358_v21 = vpop.f32.mrf.mxu1  ;;  %v12684_v3 = vpop.f32.mrf.mxu0  ;;  %v5445_v9 = vadd.f32 %v5444_v46, %v5355_v0 }
 0x749   : > { %v12688_v48 = vadd.f32 %v5533_v28, %v5445_v9  ;;  %v8739_v9 = vld [vmem:[#allocation2 + $0x160] sm:$0xf0]  ;;  %v8854_v28 = vld [vmem:[#allocation6 + $0x420] sm:$0xff] }
 0x74a   : > { %5397 = vmatmul.bf16.gmra.mxu1 %v7981_v62  ;;  %5824 = vmatmul.bf16.gmra.mxu0 %v7969_v22  ;;  %v12702_v22 = vadd.f32 %v12666_v39, %v5529_v54  ;;  %v8000_v54 = vld [vmem:[#allocation2 + $0x158] sm:$0xf] }
 0x74b   : > { %5486 = vmatmul.bf16.gmra.mxu2 %v12686_v26  ;;  %5575 = vmatmul.bf16.gmra.mxu3 %v12693_v29  ;;  %v12713_v2 = vor.u32 %v8739_v9, %v8000_v54  ;;  %v12726_v54 = vadd.f32 %v12680_v38, %v12688_v48  ;;  %v8012_v48 = vld [vmem:[#allocation2 + $0x170] sm:$0xf] }
 0x74c   : > { %6628 = vmatpush.bf16.msra.mxu0 %v8854_v28  ;;  %v8741_v28 = vld [vmem:[#allocation2 + $0x170] sm:$0xf0] }
 0x74d   : > { %13611 = vst [vmem:[#allocation14_spill] sm:$0xff] %v12713_v2 }
 0x74e   : > { %v5447_v56 = vpop.f32.mrf.mxu2  ;;  %v5536_v32 = vpop.f32.mrf.mxu3 }
 0x74f   : > { %v5360_v49 = vpop.f32.mrf.mxu1  ;;  %v12697_v33 = vpop.f32.mrf.mxu0  ;;  %v5448_v5 = vadd.f32 %v5447_v56, %v5358_v21  ;;  %v7994_v21 = vld [vmem:[#allocation2 + $0x15c] sm:$0xf0] }
 0x750   : > { %v12709_v53 = vor.u32 %v8737_v45, %v7994_v21  ;;  %v8765_v56 = vld [vmem:[#allocation6 + $0x2f0] sm:$0xff]  ;;  %v8847_v21 = vld [vmem:[#allocation6 + $0x3e8] sm:$0xff] }
 0x751   : > { %v12699_v0 = vadd.f32 %v5536_v32, %v5448_v5  ;;  %v8849_v5 = vld [vmem:[#allocation6 + $0x3f8] sm:$0xff]  ;;  %v12716_v32 = vadd.f32 %v12670_v7, %v5532_v42  ;;  %5935 = vmatpush.bf16.msra.mxu2 %v8765_v56  ;;  %v8852_v45 = vld [vmem:[#allocation6 + $0x410] sm:$0xff]  ;;  %v8763_v42 = vld [vmem:[#allocation6 + $0x2e0] sm:$0xff] }
 0x752   : > { %13610 = vst [vmem:[#allocation13_spill] sm:$0xff] %v12709_v53  ;;  %6536 = vmatpush.bf16.msra.mxu3 %v8849_v5  ;;  %v8740_v5 = vld [vmem:[#allocation2 + $0x16c] sm:$0xf] }
 0x755   : > { %5936 = vmatpush.bf16.msra.mxu2 %v8764_v37 }
 0x756   : > { %v5449_v17 = vpop.f32.mrf.mxu2  ;;  %v5538_v55 = vpop.f32.mrf.mxu3 }
 0x757   : > { %v5363_v15 = vpop.f32.mrf.mxu1  ;;  %v12706_v46 = vpop.f32.mrf.mxu0  ;;  %v5450_v1 = vadd.f32 %v5449_v17, %v5360_v49  ;;  %v8853_v49 = vld [vmem:[#allocation6 + $0x418] sm:$0xff]  ;;  %v8848_v17 = vld [vmem:[#allocation6 + $0x3f0] sm:$0xff] }
 0x758   : > { %6629 = vmatpush.bf16.msra.mxu0 %v8853_v49  ;;  %6537 = vmatpush.bf16.msra.mxu3 %v8848_v17  ;;  %v8006_v49 = vld [vmem:[#allocation2 + $0x174] sm:$0xf0]  ;;  %v8846_v17 = vld [vmem:[#allocation6 + $0x3e0] sm:$0xff] }
 0x759   : > { %v12711_v39 = vadd.f32 %v5538_v55, %v5450_v1  ;;  %v8004_v1 = vld [vmem:[#allocation2 + $0x168] sm:$0xf]  ;;  %v8851_v55 = vld [vmem:[#allocation6 + $0x408] sm:$0xff]  ;;  %5937 = vmatpush.bf16.msra.mxu2 %v8763_v42  ;;  %v8761_v42 = vld [vmem:[#allocation6 + $0x2d0] sm:$0xff] }
 0x75a   : > { %5402 = vmatmul.bf16.gmra.mxu1 %v12704_v13  ;;  %5829 = vmatmul.bf16.gmra.mxu0 %v7981_v62  ;;  %v8005_v41 = vor.u32 %v8741_v28, %v8004_v1  ;;  %v8845_v1 = vld [vmem:[#allocation6 + $0x3d8] sm:$0xff]  ;;  %v8760_v28 = vld [vmem:[#allocation6 + $0x2c8] sm:$0xff] }
 0x75b   : > { %5491 = vmatmul.bf16.gmra.mxu2 %v12709_v53  ;;  %5580 = vmatmul.bf16.gmra.mxu3 %v12713_v2  ;;  %v12730_v2 = vor.u32 %v8740_v5, %v8006_v49  ;;  %v8844_v49 = vld [vmem:[#allocation6 + $0x3d0] sm:$0xff]  ;;  %v8024_v53 = vld [vmem:[#allocation2 + $0x188] sm:$0xf] }
 0x75c   : > { %6630 = vmatpush.bf16.msra.mxu0 %v8852_v45  ;;  %6538 = vmatpush.bf16.msra.mxu3 %v8847_v21  ;;  %v8850_v45 = vld [vmem:[#allocation6 + $0x400] sm:$0xff] }
 0x75d   : > { %13612 = vst [vmem:[#allocation28_spill] sm:$0xff] %v12730_v2 }
 0x75e   : > { %v5452_v52 = vpop.f32.mrf.mxu2  ;;  %v5541_v10 = vpop.f32.mrf.mxu3 }
 0x75f   : > { %v5365_v11 = vpop.f32.mrf.mxu1  ;;  %v12720_v62 = vpop.f32.mrf.mxu0  ;;  %v5453_v58 = vadd.f32 %v5452_v52, %v5363_v15  ;;  %v8762_v15 = vld [vmem:[#allocation6 + $0x2d8] sm:$0xff] }
 0x760   : > { %6631 = vmatpush.bf16.msra.mxu0 %v8851_v55  ;;  %5938 = vmatpush.bf16.msra.mxu2 %v8762_v15  ;;  %v12741_v55 = vadd.f32 %v12684_v3, %v12699_v0  ;;  %v12749_v0 = vadd.f32 %v12697_v33, %v12711_v39 }
 0x761   : > { %v12722_v7 = vadd.f32 %v5541_v10, %v5453_v58  ;;  %v8742_v10 = vld [vmem:[#allocation2 + $0x178] sm:$0xf0]  ;;  %6539 = vmatpush.bf16.msra.mxu3 %v8846_v17  ;;  %v8016_v17 = vld [vmem:[#allocation2 + $0x180] sm:$0xf] }
 0x762   : > { %v12735_v21 = vor.u32 %v8742_v10, %v8012_v48  ;;  %v8843_v10 = vld [vmem:[#allocation6 + $0x3c8] sm:$0xff]  ;;  %v8768_v48 = vld [vmem:[#allocation2 + $0x188] sm:$0xf0] }
 0x763   : > { %v8017_v3 = vor.u32 %v8768_v48, %v8016_v17  ;;  %v12755_v39 = vadd.f32 %v12706_v46, %v12722_v7 }
 0x764   : > { %13613 = vst [vmem:[#allocation15_spill] sm:$0xff] %v12735_v21  ;;  %6632 = vmatpush.bf16.msra.mxu0 %v8850_v45  ;;  %5939 = vmatpush.bf16.msra.mxu2 %v8761_v42 }
 0x765   : > { %6540 = vmatpush.bf16.msra.mxu3 %v8845_v1  ;;  %v8018_v1 = vld [vmem:[#allocation2 + $0x18c] sm:$0xf0] }
 0x766   : > { %v5454_v56 = vpop.f32.mrf.mxu2  ;;  %v5543_v58 = vpop.f32.mrf.mxu3 }
 0x767   : > { %v5368_v9 = vpop.f32.mrf.mxu1  ;;  %v12728_v37 = vpop.f32.mrf.mxu0  ;;  %v5455_v52 = vadd.f32 %v5454_v56, %v5365_v11 }
 0x768   : > { %5940 = vmatpush.bf16.msra.mxu2 %v8760_v28 }
 0x769   : > { %v12732_v38 = vadd.f32 %v5543_v58, %v5455_v52  ;;  %6541 = vmatpush.bf16.msra.mxu3 %v8844_v49  ;;  %v8759_v58 = vld [vmem:[#allocation6 + $0x2c0] sm:$0xff] }
 0x76a   : > { %5407 = vmatmul.bf16.gmra.mxu1 %v8005_v41  ;;  %5834 = vmatmul.bf16.gmra.mxu0 %v12704_v13  ;;  %v8842_v49 = vld [vmem:[#allocation6 + $0x3c0] sm:$0xff] }
 0x76b   : > { %5496 = vmatmul.bf16.gmra.mxu2 %v12730_v2  ;;  %5585 = vmatmul.bf16.gmra.mxu3 %v12735_v21 }
 0x76c   : > { %5941 = vmatpush.bf16.msra.mxu2 %v8759_v58 }
 0x76d   : > { %6542 = vmatpush.bf16.msra.mxu3 %v8843_v10  ;;  %v8865_v10 = vld [vmem:[#allocation6 + $0x478] sm:$0xff] }
 0x76e   : > { %v5457_v15 = vpop.f32.mrf.mxu2  ;;  %v5546_v5 = vpop.f32.mrf.mxu3  ;;  %6714 = vmatpush.bf16.msra.mxu1 %v8865_v10 }
 0x76f   : > { %v5370_v11 = vpop.f32.mrf.mxu1  ;;  %v12743_v56 = vpop.f32.mrf.mxu0  ;;  %v5458_v13 = vadd.f32 %v5457_v15, %v5368_v9  ;;  %v8767_v9 = vld [vmem:[#allocation2 + $0x184] sm:$0xf] }
 0x770   : > { %v8021_v21 = vor.u32 %v8767_v9, %v8018_v1  ;;  %v8126_v9 = vld [vmem:[#allocation2 + $0xc] sm:$0xf0] }
 0x771   : > { %v12745_v52 = vadd.f32 %v5546_v5, %v5458_v13  ;;  %v8769_v5 = vld [vmem:[#allocation2 + $0x190] sm:$0xf0]  ;;  %6543 = vmatpush.bf16.msra.mxu3 %v8842_v49 }
 0x772   : > { %v8025_v58 = vor.u32 %v8769_v5, %v8024_v53  ;;  %v8697_v53 = vld [vmem:[#allocation2 + $0x10] sm:$0xf0]  ;;  %v8234_v5 = vld [vmem:[#allocation2 + $0x3c] sm:$0xf0] }
 0x776   : > { %v5459_v42 = vpop.f32.mrf.mxu2  ;;  %v5548_v28 = vpop.f32.mrf.mxu3 }
 0x777   : > { %v5373_v45 = vpop.f32.mrf.mxu1  ;;  %v12751_v15 = vpop.f32.mrf.mxu0  ;;  %v5460_v13 = vadd.f32 %v5459_v42, %v5370_v11  ;;  %v8695_v42 = vld [vmem:[#allocation2 + $0x4] sm:$0xf] }
 0x779   : > { %v5549_v2 = vadd.f32 %v5548_v28, %v5460_v13  ;;  %v8129_v13 = vor.u32 %v8695_v42, %v8126_v9 }
 0x77a   : > { %5412 = vmatmul.bf16.gmra.mxu1 %v8017_v3  ;;  %5839 = vmatmul.bf16.gmra.mxu0 %v8005_v41  ;;  %v8132_v41 = vld [vmem:[#allocation2 + $0x8] sm:$0xf] }
 0x77b   : > { %5501 = vmatmul.bf16.gmra.mxu2 %v8021_v21  ;;  %5590 = vmatmul.bf16.gmra.mxu3 %v8025_v58  ;;  %v8794_v21 = vld [vmem:[#allocation2 + $0x34] sm:$0xf]  ;;  %v12761_v58 = vadd.f32 %v12720_v62, %v12732_v38  ;;  %v12767_v62 = vadd.f32 %v12728_v37, %v12745_v52 }
 0x77c   : > { %v8237_v29 = vor.u32 %v8794_v21, %v8234_v5  ;;  %v12770_v5 = vadd.f32 %v12743_v56, %v5549_v2 }
 0x77d   : > { %13614 = vst [vmem:[#allocation31_spill] sm:$0xff] %v12761_v58 }
 0x77e   : > { %v5462_v11 = vpop.f32.mrf.mxu2  ;;  %v5551_v3 = vpop.f32.mrf.mxu3 }
 0x77f   : > { %v5375_v33 = vpop.f32.mrf.mxu1  ;;  %v12757_v17 = vpop.f32.mrf.mxu0  ;;  %v5463_v48 = vadd.f32 %v5462_v11, %v5373_v45  ;;  %v8133_v45 = vor.u32 %v8697_v53, %v8132_v41  ;;  %v8232_v11 = vld [vmem:[#allocation2 + $0x30] sm:$0xf]  ;;  %v8246_v53 = vld [vmem:[#allocation2 + $0x54] sm:$0xf0] }
 0x781   : > { %v5552_v1 = vadd.f32 %v5551_v3, %v5463_v48  ;;  %v8795_v3 = vld [vmem:[#allocation2 + $0x38] sm:$0xf0] }
 0x782   : > { %v8233_v42 = vor.u32 %v8795_v3, %v8232_v11  ;;  %v8798_v11 = vld [vmem:[#allocation2 + $0x50] sm:$0xf0] }
 0x783   : > { %v12777_v56 = vadd.f32 %v12751_v15, %v5552_v1 }
 0x786   : > { %v5464_v49 = vpop.f32.mrf.mxu2  ;;  %v5553_v10 = vpop.f32.mrf.mxu3 }
 0x787   : > { %v5378_v28 = vpop.f32.mrf.mxu1  ;;  %v12763_v46 = vpop.f32.mrf.mxu0  ;;  %v5465_v7 = vadd.f32 %v5464_v49, %v5375_v33 }
 0x789   : > { %v5554_v48 = vadd.f32 %v5553_v10, %v5465_v7 }
 0x78a   : > { %5853 = vmatmul.bf16.vlgmr.msrb.gmra.mxu1 %v8129_v13  ;;  %6633 = vmatmul.bf16.vlgmr.msra.gmra.mxu0 %v8237_v29  ;;  %v8797_v13 = vld [vmem:[#allocation2 + $0x4c] sm:$0xf] }
 0x78b   : > { %5942 = vmatmul.bf16.vlgmr.msra.gmra.mxu2 %v8133_v45  ;;  %6544 = vmatmul.bf16.vlgmr.msra.gmra.mxu3 %v8233_v42  ;;  %v8244_v45 = vld [vmem:[#allocation2 + $0x48] sm:$0xf]  ;;  %v8249_v37 = vor.u32 %v8797_v13, %v8246_v53  ;;  %v8800_v13 = vld [vmem:[#allocation2 + $0x64] sm:$0xf]  ;;  %v8258_v53 = vld [vmem:[#allocation2 + $0x6c] sm:$0xf0] }
 0x78c   : > { %v8261_v15 = vor.u32 %v8800_v13, %v8258_v53 }
 0x78e   : > { %v5467_v26 = vpop.f32.mrf.mxu2  ;;  %v5556_v33 = vpop.f32.mrf.mxu3 }
 0x78f   : > { %v5380_v9 = vpop.f32.mrf.mxu1  ;;  %v5807_v38 = vpop.f32.mrf.mxu0  ;;  %v5468_v58 = vadd.f32 %v5467_v26, %v5378_v28  ;;  %v8245_v26 = vor.u32 %v8798_v11, %v8244_v45  ;;  %v8864_v28 = vld [vmem:[#allocation6 + $0x470] sm:$0xff]  ;;  %v8801_v11 = vld [vmem:[#allocation2 + $0x68] sm:$0xf0] }
 0x790   : > { %6715 = vmatpush.bf16.msra.mxu1 %v8864_v28 }
 0x791   : > { %v5557_v49 = vadd.f32 %v5556_v33, %v5468_v58 }
 0x796   : > { %v5469_v21 = vpop.f32.mrf.mxu2  ;;  %v5558_v10 = vpop.f32.mrf.mxu3 }
 0x797   : > { %v5383_v41 = vpop.f32.mrf.mxu1  ;;  %v12772_v29 = vpop.f32.mrf.mxu0  ;;  %v5470_v7 = vadd.f32 %v5469_v21, %v5380_v9 }
 0x799   : > { %v5559_v52 = vadd.f32 %v5558_v10, %v5470_v7  ;;  %v12780_v7 = vadd.f32 %v12757_v17, %v5554_v48  ;;  %v12787_v17 = vadd.f32 %v12763_v46, %v5557_v49  ;;  %v8804_v49 = vld [vmem:[#allocation2 + $0x80] sm:$0xf0] }
 0x79a   : > { %5858 = vmatmul.bf16.gmra.mxu1 %v12524_v25  ;;  %6638 = vmatmul.bf16.gmra.mxu0 %v8249_v37  ;;  %v8256_v37 = vld [vmem:[#allocation2 + $0x60] sm:$0xf] }
 0x79b   : > { %5947 = vmatmul.bf16.gmra.mxu2 %v12534_v30  ;;  %6549 = vmatmul.bf16.gmra.mxu3 %v8245_v26  ;;  %v12789_v53 = vadd.f32 %v5807_v38, %v5559_v52 }
 0x79e   : > { %v5472_v2 = vpop.f32.mrf.mxu2  ;;  %v5561_v9 = vpop.f32.mrf.mxu3 }
 0x79f   : > { %v5385_v58 = vpop.f32.mrf.mxu1  ;;  %v5812_v3 = vpop.f32.mrf.mxu0  ;;  %v5473_v42 = vadd.f32 %v5472_v2, %v5383_v41  ;;  %v8257_v41 = vor.u32 %v8801_v11, %v8256_v37  ;;  %v8268_v37 = vld [vmem:[#allocation2 + $0x78] sm:$0xf] }
 0x7a0   : > { %v8863_v11 = vld [vmem:[#allocation6 + $0x468] sm:$0xff] }
 0x7a1   : > { %v5562_v25 = vadd.f32 %v5561_v9, %v5473_v42  ;;  %6716 = vmatpush.bf16.msra.mxu1 %v8863_v11 }
 0x7a3   : > { %v12796_v52 = vadd.f32 %v12772_v29, %v5562_v25  ;;  %v8807_v25 = vld [vmem:[#allocation2 + $0x98] sm:$0xf0] }
 0x7a6   : > { %v5474_v21 = vpop.f32.mrf.mxu2  ;;  %v5563_v45 = vpop.f32.mrf.mxu3 }
 0x7a7   : > { %v5388_v33 = vpop.f32.mrf.mxu1  ;;  %v12782_v10 = vpop.f32.mrf.mxu0  ;;  %v5475_v30 = vadd.f32 %v5474_v21, %v5385_v58  ;;  %v8270_v21 = vld [vmem:[#allocation2 + $0x84] sm:$0xf0] }
 0x7a9   : > { %v5564_v1 = vadd.f32 %v5563_v45, %v5475_v30 }
 0x7aa   : > { %5863 = vmatmul.bf16.gmra.mxu1 %v12597_v16  ;;  %6643 = vmatmul.bf16.gmra.mxu0 %v8261_v15  ;;  %v8803_v16 = vld [vmem:[#allocation2 + $0x7c] sm:$0xf] }
 0x7ab   : > { %5952 = vmatmul.bf16.gmra.mxu2 %v12602_v31  ;;  %6554 = vmatmul.bf16.gmra.mxu3 %v8257_v41  ;;  %v8273_v15 = vor.u32 %v8803_v16, %v8270_v21  ;;  %v8806_v16 = vld [vmem:[#allocation2 + $0x94] sm:$0xf]  ;;  %v8282_v21 = vld [vmem:[#allocation2 + $0x9c] sm:$0xf0] }
 0x7ae   : > { %v5477_v28 = vpop.f32.mrf.mxu2  ;;  %v5566_v58 = vpop.f32.mrf.mxu3 }
 0x7af   : > { %v5390_v26 = vpop.f32.mrf.mxu1  ;;  %v5817_v48 = vpop.f32.mrf.mxu0  ;;  %v5478_v2 = vadd.f32 %v5477_v28, %v5388_v33  ;;  %v8269_v33 = vor.u32 %v8804_v49, %v8268_v37  ;;  %v8285_v49 = vor.u32 %v8806_v16, %v8282_v21  ;;  %v8294_v16 = vld [vmem:[#allocation2 + $0xb4] sm:$0xf0] }
 0x7b1   : > { %v5567_v42 = vadd.f32 %v5566_v58, %v5478_v2 }
 0x7b6   : > { %v5479_v13 = vpop.f32.mrf.mxu2  ;;  %v5568_v31 = vpop.f32.mrf.mxu3 }
 0x7b7   : > { %v5393_v9 = vpop.f32.mrf.mxu1  ;;  %v12791_v30 = vpop.f32.mrf.mxu0  ;;  %v5480_v45 = vadd.f32 %v5479_v13, %v5390_v26 }
 0x7b9   : > { %v5569_v46 = vadd.f32 %v5568_v31, %v5480_v45  ;;  %v12798_v45 = vadd.f32 %v5812_v3, %v5564_v1  ;;  %v12805_v3 = vadd.f32 %v12782_v10, %v5567_v42 }
 0x7ba   : > { %5868 = vmatmul.bf16.gmra.mxu1 %v12608_v61  ;;  %6648 = vmatmul.bf16.gmra.mxu0 %v8273_v15  ;;  %v8280_v15 = vld [vmem:[#allocation2 + $0x90] sm:$0xf] }
 0x7bb   : > { %5957 = vmatmul.bf16.gmra.mxu2 %v12610_v35  ;;  %6559 = vmatmul.bf16.gmra.mxu3 %v8269_v33 }
 0x7be   : > { %v5482_v38 = vpop.f32.mrf.mxu2  ;;  %v5571_v2 = vpop.f32.mrf.mxu3 }
 0x7bf   : > { %v5395_v41 = vpop.f32.mrf.mxu1  ;;  %v5822_v26 = vpop.f32.mrf.mxu0  ;;  %v5483_v28 = vadd.f32 %v5482_v38, %v5393_v9  ;;  %v8281_v9 = vor.u32 %v8807_v25, %v8280_v15  ;;  %v8292_v15 = vld [vmem:[#allocation2 + $0xa8] sm:$0xf]  ;;  %v8862_v25 = vld [vmem:[#allocation6 + $0x460] sm:$0xff] }
 0x7c0   : > { %6717 = vmatpush.bf16.msra.mxu1 %v8862_v25 }
 0x7c1   : > { %v5572_v61 = vadd.f32 %v5571_v2, %v5483_v28  ;;  %v8809_v2 = vld [vmem:[#allocation2 + $0xac] sm:$0xf] }
 0x7c2   : > { %v8297_v10 = vor.u32 %v8809_v2, %v8294_v16  ;;  %v8812_v2 = vld [vmem:[#allocation2 + $0xc4] sm:$0xf]  ;;  %v8306_v16 = vld [vmem:[#allocation2 + $0xcc] sm:$0xf0] }
 0x7c6   : > { %v5484_v13 = vpop.f32.mrf.mxu2  ;;  %v5573_v37 = vpop.f32.mrf.mxu3 }
 0x7c7   : > { %v5398_v58 = vpop.f32.mrf.mxu1  ;;  %v12800_v31 = vpop.f32.mrf.mxu0  ;;  %v5485_v35 = vadd.f32 %v5484_v13, %v5395_v41  ;;  %v12809_v13 = vadd.f32 %v5817_v48, %v5569_v46  ;;  %v12816_v46 = vadd.f32 %v12791_v30, %v5572_v61  ;;  %v8309_v30 = vor.u32 %v8812_v2, %v8306_v16  ;;  %v8318_v2 = vld [vmem:[#allocation2 + $0xe4] sm:$0xf0] }
 0x7c9   : > { %v5574_v29 = vadd.f32 %v5573_v37, %v5485_v35 }
 0x7ca   : > { %5873 = vmatmul.bf16.gmra.mxu1 %v12614_v12  ;;  %6653 = vmatmul.bf16.gmra.mxu0 %v8285_v49  ;;  %v8810_v49 = vld [vmem:[#allocation2 + $0xb0] sm:$0xf0] }
 0x7cb   : > { %5962 = vmatmul.bf16.gmra.mxu2 %v12616_v44  ;;  %6564 = vmatmul.bf16.gmra.mxu3 %v8281_v9 }
 0x7ce   : > { %v5487_v11 = vpop.f32.mrf.mxu2  ;;  %v5576_v38 = vpop.f32.mrf.mxu3 }
 0x7cf   : > { %v5400_v33 = vpop.f32.mrf.mxu1  ;;  %v12807_v1 = vpop.f32.mrf.mxu0  ;;  %v5488_v41 = vadd.f32 %v5487_v11, %v5398_v58  ;;  %v8293_v58 = vor.u32 %v8810_v49, %v8292_v15  ;;  %v8813_v49 = vld [vmem:[#allocation2 + $0xc8] sm:$0xf0] }
 0x7d1   : > { %v5577_v28 = vadd.f32 %v5576_v38, %v5488_v41 }
 0x7d6   : > { %v5489_v21 = vpop.f32.mrf.mxu2  ;;  %v5578_v37 = vpop.f32.mrf.mxu3 }
 0x7d7   : > { %v5403_v12 = vpop.f32.mrf.mxu1  ;;  %v12811_v35 = vpop.f32.mrf.mxu0  ;;  %v5490_v44 = vadd.f32 %v5489_v21, %v5400_v33 }
 0x7d9   : > { %v5579_v42 = vadd.f32 %v5578_v37, %v5490_v44  ;;  %v12820_v44 = vadd.f32 %v5822_v26, %v5574_v29  ;;  %v12827_v26 = vadd.f32 %v12800_v31, %v5577_v28 }
 0x7da   : > { %5878 = vmatmul.bf16.gmra.mxu1 %v12620_v47  ;;  %6658 = vmatmul.bf16.gmra.mxu0 %v8297_v10  ;;  %v8304_v10 = vld [vmem:[#allocation2 + $0xc0] sm:$0xf] }
 0x7db   : > { %5967 = vmatmul.bf16.gmra.mxu2 %v12622_v40  ;;  %6569 = vmatmul.bf16.gmra.mxu3 %v8293_v58 }
 0x7de   : > { %v5492_v48 = vpop.f32.mrf.mxu2  ;;  %v5581_v47 = vpop.f32.mrf.mxu3 }
 0x7df   : > { %v5405_v9 = vpop.f32.mrf.mxu1  ;;  %v12818_v33 = vpop.f32.mrf.mxu0  ;;  %v5493_v11 = vadd.f32 %v5492_v48, %v5403_v12  ;;  %v8305_v12 = vor.u32 %v8813_v49, %v8304_v10  ;;  %v12835_v10 = vadd.f32 %v12807_v1, %v5579_v42  ;;  %v8861_v49 = vld [vmem:[#allocation6 + $0x458] sm:$0xff] }
 0x7e0   : > { %6718 = vmatpush.bf16.msra.mxu1 %v8861_v49 }
 0x7e1   : > { %v5582_v41 = vadd.f32 %v5581_v47, %v5493_v11  ;;  %v8815_v47 = vld [vmem:[#allocation2 + $0xdc] sm:$0xf] }
 0x7e2   : > { %v8321_v31 = vor.u32 %v8815_v47, %v8318_v2  ;;  %v8818_v47 = vld [vmem:[#allocation2 + $0xf4] sm:$0xf]  ;;  %v8330_v2 = vld [vmem:[#allocation2 + $0xfc] sm:$0xf0] }
 0x7e6   : > { %v5494_v21 = vpop.f32.mrf.mxu2  ;;  %v5583_v15 = vpop.f32.mrf.mxu3 }
 0x7e7   : > { %v5408_v38 = vpop.f32.mrf.mxu1  ;;  %v12822_v37 = vpop.f32.mrf.mxu0  ;;  %v5495_v40 = vadd.f32 %v5494_v21, %v5405_v9 }
 0x7e9   : > { %v5584_v61 = vadd.f32 %v5583_v15, %v5495_v40 }
 0x7ea   : > { %5883 = vmatmul.bf16.gmra.mxu1 %v12626_v8  ;;  %6663 = vmatmul.bf16.gmra.mxu0 %v8309_v30  ;;  %v8816_v30 = vld [vmem:[#allocation2 + $0xe0] sm:$0xf0] }
 0x7eb   : > { %5972 = vmatmul.bf16.gmra.mxu2 %v12628_v23  ;;  %6574 = vmatmul.bf16.gmra.mxu3 %v8305_v12  ;;  %v8316_v23 = vld [vmem:[#allocation2 + $0xd8] sm:$0xf] }
 0x7ee   : > { %v5497_v25 = vpop.f32.mrf.mxu2  ;;  %v5586_v48 = vpop.f32.mrf.mxu3 }
 0x7ef   : > { %v5410_v58 = vpop.f32.mrf.mxu1  ;;  %v12829_v29 = vpop.f32.mrf.mxu0  ;;  %v5498_v9 = vadd.f32 %v5497_v25, %v5408_v38  ;;  %v8317_v38 = vor.u32 %v8816_v30, %v8316_v23  ;;  %v8333_v30 = vor.u32 %v8818_v47, %v8330_v2  ;;  %v8342_v47 = vld [vmem:[#allocation2 + $0x114] sm:$0xf0] }
 0x7f1   : > { %v5587_v11 = vadd.f32 %v5586_v48, %v5498_v9  ;;  %v12841_v48 = vadd.f32 %v12811_v35, %v5582_v41  ;;  %v8819_v35 = vld [vmem:[#allocation2 + $0xf8] sm:$0xf0] }
 0x7f6   : > { %v5499_v16 = vpop.f32.mrf.mxu2  ;;  %v5588_v15 = vpop.f32.mrf.mxu3 }
 0x7f7   : > { %v5413_v8 = vpop.f32.mrf.mxu1  ;;  %v12831_v21 = vpop.f32.mrf.mxu0  ;;  %v5500_v40 = vadd.f32 %v5499_v16, %v5410_v58 }
 0x7f9   : > { %v5589_v28 = vadd.f32 %v5588_v15, %v5500_v40 }
 0x7fa   : > { %5888 = vmatmul.bf16.gmra.mxu1 %v12632_v34  ;;  %6668 = vmatmul.bf16.gmra.mxu0 %v8321_v31  ;;  %v8328_v31 = vld [vmem:[#allocation2 + $0xf0] sm:$0xf] }
 0x7fb   : > { %5977 = vmatmul.bf16.gmra.mxu2 %v12634_v19  ;;  %6579 = vmatmul.bf16.gmra.mxu3 %v8317_v38  ;;  %v8329_v41 = vor.u32 %v8819_v35, %v8328_v31 }
 0x7fe   : > { %v5502_v25 = vpop.f32.mrf.mxu2  ;;  %v5591_v34 = vpop.f32.mrf.mxu3 }
 0x7ff   : > { %v5415_v12 = vpop.f32.mrf.mxu1  ;;  %v12838_v58 = vpop.f32.mrf.mxu0  ;;  %v5503_v9 = vadd.f32 %v5502_v25, %v5413_v8  ;;  %v12846_v8 = vadd.f32 %v12818_v33, %v5584_v61  ;;  %v12855_v33 = vadd.f32 %v12822_v37, %v5587_v11  ;;  %v8822_v11 = vld [vmem:[#allocation2 + $0x110] sm:$0xf0] }
 0x801   : > { %v5592_v1 = vadd.f32 %v5591_v34, %v5503_v9 }
 0x806   : > { %v5504_v40 = vpop.f32.mrf.mxu2  ;;  %v5593_v23 = vpop.f32.mrf.mxu3 }
 0x807   : > { %v5854_v42 = vpop.f32.mrf.mxu1  ;;  %v6634_v15 = vpop.f32.mrf.mxu0  ;;  %v5505_v19 = vadd.f32 %v5504_v40, %v5415_v12 }
 0x808   : > { %v5855_v16 = vadd.f32 %v5854_v42, %v12656_v36  ;;  %v8821_v42 = vld [vmem:[#allocation2 + $0x10c] sm:$0xf] }
 0x809   : > { %v5594_v38 = vadd.f32 %v5593_v23, %v5505_v19 }
 0x80a   : > { %5893 = vmatmul.bf16.gmra.mxu1 %v12638_v6  ;;  %6673 = vmatmul.bf16.gmra.mxu0 %v8333_v30  ;;  %v8860_v30 = vld [vmem:[#allocation6 + $0x450] sm:$0xff] }
 0x80b   : > { %5982 = vmatmul.bf16.gmra.mxu2 %v12640_v51  ;;  %6584 = vmatmul.bf16.gmra.mxu3 %v8329_v41 }
 0x80c   : > { %6719 = vmatpush.bf16.msra.mxu1 %v8860_v30 }
 0x80e   : > { %v5943_v25 = vpop.f32.mrf.mxu2  ;;  %v6545_v6 = vpop.f32.mrf.mxu3 }
 0x80f   : > { %v5856_v49 = vpop.f32.mrf.mxu1  ;;  %v6636_v12 = vpop.f32.mrf.mxu0  ;;  %v12850_v9 = vadd.f32 %v5943_v25, %v5855_v16  ;;  %v12852_v34 = vadd.f32 %v6634_v15, %v6545_v6  ;;  %v8345_v16 = vor.u32 %v8821_v42, %v8342_v47  ;;  %v12864_v15 = vadd.f32 %v12829_v29, %v5589_v28  ;;  %v8354_v6 = vld [vmem:[#allocation2 + $0x12c] sm:$0xf0] }
 0x810   : > { %v5857_v36 = vadd.f32 %v5856_v49, %v12668_v63  ;;  %v8340_v63 = vld [vmem:[#allocation2 + $0x108] sm:$0xf]  ;;  %v12873_v29 = vadd.f32 %v12831_v21, %v5592_v1  ;;  %v12882_v21 = vadd.f32 %v12838_v58, %v5594_v38 }
 0x811   : > { %v8341_v31 = vor.u32 %v8822_v11, %v8340_v63 }
 0x816   : > { %v5945_v51 = vpop.f32.mrf.mxu2  ;;  %v6547_v19 = vpop.f32.mrf.mxu3 }
 0x817   : > { %v5859_v61 = vpop.f32.mrf.mxu1  ;;  %v12858_v40 = vadd.f32 %v5945_v51, %v5857_v36  ;;  %v12861_v23 = vadd.f32 %v6636_v12, %v6547_v19  ;;  %v6639_v37 = vpop.f32.mrf.mxu0  ;;  %v8824_v12 = vld [vmem:[#allocation2 + $0x124] sm:$0xf]  ;;  %v8825_v19 = vld [vmem:[#allocation2 + $0x128] sm:$0xf0] }
 0x818   : > { %v5860_v2 = vadd.f32 %v5859_v61, %v12672_v20 }
 0x81a   : > { %5898 = vmatmul.bf16.gmra.mxu1 %v12644_v24  ;;  %6678 = vmatmul.bf16.gmra.mxu0 %v8345_v16 }
 0x81b   : > { %5987 = vmatmul.bf16.gmra.mxu2 %v12646_v4  ;;  %6589 = vmatmul.bf16.gmra.mxu3 %v8341_v31 }
 0x81e   : > { %v5948_v24 = vpop.f32.mrf.mxu2  ;;  %v6550_v49 = vpop.f32.mrf.mxu3 }
 0x81f   : > { %v5861_v20 = vpop.f32.mrf.mxu1  ;;  %v12868_v41 = vadd.f32 %v5948_v24, %v5860_v2  ;;  %v12870_v36 = vadd.f32 %v6639_v37, %v6550_v49  ;;  %v6641_v28 = vpop.f32.mrf.mxu0  ;;  %v8357_v2 = vor.u32 %v8824_v12, %v8354_v6  ;;  %v8828_v12 = vld [vmem:[#allocation2 + $0x140] sm:$0xf0] }
 0x820   : > { %v5862_v35 = vadd.f32 %v5861_v20, %v12682_v57  ;;  %v8352_v57 = vld [vmem:[#allocation2 + $0x120] sm:$0xf]  ;;  %v8827_v20 = vld [vmem:[#allocation2 + $0x13c] sm:$0xf] }
 0x821   : > { %v8353_v1 = vor.u32 %v8825_v19, %v8352_v57  ;;  %v8378_v19 = vld [vmem:[#allocation2 + $0x15c] sm:$0xf0] }
 0x826   : > { %v5950_v61 = vpop.f32.mrf.mxu2  ;;  %v6552_v47 = vpop.f32.mrf.mxu3 }
 0x827   : > { %v5864_v25 = vpop.f32.mrf.mxu1  ;;  %v12876_v42 = vadd.f32 %v5950_v61, %v5862_v35  ;;  %v12879_v51 = vadd.f32 %v6641_v28, %v6552_v47  ;;  %v6644_v63 = vpop.f32.mrf.mxu0  ;;  %v8366_v35 = vld [vmem:[#allocation2 + $0x144] sm:$0xf0]  ;;  %v8364_v28 = vld [vmem:[#allocation2 + $0x138] sm:$0xf] }
 0x828   : > { %v5865_v4 = vadd.f32 %v5864_v25, %v12691_v43  ;;  %v8365_v6 = vor.u32 %v8828_v12, %v8364_v28  ;;  %v8834_v28 = vld [vmem:[#allocation2 + $0x170] sm:$0xf0]  ;;  %v13617_v12 = vld [vmem:[#allocation31_spill] sm:$0xff] }
 0x82a   : > { %5903 = vmatmul.bf16.gmra.mxu1 %v12650_v18  ;;  %6683 = vmatmul.bf16.gmra.mxu0 %v8357_v2 }
 0x82b   : > { %5992 = vmatmul.bf16.gmra.mxu2 %v12652_v50  ;;  %6594 = vmatmul.bf16.gmra.mxu3 %v8353_v1 }
 0x82e   : > { %v5953_v37 = vpop.f32.mrf.mxu2  ;;  %v6555_v18 = vpop.f32.mrf.mxu3 }
 0x82f   : > { %v5866_v43 = vpop.f32.mrf.mxu1  ;;  %v12886_v11 = vadd.f32 %v5953_v37, %v5865_v4  ;;  %v12888_v31 = vadd.f32 %v6644_v63, %v6555_v18  ;;  %v6646_v24 = vpop.f32.mrf.mxu0  ;;  %v8859_v4 = vld [vmem:[#allocation6 + $0x448] sm:$0xff] }
 0x830   : > { %v5867_v16 = vadd.f32 %v5866_v43, %v12702_v22  ;;  %v8369_v22 = vor.u32 %v8827_v20, %v8366_v35  ;;  %6720 = vmatpush.bf16.msra.mxu1 %v8859_v4  ;;  %v8831_v37 = vld [vmem:[#allocation2 + $0x158] sm:$0xf0]  ;;  %v8390_v35 = vld [vmem:[#allocation2 + $0x174] sm:$0xf0] }
 0x836   : > { %v5955_v38 = vpop.f32.mrf.mxu2  ;;  %v6557_v50 = vpop.f32.mrf.mxu3 }
 0x837   : > { %v5869_v30 = vpop.f32.mrf.mxu1  ;;  %v12891_v49 = vadd.f32 %v5955_v38, %v5867_v16  ;;  %v12894_v25 = vadd.f32 %v6646_v24, %v6557_v50  ;;  %v13615_v38 = vld [vmem:[#allocation24_spill] sm:$0xff] }
 0x838   : > { %v5870_v58 = vadd.f32 %v5869_v30, %v12716_v32  ;;  %v8858_v24 = vld [vmem:[#allocation6 + $0x440] sm:$0xff] }
 0x839   : > { %6721 = vmatpush.bf16.msra.mxu1 %v8858_v24  ;;  %v8240_v24 = vld [vmem:[#allocation2 + $0x38] sm:$0xf] }
 0x83a   : > { %5908 = vmatmul.bf16.gmra.mxu1 %v12660_v59  ;;  %6688 = vmatmul.bf16.gmra.mxu0 %v8369_v22  ;;  %v8830_v59 = vld [vmem:[#allocation2 + $0x154] sm:$0xf]  ;;  %v13616_v22 = vld [vmem:[#allocation23_spill] sm:$0xff] }
 0x83b   : > { %5997 = vmatmul.bf16.gmra.mxu2 %v12662_v14  ;;  %6599 = vmatmul.bf16.gmra.mxu3 %v8365_v6  ;;  %v8376_v14 = vld [vmem:[#allocation2 + $0x150] sm:$0xf]  ;;  %v8381_v16 = vor.u32 %v8830_v59, %v8378_v19  ;;  %v8837_v19 = vld [vmem:[#allocation2 + $0x188] sm:$0xf0] }
 0x83c   : > { %v8377_v18 = vor.u32 %v8831_v37, %v8376_v14  ;;  %v13619_v14 = vld [vmem:[#allocation14_spill] sm:$0xff] }
 0x83e   : > { %v5958_v47 = vpop.f32.mrf.mxu2 }
 0x83f   : > { %v5871_v61 = vpop.f32.mrf.mxu1  ;;  %v12898_v57 = vadd.f32 %v5958_v47, %v5870_v58  ;;  %v13618_v47 = vld [vmem:[#allocation13_spill] sm:$0xff] }
 0x840   : > { %v5872_v32 = vadd.f32 %v5871_v61, %v12726_v54  ;;  %v8836_v61 = vld [vmem:[#allocation2 + $0x184] sm:$0xf] }
 0x846   : > { %v5960_v43 = vpop.f32.mrf.mxu2 }
 0x847   : > { %v5874_v2 = vpop.f32.mrf.mxu1  ;;  %v12903_v63 = vadd.f32 %v5960_v43, %v5872_v32 }
 0x848   : > { %v12901_v1 = vadd.f32 %v5874_v2, %v12741_v55  ;;  %v8833_v55 = vld [vmem:[#allocation2 + $0x16c] sm:$0xf]  ;;  %v8400_v2 = vld [vmem:[#allocation2 + $0x180] sm:$0xf] }
 0x849   : > { %v8393_v50 = vor.u32 %v8833_v55, %v8390_v35  ;;  %v8401_v43 = vor.u32 %v8837_v19, %v8400_v2 }
 0x84a   : > { %5913 = vmatmul.bf16.gmra.mxu1 %v12674_v27  ;;  %6693 = vmatmul.bf16.gmra.mxu0 %v8381_v16  ;;  %v8388_v27 = vld [vmem:[#allocation2 + $0x168] sm:$0xf] }
 0x84b   : > { %6002 = vmatmul.bf16.gmra.mxu2 %v12676_v60  ;;  %6604 = vmatmul.bf16.gmra.mxu3 %v8377_v18  ;;  %v8389_v60 = vor.u32 %v8834_v28, %v8388_v27 }
 0x84f   : > { %v5876_v54 = vpop.f32.mrf.mxu1 }
 0x850   : > { %v12908_v30 = vadd.f32 %v5876_v54, %v12749_v0 }
 0x857   : > { %v5879_v20 = vpop.f32.mrf.mxu1 }
 0x858   : > { %v12911_v58 = vadd.f32 %v5879_v20, %v12755_v39  ;;  %v8402_v39 = vld [vmem:[#allocation2 + $0x18c] sm:$0xf0]  ;;  %v13621_v20 = vld [vmem:[#allocation15_spill] sm:$0xff] }
 0x859   : > { %v8405_v59 = vor.u32 %v8836_v61, %v8402_v39 }
 0x85a   : > { %5918 = vmatmul.bf16.gmra.mxu1 %v13615_v38  ;;  %6698 = vmatmul.bf16.gmra.mxu0 %v8393_v50  ;;  %v8796_v38 = vld [vmem:[#allocation2 + $0x40] sm:$0xf0] }
 0x85b   : > { %6007 = vmatmul.bf16.gmra.mxu2 %v13616_v22  ;;  %6609 = vmatmul.bf16.gmra.mxu3 %v8389_v60  ;;  %v8799_v60 = vld [vmem:[#allocation2 + $0x58] sm:$0xf0] }
 0x85f   : > { %v5881_v0 = vpop.f32.mrf.mxu1 }
 0x860   : > { %v12916_v6 = vadd.f32 %v5881_v0, %v13617_v12  ;;  %v8252_v0 = vld [vmem:[#allocation2 + $0x50] sm:$0xf] }
 0x867   : > { %v5884_v4 = vpop.f32.mrf.mxu1 }
 0x868   : > { %v12919_v32 = vadd.f32 %v5884_v4, %v12767_v62  ;;  %v13620_v62 = vld [vmem:[#allocation28_spill] sm:$0xff] }
 0x86a   : > { %5923 = vmatmul.bf16.gmra.mxu1 %v13618_v47  ;;  %6703 = vmatmul.bf16.gmra.mxu0 %v8405_v59  ;;  %v8264_v47 = vld [vmem:[#allocation2 + $0x68] sm:$0xf] }
 0x86b   : > { %6012 = vmatmul.bf16.gmra.mxu2 %v13619_v14  ;;  %6614 = vmatmul.bf16.gmra.mxu3 %v8401_v43  ;;  %v8276_v14 = vld [vmem:[#allocation2 + $0x80] sm:$0xf] }
 0x86f   : > { %v5886_v16 = vpop.f32.mrf.mxu1 }
 0x870   : > { %v12924_v37 = vadd.f32 %v5886_v16, %v12770_v5  ;;  %v8241_v5 = vor.u32 %v8796_v38, %v8240_v24 }
 0x877   : > { %v5889_v18 = vpop.f32.mrf.mxu1 }
 0x878   : > { %v12927_v54 = vadd.f32 %v5889_v18, %v12777_v56 }
 0x87a   : > { %5928 = vmatmul.bf16.gmra.mxu1 %v13620_v62 }
 0x87b   : > { %6017 = vmatmul.bf16.gmra.mxu2 %v13621_v20 }
 0x87f   : > { %v5891_v55 = vpop.f32.mrf.mxu1 }
 0x880   : > { %v12932_v35 = vadd.f32 %v5891_v55, %v12780_v7  ;;  %v8253_v7 = vor.u32 %v8799_v60, %v8252_v0  ;;  %v8288_v55 = vld [vmem:[#allocation2 + $0x98] sm:$0xf] }
 0x887   : > { %v5894_v27 = vpop.f32.mrf.mxu1 }
 0x888   : > { %v12935_v50 = vadd.f32 %v5894_v27, %v12787_v17  ;;  %v8802_v17 = vld [vmem:[#allocation2 + $0x70] sm:$0xf0] }
 0x88a   : > { %6722 = vmatmul.bf16.vlgmr.msra.gmra.mxu1 %v8241_v5 }
 0x88f   : > { %v5896_v28 = vpop.f32.mrf.mxu1 }
 0x890   : > { %v12938_v56 = vadd.f32 %v5896_v28, %v12789_v53  ;;  %v8265_v53 = vor.u32 %v8802_v17, %v8264_v47  ;;  %v8300_v28 = vld [vmem:[#allocation2 + $0xb0] sm:$0xf] }
 0x897   : > { %v5899_v22 = vpop.f32.mrf.mxu1 }
 0x898   : > { %v12941_v12 = vadd.f32 %v5899_v22, %v12796_v52  ;;  %v8805_v52 = vld [vmem:[#allocation2 + $0x88] sm:$0xf0] }
 0x89a   : > { %6727 = vmatmul.bf16.gmra.mxu1 %v8253_v7 }
 0x89f   : > { %v5901_v4 = vpop.f32.mrf.mxu1 }
 0x8a0   : > { %v12944_v61 = vadd.f32 %v5901_v4, %v12798_v45  ;;  %v8277_v45 = vor.u32 %v8805_v52, %v8276_v14  ;;  %v8312_v4 = vld [vmem:[#allocation2 + $0xc8] sm:$0xf] }
 0x8a7   : > { %v5904_v39 = vpop.f32.mrf.mxu1 }
 0x8a8   : > { %v12947_v2 = vadd.f32 %v5904_v39, %v12805_v3  ;;  %v8808_v3 = vld [vmem:[#allocation2 + $0xa0] sm:$0xf0] }
 0x8aa   : > { %6732 = vmatmul.bf16.gmra.mxu1 %v8265_v53 }
 0x8af   : > { %v5906_v59 = vpop.f32.mrf.mxu1 }
 0x8b0   : > { %v12950_v19 = vadd.f32 %v5906_v59, %v12809_v13  ;;  %v8289_v13 = vor.u32 %v8808_v3, %v8288_v55  ;;  %v8324_v59 = vld [vmem:[#allocation2 + $0xe0] sm:$0xf]  ;;  %v8336_v3 = vld [vmem:[#allocation2 + $0xf8] sm:$0xf] }
 0x8b7   : > { %v5909_v43 = vpop.f32.mrf.mxu1 }
 0x8b8   : > { %v12953_v16 = vadd.f32 %v5909_v43, %v12816_v46  ;;  %v8811_v46 = vld [vmem:[#allocation2 + $0xb8] sm:$0xf0] }
 0x8ba   : > { %6737 = vmatmul.bf16.gmra.mxu1 %v8277_v45  ;;  %v12984_v45 = vpop.f32.mrf.mxu3 }
 0x8bf   : > { %v5911_v18 = vpop.f32.mrf.mxu1 }
 0x8c0   : > { %v12956_v62 = vadd.f32 %v5911_v18, %v12820_v44  ;;  %v8301_v44 = vor.u32 %v8811_v46, %v8300_v28  ;;  %v9113_v28 = vld [vmem:[%s9440_s30] sm:$0xff] }
 0x8c7   : > { %v5914_v20 = vpop.f32.mrf.mxu1 }
 0x8c8   : > { %v12959_v38 = vadd.f32 %v5914_v20, %v12827_v26  ;;  %v8814_v26 = vld [vmem:[#allocation2 + $0xd0] sm:$0xf0] }
 0x8c9   : > { %v9112_v20 = vld [vmem:[#allocation8 + $0x4] sm:$0xf] }
 0x8ca   : > { %6742 = vmatmul.bf16.gmra.mxu1 %v8289_v13  ;;  %v12986_v55 = vperm.slane %v9112_v20, 3 }
 0x8cf   : > { %v5916_v27 = vpop.f32.mrf.mxu1 }
 0x8d0   : > { %v12962_v24 = vadd.f32 %v5916_v27, %v12835_v10  ;;  %v8313_v10 = vor.u32 %v8814_v26, %v8312_v4 }
 0x8d7   : > { %v5919_v5 = vpop.f32.mrf.mxu1 }
 0x8d8   : > { %v12965_v60 = vadd.f32 %v5919_v5, %v12841_v48  ;;  %v8817_v48 = vld [vmem:[#allocation2 + $0xe8] sm:$0xf0]  ;;  %v12993_v5 = vpop.f32.mrf.mxu3 }
 0x8da   : > { %6747 = vmatmul.bf16.gmra.mxu1 %v8301_v44 }
 0x8df   : > { %v5921_v22 = vpop.f32.mrf.mxu1 }
 0x8e0   : > { %v12968_v0 = vadd.f32 %v5921_v22, %v12846_v8  ;;  %v8325_v8 = vor.u32 %v8817_v48, %v8324_v59 }
 0x8e7   : > { %v5924_v7 = vpop.f32.mrf.mxu1 }
 0x8e8   : > { %v12971_v17 = vadd.f32 %v5924_v7, %v12855_v33  ;;  %v12982_v33 = vpop.f32.mrf.mxu0  ;;  %v8823_v7 = vld [vmem:[#allocation2 + $0x118] sm:$0xf0] }
 0x8ea   : > { %6752 = vmatmul.bf16.gmra.mxu1 %v8313_v10  ;;  %v13006_v10 = vpop.f32.mrf.mxu2 }
 0x8ef   : > { %v5926_v39 = vpop.f32.mrf.mxu1 }
 0x8f0   : > { %v12974_v47 = vadd.f32 %v5926_v39, %v12864_v15  ;;  %v8820_v15 = vld [vmem:[#allocation2 + $0x100] sm:$0xf0]  ;;  %v9114_v39 = vld [vmem:[%s9440_s30 + $0x8] sm:$0xff] }
 0x8f1   : > { %v8337_v13 = vor.u32 %v8820_v15, %v8336_v3 }
 0x8f7   : > { %v5929_v53 = vpop.f32.mrf.mxu1 }
 0x8f8   : > { %v12977_v52 = vadd.f32 %v5929_v53, %v12873_v29  ;;  %v13009_v53 = vpop.f32.mrf.mxu3 }
 0x8fa   : > { %6757 = vmatmul.bf16.gmra.mxu1 %v8325_v8  ;;  %v8348_v8 = vld [vmem:[#allocation2 + $0x110] sm:$0xf] }
 0x8ff   : > { %v5931_v43 = vpop.f32.mrf.mxu1 }
 0x900   : > { %v12980_v14 = vadd.f32 %v5931_v43, %v12882_v21  ;;  %v12990_v21 = vpop.f32.mrf.mxu0 }
 0x907   : > { %v6723_v18 = vpop.f32.mrf.mxu1 }
 0x908   : > { %v6724_v29 = vadd.f32 %v6723_v18, %v12852_v34  ;;  %v13004_v4 = vpop.f32.mrf.mxu0  ;;  %v9115_v18 = vld [vmem:[%s9440_s30 + $0x10] sm:$0xff] }
 0x90a   : > { %v6803_v27 = vadd.f32 %v6724_v29, %v12850_v9  ;;  %6762 = vmatmul.bf16.gmra.mxu1 %v8337_v13  ;;  %v13018_v13 = vpop.f32.mrf.mxu2 }
 0x90c   : > { %v6836_v46 = vadd.f32 %v12986_v55, %v6803_v27 }
 0x90e   : > { %v6868_v44 = vadd.f32 %v9113_v28, %v6836_v46  ;;  %v13022_v46 = vpop.f32.mrf.mxu3  ;;  %v8826_v28 = vld [vmem:[#allocation2 + $0x130] sm:$0xf0] }
 0x90f   : > { %v6725_v22 = vpop.f32.mrf.mxu1 }
 0x910   : > { %6900 = vst [vmem:[%s12998_s18] sm:$0xff] %v6868_v44  ;;  %v6726_v34 = vadd.f32 %v6725_v22, %v12861_v23  ;;  %v13016_v29 = vpop.f32.mrf.mxu0  ;;  %v9116_v44 = vld [vmem:[%s9440_s30 + $0x18] sm:$0xff] }
 0x912   : > { %v6804_v9 = vadd.f32 %v6726_v34, %v12858_v40  ;;  %v8349_v40 = vor.u32 %v8823_v7, %v8348_v8  ;;  %v9117_v8 = vld [vmem:[%s9440_s30 + $0x20] sm:$0xff] }
 0x914   : > { %v6837_v26 = vadd.f32 %v12986_v55, %v6804_v9  ;;  %v8360_v9 = vld [vmem:[#allocation2 + $0x128] sm:$0xf] }
 0x915   : > { %v8361_v7 = vor.u32 %v8826_v28, %v8360_v9  ;;  %v6652_v9 = vadd.f32 %v12990_v21, %v12993_v5  ;;  %v6655_v21 = vadd.f32 %v13004_v4, %v13009_v53  ;;  %v9120_v5 = vld [vmem:[%s9440_s30 + $0x38] sm:$0xff]  ;;  %v6657_v53 = vadd.f32 %v13016_v29, %v13022_v46  ;;  %v8835_v46 = vld [vmem:[#allocation2 + $0x178] sm:$0xf0] }
 0x916   : > { %v6869_v48 = vadd.f32 %v9114_v39, %v6837_v26 }
 0x917   : > { %v6728_v59 = vpop.f32.mrf.mxu1 }
 0x918   : > { %6901 = vst [vmem:[%s12998_s18 + $0x8] sm:$0xff] %v6869_v48  ;;  %v6729_v23 = vadd.f32 %v6728_v59, %v12870_v36  ;;  %v13029_v39 = vpop.f32.mrf.mxu0 }
 0x91a   : > { %v6805_v43 = vadd.f32 %v6729_v23, %v12868_v41  ;;  %6767 = vmatmul.bf16.gmra.mxu1 %v8349_v40 }
 0x91c   : > { %v6838_v15 = vadd.f32 %v12986_v55, %v6805_v43 }
 0x91e   : > { %v6870_v3 = vadd.f32 %v9115_v18, %v6838_v15 }
 0x91f   : > { %v6730_v20 = vpop.f32.mrf.mxu1 }
 0x920   : > { %6902 = vst [vmem:[%s12998_s18 + $0x10] sm:$0xff] %v6870_v3  ;;  %v6731_v27 = vadd.f32 %v6730_v20, %v12879_v51  ;;  %v13031_v51 = vpop.f32.mrf.mxu2  ;;  %v13041_v15 = vpop.f32.mrf.mxu0  ;;  %v8829_v20 = vld [vmem:[#allocation2 + $0x148] sm:$0xf0] }
 0x922   : > { %v6806_v36 = vadd.f32 %v6731_v27, %v12876_v42  ;;  %v13034_v42 = vpop.f32.mrf.mxu3  ;;  %v6650_v27 = vadd.f32 %v12982_v33, %v12984_v45  ;;  %v9119_v45 = vld [vmem:[%s9440_s30 + $0x30] sm:$0xff] }
 0x924   : > { %v6839_v41 = vadd.f32 %v12986_v55, %v6806_v36  ;;  %v9118_v36 = vld [vmem:[%s9440_s30 + $0x28] sm:$0xff] }
 0x926   : > { %v6871_v22 = vadd.f32 %v9116_v44, %v6839_v41 }
 0x927   : > { %v6733_v34 = vpop.f32.mrf.mxu1 }
 0x928   : > { %6903 = vst [vmem:[%s12998_s18 + $0x18] sm:$0xff] %v6871_v22  ;;  %v6734_v26 = vadd.f32 %v6733_v34, %v12888_v31  ;;  %v13043_v18 = vpop.f32.mrf.mxu2 }
 0x92a   : > { %v6807_v48 = vadd.f32 %v6734_v26, %v12886_v11  ;;  %6772 = vmatmul.bf16.gmra.mxu1 %v8361_v7  ;;  %v13046_v3 = vpop.f32.mrf.mxu3  ;;  %v13056_v26 = vpop.f32.mrf.mxu0 }
 0x92c   : > { %v6840_v59 = vadd.f32 %v12986_v55, %v6807_v48 }
 0x92e   : > { %v6872_v23 = vadd.f32 %v9117_v8, %v6840_v59 }
 0x92f   : > { %v6735_v40 = vpop.f32.mrf.mxu1 }
 0x930   : > { %6904 = vst [vmem:[%s12998_s18 + $0x20] sm:$0xff] %v6872_v23  ;;  %v6736_v31 = vadd.f32 %v6735_v40, %v12894_v25  ;;  %v8372_v25 = vld [vmem:[#allocation2 + $0x140] sm:$0xf]  ;;  %v13058_v33 = vpop.f32.mrf.mxu2  ;;  %v8832_v40 = vld [vmem:[#allocation2 + $0x160] sm:$0xf0] }
 0x931   : > { %v8373_v44 = vor.u32 %v8829_v20, %v8372_v25  ;;  %v5964_v20 = vadd.f32 %v13006_v10, %v12901_v1  ;;  %v5966_v10 = vadd.f32 %v13018_v13, %v12908_v30  ;;  %v9122_v30 = vld [vmem:[%s9440_s30 + $0x48] sm:$0xff] }
 0x932   : > { %v6808_v43 = vadd.f32 %v6736_v31, %v12891_v49  ;;  %v13061_v48 = vpop.f32.mrf.mxu3 }
 0x934   : > { %v6841_v11 = vadd.f32 %v12986_v55, %v6808_v43 }
 0x936   : > { %v6873_v41 = vadd.f32 %v9118_v36, %v6841_v11  ;;  %v8384_v11 = vld [vmem:[#allocation2 + $0x158] sm:$0xf] }
 0x937   : > { %v6738_v28 = vpop.f32.mrf.mxu1 }
 0x938   : > { %6905 = vst [vmem:[%s12998_s18 + $0x28] sm:$0xff] %v6873_v41  ;;  %v6739_v49 = vadd.f32 %v6738_v28, %v6650_v27  ;;  %v13071_v27 = vpop.f32.mrf.mxu0  ;;  %v13073_v36 = vpop.f32.mrf.mxu2  ;;  %v8385_v41 = vor.u32 %v8832_v40, %v8384_v11  ;;  %v8839_v11 = vld [vmem:[#allocation2 + $0x19c] sm:$0xf] }
 0x93a   : > { %v6809_v22 = vadd.f32 %v6739_v49, %v12898_v57  ;;  %6777 = vmatmul.bf16.gmra.mxu1 %v8373_v44  ;;  %v13076_v28 = vpop.f32.mrf.mxu3  ;;  %v9121_v49 = vld [vmem:[%s9440_s30 + $0x40] sm:$0xff] }
 0x93c   : > { %v6842_v34 = vadd.f32 %v12986_v55, %v6809_v22 }
 0x93e   : > { %v6874_v7 = vadd.f32 %v9119_v45, %v6842_v34  ;;  %v8412_v34 = vld [vmem:[#allocation2 + $0x198] sm:$0xf] }
 0x93f   : > { %v6740_v59 = vpop.f32.mrf.mxu1 }
 0x940   : > { %6906 = vst [vmem:[%s12998_s18 + $0x30] sm:$0xff] %v6874_v7  ;;  %v6741_v8 = vadd.f32 %v6740_v59, %v6652_v9  ;;  %v8840_v9 = vld [vmem:[#allocation2 + $0x1a0] sm:$0xf0]  ;;  %v13085_v7 = vpop.f32.mrf.mxu0  ;;  %v13087_v59 = vpop.f32.mrf.mxu2 }
 0x941   : > { %v8413_v45 = vor.u32 %v8840_v9, %v8412_v34  ;;  %v8838_v34 = vld [vmem:[#allocation2 + $0x190] sm:$0xf0]  ;;  %v6665_v9 = vadd.f32 %v13056_v26, %v13061_v48  ;;  %v6667_v26 = vadd.f32 %v13071_v27, %v13076_v28  ;;  %v9126_v28 = vld [vmem:[%s9440_s30 + $0x68] sm:$0xff] }
 0x942   : > { %v6810_v57 = vadd.f32 %v6741_v8, %v12903_v63  ;;  %v9125_v48 = vld [vmem:[%s9440_s30 + $0x60] sm:$0xff] }
 0x943   : > { %6619 = vmatmul.bf16.gmra.mxu3 %v8413_v45 }
 0x944   : > { %v6843_v23 = vadd.f32 %v12986_v55, %v6810_v57  ;;  %v6580_v57 = vpop.f32.mrf.mxu3 }
 0x945   : > { %v6670_v27 = vadd.f32 %v13085_v7, %v6580_v57  ;;  %v9127_v7 = vld [vmem:[%s9440_s30 + $0x70] sm:$0xff] }
 0x946   : > { %v6875_v31 = vadd.f32 %v9120_v5, %v6843_v23  ;;  %v6660_v23 = vadd.f32 %v13029_v39, %v13034_v42  ;;  %v5969_v5 = vadd.f32 %v13031_v51, %v12911_v58  ;;  %v9123_v58 = vld [vmem:[%s9440_s30 + $0x50] sm:$0xff] }
 0x947   : > { %v6743_v43 = vpop.f32.mrf.mxu1 }
 0x948   : > { %6907 = vst [vmem:[%s12998_s18 + $0x38] sm:$0xff] %v6875_v31  ;;  %v6744_v63 = vadd.f32 %v6743_v43, %v6655_v21  ;;  %v8396_v21 = vld [vmem:[#allocation2 + $0x170] sm:$0xf]  ;;  %v5980_v39 = vpop.f32.mrf.mxu2 }
 0x949   : > { %v8397_v43 = vor.u32 %v8835_v46, %v8396_v21 }
 0x94a   : > { %v6811_v25 = vadd.f32 %v6744_v63, %v5964_v20  ;;  %6782 = vmatmul.bf16.gmra.mxu1 %v8385_v41  ;;  %v8414_v20 = vld [vmem:[#allocation2 + $0x1a4] sm:$0xf0] }
 0x94b   : > { %v8417_v63 = vor.u32 %v8839_v11, %v8414_v20 }
 0x94c   : > { %v6844_v4 = vadd.f32 %v12986_v55, %v6811_v25  ;;  %v6671_v25 = vpop.f32.mrf.mxu0 }
 0x94d   : > { %6708 = vmatmul.bf16.gmra.mxu0 %v8417_v63  ;;  %v8420_v63 = vld [vmem:[#allocation2 + $0x1a0] sm:$0xf] }
 0x94e   : > { %v6876_v44 = vadd.f32 %v9121_v49, %v6844_v4  ;;  %v6582_v4 = vpop.f32.mrf.mxu3 }
 0x94f   : > { %v6745_v1 = vpop.f32.mrf.mxu1 }
 0x950   : > { %6908 = vst [vmem:[%s12998_s18 + $0x40] sm:$0xff] %v6876_v44  ;;  %v6746_v22 = vadd.f32 %v6745_v1, %v6657_v53  ;;  %v6662_v53 = vadd.f32 %v13041_v15, %v13046_v3  ;;  %v5971_v44 = vadd.f32 %v13043_v18, %v12916_v6  ;;  %v9124_v15 = vld [vmem:[%s9440_s30 + $0x58] sm:$0xff]  ;;  %v5974_v6 = vadd.f32 %v13058_v33, %v12919_v32 }
 0x952   : > { %v6812_v8 = vadd.f32 %v6746_v22, %v5966_v10 }
 0x954   : > { %v6845_v29 = vadd.f32 %v12986_v55, %v6812_v8  ;;  %v6674_v45 = vpop.f32.mrf.mxu0  ;;  %v5983_v8 = vpop.f32.mrf.mxu2 }
 0x956   : > { %v6877_v13 = vadd.f32 %v9122_v30, %v6845_v29  ;;  %v6585_v29 = vpop.f32.mrf.mxu3 }
 0x957   : > { %v6748_v40 = vpop.f32.mrf.mxu1 }
 0x958   : > { %6909 = vst [vmem:[%s12998_s18 + $0x48] sm:$0xff] %v6877_v13  ;;  %v6749_v31 = vadd.f32 %v6748_v40, %v6660_v23  ;;  %v8408_v23 = vld [vmem:[#allocation2 + $0x188] sm:$0xf] }
 0x959   : > { %v8409_v30 = vor.u32 %v8838_v34, %v8408_v23  ;;  %v6672_v34 = vadd.f32 %v6671_v25, %v6582_v4  ;;  %v5984_v4 = vadd.f32 %v5983_v8, %v12935_v50 }
 0x95a   : > { %v6813_v41 = vadd.f32 %v6749_v31, %v5969_v5  ;;  %6787 = vmatmul.bf16.gmra.mxu1 %v8397_v43  ;;  %v5976_v31 = vadd.f32 %v13073_v36, %v12924_v37  ;;  %v5979_v37 = vadd.f32 %v13087_v59, %v12927_v54 }
 0x95c   : > { %v6846_v42 = vadd.f32 %v12986_v55, %v6813_v41  ;;  %v6676_v43 = vpop.f32.mrf.mxu0  ;;  %v5985_v32 = vpop.f32.mrf.mxu2  ;;  %v8841_v41 = vld [vmem:[#allocation2 + $0x1a8] sm:$0xf0] }
 0x95e   : > { %v6878_v51 = vadd.f32 %v9123_v58, %v6846_v42  ;;  %v6587_v11 = vpop.f32.mrf.mxu3  ;;  %v8421_v58 = vor.u32 %v8841_v41, %v8420_v63  ;;  %v9130_v41 = vld [vmem:[%s9440_s30 + $0x88] sm:$0xff] }
 0x95f   : > { %v6750_v49 = vpop.f32.mrf.mxu1 }
 0x960   : > { %6910 = vst [vmem:[%s12998_s18 + $0x50] sm:$0xff] %v6878_v51  ;;  %v6751_v1 = vadd.f32 %v6750_v49, %v6662_v53 }
 0x962   : > { %v6814_v10 = vadd.f32 %v6751_v1, %v5971_v44 }
 0x964   : > { %v6847_v22 = vadd.f32 %v12986_v55, %v6814_v10  ;;  %v6679_v49 = vpop.f32.mrf.mxu0  ;;  %v5988_v44 = vpop.f32.mrf.mxu2 }
 0x966   : > { %v6879_v3 = vadd.f32 %v9124_v15, %v6847_v22  ;;  %v6590_v10 = vpop.f32.mrf.mxu3  ;;  %v5981_v15 = vadd.f32 %v5980_v39, %v12932_v35 }
 0x967   : > { %v6753_v46 = vpop.f32.mrf.mxu1  ;;  %v6680_v63 = vadd.f32 %v6679_v49, %v6590_v10 }
 0x968   : > { %6911 = vst [vmem:[%s12998_s18 + $0x58] sm:$0xff] %v6879_v3  ;;  %v6754_v18 = vadd.f32 %v6753_v46, %v6665_v9 }
 0x96a   : > { %v6815_v13 = vadd.f32 %v6754_v18, %v5974_v6  ;;  %6792 = vmatmul.bf16.gmra.mxu1 %v8409_v30  ;;  %v6675_v18 = vadd.f32 %v6674_v45, %v6585_v29  ;;  %v9128_v30 = vld [vmem:[%s9440_s30 + $0x78] sm:$0xff]  ;;  %v5986_v29 = vadd.f32 %v5985_v32, %v12938_v56 }
 0x96c   : > { %v6848_v40 = vadd.f32 %v12986_v55, %v6815_v13  ;;  %v6681_v59 = vpop.f32.mrf.mxu0  ;;  %v5990_v46 = vpop.f32.mrf.mxu2 }
 0x96e   : > { %v6880_v21 = vadd.f32 %v9125_v48, %v6848_v40  ;;  %v6592_v6 = vpop.f32.mrf.mxu3 }
 0x96f   : > { %v6755_v5 = vpop.f32.mrf.mxu1 }
 0x970   : > { %6912 = vst [vmem:[%s12998_s18 + $0x60] sm:$0xff] %v6880_v21  ;;  %v6756_v33 = vadd.f32 %v6755_v5, %v6667_v26  ;;  %v6677_v26 = vadd.f32 %v6676_v43, %v6587_v11  ;;  %v9129_v5 = vld [vmem:[%s9440_s30 + $0x80] sm:$0xff]  ;;  %v5989_v11 = vadd.f32 %v5988_v44, %v12941_v12 }
 0x972   : > { %v6816_v20 = vadd.f32 %v6756_v33, %v5976_v31 }
 0x974   : > { %v6849_v42 = vadd.f32 %v12986_v55, %v6816_v20  ;;  %v6684_v48 = vpop.f32.mrf.mxu0  ;;  %v5993_v21 = vpop.f32.mrf.mxu2 }
 0x976   : > { %v6881_v53 = vadd.f32 %v9126_v28, %v6849_v42  ;;  %v6595_v33 = vpop.f32.mrf.mxu3 }
 0x977   : > { %v6758_v51 = vpop.f32.mrf.mxu1 }
 0x978   : > { %6913 = vst [vmem:[%s12998_s18 + $0x68] sm:$0xff] %v6881_v53  ;;  %v6759_v36 = vadd.f32 %v6758_v51, %v6670_v27  ;;  %v6682_v51 = vadd.f32 %v6681_v59, %v6592_v6 }
 0x97a   : > { %v6817_v1 = vadd.f32 %v6759_v36, %v5979_v37  ;;  %6797 = vmatmul.bf16.gmra.mxu1 %v8421_v58  ;;  %v9131_v37 = vld [vmem:[%s9440_s30 + $0x90] sm:$0xff] }
 0x97c   : > { %v6850_v22 = vadd.f32 %v12986_v55, %v6817_v1  ;;  %v6686_v27 = vpop.f32.mrf.mxu0  ;;  %v5995_v28 = vpop.f32.mrf.mxu2  ;;  %v5991_v1 = vadd.f32 %v5990_v46, %v12944_v61 }
 0x97e   : > { %v6882_v57 = vadd.f32 %v9127_v7, %v6850_v22  ;;  %v6597_v58 = vpop.f32.mrf.mxu3 }
 0x97f   : > { %v6760_v9 = vpop.f32.mrf.mxu1 }
 0x980   : > { %6914 = vst [vmem:[%s12998_s18 + $0x70] sm:$0xff] %v6882_v57  ;;  %v6761_v3 = vadd.f32 %v6760_v9, %v6672_v34  ;;  %v6685_v57 = vadd.f32 %v6684_v48, %v6595_v33  ;;  %v9132_v9 = vld [vmem:[%s9440_s30 + $0x98] sm:$0xff] }
 0x982   : > { %v6818_v54 = vadd.f32 %v6761_v3, %v5981_v15 }
 0x984   : > { %v6851_v23 = vadd.f32 %v12986_v55, %v6818_v54  ;;  %v6689_v22 = vpop.f32.mrf.mxu0  ;;  %v5998_v12 = vpop.f32.mrf.mxu2  ;;  %v5994_v54 = vadd.f32 %v5993_v21, %v12947_v2 }
 0x986   : > { %v6883_v13 = vadd.f32 %v9128_v30, %v6851_v23  ;;  %v6600_v34 = vpop.f32.mrf.mxu3  ;;  %v6687_v30 = vadd.f32 %v6686_v27, %v6597_v58 }
 0x987   : > { %v6763_v25 = vpop.f32.mrf.mxu1  ;;  %v6690_v48 = vadd.f32 %v6689_v22, %v6600_v34  ;;  %v9137_v34 = vld [vmem:[%s9440_s30 + $0xc0] sm:$0xff] }
 0x988   : > { %6915 = vst [vmem:[%s12998_s18 + $0x78] sm:$0xff] %v6883_v13  ;;  %v6764_v40 = vadd.f32 %v6763_v25, %v6675_v18  ;;  %v9133_v13 = vld [vmem:[%s9440_s30 + $0xa0] sm:$0xff] }
 0x98a   : > { %v6819_v35 = vadd.f32 %v6764_v40, %v5984_v4  ;;  %v5996_v40 = vadd.f32 %v5995_v28, %v12950_v19 }
 0x98c   : > { %v6852_v39 = vadd.f32 %v12986_v55, %v6819_v35  ;;  %v6691_v61 = vpop.f32.mrf.mxu0  ;;  %v6000_v46 = vpop.f32.mrf.mxu2 }
 0x98e   : > { %v6884_v31 = vadd.f32 %v9129_v5, %v6852_v39  ;;  %v6602_v18 = vpop.f32.mrf.mxu3  ;;  %v9134_v5 = vld [vmem:[%s9440_s30 + $0xa8] sm:$0xff] }
 0x98f   : > { %v6765_v45 = vpop.f32.mrf.mxu1 }
 0x990   : > { %6916 = vst [vmem:[%s12998_s18 + $0x80] sm:$0xff] %v6884_v31  ;;  %v6766_v20 = vadd.f32 %v6765_v45, %v6677_v26 }
 0x992   : > { %v6820_v50 = vadd.f32 %v6766_v20, %v5986_v29  ;;  %v5999_v29 = vadd.f32 %v5998_v12, %v12953_v16 }
 0x994   : > { %v6853_v8 = vadd.f32 %v12986_v55, %v6820_v50  ;;  %v6694_v26 = vpop.f32.mrf.mxu0  ;;  %v6003_v21 = vpop.f32.mrf.mxu2 }
 0x996   : > { %v6885_v42 = vadd.f32 %v9130_v41, %v6853_v8  ;;  %v6605_v33 = vpop.f32.mrf.mxu3  ;;  %v6692_v8 = vadd.f32 %v6691_v61, %v6602_v18 }
 0x997   : > { %v6768_v43 = vpop.f32.mrf.mxu1 }
 0x998   : > { %6917 = vst [vmem:[%s12998_s18 + $0x88] sm:$0xff] %v6885_v42  ;;  %v6769_v53 = vadd.f32 %v6768_v43, %v6680_v63  ;;  %v9135_v63 = vld [vmem:[%s9440_s30 + $0xb0] sm:$0xff] }
 0x99a   : > { %v6821_v56 = vadd.f32 %v6769_v53, %v5989_v11  ;;  %v6001_v11 = vadd.f32 %v6000_v46, %v12956_v62  ;;  %v9138_v46 = vld [vmem:[%s9440_s30 + $0xc8] sm:$0xff] }
 0x99c   : > { %v6854_v32 = vadd.f32 %v12986_v55, %v6821_v56  ;;  %v6696_v43 = vpop.f32.mrf.mxu0  ;;  %v6005_v27 = vpop.f32.mrf.mxu2  ;;  %v6695_v56 = vadd.f32 %v6694_v26, %v6605_v33 }
 0x99e   : > { %v6886_v36 = vadd.f32 %v9131_v37, %v6854_v32  ;;  %v6607_v53 = vpop.f32.mrf.mxu3  ;;  %v9136_v32 = vld [vmem:[%s9440_s30 + $0xb8] sm:$0xff] }
 0x99f   : > { %v6770_v49 = vpop.f32.mrf.mxu1 }
 0x9a0   : > { %6918 = vst [vmem:[%s12998_s18 + $0x90] sm:$0xff] %v6886_v36  ;;  %v6771_v10 = vadd.f32 %v6770_v49, %v6682_v51  ;;  %v6004_v36 = vadd.f32 %v6003_v21, %v12959_v38 }
 0x9a2   : > { %v6822_v44 = vadd.f32 %v6771_v10, %v5991_v1 }
 0x9a4   : > { %v6855_v7 = vadd.f32 %v12986_v55, %v6822_v44  ;;  %v6699_v1 = vpop.f32.mrf.mxu0  ;;  %v6008_v10 = vpop.f32.mrf.mxu2  ;;  %v6697_v44 = vadd.f32 %v6696_v43, %v6607_v53 }
 0x9a6   : > { %v6887_v15 = vadd.f32 %v9132_v9, %v6855_v7  ;;  %v6610_v22 = vpop.f32.mrf.mxu3  ;;  %v6006_v9 = vadd.f32 %v6005_v27, %v12962_v24 }
 0x9a7   : > { %v6773_v3 = vpop.f32.mrf.mxu1  ;;  %v6700_v61 = vadd.f32 %v6699_v1, %v6610_v22 }
 0x9a8   : > { %6919 = vst [vmem:[%s12998_s18 + $0x98] sm:$0xff] %v6887_v15  ;;  %v6774_v59 = vadd.f32 %v6773_v3, %v6685_v57 }
 0x9aa   : > { %v6823_v23 = vadd.f32 %v6774_v59, %v5994_v54 }
 0x9ac   : > { %v6856_v6 = vadd.f32 %v12986_v55, %v6823_v23  ;;  %v6701_v38 = vpop.f32.mrf.mxu0  ;;  %v6010_v54 = vpop.f32.mrf.mxu2 }
 0x9ad   : > { %v6011_v21 = vadd.f32 %v6010_v54, %v12968_v0 }
 0x9ae   : > { %v6888_v25 = vadd.f32 %v9133_v13, %v6856_v6  ;;  %v6612_v23 = vpop.f32.mrf.mxu3 }
 0x9af   : > { %v6775_v4 = vpop.f32.mrf.mxu1 }
 0x9b0   : > { %6920 = vst [vmem:[%s12998_s18 + $0xa0] sm:$0xff] %v6888_v25  ;;  %v6776_v35 = vadd.f32 %v6775_v4, %v6687_v30  ;;  %v6009_v30 = vadd.f32 %v6008_v10, %v12965_v60 }
 0x9b2   : > { %v6824_v2 = vadd.f32 %v6776_v35, %v5996_v40  ;;  %v6702_v40 = vadd.f32 %v6701_v38, %v6612_v23 }
 0x9b4   : > { %v6857_v39 = vadd.f32 %v12986_v55, %v6824_v2  ;;  %v6704_v4 = vpop.f32.mrf.mxu0  ;;  %v6013_v35 = vpop.f32.mrf.mxu2  ;;  %v9139_v2 = vld [vmem:[%s9440_s30 + $0xd0] sm:$0xff] }
 0x9b6   : > { %v6889_v31 = vadd.f32 %v9134_v5, %v6857_v39  ;;  %v6615_v26 = vpop.f32.mrf.mxu3 }
 0x9b7   : > { %v6778_v45 = vpop.f32.mrf.mxu1  ;;  %v6705_v33 = vadd.f32 %v6704_v4, %v6615_v26 }
 0x9b8   : > { %6921 = vst [vmem:[%s12998_s18 + $0xa8] sm:$0xff] %v6889_v31  ;;  %v6779_v20 = vadd.f32 %v6778_v45, %v6690_v48  ;;  %v9140_v45 = vld [vmem:[%s9440_s30 + $0xd8] sm:$0xff] }
 0x9ba   : > { %v6825_v19 = vadd.f32 %v6779_v20, %v5999_v29 }
 0x9bc   : > { %v6858_v50 = vadd.f32 %v12986_v55, %v6825_v19  ;;  %v6706_v19 = vpop.f32.mrf.mxu0 }
 0x9be   : > { %v6890_v41 = vadd.f32 %v9135_v63, %v6858_v50  ;;  %v6014_v50 = vadd.f32 %v6013_v35, %v12971_v17  ;;  %v6015_v63 = vpop.f32.mrf.mxu2 }
 0x9bf   : > { %v6780_v42 = vpop.f32.mrf.mxu1  ;;  %v6016_v53 = vadd.f32 %v6015_v63, %v12974_v47 }
 0x9c0   : > { %6922 = vst [vmem:[%s12998_s18 + $0xb0] sm:$0xff] %v6890_v41  ;;  %v6781_v28 = vadd.f32 %v6780_v42, %v6692_v8  ;;  %v6617_v41 = vpop.f32.mrf.mxu3 }
 0x9c1   : > { %v6707_v43 = vadd.f32 %v6706_v19, %v6617_v41 }
 0x9c2   : > { %v6826_v16 = vadd.f32 %v6781_v28, %v6001_v11  ;;  %v9141_v11 = vld [vmem:[%s9440_s30 + $0xe0] sm:$0xff] }
 0x9c4   : > { %v6859_v58 = vadd.f32 %v12986_v55, %v6826_v16 }
 0x9c6   : > { %v6891_v51 = vadd.f32 %v9136_v32, %v6859_v58  ;;  %v6018_v32 = vpop.f32.mrf.mxu2 }
 0x9c7   : > { %v6783_v37 = vpop.f32.mrf.mxu1  ;;  %v6019_v10 = vadd.f32 %v6018_v32, %v12977_v52 }
 0x9c8   : > { %6923 = vst [vmem:[%s12998_s18 + $0xb8] sm:$0xff] %v6891_v51  ;;  %v6784_v49 = vadd.f32 %v6783_v37, %v6695_v56  ;;  %v6620_v58 = vpop.f32.mrf.mxu3 }
 0x9ca   : > { %v6827_v62 = vadd.f32 %v6784_v49, %v6004_v36  ;;  %v6709_v17 = vpop.f32.mrf.mxu0  ;;  %v9142_v36 = vld [vmem:[%s9440_s30 + $0xe8] sm:$0xff] }
 0x9cb   : > { %v6710_v51 = vadd.f32 %v6709_v17, %v6620_v58 }
 0x9cc   : > { %v6860_v12 = vadd.f32 %v12986_v55, %v6827_v62 }
 0x9ce   : > { %v6892_v7 = vadd.f32 %v9137_v34, %v6860_v12  ;;  %v6020_v34 = vpop.f32.mrf.mxu2 }
 0x9cf   : > { %v6785_v57 = vpop.f32.mrf.mxu1  ;;  %v6021_v52 = vadd.f32 %v6020_v34, %v12980_v14 }
 0x9d0   : > { %6924 = vst [vmem:[%s12998_s18 + $0xc0] sm:$0xff] %v6892_v7  ;;  %v6786_v15 = vadd.f32 %v6785_v57, %v6697_v44  ;;  %v6622_v22 = vpop.f32.mrf.mxu3  ;;  %v9143_v57 = vld [vmem:[%s9440_s30 + $0xf0] sm:$0xff] }
 0x9d2   : > { %v6828_v3 = vadd.f32 %v6786_v15, %v6006_v9  ;;  %v6711_v12 = vpop.f32.mrf.mxu0 }
 0x9d3   : > { %v6712_v7 = vadd.f32 %v6711_v12, %v6622_v22 }
 0x9d4   : > { %v6861_v59 = vadd.f32 %v12986_v55, %v6828_v3 }
 0x9d6   : > { %v6893_v6 = vadd.f32 %v9138_v46, %v6861_v59  ;;  %v9144_v59 = vld [vmem:[%s9440_s30 + $0xf8] sm:$0xff] }
 0x9d7   : > { %v6788_v18 = vpop.f32.mrf.mxu1 }
 0x9d8   : > { %6925 = vst [vmem:[%s12998_s18 + $0xc8] sm:$0xff] %v6893_v6  ;;  %v6789_v13 = vadd.f32 %v6788_v18, %v6700_v61 }
 0x9da   : > { %v6829_v24 = vadd.f32 %v6789_v13, %v6009_v30 }
 0x9dc   : > { %v6862_v25 = vadd.f32 %v12986_v55, %v6829_v24 }
 0x9de   : > { %v6894_v39 = vadd.f32 %v9139_v2, %v6862_v25 }
 0x9df   : > { %v6790_v48 = vpop.f32.mrf.mxu1 }
 0x9e0   : > { %6926 = vst [vmem:[%s12998_s18 + $0xd0] sm:$0xff] %v6894_v39  ;;  %v6791_v5 = vadd.f32 %v6790_v48, %v6702_v40 }
 0x9e2   : > { %v6830_v60 = vadd.f32 %v6791_v5, %v6011_v21 }
 0x9e4   : > { %v6863_v31 = vadd.f32 %v12986_v55, %v6830_v60 }
 0x9e6   : > { %v6895_v29 = vadd.f32 %v9140_v45, %v6863_v31 }
 0x9e7   : > { %v6793_v20 = vpop.f32.mrf.mxu1 }
 0x9e8   : > { %6927 = vst [vmem:[%s12998_s18 + $0xd8] sm:$0xff] %v6895_v29  ;;  %v6794_v8 = vadd.f32 %v6793_v20, %v6705_v33 }
 0x9ea   : > { %v6831_v0 = vadd.f32 %v6794_v8, %v6014_v50 }
 0x9ec   : > { %v6864_v42 = vadd.f32 %v12986_v55, %v6831_v0 }
 0x9ee   : > { %v6896_v27 = vadd.f32 %v9141_v11, %v6864_v42 }
 0x9ef   : > { %v6795_v28 = vpop.f32.mrf.mxu1 }
 0x9f0   : > { %6928 = vst [vmem:[%s12998_s18 + $0xe0] sm:$0xff] %v6896_v27  ;;  %v6796_v16 = vadd.f32 %v6795_v28, %v6707_v43 }
 0x9f2   : > { %v6832_v56 = vadd.f32 %v6796_v16, %v6016_v53 }
 0x9f4   : > { %v6865_v37 = vadd.f32 %v12986_v55, %v6832_v56 }
 0x9f6   : > { %v6897_v49 = vadd.f32 %v9142_v36, %v6865_v37 }
 0x9f7   : > { %v6798_v1 = vpop.f32.mrf.mxu1 }
 0x9f8   : > { %6929 = vst [vmem:[%s12998_s18 + $0xe8] sm:$0xff] %v6897_v49  ;;  %v6799_v62 = vadd.f32 %v6798_v1, %v6710_v51 }
 0x9fa   : > { %v6833_v47 = vadd.f32 %v6799_v62, %v6019_v10 }
 0x9fc   : > { %v6866_v44 = vadd.f32 %v12986_v55, %v6833_v47 }
 0x9fe   : > { %v6898_v9 = vadd.f32 %v9143_v57, %v6866_v44 }
 0x9ff   : > { %v6800_v15 = vpop.f32.mrf.mxu1 }
 0xa00   : > { %6930 = vst [vmem:[%s12998_s18 + $0xf0] sm:$0xff] %v6898_v9  ;;  %v6801_v3 = vadd.f32 %v6800_v15, %v6712_v7 }
 0xa02   : > { %v6834_v38 = vadd.f32 %v6801_v3, %v6021_v52 }
 0xa04   : > { %v6867_v54 = vadd.f32 %v12986_v55, %v6834_v38 }
 0xa06   : > { %v6899_v23 = vadd.f32 %v9144_v59, %v6867_v54 }
 0xa08   : > { %6931 = vst [vmem:[%s12998_s18 + $0xf8] sm:$0xff] %v6899_v23 }
 0xa09   : > { %9262 = shalt.err (!%p9259_p10)
}
 0xa0a   : > { %s9316_s22 = smov 128   ;;  %s9317_s24 = smov 8  }
 0xa0b   : > { %8893 = dma.vmem_to_hbm [thread:$0]  (%p9404_p3), %s6946_s29, 4096, %s6948_s16, %s6933_s4, %s9316_s22, %s9316_s22, %s9317_s24  }
 0xa0c PF: > { %s6962_s25 = sand.u32 1, %s9293_s12   ;;  %p13622_p12 = scmp.ge.s32.totalorder %s9305_s15, 2 }
 0xa0d   : > { %s6963_s30 = scalar_lea.sflag [#allocation5], %s6962_s25 }
 0xa0e   : > { %p8907_p13 = pnand %p13622_p12, %p9373_p6 }
 0xa10   : > { %p8908_p0 = pneg %p8907_p13 }
 0xa12   : > { %9288 = dma.done.wait (%p8908_p0), %s6963_s30, 4096  }
 0xa13   : > { %9290 = vsyncadd (%p8908_p0), %s6963_s30, 4294963200  ;;  %p17_p5 = scmp.ge.s32.totalorder %s9394_s6, 4   ;;  %s13623_s12 = smov %s9297_s13 }
 0xa14   : > { %s13624_s13 = smov %s9301_s14  ;;  %s13625_s14 = smov %s9410_s10 }
 0xa15   : > { %s13626_s15 = smov %s9394_s6  ;;  %19 = sbr.rel (!%p17_p5) target bundleno = 6 (0x6), region = 91 }
 0xa1a   :  { %6969 = vsyncpa [#allocation4], 1 }
 0xa1b   :  { %6971 = vsyncpa [#allocation4 + $0x1], 1 }
 0xa1c   :  { %6972 = vsyncpa [#allocation7], 1 }
 0xa1d   :  { %6973 = vsyncpa [#allocation5], 1 }
 0xa1e   :  { %6975 = vsyncpa [#allocation5 + $0x1], 1 }

</bundles_post_ra>
